<compile_context>
chip_gen: v7x
topology: tpu7x:2x2x1
jax: 0.10.0
libtpu: 0.0.40
codegen_flags: <defaults>
</compile_context>

<pallas_src>
import math
import numpy as np
import jax
import jax.numpy as jnp
from jax import lax
from jax.experimental import pallas as pl
from jax.experimental.pallas import tpu as pltpu

# --- hyper-parameters (mirroring the PyTorch module constants) ---------------
d_k = 8
d_v = 8
heads = 6
d_model = 512
d_ff = 2048
n_layer = 6
tgt_len = 5
tgt_voc_len = 10

LN_EPS = 1e-5          # torch.nn.LayerNorm default
L_PAD = 8              # tgt_len (5) padded to a full 8-sublane tile
Hd = heads * d_k       # 48

# --- packed per-layer f32 param vector layout (big chunks 128-aligned) -------
OFF_B1 = 0                                  # (d_ff,)
OFF_S_BO = OFF_B1 + d_ff                    # 2048  self-attn out-proj bias
OFF_S_G = OFF_S_BO + d_model                # 2560  self-attn LN gamma
OFF_S_B = OFF_S_G + d_model                 # 3072  self-attn LN beta
OFF_E_BO = OFF_S_B + d_model                # 3584  enc-dec out-proj bias
OFF_E_G = OFF_E_BO + d_model                # 4096  enc-dec LN gamma
OFF_E_B = OFF_E_G + d_model                 # 4608  enc-dec LN beta
OFF_B2 = OFF_E_B + d_model                  # 5120  FFN second bias
OFF_S_QKV_B = OFF_B2 + d_model              # 5632  fused self Q|K|V bias (144)
OFF_E_Q_B = OFF_S_QKV_B + 3 * Hd            # 5776  enc-dec Q bias (48)
OFF_E_KV_B = OFF_E_Q_B + Hd                 # 5824  fused enc-dec K|V bias (96)
PK = ((OFF_E_KV_B + 2 * Hd + 127) // 128) * 128   # 6016 (padded to lane multiple)


# --- in-kernel helpers --------------------------------------------------------
def _layer_norm(x, gamma, beta):
    mean = jnp.mean(x, axis=-1, keepdims=True)
    var = jnp.mean((x - mean) ** 2, axis=-1, keepdims=True)
    return (x - mean) * lax.rsqrt(var + LN_EPS) * gamma + beta


# --- fused decoder-stack kernel: grid axis = layer ----------------------------
def decoder_stack_kernel(masks_ref, emb_ref, enc_ref,
                         s_qkv_w, s_wo, e_q_w, e_kv_w, e_wo, w1, w2, pvec,
                         out_ref):
    M = out_ref.shape[0]                      # B * L_PAD (fused batch rows)
    layer = pl.program_id(0)

    # Initialize the resident activation carry from the embedded input (layer 0).
    @pl.when(layer == 0)
    def _():
        out_ref[...] = emb_ref[...]

    def pp(off, size):                        # slice the packed f32 param vector
        return pvec[0, 0, off:off + size]

    inv_scale = jnp.float32(1.0 / math.sqrt(d_k))

    def attend(q, k, v, keep, repl, wo, bo, gamma, beta, residual):
        # Per-head scores over the fused-batch rows; cross-batch / padded keys are
        # excluded via the precomputed keep/repl tiles. Stacked along sublanes so a
        # SINGLE softmax covers every (batch, head) pair.
        tiles = []
        for h in range(heads):
            qh = q[:, h * d_k:(h + 1) * d_k]
            kh = k[:, h * d_k:(h + 1) * d_k]
            tiles.append(lax.dot_general(qh, kh, (((1,), (1,)), ((), ())),
                                         preferred_element_type=jnp.float32))
        s = jnp.concatenate(tiles, axis=0) * inv_scale        # (heads*M, M)
        # masked_fill_(mask, -1e-9) semantics (+ -1e30 hard exclusion of pad keys)
        s = s * keep + repl
        m = jnp.max(s, axis=-1, keepdims=True)
        e = jnp.exp(s - m)
        p = e / jnp.sum(e, axis=-1, keepdims=True)            # exact softmax
        ctx = []
        for h in range(heads):
            ph = p[h * M:(h + 1) * M, :]
            vh = v[:, h * d_v:(h + 1) * d_v]
            ctx.append(jnp.dot(ph, vh, preferred_element_type=jnp.float32))
        ctx = jnp.concatenate(ctx, axis=-1)                   # (M, heads*d_v)
        o = jnp.dot(ctx.astype(jnp.bfloat16), wo,
                    preferred_element_type=jnp.float32) + bo
        return _layer_norm(residual + o, gamma, beta)

    x = out_ref[...]                          # (M, d_model) f32 carry (resident VMEM)
    enc = enc_ref[...]                        # (M, d_model) f32

    # --- decoder self-attention (fused Q|K|V projection: one matmul) ---------
    qkv = jnp.dot(x.astype(jnp.bfloat16), s_qkv_w[0],
                  preferred_element_type=jnp.float32) + pp(OFF_S_QKV_B, 3 * Hd)
    x = attend(qkv[:, 0:Hd], qkv[:, Hd:2 * Hd], qkv[:, 2 * Hd:3 * Hd],
               masks_ref[0], masks_ref[1],
               s_wo[0], pp(OFF_S_BO, d_model),
               pp(OFF_S_G, d_model), pp(OFF_S_B, d_model), x)

    # --- encoder-decoder attention (fused K|V projection of enc output) ------
    q = jnp.dot(x.astype(jnp.bfloat16), e_q_w[0],
                preferred_element_type=jnp.float32) + pp(OFF_E_Q_B, Hd)
    kv = jnp.dot(enc.astype(jnp.bfloat16), e_kv_w[0],
                 preferred_element_type=jnp.float32) + pp(OFF_E_KV_B, 2 * Hd)
    x = attend(q, kv[:, 0:Hd], kv[:, Hd:2 * Hd],
               masks_ref[2], masks_ref[3],
               e_wo[0], pp(OFF_E_BO, d_model),
               pp(OFF_E_G, d_model), pp(OFF_E_B, d_model), x)

    # --- position-wise feed-forward + residual + fresh LayerNorm -------------
    h1 = jnp.maximum(jnp.dot(x.astype(jnp.bfloat16), w1[0],
                             preferred_element_type=jnp.float32) + pp(OFF_B1, d_ff),
                     0.0)
    y = jnp.dot(h1.astype(jnp.bfloat16), w2[0],
                preferred_element_type=jnp.float32) + pp(OFF_B2, d_model)
    x = _layer_norm(y + x, jnp.float32(1.0), jnp.float32(0.0))

    out_ref[...] = x                          # carry; written to HBM once at the end


# --- wrapper -------------------------------------------------------------------
def decoder_forward(params, dec_input, enc_output):
    B, L = dec_input.shape
    Lp = L_PAD
    M = B * Lp

    # Embedding + positional encoding; reference position indices [tgt_len, 1, ..., tgt_len-1]
    seq_ids = jnp.array([tgt_len] + list(range(1, tgt_len)), dtype=jnp.int32)
    dec_emb = params["emb"][dec_input] + params["pos"][seq_ids][None, :, :]
    emb_flat = jnp.pad(dec_emb, ((0, 0), (0, Lp - L), (0, 0))).reshape(M, d_model)
    enc_flat = jnp.pad(enc_output, ((0, 0), (0, Lp - L), (0, 0))).reshape(M, d_model)

    # keep/replace mask tiles for the head-stacked (heads*M, M) score block:
    #   keep=1 -> real score; keep=0, repl=-1e-9 -> reference masked_fill;
    #   keep=0, repl=-1e30   -> artificial (cross-batch / padded-key) exclusion.
    lq = jnp.arange(Lp)[None, :, None]                 # query position within batch
    cf = jnp.arange(M)[None, None, :]                  # flat key index
    bq = jnp.arange(B)[:, None, None]
    bk = cf // Lp
    kp = cf % Lp
    same = bq == bk                                     # (B,1,M) same-batch key
    realk = kp < L                                      # (1,1,M) real (non-pad) key
    keypad = jnp.pad(dec_input == 0, ((0, 0), (0, Lp - L))).reshape(M)[None, None, :]

    ref_self = (kp > lq) | keypad                       # causal + dec key padding
    ref_enc = keypad                                    # reference uses dec padding here too

    def build(refmask):
        keep = jnp.broadcast_to(same & realk & ~refmask, (B, Lp, M))
        repl = jnp.where(keep, jnp.float32(0.0),
                         jnp.where(same & realk, jnp.float32(-1e-9), jnp.float32(-1e30)))
        keep = keep.astype(jnp.float32).reshape(M, M)
        repl = repl.reshape(M, M)
        return jnp.tile(keep, (heads, 1)), jnp.tile(repl, (heads, 1))

    ks, rs = build(ref_self)
    ke, re = build(jnp.broadcast_to(ref_enc, ref_self.shape))
    masks = jnp.stack([ks, rs, ke, re], axis=0)         # (4, heads*M, M) f32, ~24 KB

    layer_weights = [params[k] for k in
                     ("s_qkv_w", "s_wo", "e_q_w", "e_kv_w", "e_wo", "w1", "w2", "pvec")]

    def const_spec(shape):                               # fetched once (constant block)
        nd = len(shape)
        return pl.BlockSpec(shape, lambda l, _n=nd: (0,) * _n)

    def layer_spec(shape):                               # per-layer block, prefetched
        nd = len(shape)
        return pl.BlockSpec((1,) + tuple(shape[1:]),
                            lambda l, _n=nd: (l,) + (0,) * (_n - 1))

    in_specs = ([const_spec(masks.shape), const_spec(emb_flat.shape),
                 const_spec(enc_flat.shape)]
                + [layer_spec(w.shape) for w in layer_weights])

    out_flat = pl.pallas_call(
        decoder_stack_kernel,
        out_shape=jax.ShapeDtypeStruct((M, d_model), jnp.float32),
        grid=(n_layer,),
        in_specs=in_specs,
        out_specs=pl.BlockSpec((M, d_model), lambda l: (0, 0)),   # resident carry
        compiler_params=pltpu.CompilerParams(
            dimension_semantics=("arbitrary",),          # layer axis carries state
            vmem_limit_bytes=32 * 1024 * 1024),
    )(masks, emb_flat, enc_flat, *layer_weights)

    return out_flat.reshape(B, Lp, d_model)[:, :L, :]


# --- glue: positional table, parameter init ------------------------------------
def positional_encoding_table(n_pos, dm):
    i = np.arange(dm)
    i_eff = np.where(i % 2 != 0, i - 1, i)               # odd columns reuse i-1
    rates = 1.0 / np.power(10000.0, 2.0 * i_eff / dm)
    angles = np.arange(n_pos)[:, None] * rates[None, :]
    # NOTE: the reference applies sin to BOTH even and odd columns.
    return np.sin(angles).astype(np.float32)


def init_params(key):
    ks = jax.random.split(key, 8)
    s = 0.02

    def w(k, shape):                                      # bf16 weights (streamed)
        return (jax.random.normal(k, shape, jnp.float32) * s).astype(jnp.bfloat16)

    pvec = np.zeros((n_layer, 1, PK), np.float32)
    pvec[:, 0, OFF_S_G:OFF_S_G + d_model] = 1.0           # LayerNorm gammas
    pvec[:, 0, OFF_E_G:OFF_E_G + d_model] = 1.0
    # all linear biases / LayerNorm betas stay zero

    return {
        "emb": jax.random.normal(ks[0], (tgt_voc_len, d_model), jnp.float32),
        "pos": jnp.asarray(positional_encoding_table(tgt_len + 1, d_model)),
        # fused / stacked bf16 weights
        "s_qkv_w": w(ks[1], (n_layer, d_model, 3 * Hd)),   # Q|K|V fused (512, 144)
        "s_wo":    w(ks[2], (n_layer, Hd, d_model)),
        "e_q_w":   w(ks[3], (n_layer, d_model, Hd)),
        "e_kv_w":  w(ks[4], (n_layer, d_model, 2 * Hd)),   # K|V fused (512, 96)
        "e_wo":    w(ks[5], (n_layer, Hd, d_model)),
        "w1":      w(ks[6], (n_layer, d_model, d_ff)),
        "w2":      w(ks[7], (n_layer, d_ff, d_model)),
        # packed tiny f32 params (biases + LN gamma/beta)
        "pvec":    jnp.asarray(pvec),
    }


if __name__ == "__main__":
    key = jax.random.PRNGKey(0)
    kparam, kdec, kenc = jax.random.split(key, 3)
    params = init_params(kparam)

    batch = 2
    dec_input = jax.random.randint(kdec, (batch, tgt_len), 0, tgt_voc_len).astype(jnp.int32)
    enc_output = jax.random.normal(kenc, (batch, tgt_len, d_model), jnp.float32)

    out = jax.jit(decoder_forward)(params, dec_input, enc_output)
    jax.block_until_ready(out)
    assert out.shape == (batch, tgt_len, d_model)
    assert bool(jnp.all(jnp.isfinite(out)))
    print("KERNEL_OK")
</pallas_src>

<mosaic_0001>
module attributes {stable_mosaic.version = 11 : i64} {
  func.func @decoder_stack_kernel(%arg0: i32, %arg1: memref<4x96x16xf32, #tpu.memory_space<vmem>>, %arg2: memref<16x512xf32, #tpu.memory_space<vmem>>, %arg3: memref<16x512xf32, #tpu.memory_space<vmem>>, %arg4: memref<1x512x144xbf16, #tpu.memory_space<vmem>>, %arg5: memref<1x48x512xbf16, #tpu.memory_space<vmem>>, %arg6: memref<1x512x48xbf16, #tpu.memory_space<vmem>>, %arg7: memref<1x512x96xbf16, #tpu.memory_space<vmem>>, %arg8: memref<1x48x512xbf16, #tpu.memory_space<vmem>>, %arg9: memref<1x512x2048xbf16, #tpu.memory_space<vmem>>, %arg10: memref<1x2048x512xbf16, #tpu.memory_space<vmem>>, %arg11: memref<1x1x6016xf32, #tpu.memory_space<vmem>>, %arg12: memref<16x512xf32, #tpu.memory_space<vmem>>) attributes {dimension_semantics = [#tpu.dimension_semantics<arbitrary>], iteration_bounds = array<i64: 6>, scalar_prefetch = 0 : i64, scratch_operands = 0 : i64, tpu.core_type = #tpu.core_type<tc>, window_params = [{pipeline_mode = #tpu.pipeline_mode<synchronous>, transform_indices = @transform_0, window_bounds = array<i64: 4, 96, 16>}, {pipeline_mode = #tpu.pipeline_mode<synchronous>, transform_indices = @transform_1, window_bounds = array<i64: 16, 512>}, {pipeline_mode = #tpu.pipeline_mode<synchronous>, transform_indices = @transform_2, window_bounds = array<i64: 16, 512>}, {transform_indices = @transform_3, window_bounds = array<i64: 1, 512, 144>}, {transform_indices = @transform_4, window_bounds = array<i64: 1, 48, 512>}, {transform_indices = @transform_5, window_bounds = array<i64: 1, 512, 48>}, {transform_indices = @transform_6, window_bounds = array<i64: 1, 512, 96>}, {transform_indices = @transform_7, window_bounds = array<i64: 1, 48, 512>}, {transform_indices = @transform_8, window_bounds = array<i64: 1, 512, 2048>}, {transform_indices = @transform_9, window_bounds = array<i64: 1, 2048, 512>}, {transform_indices = @transform_10, window_bounds = array<i64: 1, 1, 6016>}, {pipeline_mode = #tpu.pipeline_mode<synchronous>, transform_indices = @transform_11, window_bounds = array<i64: 16, 512>}]} {
    %c0_i32 = arith.constant 0 : i32
    %0 = arith.cmpi eq, %arg0, %c0_i32 : i32
    %1 = arith.extui %0 : i1 to i32
    %c0_i32_0 = arith.constant 0 : i32
    %2 = arith.cmpi ne, %1, %c0_i32_0 : i32
    scf.if %2 {
      %c0_113 = arith.constant 0 : index
      %c0_114 = arith.constant 0 : index
      %267 = vector.load %arg2[%c0_113, %c0_114] : memref<16x512xf32, #tpu.memory_space<vmem>>, vector<16x512xf32>
      %c0_115 = arith.constant 0 : index
      %c0_116 = arith.constant 0 : index
      %268 = vector.load %arg12[%c0_115, %c0_116] : memref<16x512xf32, #tpu.memory_space<vmem>>, vector<16x512xf32>
      tpu.vector_store %arg12[%c0_115, %c0_116], %267 {strides = array<i32>} : memref<16x512xf32, #tpu.memory_space<vmem>>, vector<16x512xf32>,
    } else {
    }
    %c0 = arith.constant 0 : index
    %c0_1 = arith.constant 0 : index
    %3 = vector.load %arg12[%c0, %c0_1] : memref<16x512xf32, #tpu.memory_space<vmem>>, vector<16x512xf32>
    %c0_2 = arith.constant 0 : index
    %c0_3 = arith.constant 0 : index
    %4 = vector.load %arg3[%c0_2, %c0_3] : memref<16x512xf32, #tpu.memory_space<vmem>>, vector<16x512xf32>
    %5 = arith.truncf %3 : vector<16x512xf32> to vector<16x512xbf16>
    %c0_4 = arith.constant 0 : index
    %c0_5 = arith.constant 0 : index
    %c0_6 = arith.constant 0 : index
    %6 = vector.load %arg4[%c0_4, %c0_5, %c0_6] : memref<1x512x144xbf16, #tpu.memory_space<vmem>>, vector<1x512x144xbf16>
    %7 = vector.shape_cast %6 : vector<1x512x144xbf16> to vector<512x144xbf16>
    %cst = arith.constant dense<0.000000e+00> : vector<16x144xf32>
    %8 = tpu.matmul %5, %7, %cst {dimension_numbers = #tpu.dot_dimension_numbers<[1], [0], [0], [1], [0, 0, 1, 1], [], []>} : vector<16x512xbf16>, vector<512x144xbf16>, vector<16x144xf32> -> vector<16x144xf32>
    %c0_7 = arith.constant 0 : index
    %c0_8 = arith.constant 0 : index
    %c5632 = arith.constant 5632 : index
    %9 = vector.load %arg11[%c0_7, %c0_8, %c5632] : memref<1x1x6016xf32, #tpu.memory_space<vmem>>, vector<1x1x144xf32>
    %10 = vector.shape_cast %9 : vector<1x1x144xf32> to vector<144xf32>
    %11 = vector.shape_cast %10 : vector<144xf32> to vector<1x144xf32>
    %12 = vector.broadcast %11 : vector<1x144xf32> to vector<16x144xf32>
    %13 = arith.addf %8, %12 : vector<16x144xf32>
    %14 = vector.extract_strided_slice %13 {offsets = [0, 0], sizes = [16, 48], strides = [1, 1]} : vector<16x144xf32> to vector<16x48xf32>
    %15 = vector.extract_strided_slice %13 {offsets = [0, 48], sizes = [16, 48], strides = [1, 1]} : vector<16x144xf32> to vector<16x48xf32>
    %16 = vector.extract_strided_slice %13 {offsets = [0, 96], sizes = [16, 48], strides = [1, 1]} : vector<16x144xf32> to vector<16x48xf32>
    %c0_9 = arith.constant 0 : index
    %c0_10 = arith.constant 0 : index
    %c0_11 = arith.constant 0 : index
    %17 = vector.load %arg1[%c0_9, %c0_10, %c0_11] : memref<4x96x16xf32, #tpu.memory_space<vmem>>, vector<1x96x16xf32>
    %18 = vector.shape_cast %17 : vector<1x96x16xf32> to vector<96x16xf32>
    %c1 = arith.constant 1 : index
    %c0_12 = arith.constant 0 : index
    %c0_13 = arith.constant 0 : index
    %19 = vector.load %arg1[%c1, %c0_12, %c0_13] : memref<4x96x16xf32, #tpu.memory_space<vmem>>, vector<1x96x16xf32>
    %20 = vector.shape_cast %19 : vector<1x96x16xf32> to vector<96x16xf32>
    %c0_14 = arith.constant 0 : index
    %c0_15 = arith.constant 0 : index
    %c0_16 = arith.constant 0 : index
    %21 = vector.load %arg5[%c0_14, %c0_15, %c0_16] : memref<1x48x512xbf16, #tpu.memory_space<vmem>>, vector<1x48x512xbf16>
    %22 = vector.shape_cast %21 : vector<1x48x512xbf16> to vector<48x512xbf16>
    %c0_17 = arith.constant 0 : index
    %c0_18 = arith.constant 0 : index
    %c2048 = arith.constant 2048 : index
    %23 = vector.load %arg11[%c0_17, %c0_18, %c2048] : memref<1x1x6016xf32, #tpu.memory_space<vmem>>, vector<1x1x512xf32>
    %24 = vector.shape_cast %23 : vector<1x1x512xf32> to vector<512xf32>
    %c0_19 = arith.constant 0 : index
    %c0_20 = arith.constant 0 : index
    %c2560 = arith.constant 2560 : index
    %25 = vector.load %arg11[%c0_19, %c0_20, %c2560] : memref<1x1x6016xf32, #tpu.memory_space<vmem>>, vector<1x1x512xf32>
    %26 = vector.shape_cast %25 : vector<1x1x512xf32> to vector<512xf32>
    %c0_21 = arith.constant 0 : index
    %c0_22 = arith.constant 0 : index
    %c3072 = arith.constant 3072 : index
    %27 = vector.load %arg11[%c0_21, %c0_22, %c3072] : memref<1x1x6016xf32, #tpu.memory_space<vmem>>, vector<1x1x512xf32>
    %28 = vector.shape_cast %27 : vector<1x1x512xf32> to vector<512xf32>
    %29 = vector.extract_strided_slice %14 {offsets = [0, 0], sizes = [16, 8], strides = [1, 1]} : vector<16x48xf32> to vector<16x8xf32>
    %30 = vector.extract_strided_slice %15 {offsets = [0, 0], sizes = [16, 8], strides = [1, 1]} : vector<16x48xf32> to vector<16x8xf32>
    %cst_23 = arith.constant dense<0.000000e+00> : vector<16x16xf32>
    %31 = tpu.matmul %29, %30, %cst_23 {dimension_numbers = #tpu.dot_dimension_numbers<[1], [1], [0], [0], [0, 0, 1, 0], [], []>} : vector<16x8xf32>, vector<16x8xf32>, vector<16x16xf32> -> vector<16x16xf32>
    %32 = vector.extract_strided_slice %14 {offsets = [0, 8], sizes = [16, 8], strides = [1, 1]} : vector<16x48xf32> to vector<16x8xf32>
    %33 = vector.extract_strided_slice %15 {offsets = [0, 8], sizes = [16, 8], strides = [1, 1]} : vector<16x48xf32> to vector<16x8xf32>
    %cst_24 = arith.constant dense<0.000000e+00> : vector<16x16xf32>
    %34 = tpu.matmul %32, %33, %cst_24 {dimension_numbers = #tpu.dot_dimension_numbers<[1], [1], [0], [0], [0, 0, 1, 0], [], []>} : vector<16x8xf32>, vector<16x8xf32>, vector<16x16xf32> -> vector<16x16xf32>
    %35 = vector.extract_strided_slice %14 {offsets = [0, 16], sizes = [16, 8], strides = [1, 1]} : vector<16x48xf32> to vector<16x8xf32>
    %36 = vector.extract_strided_slice %15 {offsets = [0, 16], sizes = [16, 8], strides = [1, 1]} : vector<16x48xf32> to vector<16x8xf32>
    %cst_25 = arith.constant dense<0.000000e+00> : vector<16x16xf32>
    %37 = tpu.matmul %35, %36, %cst_25 {dimension_numbers = #tpu.dot_dimension_numbers<[1], [1], [0], [0], [0, 0, 1, 0], [], []>} : vector<16x8xf32>, vector<16x8xf32>, vector<16x16xf32> -> vector<16x16xf32>
    %38 = vector.extract_strided_slice %14 {offsets = [0, 24], sizes = [16, 8], strides = [1, 1]} : vector<16x48xf32> to vector<16x8xf32>
    %39 = vector.extract_strided_slice %15 {offsets = [0, 24], sizes = [16, 8], strides = [1, 1]} : vector<16x48xf32> to vector<16x8xf32>
    %cst_26 = arith.constant dense<0.000000e+00> : vector<16x16xf32>
    %40 = tpu.matmul %38, %39, %cst_26 {dimension_numbers = #tpu.dot_dimension_numbers<[1], [1], [0], [0], [0, 0, 1, 0], [], []>} : vector<16x8xf32>, vector<16x8xf32>, vector<16x16xf32> -> vector<16x16xf32>
    %41 = vector.extract_strided_slice %14 {offsets = [0, 32], sizes = [16, 8], strides = [1, 1]} : vector<16x48xf32> to vector<16x8xf32>
    %42 = vector.extract_strided_slice %15 {offsets = [0, 32], sizes = [16, 8], strides = [1, 1]} : vector<16x48xf32> to vector<16x8xf32>
    %cst_27 = arith.constant dense<0.000000e+00> : vector<16x16xf32>
    %43 = tpu.matmul %41, %42, %cst_27 {dimension_numbers = #tpu.dot_dimension_numbers<[1], [1], [0], [0], [0, 0, 1, 0], [], []>} : vector<16x8xf32>, vector<16x8xf32>, vector<16x16xf32> -> vector<16x16xf32>
    %44 = vector.extract_strided_slice %14 {offsets = [0, 40], sizes = [16, 8], strides = [1, 1]} : vector<16x48xf32> to vector<16x8xf32>
    %45 = vector.extract_strided_slice %15 {offsets = [0, 40], sizes = [16, 8], strides = [1, 1]} : vector<16x48xf32> to vector<16x8xf32>
    %cst_28 = arith.constant dense<0.000000e+00> : vector<16x16xf32>
    %46 = tpu.matmul %44, %45, %cst_28 {dimension_numbers = #tpu.dot_dimension_numbers<[1], [1], [0], [0], [0, 0, 1, 0], [], []>} : vector<16x8xf32>, vector<16x8xf32>, vector<16x16xf32> -> vector<16x16xf32>
    %47 = tpu.concatenate %31, %34, %37, %40, %43, %46 in 0 : vector<16x16xf32>, vector<16x16xf32>, vector<16x16xf32>, vector<16x16xf32>, vector<16x16xf32>, vector<16x16xf32> -> vector<96x16xf32>
    %cst_29 = arith.constant 0.353553385 : f32
    %48 = vector.broadcast %cst_29 : f32 to vector<96x16xf32>
    %49 = arith.mulf %47, %48 : vector<96x16xf32>
    %50 = arith.mulf %49, %18 : vector<96x16xf32>
    %51 = arith.addf %50, %20 : vector<96x16xf32>
    %cst_30 = arith.constant dense<0xFF800000> : vector<96xf32>
    %52 = vector.multi_reduction <maximumf>, %51, %cst_30 [1] : vector<96x16xf32> to vector<96xf32>
    %53 = vector.shape_cast %52 : vector<96xf32> to vector<96x1xf32>
    %54 = vector.broadcast %53 : vector<96x1xf32> to vector<96x16xf32>
    %55 = arith.subf %51, %54 : vector<96x16xf32>
    %56 = math.exp %55 : vector<96x16xf32>
    %cst_31 = arith.constant dense<0.000000e+00> : vector<96xf32>
    %57 = vector.multi_reduction <add>, %56, %cst_31 [1] : vector<96x16xf32> to vector<96xf32>
    %58 = vector.shape_cast %57 : vector<96xf32> to vector<96x1xf32>
    %59 = vector.broadcast %58 : vector<96x1xf32> to vector<96x16xf32>
    %60 = arith.divf %56, %59 : vector<96x16xf32>
    %61 = vector.extract_strided_slice %60 {offsets = [0, 0], sizes = [16, 16], strides = [1, 1]} : vector<96x16xf32> to vector<16x16xf32>
    %62 = vector.extract_strided_slice %16 {offsets = [0, 0], sizes = [16, 8], strides = [1, 1]} : vector<16x48xf32> to vector<16x8xf32>
    %cst_32 = arith.constant dense<0.000000e+00> : vector<16x8xf32>
    %63 = tpu.matmul %61, %62, %cst_32 {dimension_numbers = #tpu.dot_dimension_numbers<[1], [0], [0], [1], [0, 0, 1, 1], [], []>} : vector<16x16xf32>, vector<16x8xf32>, vector<16x8xf32> -> vector<16x8xf32>
    %64 = vector.extract_strided_slice %60 {offsets = [16, 0], sizes = [16, 16], strides = [1, 1]} : vector<96x16xf32> to vector<16x16xf32>
    %65 = vector.extract_strided_slice %16 {offsets = [0, 8], sizes = [16, 8], strides = [1, 1]} : vector<16x48xf32> to vector<16x8xf32>
    %cst_33 = arith.constant dense<0.000000e+00> : vector<16x8xf32>
    %66 = tpu.matmul %64, %65, %cst_33 {dimension_numbers = #tpu.dot_dimension_numbers<[1], [0], [0], [1], [0, 0, 1, 1], [], []>} : vector<16x16xf32>, vector<16x8xf32>, vector<16x8xf32> -> vector<16x8xf32>
    %67 = vector.extract_strided_slice %60 {offsets = [32, 0], sizes = [16, 16], strides = [1, 1]} : vector<96x16xf32> to vector<16x16xf32>
    %68 = vector.extract_strided_slice %16 {offsets = [0, 16], sizes = [16, 8], strides = [1, 1]} : vector<16x48xf32> to vector<16x8xf32>
    %cst_34 = arith.constant dense<0.000000e+00> : vector<16x8xf32>
    %69 = tpu.matmul %67, %68, %cst_34 {dimension_numbers = #tpu.dot_dimension_numbers<[1], [0], [0], [1], [0, 0, 1, 1], [], []>} : vector<16x16xf32>, vector<16x8xf32>, vector<16x8xf32> -> vector<16x8xf32>
    %70 = vector.extract_strided_slice %60 {offsets = [48, 0], sizes = [16, 16], strides = [1, 1]} : vector<96x16xf32> to vector<16x16xf32>
    %71 = vector.extract_strided_slice %16 {offsets = [0, 24], sizes = [16, 8], strides = [1, 1]} : vector<16x48xf32> to vector<16x8xf32>
    %cst_35 = arith.constant dense<0.000000e+00> : vector<16x8xf32>
    %72 = tpu.matmul %70, %71, %cst_35 {dimension_numbers = #tpu.dot_dimension_numbers<[1], [0], [0], [1], [0, 0, 1, 1], [], []>} : vector<16x16xf32>, vector<16x8xf32>, vector<16x8xf32> -> vector<16x8xf32>
    %73 = vector.extract_strided_slice %60 {offsets = [64, 0], sizes = [16, 16], strides = [1, 1]} : vector<96x16xf32> to vector<16x16xf32>
    %74 = vector.extract_strided_slice %16 {offsets = [0, 32], sizes = [16, 8], strides = [1, 1]} : vector<16x48xf32> to vector<16x8xf32>
    %cst_36 = arith.constant dense<0.000000e+00> : vector<16x8xf32>
    %75 = tpu.matmul %73, %74, %cst_36 {dimension_numbers = #tpu.dot_dimension_numbers<[1], [0], [0], [1], [0, 0, 1, 1], [], []>} : vector<16x16xf32>, vector<16x8xf32>, vector<16x8xf32> -> vector<16x8xf32>
    %76 = vector.extract_strided_slice %60 {offsets = [80, 0], sizes = [16, 16], strides = [1, 1]} : vector<96x16xf32> to vector<16x16xf32>
    %77 = vector.extract_strided_slice %16 {offsets = [0, 40], sizes = [16, 8], strides = [1, 1]} : vector<16x48xf32> to vector<16x8xf32>
    %cst_37 = arith.constant dense<0.000000e+00> : vector<16x8xf32>
    %78 = tpu.matmul %76, %77, %cst_37 {dimension_numbers = #tpu.dot_dimension_numbers<[1], [0], [0], [1], [0, 0, 1, 1], [], []>} : vector<16x16xf32>, vector<16x8xf32>, vector<16x8xf32> -> vector<16x8xf32>
    %79 = tpu.concatenate %63, %66, %69, %72, %75, %78 in 1 : vector<16x8xf32>, vector<16x8xf32>, vector<16x8xf32>, vector<16x8xf32>, vector<16x8xf32>, vector<16x8xf32> -> vector<16x48xf32>
    %80 = arith.truncf %79 : vector<16x48xf32> to vector<16x48xbf16>
    %cst_38 = arith.constant dense<0.000000e+00> : vector<16x512xf32>
    %81 = tpu.matmul %80, %22, %cst_38 {dimension_numbers = #tpu.dot_dimension_numbers<[1], [0], [0], [1], [0, 0, 1, 1], [], []>} : vector<16x48xbf16>, vector<48x512xbf16>, vector<16x512xf32> -> vector<16x512xf32>
    %82 = vector.shape_cast %24 : vector<512xf32> to vector<1x512xf32>
    %83 = vector.broadcast %82 : vector<1x512xf32> to vector<16x512xf32>
    %84 = arith.addf %81, %83 : vector<16x512xf32>
    %85 = arith.addf %3, %84 : vector<16x512xf32>
    %cst_39 = arith.constant dense<0.000000e+00> : vector<16xf32>
    %86 = vector.multi_reduction <add>, %85, %cst_39 [1] : vector<16x512xf32> to vector<16xf32>
    %87 = vector.shape_cast %86 : vector<16xf32> to vector<16x1xf32>
    %cst_40 = arith.constant 5.120000e+02 : f32
    %88 = vector.broadcast %cst_40 : f32 to vector<16x1xf32>
    %89 = arith.divf %87, %88 : vector<16x1xf32>
    %90 = vector.broadcast %89 : vector<16x1xf32> to vector<16x512xf32>
    %91 = arith.subf %85, %90 : vector<16x512xf32>
    %92 = arith.mulf %91, %91 : vector<16x512xf32>
    %cst_41 = arith.constant dense<0.000000e+00> : vector<16xf32>
    %93 = vector.multi_reduction <add>, %92, %cst_41 [1] : vector<16x512xf32> to vector<16xf32>
    %94 = vector.shape_cast %93 : vector<16xf32> to vector<16x1xf32>
    %cst_42 = arith.constant 5.120000e+02 : f32
    %95 = vector.broadcast %cst_42 : f32 to vector<16x1xf32>
    %96 = arith.divf %94, %95 : vector<16x1xf32>
    %97 = vector.broadcast %89 : vector<16x1xf32> to vector<16x512xf32>
    %98 = arith.subf %85, %97 : vector<16x512xf32>
    %cst_43 = arith.constant 9.99999974E-6 : f32
    %99 = vector.broadcast %cst_43 : f32 to vector<16x1xf32>
    %100 = arith.addf %96, %99 : vector<16x1xf32>
    %101 = math.rsqrt %100 : vector<16x1xf32>
    %102 = vector.broadcast %101 : vector<16x1xf32> to vector<16x512xf32>
    %103 = arith.mulf %98, %102 : vector<16x512xf32>
    %104 = vector.shape_cast %26 : vector<512xf32> to vector<1x512xf32>
    %105 = vector.broadcast %104 : vector<1x512xf32> to vector<16x512xf32>
    %106 = arith.mulf %103, %105 : vector<16x512xf32>
    %107 = vector.shape_cast %28 : vector<512xf32> to vector<1x512xf32>
    %108 = vector.broadcast %107 : vector<1x512xf32> to vector<16x512xf32>
    %109 = arith.addf %106, %108 : vector<16x512xf32>
    %110 = arith.truncf %109 : vector<16x512xf32> to vector<16x512xbf16>
    %c0_44 = arith.constant 0 : index
    %c0_45 = arith.constant 0 : index
    %c0_46 = arith.constant 0 : index
    %111 = vector.load %arg6[%c0_44, %c0_45, %c0_46] : memref<1x512x48xbf16, #tpu.memory_space<vmem>>, vector<1x512x48xbf16>
    %112 = vector.shape_cast %111 : vector<1x512x48xbf16> to vector<512x48xbf16>
    %cst_47 = arith.constant dense<0.000000e+00> : vector<16x48xf32>
    %113 = tpu.matmul %110, %112, %cst_47 {dimension_numbers = #tpu.dot_dimension_numbers<[1], [0], [0], [1], [0, 0, 1, 1], [], []>} : vector<16x512xbf16>, vector<512x48xbf16>, vector<16x48xf32> -> vector<16x48xf32>
    %c0_48 = arith.constant 0 : index
    %c0_49 = arith.constant 0 : index
    %c5776 = arith.constant 5776 : index
    %114 = vector.load %arg11[%c0_48, %c0_49, %c5776] : memref<1x1x6016xf32, #tpu.memory_space<vmem>>, vector<1x1x48xf32>
    %115 = vector.shape_cast %114 : vector<1x1x48xf32> to vector<48xf32>
    %116 = vector.shape_cast %115 : vector<48xf32> to vector<1x48xf32>
    %117 = vector.broadcast %116 : vector<1x48xf32> to vector<16x48xf32>
    %118 = arith.addf %113, %117 : vector<16x48xf32>
    %119 = arith.truncf %4 : vector<16x512xf32> to vector<16x512xbf16>
    %c0_50 = arith.constant 0 : index
    %c0_51 = arith.constant 0 : index
    %c0_52 = arith.constant 0 : index
    %120 = vector.load %arg7[%c0_50, %c0_51, %c0_52] : memref<1x512x96xbf16, #tpu.memory_space<vmem>>, vector<1x512x96xbf16>
    %121 = vector.shape_cast %120 : vector<1x512x96xbf16> to vector<512x96xbf16>
    %cst_53 = arith.constant dense<0.000000e+00> : vector<16x96xf32>
    %122 = tpu.matmul %119, %121, %cst_53 {dimension_numbers = #tpu.dot_dimension_numbers<[1], [0], [0], [1], [0, 0, 1, 1], [], []>} : vector<16x512xbf16>, vector<512x96xbf16>, vector<16x96xf32> -> vector<16x96xf32>
    %c0_54 = arith.constant 0 : index
    %c0_55 = arith.constant 0 : index
    %c5824 = arith.constant 5824 : index
    %123 = vector.load %arg11[%c0_54, %c0_55, %c5824] : memref<1x1x6016xf32, #tpu.memory_space<vmem>>, vector<1x1x96xf32>
    %124 = vector.shape_cast %123 : vector<1x1x96xf32> to vector<96xf32>
    %125 = vector.shape_cast %124 : vector<96xf32> to vector<1x96xf32>
    %126 = vector.broadcast %125 : vector<1x96xf32> to vector<16x96xf32>
    %127 = arith.addf %122, %126 : vector<16x96xf32>
    %128 = vector.extract_strided_slice %127 {offsets = [0, 0], sizes = [16, 48], strides = [1, 1]} : vector<16x96xf32> to vector<16x48xf32>
    %129 = vector.extract_strided_slice %127 {offsets = [0, 48], sizes = [16, 48], strides = [1, 1]} : vector<16x96xf32> to vector<16x48xf32>
    %c2 = arith.constant 2 : index
    %c0_56 = arith.constant 0 : index
    %c0_57 = arith.constant 0 : index
    %130 = vector.load %arg1[%c2, %c0_56, %c0_57] : memref<4x96x16xf32, #tpu.memory_space<vmem>>, vector<1x96x16xf32>
    %131 = vector.shape_cast %130 : vector<1x96x16xf32> to vector<96x16xf32>
    %c3 = arith.constant 3 : index
    %c0_58 = arith.constant 0 : index
    %c0_59 = arith.constant 0 : index
    %132 = vector.load %arg1[%c3, %c0_58, %c0_59] : memref<4x96x16xf32, #tpu.memory_space<vmem>>, vector<1x96x16xf32>
    %133 = vector.shape_cast %132 : vector<1x96x16xf32> to vector<96x16xf32>
    %c0_60 = arith.constant 0 : index
    %c0_61 = arith.constant 0 : index
    %c0_62 = arith.constant 0 : index
    %134 = vector.load %arg8[%c0_60, %c0_61, %c0_62] : memref<1x48x512xbf16, #tpu.memory_space<vmem>>, vector<1x48x512xbf16>
    %135 = vector.shape_cast %134 : vector<1x48x512xbf16> to vector<48x512xbf16>
    %c0_63 = arith.constant 0 : index
    %c0_64 = arith.constant 0 : index
    %c3584 = arith.constant 3584 : index
    %136 = vector.load %arg11[%c0_63, %c0_64, %c3584] : memref<1x1x6016xf32, #tpu.memory_space<vmem>>, vector<1x1x512xf32>
    %137 = vector.shape_cast %136 : vector<1x1x512xf32> to vector<512xf32>
    %c0_65 = arith.constant 0 : index
    %c0_66 = arith.constant 0 : index
    %c4096 = arith.constant 4096 : index
    %138 = vector.load %arg11[%c0_65, %c0_66, %c4096] : memref<1x1x6016xf32, #tpu.memory_space<vmem>>, vector<1x1x512xf32>
    %139 = vector.shape_cast %138 : vector<1x1x512xf32> to vector<512xf32>
    %c0_67 = arith.constant 0 : index
    %c0_68 = arith.constant 0 : index
    %c4608 = arith.constant 4608 : index
    %140 = vector.load %arg11[%c0_67, %c0_68, %c4608] : memref<1x1x6016xf32, #tpu.memory_space<vmem>>, vector<1x1x512xf32>
    %141 = vector.shape_cast %140 : vector<1x1x512xf32> to vector<512xf32>
    %142 = vector.extract_strided_slice %118 {offsets = [0, 0], sizes = [16, 8], strides = [1, 1]} : vector<16x48xf32> to vector<16x8xf32>
    %143 = vector.extract_strided_slice %128 {offsets = [0, 0], sizes = [16, 8], strides = [1, 1]} : vector<16x48xf32> to vector<16x8xf32>
    %cst_69 = arith.constant dense<0.000000e+00> : vector<16x16xf32>
    %144 = tpu.matmul %142, %143, %cst_69 {dimension_numbers = #tpu.dot_dimension_numbers<[1], [1], [0], [0], [0, 0, 1, 0], [], []>} : vector<16x8xf32>, vector<16x8xf32>, vector<16x16xf32> -> vector<16x16xf32>
    %145 = vector.extract_strided_slice %118 {offsets = [0, 8], sizes = [16, 8], strides = [1, 1]} : vector<16x48xf32> to vector<16x8xf32>
    %146 = vector.extract_strided_slice %128 {offsets = [0, 8], sizes = [16, 8], strides = [1, 1]} : vector<16x48xf32> to vector<16x8xf32>
    %cst_70 = arith.constant dense<0.000000e+00> : vector<16x16xf32>
    %147 = tpu.matmul %145, %146, %cst_70 {dimension_numbers = #tpu.dot_dimension_numbers<[1], [1], [0], [0], [0, 0, 1, 0], [], []>} : vector<16x8xf32>, vector<16x8xf32>, vector<16x16xf32> -> vector<16x16xf32>
    %148 = vector.extract_strided_slice %118 {offsets = [0, 16], sizes = [16, 8], strides = [1, 1]} : vector<16x48xf32> to vector<16x8xf32>
    %149 = vector.extract_strided_slice %128 {offsets = [0, 16], sizes = [16, 8], strides = [1, 1]} : vector<16x48xf32> to vector<16x8xf32>
    %cst_71 = arith.constant dense<0.000000e+00> : vector<16x16xf32>
    %150 = tpu.matmul %148, %149, %cst_71 {dimension_numbers = #tpu.dot_dimension_numbers<[1], [1], [0], [0], [0, 0, 1, 0], [], []>} : vector<16x8xf32>, vector<16x8xf32>, vector<16x16xf32> -> vector<16x16xf32>
    %151 = vector.extract_strided_slice %118 {offsets = [0, 24], sizes = [16, 8], strides = [1, 1]} : vector<16x48xf32> to vector<16x8xf32>
    %152 = vector.extract_strided_slice %128 {offsets = [0, 24], sizes = [16, 8], strides = [1, 1]} : vector<16x48xf32> to vector<16x8xf32>
    %cst_72 = arith.constant dense<0.000000e+00> : vector<16x16xf32>
    %153 = tpu.matmul %151, %152, %cst_72 {dimension_numbers = #tpu.dot_dimension_numbers<[1], [1], [0], [0], [0, 0, 1, 0], [], []>} : vector<16x8xf32>, vector<16x8xf32>, vector<16x16xf32> -> vector<16x16xf32>
    %154 = vector.extract_strided_slice %118 {offsets = [0, 32], sizes = [16, 8], strides = [1, 1]} : vector<16x48xf32> to vector<16x8xf32>
    %155 = vector.extract_strided_slice %128 {offsets = [0, 32], sizes = [16, 8], strides = [1, 1]} : vector<16x48xf32> to vector<16x8xf32>
    %cst_73 = arith.constant dense<0.000000e+00> : vector<16x16xf32>
    %156 = tpu.matmul %154, %155, %cst_73 {dimension_numbers = #tpu.dot_dimension_numbers<[1], [1], [0], [0], [0, 0, 1, 0], [], []>} : vector<16x8xf32>, vector<16x8xf32>, vector<16x16xf32> -> vector<16x16xf32>
    %157 = vector.extract_strided_slice %118 {offsets = [0, 40], sizes = [16, 8], strides = [1, 1]} : vector<16x48xf32> to vector<16x8xf32>
    %158 = vector.extract_strided_slice %128 {offsets = [0, 40], sizes = [16, 8], strides = [1, 1]} : vector<16x48xf32> to vector<16x8xf32>
    %cst_74 = arith.constant dense<0.000000e+00> : vector<16x16xf32>
    %159 = tpu.matmul %157, %158, %cst_74 {dimension_numbers = #tpu.dot_dimension_numbers<[1], [1], [0], [0], [0, 0, 1, 0], [], []>} : vector<16x8xf32>, vector<16x8xf32>, vector<16x16xf32> -> vector<16x16xf32>
    %160 = tpu.concatenate %144, %147, %150, %153, %156, %159 in 0 : vector<16x16xf32>, vector<16x16xf32>, vector<16x16xf32>, vector<16x16xf32>, vector<16x16xf32>, vector<16x16xf32> -> vector<96x16xf32>
    %cst_75 = arith.constant 0.353553385 : f32
    %161 = vector.broadcast %cst_75 : f32 to vector<96x16xf32>
    %162 = arith.mulf %160, %161 : vector<96x16xf32>
    %163 = arith.mulf %162, %131 : vector<96x16xf32>
    %164 = arith.addf %163, %133 : vector<96x16xf32>
    %cst_76 = arith.constant dense<0xFF800000> : vector<96xf32>
    %165 = vector.multi_reduction <maximumf>, %164, %cst_76 [1] : vector<96x16xf32> to vector<96xf32>
    %166 = vector.shape_cast %165 : vector<96xf32> to vector<96x1xf32>
    %167 = vector.broadcast %166 : vector<96x1xf32> to vector<96x16xf32>
    %168 = arith.subf %164, %167 : vector<96x16xf32>
    %169 = math.exp %168 : vector<96x16xf32>
    %cst_77 = arith.constant dense<0.000000e+00> : vector<96xf32>
    %170 = vector.multi_reduction <add>, %169, %cst_77 [1] : vector<96x16xf32> to vector<96xf32>
    %171 = vector.shape_cast %170 : vector<96xf32> to vector<96x1xf32>
    %172 = vector.broadcast %171 : vector<96x1xf32> to vector<96x16xf32>
    %173 = arith.divf %169, %172 : vector<96x16xf32>
    %174 = vector.extract_strided_slice %173 {offsets = [0, 0], sizes = [16, 16], strides = [1, 1]} : vector<96x16xf32> to vector<16x16xf32>
    %175 = vector.extract_strided_slice %129 {offsets = [0, 0], sizes = [16, 8], strides = [1, 1]} : vector<16x48xf32> to vector<16x8xf32>
    %cst_78 = arith.constant dense<0.000000e+00> : vector<16x8xf32>
    %176 = tpu.matmul %174, %175, %cst_78 {dimension_numbers = #tpu.dot_dimension_numbers<[1], [0], [0], [1], [0, 0, 1, 1], [], []>} : vector<16x16xf32>, vector<16x8xf32>, vector<16x8xf32> -> vector<16x8xf32>
    %177 = vector.extract_strided_slice %173 {offsets = [16, 0], sizes = [16, 16], strides = [1, 1]} : vector<96x16xf32> to vector<16x16xf32>
    %178 = vector.extract_strided_slice %129 {offsets = [0, 8], sizes = [16, 8], strides = [1, 1]} : vector<16x48xf32> to vector<16x8xf32>
    %cst_79 = arith.constant dense<0.000000e+00> : vector<16x8xf32>
    %179 = tpu.matmul %177, %178, %cst_79 {dimension_numbers = #tpu.dot_dimension_numbers<[1], [0], [0], [1], [0, 0, 1, 1], [], []>} : vector<16x16xf32>, vector<16x8xf32>, vector<16x8xf32> -> vector<16x8xf32>
    %180 = vector.extract_strided_slice %173 {offsets = [32, 0], sizes = [16, 16], strides = [1, 1]} : vector<96x16xf32> to vector<16x16xf32>
    %181 = vector.extract_strided_slice %129 {offsets = [0, 16], sizes = [16, 8], strides = [1, 1]} : vector<16x48xf32> to vector<16x8xf32>
    %cst_80 = arith.constant dense<0.000000e+00> : vector<16x8xf32>
    %182 = tpu.matmul %180, %181, %cst_80 {dimension_numbers = #tpu.dot_dimension_numbers<[1], [0], [0], [1], [0, 0, 1, 1], [], []>} : vector<16x16xf32>, vector<16x8xf32>, vector<16x8xf32> -> vector<16x8xf32>
    %183 = vector.extract_strided_slice %173 {offsets = [48, 0], sizes = [16, 16], strides = [1, 1]} : vector<96x16xf32> to vector<16x16xf32>
    %184 = vector.extract_strided_slice %129 {offsets = [0, 24], sizes = [16, 8], strides = [1, 1]} : vector<16x48xf32> to vector<16x8xf32>
    %cst_81 = arith.constant dense<0.000000e+00> : vector<16x8xf32>
    %185 = tpu.matmul %183, %184, %cst_81 {dimension_numbers = #tpu.dot_dimension_numbers<[1], [0], [0], [1], [0, 0, 1, 1], [], []>} : vector<16x16xf32>, vector<16x8xf32>, vector<16x8xf32> -> vector<16x8xf32>
    %186 = vector.extract_strided_slice %173 {offsets = [64, 0], sizes = [16, 16], strides = [1, 1]} : vector<96x16xf32> to vector<16x16xf32>
    %187 = vector.extract_strided_slice %129 {offsets = [0, 32], sizes = [16, 8], strides = [1, 1]} : vector<16x48xf32> to vector<16x8xf32>
    %cst_82 = arith.constant dense<0.000000e+00> : vector<16x8xf32>
    %188 = tpu.matmul %186, %187, %cst_82 {dimension_numbers = #tpu.dot_dimension_numbers<[1], [0], [0], [1], [0, 0, 1, 1], [], []>} : vector<16x16xf32>, vector<16x8xf32>, vector<16x8xf32> -> vector<16x8xf32>
    %189 = vector.extract_strided_slice %173 {offsets = [80, 0], sizes = [16, 16], strides = [1, 1]} : vector<96x16xf32> to vector<16x16xf32>
    %190 = vector.extract_strided_slice %129 {offsets = [0, 40], sizes = [16, 8], strides = [1, 1]} : vector<16x48xf32> to vector<16x8xf32>
    %cst_83 = arith.constant dense<0.000000e+00> : vector<16x8xf32>
    %191 = tpu.matmul %189, %190, %cst_83 {dimension_numbers = #tpu.dot_dimension_numbers<[1], [0], [0], [1], [0, 0, 1, 1], [], []>} : vector<16x16xf32>, vector<16x8xf32>, vector<16x8xf32> -> vector<16x8xf32>
    %192 = tpu.concatenate %176, %179, %182, %185, %188, %191 in 1 : vector<16x8xf32>, vector<16x8xf32>, vector<16x8xf32>, vector<16x8xf32>, vector<16x8xf32>, vector<16x8xf32> -> vector<16x48xf32>
    %193 = arith.truncf %192 : vector<16x48xf32> to vector<16x48xbf16>
    %cst_84 = arith.constant dense<0.000000e+00> : vector<16x512xf32>
    %194 = tpu.matmul %193, %135, %cst_84 {dimension_numbers = #tpu.dot_dimension_numbers<[1], [0], [0], [1], [0, 0, 1, 1], [], []>} : vector<16x48xbf16>, vector<48x512xbf16>, vector<16x512xf32> -> vector<16x512xf32>
    %195 = vector.shape_cast %137 : vector<512xf32> to vector<1x512xf32>
    %196 = vector.broadcast %195 : vector<1x512xf32> to vector<16x512xf32>
    %197 = arith.addf %194, %196 : vector<16x512xf32>
    %198 = arith.addf %109, %197 : vector<16x512xf32>
    %cst_85 = arith.constant dense<0.000000e+00> : vector<16xf32>
    %199 = vector.multi_reduction <add>, %198, %cst_85 [1] : vector<16x512xf32> to vector<16xf32>
    %200 = vector.shape_cast %199 : vector<16xf32> to vector<16x1xf32>
    %cst_86 = arith.constant 5.120000e+02 : f32
    %201 = vector.broadcast %cst_86 : f32 to vector<16x1xf32>
    %202 = arith.divf %200, %201 : vector<16x1xf32>
    %203 = vector.broadcast %202 : vector<16x1xf32> to vector<16x512xf32>
    %204 = arith.subf %198, %203 : vector<16x512xf32>
    %205 = arith.mulf %204, %204 : vector<16x512xf32>
    %cst_87 = arith.constant dense<0.000000e+00> : vector<16xf32>
    %206 = vector.multi_reduction <add>, %205, %cst_87 [1] : vector<16x512xf32> to vector<16xf32>
    %207 = vector.shape_cast %206 : vector<16xf32> to vector<16x1xf32>
    %cst_88 = arith.constant 5.120000e+02 : f32
    %208 = vector.broadcast %cst_88 : f32 to vector<16x1xf32>
    %209 = arith.divf %207, %208 : vector<16x1xf32>
    %210 = vector.broadcast %202 : vector<16x1xf32> to vector<16x512xf32>
    %211 = arith.subf %198, %210 : vector<16x512xf32>
    %cst_89 = arith.constant 9.99999974E-6 : f32
    %212 = vector.broadcast %cst_89 : f32 to vector<16x1xf32>
    %213 = arith.addf %209, %212 : vector<16x1xf32>
    %214 = math.rsqrt %213 : vector<16x1xf32>
    %215 = vector.broadcast %214 : vector<16x1xf32> to vector<16x512xf32>
    %216 = arith.mulf %211, %215 : vector<16x512xf32>
    %217 = vector.shape_cast %139 : vector<512xf32> to vector<1x512xf32>
    %218 = vector.broadcast %217 : vector<1x512xf32> to vector<16x512xf32>
    %219 = arith.mulf %216, %218 : vector<16x512xf32>
    %220 = vector.shape_cast %141 : vector<512xf32> to vector<1x512xf32>
    %221 = vector.broadcast %220 : vector<1x512xf32> to vector<16x512xf32>
    %222 = arith.addf %219, %221 : vector<16x512xf32>
    %223 = arith.truncf %222 : vector<16x512xf32> to vector<16x512xbf16>
    %c0_90 = arith.constant 0 : index
    %c0_91 = arith.constant 0 : index
    %c0_92 = arith.constant 0 : index
    %224 = vector.load %arg9[%c0_90, %c0_91, %c0_92] : memref<1x512x2048xbf16, #tpu.memory_space<vmem>>, vector<1x512x2048xbf16>
    %225 = vector.shape_cast %224 : vector<1x512x2048xbf16> to vector<512x2048xbf16>
    %cst_93 = arith.constant dense<0.000000e+00> : vector<16x2048xf32>
    %226 = tpu.matmul %223, %225, %cst_93 {dimension_numbers = #tpu.dot_dimension_numbers<[1], [0], [0], [1], [0, 0, 1, 1], [], []>} : vector<16x512xbf16>, vector<512x2048xbf16>, vector<16x2048xf32> -> vector<16x2048xf32>
    %c0_94 = arith.constant 0 : index
    %c0_95 = arith.constant 0 : index
    %c0_96 = arith.constant 0 : index
    %227 = vector.load %arg11[%c0_94, %c0_95, %c0_96] : memref<1x1x6016xf32, #tpu.memory_space<vmem>>, vector<1x1x2048xf32>
    %228 = vector.shape_cast %227 : vector<1x1x2048xf32> to vector<2048xf32>
    %229 = vector.shape_cast %228 : vector<2048xf32> to vector<1x2048xf32>
    %230 = vector.broadcast %229 : vector<1x2048xf32> to vector<16x2048xf32>
    %231 = arith.addf %226, %230 : vector<16x2048xf32>
    %cst_97 = arith.constant 0.000000e+00 : f32
    %232 = vector.broadcast %cst_97 : f32 to vector<16x2048xf32>
    %233 = arith.maximumf %231, %232 : vector<16x2048xf32>
    %234 = arith.truncf %233 : vector<16x2048xf32> to vector<16x2048xbf16>
    %c0_98 = arith.constant 0 : index
    %c0_99 = arith.constant 0 : index
    %c0_100 = arith.constant 0 : index
    %235 = vector.load %arg10[%c0_98, %c0_99, %c0_100] : memref<1x2048x512xbf16, #tpu.memory_space<vmem>>, vector<1x2048x512xbf16>
    %236 = vector.shape_cast %235 : vector<1x2048x512xbf16> to vector<2048x512xbf16>
    %cst_101 = arith.constant dense<0.000000e+00> : vector<16x512xf32>
    %237 = tpu.matmul %234, %236, %cst_101 {dimension_numbers = #tpu.dot_dimension_numbers<[1], [0], [0], [1], [0, 0, 1, 1], [], []>} : vector<16x2048xbf16>, vector<2048x512xbf16>, vector<16x512xf32> -> vector<16x512xf32>
    %c0_102 = arith.constant 0 : index
    %c0_103 = arith.constant 0 : index
    %c5120 = arith.constant 5120 : index
    %238 = vector.load %arg11[%c0_102, %c0_103, %c5120] : memref<1x1x6016xf32, #tpu.memory_space<vmem>>, vector<1x1x512xf32>
    %239 = vector.shape_cast %238 : vector<1x1x512xf32> to vector<512xf32>
    %240 = vector.shape_cast %239 : vector<512xf32> to vector<1x512xf32>
    %241 = vector.broadcast %240 : vector<1x512xf32> to vector<16x512xf32>
    %242 = arith.addf %237, %241 : vector<16x512xf32>
    %243 = arith.addf %242, %222 : vector<16x512xf32>
    %cst_104 = arith.constant dense<0.000000e+00> : vector<16xf32>
    %244 = vector.multi_reduction <add>, %243, %cst_104 [1] : vector<16x512xf32> to vector<16xf32>
    %245 = vector.shape_cast %244 : vector<16xf32> to vector<16x1xf32>
    %cst_105 = arith.constant 5.120000e+02 : f32
    %246 = vector.broadcast %cst_105 : f32 to vector<16x1xf32>
    %247 = arith.divf %245, %246 : vector<16x1xf32>
    %248 = vector.broadcast %247 : vector<16x1xf32> to vector<16x512xf32>
    %249 = arith.subf %243, %248 : vector<16x512xf32>
    %250 = arith.mulf %249, %249 : vector<16x512xf32>
    %cst_106 = arith.constant dense<0.000000e+00> : vector<16xf32>
    %251 = vector.multi_reduction <add>, %250, %cst_106 [1] : vector<16x512xf32> to vector<16xf32>
    %252 = vector.shape_cast %251 : vector<16xf32> to vector<16x1xf32>
    %cst_107 = arith.constant 5.120000e+02 : f32
    %253 = vector.broadcast %cst_107 : f32 to vector<16x1xf32>
    %254 = arith.divf %252, %253 : vector<16x1xf32>
    %255 = vector.broadcast %247 : vector<16x1xf32> to vector<16x512xf32>
    %256 = arith.subf %243, %255 : vector<16x512xf32>
    %cst_108 = arith.constant 9.99999974E-6 : f32
    %257 = vector.broadcast %cst_108 : f32 to vector<16x1xf32>
    %258 = arith.addf %254, %257 : vector<16x1xf32>
    %259 = math.rsqrt %258 : vector<16x1xf32>
    %260 = vector.broadcast %259 : vector<16x1xf32> to vector<16x512xf32>
    %261 = arith.mulf %256, %260 : vector<16x512xf32>
    %cst_109 = arith.constant 1.000000e+00 : f32
    %262 = vector.broadcast %cst_109 : f32 to vector<16x512xf32>
    %263 = arith.mulf %261, %262 : vector<16x512xf32>
    %cst_110 = arith.constant 0.000000e+00 : f32
    %264 = vector.broadcast %cst_110 : f32 to vector<16x512xf32>
    %265 = arith.addf %263, %264 : vector<16x512xf32>
    %c0_111 = arith.constant 0 : index
    %c0_112 = arith.constant 0 : index
    %266 = vector.load %arg12[%c0_111, %c0_112] : memref<16x512xf32, #tpu.memory_space<vmem>>, vector<16x512xf32>
    tpu.vector_store %arg12[%c0_111, %c0_112], %265 {strides = array<i32>} : memref<16x512xf32, #tpu.memory_space<vmem>>, vector<16x512xf32>,
    return
  }
  func.func @transform_0(%arg0: i32) -> (i32, i32, i32) {
    %c0_i32 = arith.constant 0 : i32
    %c0_i32_0 = arith.constant 0 : i32
    %c0_i32_1 = arith.constant 0 : i32
    %c0_i32_2 = arith.constant 0 : i32
    return %c0_i32, %c0_i32_0, %c0_i32_1 : i32, i32, i32
  }
  func.func @transform_1(%arg0: i32) -> (i32, i32) {
    %c0_i32 = arith.constant 0 : i32
    %c0_i32_0 = arith.constant 0 : i32
    %c0_i32_1 = arith.constant 0 : i32
    return %c0_i32, %c0_i32_0 : i32, i32
  }
  func.func @transform_2(%arg0: i32) -> (i32, i32) {
    %c0_i32 = arith.constant 0 : i32
    %c0_i32_0 = arith.constant 0 : i32
    %c0_i32_1 = arith.constant 0 : i32
    return %c0_i32, %c0_i32_0 : i32, i32
  }
  func.func @transform_3(%arg0: i32) -> (i32, i32, i32) {
    %c0_i32 = arith.constant 0 : i32
    %c0_i32_0 = arith.constant 0 : i32
    %c0_i32_1 = arith.constant 0 : i32
    return %arg0, %c0_i32, %c0_i32_0 : i32, i32, i32
  }
  func.func @transform_4(%arg0: i32) -> (i32, i32, i32) {
    %c0_i32 = arith.constant 0 : i32
    %c0_i32_0 = arith.constant 0 : i32
    %c0_i32_1 = arith.constant 0 : i32
    return %arg0, %c0_i32, %c0_i32_0 : i32, i32, i32
  }
  func.func @transform_5(%arg0: i32) -> (i32, i32, i32) {
    %c0_i32 = arith.constant 0 : i32
    %c0_i32_0 = arith.constant 0 : i32
    %c0_i32_1 = arith.constant 0 : i32
    return %arg0, %c0_i32, %c0_i32_0 : i32, i32, i32
  }
  func.func @transform_6(%arg0: i32) -> (i32, i32, i32) {
    %c0_i32 = arith.constant 0 : i32
    %c0_i32_0 = arith.constant 0 : i32
    %c0_i32_1 = arith.constant 0 : i32
    return %arg0, %c0_i32, %c0_i32_0 : i32, i32, i32
  }
  func.func @transform_7(%arg0: i32) -> (i32, i32, i32) {
    %c0_i32 = arith.constant 0 : i32
    %c0_i32_0 = arith.constant 0 : i32
    %c0_i32_1 = arith.constant 0 : i32
    return %arg0, %c0_i32, %c0_i32_0 : i32, i32, i32
  }
  func.func @transform_8(%arg0: i32) -> (i32, i32, i32) {
    %c0_i32 = arith.constant 0 : i32
    %c0_i32_0 = arith.constant 0 : i32
    %c0_i32_1 = arith.constant 0 : i32
    return %arg0, %c0_i32, %c0_i32_0 : i32, i32, i32
  }
  func.func @transform_9(%arg0: i32) -> (i32, i32, i32) {
    %c0_i32 = arith.constant 0 : i32
    %c0_i32_0 = arith.constant 0 : i32
    %c0_i32_1 = arith.constant 0 : i32
    return %arg0, %c0_i32, %c0_i32_0 : i32, i32, i32
  }
  func.func @transform_10(%arg0: i32) -> (i32, i32, i32) {
    %c0_i32 = arith.constant 0 : i32
    %c0_i32_0 = arith.constant 0 : i32
    %c0_i32_1 = arith.constant 0 : i32
    return %arg0, %c0_i32, %c0_i32_0 : i32, i32, i32
  }
  func.func @transform_11(%arg0: i32) -> (i32, i32) {
    %c0_i32 = arith.constant 0 : i32
    %c0_i32_0 = arith.constant 0 : i32
    %c0_i32_1 = arith.constant 0 : i32
    return %c0_i32, %c0_i32_0 : i32, i32
  }
}

</mosaic_0001>

<bundles_post_ra>
// kernel: decoder_forward.1
= control target key start
LH: loop header
LB: loop body
LE: loop exit
PB: predicated region body
PF: predicated region fallthrough
CT: control target
= control target key end

     0   :  { %s19137_s0 = inlined_call_operand.vmem [shape: f32[4,96,16], index: 0, kind: input, shape index: {}]   ;;  %s19138_s1 = inlined_call_operand.vmem [shape: f32[16,512], index: 1, kind: input, shape index: {}]   ;;  %s19139_s2 = inlined_call_operand.vmem [shape: f32[16,512], index: 2, kind: input, shape index: {}]   ;;  %s19140_s3 = inlined_call_operand.vmem [shape: bf16[6,512,144], index: 3, kind: input, shape index: {}]   ;;  %s19141_s4 = inlined_call_operand.hbm [shape: bf16[6,48,512], index: 4, kind: input, shape index: {}]   ;;  %s19142_s5 = inlined_call_operand.vmem [shape: bf16[6,512,48], index: 5, kind: input, shape index: {}]   ;;  %s19143_s6 = inlined_call_operand.vmem [shape: bf16[6,512,96], index: 6, kind: input, shape index: {}]   ;;  %s19144_s7 = inlined_call_operand.hbm [shape: bf16[6,48,512], index: 7, kind: input, shape index: {}]   ;;  %s19145_s8 = inlined_call_operand.hbm [shape: bf16[6,512,2048], index: 8, kind: input, shape index: {}]   ;;  %s19146_s9 = inlined_call_operand.hbm [shape: bf16[6,2048,512], index: 9, kind: input, shape index: {}]   ;;  %s19147_s10 = inlined_call_operand.hbm [shape: f32[6,1,6016], index: 10, kind: input, shape index: {}]   ;;  %s19148_s11 = inlined_call_operand.vmem [shape: f32[16,512], index: 11, kind: output, shape index: {}]  }
   0x1   :  { %19173 = sst [smem:[#allocation16_spill]] %s19137_s0 }
   0x2   :  { %19174 = sst [smem:[#allocation17_spill]] %s19138_s1 }
   0x3   :  { %19175 = sst [smem:[#allocation18_spill]] %s19139_s2 }
   0x4   :  { %19176 = sst [smem:[#allocation19_spill]] %s19141_s4 }
   0x5   :  { %19177 = sst [smem:[#allocation20_spill]] %s19144_s7 }
   0x6   :  { %19178 = sst [smem:[#allocation21_spill]] %s19146_s9 }
   0x7   :  { %19179 = sst [smem:[#allocation22_spill]] %s19148_s11 }
   0x8   :  { %16 = vsyncpa [#allocation3], 0 }
   0x9   :  { %18 = vsyncpa [#allocation3 + $0x1], 0 }
   0xa   :  { %19 = vsyncpa [#allocation5], 0 }
   0xb   :  { %21 = vsyncpa [#allocation5 + $0x1], 0 }
   0xc   :  { %22 = vsyncpa [#allocation8], 0 }
   0xd   :  { %24 = vsyncpa [#allocation8 + $0x1], 0  ;;  %s16512_s17 = smov 0   ;;  %s16514_s18 = smov 0  }
   0xe   :  { %s16516_s19 = smov 0   ;;  %s16518_s20 = smov 0  }
   0xf LB: > { %19180 = sst [smem:[#allocation13_spill]] %s16421_s19  ;;  %s16531_s21 = sadd.s32 4294967295, %s16425_s20   ;;  %s16425_s20 = sphi %s16518_s20, %s19214_s20   ;;  %s16421_s19 = sphi %s16516_s19, %s19216_s19   ;;  %s16417_s18 = sphi %s16514_s18, %s19218_s18   ;;  %s16413_s17 = sphi %s16512_s17, %s19217_s17  }
  0x10   : > { %s16534_s22 = sadd.s32 1, %s16425_s20   ;;  %s126_s24 = sadd.s32 1, %s16421_s19 }
  0x11   : > { %19181 = sst [smem:[#allocation14_spill]] %s16534_s22  ;;  %s123_s23 = ssub.s32 %s16425_s20, %s16534_s22 }
  0x12   : > { %p124_p0 = scmp.eq.s32.totalorder %s123_s23, 0  ;;  %p133_p1 = scmp.ne.s32.totalorder %s16421_s19, %s16417_s18 }
  0x13   : > { %p134_p2 = scmp.eq.s32.totalorder %s16425_s20, 0  ;;  %p139_p3 = scmp.ne.s32.totalorder %s16417_s18, %s16413_s17 }
  0x14   : > { %s16544_s25 = scalar_select %p124_p0, %s16421_s19, %s126_s24  }
  0x15   : > { %p135_p4 = por %p134_p2, %p133_p1  ;;  %p140_p5 = scmp.eq.s32.totalorder %s16531_s21, 0 }
  0x16   : > { %19182 = sst [smem:[#allocation15_spill]] %s16544_s25  ;;  %p14940_p6 = scmp.lt.s32.totalorder %s16425_s20, 6 }
  0x17   : > { %p16548_p7 = por %p140_p5, %p139_p3  ;;  %s16553_s27 = sand.u32 1, %s16421_s19  }
  0x18   : > { %s19149_s28 = smul.u32 96, %s16553_s27  ;;  %p16556_p8 = pnand %p14940_p6, %p135_p4 }
  0x19   : > { %s19183_s26 = scalar_select %p16548_p7, 1, 0 }
  0x1a   : > { %s19184_s29 = scalar_select %p16556_p8, 1, 0 }
  0x1b   : > { %s19150_s30 = smul.u32 1536, %s16425_s20  ;;  %s19151_s12 = sand.u32 1, %s16425_s20  }
  0x1c   : > { %s19185_s7 = sld [smem:[#allocation20_spill]]  ;;  %s398_s16 = scalar_lea.vmem [#allocation4], %s19149_s28 }
  0x1d   : > { %s405_s17 = sshll.u32 %s398_s16, 4  ;;  %s16577_s23 = scalar_lea.sflag [#allocation5], %s19151_s12  ;;  %s16572_s17 = int_to_ptr.vmem [resolvable:$true] %s405_s17 }
  0x1e   : > { %p16583_p12 = pneg %p16556_p8 }
  0x22   : > { %s16567_s15 = scalar_lea.hbm %s19185_s7, %s19150_s30  ;;  %s16238_s28 = scalar_lea.hbm %s19185_s7, 9216 }
  0x23   : > { %s16233_s24 = scalar_lea.hbm %s16567_s15, 1536  ;;  %p16239_p1 = scmp.lt.u32.totalorder %s16567_s15, %s19185_s7 }
  0x24   : > { %p16234_p11 = scmp.ne.s32.totalorder %s16567_s15, %s16233_s24  ;;  %p16240_p2 = scmp.lt.u32.totalorder %s16238_s28, %s16233_s24 }
  0x25   : > { %p16242_p4 = scmp.lt.u32.totalorder %s16233_s24, %s16567_s15 }
  0x26   : > { %p16236_p13 = pnand %p16583_p12, %p16234_p11  ;;  %p16241_p3 = por %p16240_p2, %p16239_p1 }
  0x28   : > { %p16237_p0 = pneg %p16236_p13  ;;  %p16243_p5 = por %p16242_p4, %p16241_p3 }
  0x2a   : > { %p16244_p6 = pnand %p16243_p5, %p16237_p0 }
  0x2c   : > { %16247 = shalt.err (!%p16244_p6)
}
  0x2d   : > { %s16248_s12 = scalar_lea.vmem %s16572_s17, 1536  ;;  %s16427_s14 = smov [#allocation4]  }
  0x2e   : > { %p16249_p11 = scmp.ne.s32.totalorder %s16572_s17, %s16248_s12  ;;  %s16253_s16 = sshll.u32 %s16427_s14, 4  ;;  %s16254_s16 = int_to_ptr.vmem [resolvable:$false] %s16253_s16 }
  0x2f   : > { %s16255_s25 = scalar_lea.vmem %s16254_s16, 3072  ;;  %p16256_p10 = scmp.lt.s32.totalorder %s16572_s17, %s16254_s16 }
  0x30   : > { %p16251_p13 = pnand %p16249_p11, %p16583_p12  ;;  %p16257_p7 = scmp.lt.s32.totalorder %s16255_s25, %s16248_s12 }
  0x32   : > { %p16252_p9 = pneg %p16251_p13  ;;  %p16258_p1 = por %p16257_p7, %p16256_p10 }
  0x34   : > { %p16259_p2 = pnand %p16258_p1, %p16252_p9 }
  0x36   : > { %16262 = shalt.err (!%p16259_p2)
}
  0x37   : > { %s19158_s28 = smov 256   ;;  %s19160_s30 = smov 16  }
  0x38   : > { %14930 = dma.hbm_to_vmem [thread:$0]  (!%p16556_p8), %s16567_s15, 1536, %s16572_s17, %s16577_s23, %s19158_s28, %s19158_s28, %s19160_s30  }
  0x39   : > { %p19187_p7 = scmp.lt.s32.totalorder %s16425_s20, 7  ;;  %p19188_p9 = scmp.ge.s32.totalorder %s16425_s20, 1 }
  0x3a   : > { %s12985_s24 = sshll.u32 %s16553_s27, 12  ;;  %s14293_s14 = sshll.u32 %s16425_s20, 16 }
  0x3b   : > { %p16614_p10 = pnand %p19188_p9, %p19187_p7  ;;  %s16623_s7 = scalar_lea.hbm %s19145_s8, %s14293_s14 }
  0x3c   : > { %s419_s19 = scalar_lea.vmem [#allocation6], %s12985_s24  ;;  %s19190_s9 = sld [smem:[#allocation21_spill]] }
  0x3d   : > { %s19189_s12 = scalar_select %p16614_p10, 1, 0 }
  0x3e   : > { %s426_s22 = sshll.u32 %s419_s19, 4  ;;  %s440_s17 = scalar_lea.vmem [#allocation7], %s12985_s24  ;;  %s16625_s22 = int_to_ptr.vmem [resolvable:$true] %s426_s22 }
  0x3f   : > { %s447_s28 = sshll.u32 %s440_s17, 4  ;;  %s19191_s16 = sand.u32 1, %s16425_s20   ;;  %s16632_s28 = int_to_ptr.vmem [resolvable:$true] %s447_s28 }
  0x40   : > { %s16636_s25 = scalar_lea.sflag [#allocation8], %s19191_s16 }
  0x42   : > { %s16630_s15 = scalar_lea.hbm %s19190_s9, %s14293_s14  ;;  %s16268_s2 = scalar_lea.hbm %s19190_s9, 393216 }
  0x43   : > { %s16263_s30 = scalar_lea.hbm %s16630_s15, 65536  ;;  %p16269_p5 = scmp.lt.u32.totalorder %s16630_s15, %s19190_s9 }
  0x44   : > { %p16264_p0 = scmp.ne.s32.totalorder %s16630_s15, %s16263_s30  ;;  %p16270_p6 = scmp.lt.u32.totalorder %s16268_s2, %s16263_s30 }
  0x45   : > { %p16272_p13 = scmp.lt.u32.totalorder %s16263_s30, %s16630_s15 }
  0x46   : > { %p16266_p3 = pnand %p16264_p0, %p16583_p12  ;;  %p16271_p11 = por %p16270_p6, %p16269_p5 }
  0x48   : > { %p16267_p4 = pneg %p16266_p3  ;;  %p16273_p1 = por %p16272_p13, %p16271_p11 }
  0x4a   : > { %p16274_p2 = pnand %p16273_p1, %p16267_p4 }
  0x4c   : > { %16277 = shalt.err (!%p16274_p2)
}
  0x4d   : > { %s16278_s24 = scalar_lea.vmem %s16632_s28, 65536  ;;  %s16430_s17 = smov [#allocation7]  }
  0x4e   : > { %p16279_p7 = scmp.ne.s32.totalorder %s16632_s28, %s16278_s24  ;;  %s16283_s16 = sshll.u32 %s16430_s17, 4  ;;  %s16284_s16 = int_to_ptr.vmem [resolvable:$false] %s16283_s16 }
  0x4f   : > { %s16285_s11 = scalar_lea.vmem %s16284_s16, 131072  ;;  %p16286_p3 = scmp.lt.s32.totalorder %s16632_s28, %s16284_s16 }
  0x50   : > { %p16281_p9 = pnand %p16279_p7, %p16583_p12  ;;  %p16287_p10 = scmp.lt.s32.totalorder %s16285_s11, %s16278_s24 }
  0x52   : > { %p16282_p0 = pneg %p16281_p9  ;;  %p16288_p5 = por %p16287_p10, %p16286_p3 }
  0x54   : > { %p16289_p6 = pnand %p16288_p5, %p16282_p0 }
  0x56   : > { %16292 = shalt.err (!%p16289_p6)
}
  0x57   : > { %s19192_s30 = smov 16   ;;  %s19193_s19 = smov 256  }
  0x58   : > { %14936 = dma.hbm_to_vmem [thread:$0]  (!%p16556_p8), %s16630_s15, 65536, %s16632_s28, %s16636_s25, %s19193_s19, %s19193_s19, %s19192_s30  }
  0x59   : > { %s19194_s0 = smul.u32 1536, %s16425_s20  ;;  %s19195_s4 = sld [smem:[#allocation19_spill]] }
  0x5a   : > { %s19196_s17 = smul.u32 96, %s16553_s27  ;;  %s358_s9 = scalar_lea.sflag [#allocation3], %s16553_s27 }
  0x5c   : > { %s361_s16 = scalar_lea.vmem [#allocation2], %s19196_s17 }
  0x5d   : > { %s368_s11 = sshll.u32 %s361_s16, 4  ;;  %s16672_s11 = int_to_ptr.vmem [resolvable:$true] %s368_s11 }
  0x5f   : > { %s16668_s24 = scalar_lea.hbm %s19195_s4, %s19194_s0  ;;  %s16298_s0 = scalar_lea.hbm %s19195_s4, 9216 }
  0x60   : > { %s16293_s1 = scalar_lea.hbm %s16668_s24, 1536  ;;  %p16299_p13 = scmp.lt.u32.totalorder %s16668_s24, %s19195_s4 }
  0x61   : > { %p16294_p10 = scmp.ne.s32.totalorder %s16668_s24, %s16293_s1  ;;  %p16300_p1 = scmp.lt.u32.totalorder %s16298_s0, %s16293_s1 }
  0x62   : > { %p16302_p7 = scmp.lt.u32.totalorder %s16293_s1, %s16668_s24 }
  0x63   : > { %p16296_p4 = pnand %p16294_p10, %p16583_p12  ;;  %p16301_p2 = por %p16300_p1, %p16299_p13 }
  0x65   : > { %p16297_p11 = pneg %p16296_p4  ;;  %p16303_p9 = por %p16302_p7, %p16301_p2 }
  0x67   : > { %p16304_p0 = pnand %p16303_p9, %p16297_p11 }
  0x69   : > { %16307 = shalt.err (!%p16304_p0)
}
  0x6a   : > { %s16308_s17 = scalar_lea.vmem %s16672_s11, 1536  ;;  %s16431_s16 = smov [#allocation2]  }
  0x6b   : > { %p16309_p3 = scmp.ne.s32.totalorder %s16672_s11, %s16308_s17  ;;  %s16313_s28 = sshll.u32 %s16431_s16, 4  ;;  %s16314_s28 = int_to_ptr.vmem [resolvable:$false] %s16313_s28 }
  0x6c   : > { %s16315_s15 = scalar_lea.vmem %s16314_s28, 3072  ;;  %p16316_p10 = scmp.lt.s32.totalorder %s16672_s11, %s16314_s28 }
  0x6d   : > { %p16311_p5 = pnand %p16309_p3, %p16583_p12  ;;  %p16317_p4 = scmp.lt.s32.totalorder %s16315_s15, %s16308_s17 }
  0x6f   : > { %p16312_p6 = pneg %p16311_p5  ;;  %p16318_p13 = por %p16317_p4, %p16316_p10 }
  0x71   : > { %p16319_p1 = pnand %p16318_p13, %p16312_p6 }
  0x73   : > { %16322 = shalt.err (!%p16319_p1)
}
  0x74   : > { %14927 = dma.hbm_to_vmem [thread:$0]  (!%p16556_p8), %s16668_s24, 1536, %s16672_s11, %s358_s9, %s19193_s19, %s19193_s19, %s19192_s30  }
  0x75   : > { %s14910_s1 = smul.u32 47, %s16553_s27  ;;  %s16323_s0 = scalar_lea.hbm %s16623_s7, 65536 }
  0x76   : > { %p16324_p11 = scmp.ne.s32.totalorder %s16623_s7, %s16323_s0  ;;  %s16328_s17 = scalar_lea.hbm %s19145_s8, 393216 }
  0x77   : > { %p16329_p9 = scmp.lt.u32.totalorder %s16623_s7, %s19145_s8  ;;  %p16330_p0 = scmp.lt.u32.totalorder %s16328_s17, %s16323_s0 }
  0x78   : > { %p16326_p2 = pnand %p16324_p11, %p16583_p12  ;;  %p16332_p5 = scmp.lt.u32.totalorder %s16323_s0, %s16623_s7 }
  0x79   : > { %p16331_p3 = por %p16330_p0, %p16329_p9 }
  0x7a   : > { %p16327_p7 = pneg %p16326_p2 }
  0x7b   : > { %p16333_p6 = por %p16332_p5, %p16331_p3 }
  0x7d   : > { %p16334_p10 = pnand %p16333_p6, %p16327_p7 }
  0x7f   : > { %16337 = shalt.err (!%p16334_p10)
}
  0x80   : > { %s16338_s9 = scalar_lea.vmem %s16625_s22, 65536  ;;  %s16432_s30 = smov [#allocation6]  }
  0x81   : > { %p16339_p4 = scmp.ne.s32.totalorder %s16625_s22, %s16338_s9  ;;  %s16343_s19 = sshll.u32 %s16432_s30, 4  ;;  %s16344_s19 = int_to_ptr.vmem [resolvable:$false] %s16343_s19 }
  0x82   : > { %s16345_s24 = scalar_lea.vmem %s16344_s19, 131072  ;;  %p16346_p11 = scmp.lt.s32.totalorder %s16625_s22, %s16344_s19 }
  0x83   : > { %p16341_p13 = pnand %p16339_p4, %p16583_p12  ;;  %p16347_p2 = scmp.lt.s32.totalorder %s16345_s24, %s16338_s9 }
  0x85   : > { %p16342_p1 = pneg %p16341_p13  ;;  %p16348_p9 = por %p16347_p2, %p16346_p11 }
  0x87   : > { %p16349_p0 = pnand %p16348_p9, %p16342_p1 }
  0x89   : > { %16352 = shalt.err (!%p16349_p0)
}
  0x8a   : > { %s16433_s11 = smov 1024   ;;  %s16434_s15 = smov 64  }
  0x8b   : > { %14933 = dma.hbm_to_vmem [thread:$0]  (!%p16556_p8), %s16623_s7, 65536, %s16625_s22, %s16577_s23, %s16433_s11, %s16433_s11, %s16434_s15  }
  0x8c   : > { %s14911_s0 = smul.u32 752, %s16425_s20  ;;  %s461_s2 = scalar_lea.vmem [#allocation9], %s14910_s1 }
  0x8d   : > { %s469_s14 = sshll.u32 %s461_s2, 4  ;;  %s16358_s24 = scalar_lea.hbm %s19147_s10, 4512  ;;  %s470_s14 = int_to_ptr.vmem [resolvable:$true] %s469_s14 }
  0x8e   : > { %s467_s28 = scalar_lea.hbm %s19147_s10, %s14911_s0 }
  0x8f   : > { %s16353_s9 = scalar_lea.hbm %s467_s28, 752  ;;  %p16359_p6 = scmp.lt.u32.totalorder %s467_s28, %s19147_s10 }
  0x90   : > { %p16354_p7 = scmp.ne.s32.totalorder %s467_s28, %s16353_s9  ;;  %p16360_p10 = scmp.lt.u32.totalorder %s16358_s24, %s16353_s9 }
  0x91   : > { %p16362_p13 = scmp.lt.u32.totalorder %s16353_s9, %s467_s28 }
  0x92   : > { %p16356_p3 = pnand %p16354_p7, %p16583_p12  ;;  %p16361_p4 = por %p16360_p10, %p16359_p6 }
  0x94   : > { %p16357_p5 = pneg %p16356_p3  ;;  %p16363_p1 = por %p16362_p13, %p16361_p4 }
  0x96   : > { %p16364_p11 = pnand %p16363_p1, %p16357_p5 }
  0x98   : > { %16367 = shalt.err (!%p16364_p11)
}
  0x99   : > { %s16368_s20 = scalar_lea.vmem %s470_s14, 752  ;;  %s16435_s22 = smov [#allocation9]  }
  0x9a   : > { %p16369_p2 = scmp.ne.s32.totalorder %s470_s14, %s16368_s20  ;;  %s16373_s27 = sshll.u32 %s16435_s22, 4  ;;  %s16374_s27 = int_to_ptr.vmem [resolvable:$false] %s16373_s27 }
  0x9b   : > { %s16375_s23 = scalar_lea.vmem %s16374_s27, 1504  ;;  %p16376_p7 = scmp.lt.s32.totalorder %s470_s14, %s16374_s27 }
  0x9c   : > { %p16371_p9 = pnand %p16369_p2, %p16583_p12  ;;  %p16377_p3 = scmp.lt.s32.totalorder %s16375_s23, %s16368_s20 }
  0x9e   : > { %p16372_p0 = pneg %p16371_p9  ;;  %p16378_p8 = por %p16377_p3, %p16376_p7 }
  0xa0   : > { %p16379_p6 = pnand %p16378_p8, %p16372_p0 }
  0xa2   : > { %16382 = shalt.err (!%p16379_p6)
}
  0xa3   : > { %p19197_p10 = scmp.ne.s32.totalorder %s19184_s29, 0  ;;  %p19198_p5 = scmp.ne.s32.totalorder %s19189_s12, 0 }
  0xa4   : > { %s480_s4 = sand.u32 (!%p19198_p5), 1, %s16417_s18   ;;  %p19199_p12 = scmp.ne.s32.totalorder (!%p19198_p5), %s19183_s26, 0 }
  0xa5   : > { %14939 = dma.hbm_to_vmem [thread:$0]  (!%p19197_p10), %s467_s28, 752, %s470_s14, %s16636_s25  }
  0xa6   : > { %478 = sbr.rel (%p19198_p5) target bundleno = 5557 (0x15b5), region = 64  ;;  %s481_s1 = scalar_lea.sflag (!%p19198_p5), [#allocation3], %s480_s4 }
  0xa7   : > { %s14912_s13 = smul.u32 (!%p19198_p5), 96, %s480_s4 }
  0xa9   : > { %s16746_s11 = scalar_lea.vmem (!%p19198_p5), [#allocation2], %s14912_s13 }
  0xad   : > { %16400 = dma.done.wait (%p19199_p12), %s481_s1, 1536  }
  0xae   : > { %16402 = vsyncadd (%p19199_p12), %s481_s1, 4294965760  ;;  %s489_s29 = sand.u32 1, %s16531_s21   ;;  %s16753_s25 = scalar_lea.vmem [#allocation4], %s14912_s13 }
  0xaf   : > { %s490_s15 = scalar_lea.sflag [#allocation5], %s489_s29 }
  0xb0   : > { %16404 = dma.done.wait (%p19199_p12), %s490_s15, 67072  }
  0xb1   : > { %16406 = vsyncadd (%p19199_p12), %s490_s15, 4294900224  ;;  %s12993_s12 = sshll.u32 %s480_s4, 12  ;;  %s508_s2 = scalar_lea.sflag [#allocation8], %s489_s29 }
  0xb2   : > { %s16759_s0 = scalar_lea.vmem [#allocation6], %s12993_s12  ;;  %s16761_s14 = scalar_lea.vmem [#allocation7], %s12993_s12 }
  0xb3   : > { %16408 = dma.done.wait (%p19199_p12), %s508_s2, 66288  }
  0xb4   : > { %16410 = vsyncadd (%p19199_p12), %s508_s2, 4294901008  ;;  %s14913_s17 = smul.u32 47, %s480_s4  ;;  %p589_p8 = scmp.lt.s32.totalorder %s16531_s21, 5 }
  0xb5   : > { %p13001_p4 = scmp.ne.s32.totalorder %s16531_s21, 0 }
  0xb6   : > { %s590_s16 = scalar_select %p589_p8, %s16531_s21, 5 }
  0xb7   : > { %s16784_s4 = scalar_lea.vmem [#allocation9], %s14913_s17  ;;  %608 = sbr.rel (%p13001_p4) target bundleno = 197 (0xc5), region = 88 }
  0xb8   : > { %s14295_s28 = sshll.u32 %s590_s16, 9  ;;  %s14296_s9 = sshll.u32 %s590_s16, 8 }
  0xb9   : > { %s16772_s24 = scalar_lea.vmem %s19140_s3, %s14295_s28  ;;  %s16777_s22 = scalar_lea.vmem %s19142_s5, %s14296_s9 }
  0xba   : > { %s16782_s23 = scalar_lea.vmem %s19143_s6, %s14296_s9  ;;  %s19200_s29 = sld [smem:[#allocation17_spill]] (!%p13001_p4) }
  0xbb   : > { %s19201_s30 = sld [smem:[#allocation22_spill]] (!%p13001_p4) }
  0xc0   : > { %v609_v0 = vld [vmem:[%s19200_s29] sm:$0xff]  ;;  %v610_v1 = vld [vmem:[%s19200_s29 + $0x8] sm:$0xff]  ;;  %v611_v2 = vld [vmem:[%s19200_s29 + $0x10] sm:$0xff] }
  0xc1   : > { %617 = vst [vmem:[%s19201_s30] sm:$0xff] %v609_v0  ;;  %618 = vst [vmem:[%s19201_s30 + $0x8] sm:$0xff] %v610_v1  ;;  %v612_v3 = vld [vmem:[%s19200_s29 + $0x18] sm:$0xff]  ;;  %v613_v4 = vld [vmem:[%s19200_s29 + $0x20] sm:$0xff] }
  0xc2   : > { %619 = vst [vmem:[%s19201_s30 + $0x10] sm:$0xff] %v611_v2  ;;  %v614_v5 = vld [vmem:[%s19200_s29 + $0x28] sm:$0xff]  ;;  %620 = vst [vmem:[%s19201_s30 + $0x18] sm:$0xff] %v612_v3  ;;  %v615_v6 = vld [vmem:[%s19200_s29 + $0x30] sm:$0xff] }
  0xc3   : > { %621 = vst [vmem:[%s19201_s30 + $0x20] sm:$0xff] %v613_v4  ;;  %622 = vst [vmem:[%s19201_s30 + $0x28] sm:$0xff] %v614_v5  ;;  %v616_v7 = vld [vmem:[%s19200_s29 + $0x38] sm:$0xff] }
  0xc4   : > { %623 = vst [vmem:[%s19201_s30 + $0x30] sm:$0xff] %v615_v6  ;;  %624 = vst [vmem:[%s19201_s30 + $0x38] sm:$0xff] %v616_v7 }
  0xc5 PF: > { %v15153_v8 = vld [vmem:[%s16772_s24 + $0x4] ss:$8 sps:$4 sm:$0xff]   ;;  %v15155_v9 = vld [vmem:[%s16772_s24] ss:$8 sps:$4 sm:$0xff]   ;;  %v15156_v10 = vld [vmem:[%s16772_s24 + $0x14] ss:$8 sps:$4 sm:$0xff]  }
  0xc6   : > { %1041 = vmatprep.subr.bf16.mxu0 %v15153_v8  ;;  %v15158_v11 = vld [vmem:[%s16772_s24 + $0x10] ss:$8 sps:$4 sm:$0xff]   ;;  %v15159_v12 = vld [vmem:[%s16772_s24 + $0x24] ss:$8 sps:$4 sm:$0xff]   ;;  %v15161_v13 = vld [vmem:[%s16772_s24 + $0x20] ss:$8 sps:$4 sm:$0xff]  }
  0xc7   : > { %1042 = vmatpush1.bf16.msra.mxu0 %v15155_v9  ;;  %v15162_v14 = vld [vmem:[%s16772_s24 + $0x34] ss:$8 sps:$4 sm:$0xff]   ;;  %v15164_v15 = vld [vmem:[%s16772_s24 + $0x30] ss:$8 sps:$4 sm:$0xff]   ;;  %v15165_v16 = vld [vmem:[%s16772_s24 + $0x44] ss:$8 sps:$4 sm:$0xff]  }
  0xc8   : > { %1043 = vmatprep.subr.bf16.mxu0 %v15156_v10  ;;  %v15167_v17 = vld [vmem:[%s16772_s24 + $0x40] ss:$8 sps:$4 sm:$0xff]   ;;  %v15168_v18 = vld [vmem:[%s16772_s24 + $0x54] ss:$8 sps:$4 sm:$0xff]   ;;  %v15170_v19 = vld [vmem:[%s16772_s24 + $0x50] ss:$8 sps:$4 sm:$0xff]  }
  0xc9   : > { %v15171_v20 = vld [vmem:[%s16772_s24 + $0x64] ss:$8 sps:$4 sm:$0xff]   ;;  %s19202_s12 = sld [smem:[#allocation22_spill]]  ;;  %v15173_v24 = vld [vmem:[%s16772_s24 + $0x60] ss:$8 sps:$4 sm:$0xff]   ;;  %vm1173_vm0 = vcmask 64512  }
  0xca   : > { %v15174_v25 = vld [vmem:[%s16772_s24 + $0x74] ss:$8 sps:$4 sm:$0xff]   ;;  %v15176_v26 = vld [vmem:[%s16772_s24 + $0x70] ss:$8 sps:$4 sm:$0xff]   ;;  %v15177_v27 = vld [vmem:[%s16772_s24 + $0x84] ss:$8 sps:$4 sm:$0xff]  }
  0xcb   : > { %1044 = vmatpush1.bf16.msra.mxu0 %v15158_v11  ;;  %v15179_v28 = vld [vmem:[%s16772_s24 + $0x80] ss:$8 sps:$4 sm:$0xff]   ;;  %v15180_v29 = vld [vmem:[%s16772_s24 + $0x94] ss:$8 sps:$4 sm:$0xff]   ;;  %v15182_v30 = vld [vmem:[%s16772_s24 + $0x90] ss:$8 sps:$4 sm:$0xff]  }
  0xcc   : > { %1045 = vmatprep.subr.bf16.mxu0 %v15159_v12  ;;  %v15183_v31 = vld [vmem:[%s16772_s24 + $0xa4] ss:$8 sps:$4 sm:$0xff]   ;;  %v15185_v32 = vld [vmem:[%s16772_s24 + $0xa0] ss:$8 sps:$4 sm:$0xff]   ;;  %v15186_v33 = vld [vmem:[%s16772_s24 + $0xb4] ss:$8 sps:$4 sm:$0xff]  }
  0xcd   : > { %v15188_v34 = vld [vmem:[%s16772_s24 + $0xb0] ss:$8 sps:$4 sm:$0xff]   ;;  %v15189_v35 = vld [vmem:[%s16772_s24 + $0xc4] ss:$8 sps:$4 sm:$0xff]   ;;  %v15191_v36 = vld [vmem:[%s16772_s24 + $0xc0] ss:$8 sps:$4 sm:$0xff]  }
  0xce   : > { %v15192_v37 = vld [vmem:[%s16772_s24 + $0xd4] ss:$8 sps:$4 sm:$0xff]   ;;  %v15194_v38 = vld [vmem:[%s16772_s24 + $0xd0] ss:$8 sps:$4 sm:$0xff]   ;;  %v15195_v39 = vld [vmem:[%s16772_s24 + $0xe4] ss:$8 sps:$4 sm:$0xff]  }
  0xcf   : > { %1046 = vmatpush1.bf16.msra.mxu0 %v15161_v13  ;;  %v626_v21 = vld [vmem:[%s19202_s12 + $0x8] sm:$0xff]  ;;  %v15198_v41 = vld [vmem:[%s16772_s24 + $0xf4] ss:$8 sps:$4 sm:$0xff]   ;;  %v15200_v42 = vld [vmem:[%s16772_s24 + $0xf0] ss:$8 sps:$4 sm:$0xff]   ;;  %s19169_s15 = smov 80  }
  0xd0   : > { %1047 = vmatprep.subr.bf16.mxu0 %v15162_v14  ;;  %v630_v22 = vld [vmem:[%s19202_s12 + $0x28] sm:$0xff]  ;;  %v625_v43 = vld [vmem:[%s19202_s12] sm:$0xff]  ;;  %v628_v46 = vld [vmem:[%s19202_s12 + $0x18] sm:$0xff]  ;;  %s16438_s2 = smov 120   ;;  %s19168_s16 = smov 72   ;;  %vm1748_vm2 = vcmask 130048  }
  0xd1   : > { %v642_v23 = vpack.c.bf16 %v630_v22, %v626_v21  ;;  %v15197_v40 = vld [vmem:[%s16772_s24 + $0xe0] ss:$8 sps:$4 sm:$0xff]   ;;  %v15203_v45 = vld [vmem:[%s16772_s24 + $0x104] ss:$8 sps:$4 sm:$0xff]   ;;  %v632_v47 = vld [vmem:[%s19202_s12 + $0x38] sm:$0xff]  ;;  %s19167_s28 = smov 56  }
  0xd2   : > { %v629_v44 = vld [vmem:[%s19202_s12 + $0x20] sm:$0xff]  ;;  %v15206_v50 = vld [vmem:[%s16772_s24 + $0x114] ss:$8 sps:$4 sm:$0xff]   ;;  %v644_v51 = vpack.c.bf16 %v632_v47, %v628_v46  ;;  %v15204_v52 = vld [vmem:[%s16772_s24 + $0x110] ss:$8 sps:$4 sm:$0xff]   ;;  %s16441_s9 = smov 112  }
  0xd3   : > { %1048 = vmatpush1.bf16.msra.mxu0 %v15164_v15  ;;  %1073 = vmatprep.mubr.bf16.mxu0 %v642_v23  ;;  %v15201_v48 = vld [vmem:[%s16772_s24 + $0x100] ss:$8 sps:$4 sm:$0xff]   ;;  %v641_v49 = vpack.c.bf16 %v629_v44, %v625_v43  ;;  %v15209_v53 = vld [vmem:[%s16772_s24 + $0x124] ss:$8 sps:$4 sm:$0xff]   ;;  %v15212_v55 = vld [vmem:[%s16772_s24 + $0x134] ss:$8 sps:$4 sm:$0xff]  }
  0xd4   : > { %1049 = vmatprep.subr.bf16.mxu0 %v15165_v16  ;;  %v15207_v54 = vld [vmem:[%s16772_s24 + $0x120] ss:$8 sps:$4 sm:$0xff]   ;;  %v15210_v56 = vld [vmem:[%s16772_s24 + $0x130] ss:$8 sps:$4 sm:$0xff]   ;;  %v15215_v57 = vld [vmem:[%s16772_s24 + $0x144] ss:$8 sps:$4 sm:$0xff]  }
  0xd5   : > { %v15213_v58 = vld [vmem:[%s16772_s24 + $0x140] ss:$8 sps:$4 sm:$0xff]   ;;  %v15218_v59 = vld [vmem:[%s16772_s24 + $0x154] ss:$8 sps:$4 sm:$0xff]   ;;  %v15216_v60 = vld [vmem:[%s16772_s24 + $0x150] ss:$8 sps:$4 sm:$0xff]  }
  0xd6   : > { %v15221_v61 = vld [vmem:[%s16772_s24 + $0x164] ss:$8 sps:$4 sm:$0xff]   ;;  %v15219_v62 = vld [vmem:[%s16772_s24 + $0x160] ss:$8 sps:$4 sm:$0xff]   ;;  %v15224_v63 = vld [vmem:[%s16772_s24 + $0x174] ss:$8 sps:$4 sm:$0xff]  }
  0xd7   : > { %1050 = vmatpush1.bf16.msra.mxu0 %v15167_v17  ;;  %v15222_v0 = vld [vmem:[%s16772_s24 + $0x170] ss:$8 sps:$4 sm:$0xff]   ;;  %v15227_v1 = vld [vmem:[%s16772_s24 + $0x184] ss:$8 sps:$4 sm:$0xff]   ;;  %v15225_v2 = vld [vmem:[%s16772_s24 + $0x180] ss:$8 sps:$4 sm:$0xff]  }
  0xd8   : > { %1051 = vmatprep.subr.bf16.mxu0 %v15168_v18  ;;  %v15230_v3 = vld [vmem:[%s16772_s24 + $0x194] ss:$8 sps:$4 sm:$0xff]   ;;  %v15228_v4 = vld [vmem:[%s16772_s24 + $0x190] ss:$8 sps:$4 sm:$0xff]   ;;  %v15233_v5 = vld [vmem:[%s16772_s24 + $0x1a4] ss:$8 sps:$4 sm:$0xff]  }
  0xd9   : > { %v15231_v6 = vld [vmem:[%s16772_s24 + $0x1a0] ss:$8 sps:$4 sm:$0xff]   ;;  %v15236_v7 = vld [vmem:[%s16772_s24 + $0x1b4] ss:$8 sps:$4 sm:$0xff]   ;;  %v15234_v8 = vld [vmem:[%s16772_s24 + $0x1b0] ss:$8 sps:$4 sm:$0xff]  }
  0xda   : > { %v15239_v9 = vld [vmem:[%s16772_s24 + $0x1c4] ss:$8 sps:$4 sm:$0xff]   ;;  %v15237_v10 = vld [vmem:[%s16772_s24 + $0x1c0] ss:$8 sps:$4 sm:$0xff]   ;;  %v15242_v11 = vld [vmem:[%s16772_s24 + $0x1d4] ss:$8 sps:$4 sm:$0xff]  }
  0xdb   : > { %1052 = vmatpush1.bf16.msra.mxu0 %v15170_v19  ;;  %v15240_v12 = vld [vmem:[%s16772_s24 + $0x1d0] ss:$8 sps:$4 sm:$0xff]   ;;  %v15245_v13 = vld [vmem:[%s16772_s24 + $0x1e4] ss:$8 sps:$4 sm:$0xff]   ;;  %v15243_v14 = vld [vmem:[%s16772_s24 + $0x1e0] ss:$8 sps:$4 sm:$0xff]  }
  0xdc   : > { %1053 = vmatprep.subr.bf16.mxu0 %v15171_v20  ;;  %v15248_v15 = vld [vmem:[%s16772_s24 + $0x1f4] ss:$8 sps:$4 sm:$0xff]   ;;  %v15246_v16 = vld [vmem:[%s16772_s24 + $0x1f0] ss:$8 sps:$4 sm:$0xff]   ;;  %v711_v20 = vlaneseq  ;;  %s16436_s24 = smov 64   ;;  %s16442_s17 = smov 104   ;;  %vm16971_vm1 = vmpackc.low %vm1173_vm0, %vm1173_vm0 }
  0xdd   : > { %v627_v17 = vld [vmem:[%s19202_s12 + $0x10] sm:$0xff]  ;;  %v709_v23 = vld [vmem:[%s16784_s4 + $0x2c] sm:$0x3]  ;;  %s19166_s19 = smov 48   ;;  %s16444_s21 = smov 40   ;;  %vm2443_vm3 = vcmask 195584  }
  0xde   : > { %v631_v18 = vld [vmem:[%s19202_s12 + $0x30] sm:$0xff]  ;;  %v16923_v21 = vshrl.u32 %v711_v20, 7  ;;  %s16445_s7 = smov 96   ;;  %s16446_s20 = smov 88   ;;  %vm2446_vm4 = vcmask 261120   ;;  %vm2449_vm5 = vcmask 326656  }
  0xdf   : > { %1054 = vmatpush1.bf16.msra.mxu0 %v15173_v24  ;;  %v643_v19 = vpack.c.bf16 %v631_v18, %v627_v17  ;;  %s19205_s13 = sld [smem:[#allocation16_spill]]  ;;  %s19170_s27 = smov 32   ;;  %vm2534_vm6 = vcmask 392192   ;;  %vm3368_vm7 = vcmask 523264  }
  0xe0   : > { %1055 = vmatprep.subr.bf16.mxu0 %v15174_v25  ;;  %v16926_v22 = vsub.s32 0, %v16923_v21  ;;  %v16930_v24 = vsub.s32 1, %v16923_v21  ;;  %s19171_s26 = smov 24   ;;  %s19206_s1 = sld [smem:[#allocation18_spill]] }
  0xe1   : > { %s19212_s30 = smov 24  }
  0xe2   : > { %v714_v25 = vrot.slane %v709_v23, %v16926_v22 }
  0xe3   : > { %1056 = vmatpush1.bf16.msra.mxu0 %v15176_v26 }
  0xe4   : > { %1057 = vmatprep.subr.bf16.mxu0 %v15177_v27  ;;  %v718_v27 = vrot.slane %v709_v23, %v16930_v24 }
  0xe5   : > { %v13066_v17 = vld [vmem:[%s19205_s13 + $0x60] sm:$0xff] }
  0xe7   : > { %1058 = vmatpush1.bf16.msra.mxu0 %v15179_v28 }
  0xe8   : > { %1059 = vmatprep.subr.bf16.mxu0 %v15180_v29 }
  0xeb   : > { %1060 = vmatpush1.bf16.msra.mxu0 %v15182_v30 }
  0xec   : > { %1061 = vmatprep.subr.bf16.mxu0 %v15183_v31 }
  0xef   : > { %1062 = vmatpush1.bf16.msra.mxu0 %v15185_v32 }
  0xf0   : > { %1063 = vmatprep.subr.bf16.mxu0 %v15186_v33 }
  0xf3   : > { %1064 = vmatpush1.bf16.msra.mxu0 %v15188_v34 }
  0xf4   : > { %1065 = vmatprep.subr.bf16.mxu0 %v15189_v35 }
  0xf7   : > { %1066 = vmatpush1.bf16.msra.mxu0 %v15191_v36 }
  0xf8   : > { %1067 = vmatprep.subr.bf16.mxu0 %v15192_v37 }
  0xfb   : > { %1068 = vmatpush1.bf16.msra.mxu0 %v15194_v38 }
  0xfc   : > { %1069 = vmatprep.subr.bf16.mxu0 %v15195_v39 }
  0xff   : > { %1070 = vmatpush1.bf16.msra.mxu0 %v15197_v40 }
 0x100   : > { %1071 = vmatprep.subr.bf16.mxu0 %v15198_v41 }
 0x103   : > { %1072 = vmatpush1.bf16.msra.mxu0 %v15200_v42  ;;  %v13206_v42 = vld [vmem:[%s19205_s13 + $0x128] sm:$0xff] }
 0x104   : > { %1084 = vmatprep.subr.bf16.mxu0 %v15203_v45 }
 0x106   : > { %1074 = vmatmul.mubr.bf16.vlgmr.msra.gmra.mrb[0].mxu0 %v641_v49 }
 0x107   : > { %1085 = vmatpush1.bf16.msra.mxu0 %v15201_v48  ;;  %1116 = vmatprep.mubr.bf16.mxu0 %v644_v51 }
 0x108   : > { %1086 = vmatprep.subr.bf16.mxu0 %v15206_v50 }
 0x10b   : > { %1087 = vmatpush1.bf16.msra.mxu0 %v15204_v52 }
 0x10c   : > { %1088 = vmatprep.subr.bf16.mxu0 %v15209_v53 }
 0x10f   : > { %1089 = vmatpush1.bf16.msra.mxu0 %v15207_v54 }
 0x110   : > { %1090 = vmatprep.subr.bf16.mxu0 %v15212_v55 }
 0x113   : > { %1091 = vmatpush1.bf16.msra.mxu0 %v15210_v56 }
 0x114   : > { %1092 = vmatprep.subr.bf16.mxu0 %v15215_v57 }
 0x117   : > { %1093 = vmatpush1.bf16.msra.mxu0 %v15213_v58 }
 0x118   : > { %1094 = vmatprep.subr.bf16.mxu0 %v15218_v59 }
 0x11b   : > { %1095 = vmatpush1.bf16.msra.mxu0 %v15216_v60 }
 0x11c   : > { %1096 = vmatprep.subr.bf16.mxu0 %v15221_v61 }
 0x11f   : > { %1097 = vmatpush1.bf16.msra.mxu0 %v15219_v62 }
 0x120   : > { %1098 = vmatprep.subr.bf16.mxu0 %v15224_v63 }
 0x123   : > { %1099 = vmatpush1.bf16.msra.mxu0 %v15222_v0 }
 0x124   : > { %1100 = vmatprep.subr.bf16.mxu0 %v15227_v1 }
 0x127   : > { %1101 = vmatpush1.bf16.msra.mxu0 %v15225_v2 }
 0x128   : > { %1102 = vmatprep.subr.bf16.mxu0 %v15230_v3 }
 0x12b   : > { %1103 = vmatpush1.bf16.msra.mxu0 %v15228_v4 }
 0x12c   : > { %1104 = vmatprep.subr.bf16.mxu0 %v15233_v5 }
 0x12f   : > { %1105 = vmatpush1.bf16.msra.mxu0 %v15231_v6 }
 0x130   : > { %1106 = vmatprep.subr.bf16.mxu0 %v15236_v7 }
 0x133   : > { %1107 = vmatpush1.bf16.msra.mxu0 %v15234_v8 }
 0x134   : > { %1108 = vmatprep.subr.bf16.mxu0 %v15239_v9  ;;  %v1128_v9 = vld [vmem:[%s19205_s13 + $0x8] sm:$0xff] }
 0x137   : > { %1109 = vmatpush1.bf16.msra.mxu0 %v15237_v10 }
 0x138   : > { %1110 = vmatprep.subr.bf16.mxu0 %v15242_v11 }
 0x13b   : > { %1111 = vmatpush1.bf16.msra.mxu0 %v15240_v12  ;;  %v1127_v12 = vld [vmem:[%s19205_s13] sm:$0xff] }
 0x13c   : > { %1112 = vmatprep.subr.bf16.mxu0 %v15245_v13 }
 0x13f   : > { %1113 = vmatpush1.bf16.msra.mxu0 %v15243_v14 }
 0x140   : > { %1114 = vmatprep.subr.bf16.mxu0 %v15248_v15  ;;  %v13067_v15 = vld [vmem:[%s19205_s13 + $0x68] sm:$0xff] }
 0x143   : > { %1115 = vmatpush1.bf16.msra.mxu0 %v15246_v16 }
 0x146   : > { %1117 = vmatmul.mubr.bf16.vlgmr.msra.gmra.mrb[0].mxu0 %v643_v19 }
 0x219   : > { %v1118_v26 = vpop.f32.mrb[0].mxu0 }
 0x21a   : > { %v14770_v28 = vadd.f32 %v1118_v26, %v714_v25  ;;  %v1120_v29 = vpop.f32.mrb[1].mxu0 }
 0x21b   : > { %v1122_v30 = vpop.f32.mrb[2].mxu0  ;;  %v16935_v33 = vadd.f32 %v1120_v29, %v718_v27  ;;  %v1129_v29 = vld [vmem:[%s19205_s13 + $0x10] sm:$0xff] }
 0x21c   : > { %v14772_v31 = vadd.f32 %v1122_v30, %v714_v25  ;;  %v1124_v32 = vpop.f32.mrb[3].mxu0  ;;  %14486 = vmatprep.mubr.msk.f32.mxu1 %vm1173_vm0, %v14770_v28 }
 0x21d   : > { %v16937_v34 = vadd.f32 %v1124_v32, %v718_v27  ;;  %v1130_v27 = vld [vmem:[%s19205_s13 + $0x18] sm:$0xff]  ;;  %v13068_v32 = vld [vmem:[%s19205_s13 + $0x70] sm:$0xff] }
 0x21e   : > { %v16939_v35 = vpack.i.bf16 %v14772_v31, %v14770_v28 }
 0x21f   : > { %v15043_v36 = vpack.i.bf16 %v16937_v34, %v16935_v33  ;;  %v16945_v37 = vpack.c.bf16 %v16937_v34, %v16935_v33 }
 0x220   : > { %15004 = vrot.lane.b32.xlu1 %v16939_v35, %s16436_s24  ;;  %14994 = vrot.lane.b32.xlu0 %v16939_v35, %s19169_s15  ;;  %s19172_s15 = smov 16  }
 0x224   : > { %1257 = vrot.lane.b32.xlu1 %v14770_v28, %s16438_s2  ;;  %14999 = vrot.lane.b32.xlu0 %v16939_v35, %s19168_s16  ;;  %s16450_s16 = smov 8  }
 0x228   : > { %15009 = vrot.lane.b32.xlu1 %v16939_v35, %s19167_s28  ;;  %1259 = vrot.lane.b32.xlu0 %v14772_v31, %s16438_s2 }
 0x22c   : > { %1350 = vrot.lane.b32.xlu1 %v14772_v31, %s16441_s9  ;;  %1348 = vrot.lane.b32.xlu0 %v14770_v28, %s16441_s9 }
 0x230   : > { %1439 = vrot.lane.b32.xlu1 %v14770_v28, %s16442_s17  ;;  %15014 = vrot.lane.b32.xlu0 %v16939_v35, %s19166_s19 }
 0x234   : > { %15019 = vrot.lane.b32.xlu1 %v16939_v35, %s16444_s21  ;;  %1441 = vrot.lane.b32.xlu0 %v14772_v31, %s16442_s17 }
 0x238   : > { %1532 = vrot.lane.b32.xlu1 %v14772_v31, %s16445_s7  ;;  %1530 = vrot.lane.b32.xlu0 %v14770_v28, %s16445_s7 }
 0x23c   : > { %1623 = vrot.lane.b32.xlu1 %v14772_v31, %s16446_s20  ;;  %1621 = vrot.lane.b32.xlu0 %v14770_v28, %s16446_s20 }
 0x292   : > { %v15005_v38 = vpop.permute.xlu1 %15004  ;;  %v14995_v39 = vpop.permute.xlu0 %14994 }
 0x293   : > { %v14997_v40 = vunpack.i.h.bf16 %v14995_v39  ;;  %v14996_v41 = vunpack.i.l.bf16 %v14995_v39  ;;  %v15007_v49 = vunpack.i.h.bf16 %v15005_v38  ;;  %v15006_v50 = vunpack.i.l.bf16 %v15005_v38 }
 0x295   : > { %v14650_v43 = vpack.c.bf16 %v14997_v40, %v14996_v41  ;;  %v14662_v53 = vpack.c.bf16 %v15007_v49, %v15006_v50  ;;  %v13069_v40 = vld [vmem:[%s19205_s13 + $0x78] sm:$0xff] }
 0x296   : > { %v15000_v44 = vpop.permute.xlu0 %14999  ;;  %v1258_v47 = vpop.permute.xlu1 %1257 }
 0x297   : > { %v15002_v45 = vunpack.i.h.bf16 %v15000_v44  ;;  %v15001_v46 = vunpack.i.l.bf16 %v15000_v44  ;;  %14652 = vmatprep.subr.msk.bf16.mxu1 %vm16971_vm1, %v14650_v43 }
 0x298   : > { %14655 = vmatpush3.bf16.xpose.msk.msra.mxu1 %vm16971_vm1, %v14650_v43  ;;  %v1132_v43 = vld [vmem:[%s19205_s13 + $0x28] sm:$0xff] }
 0x299   : > { %v14656_v48 = vpack.c.bf16 %v15002_v45, %v15001_v46 }
 0x29a   : > { %v1260_v51 = vpop.permute.xlu0 %1259  ;;  %v15010_v52 = vpop.permute.xlu1 %15009 }
 0x29b   : > { %14658 = vmatprep.subr.msk.bf16.mxu1 %vm16971_vm1, %v14656_v48  ;;  %v15012_v55 = vunpack.i.h.bf16 %v15010_v52  ;;  %v15011_v56 = vunpack.i.l.bf16 %v15010_v52 }
 0x29d   : > { %v14668_v58 = vpack.c.bf16 %v15012_v55, %v15011_v56 }
 0x29e   : > { %v1349_v54 = vpop.permute.xlu0 %1348  ;;  %v1351_v57 = vpop.permute.xlu1 %1350 }
 0x29f   : > { %14487 = vmatmul.mubr.msk.f32.vlgmr.msra.gmra.mrb[0].mxu1 %vm1173_vm0, %v14772_v31 }
 0x2a0   : > { %14661 = vmatpush3.bf16.xpose.msk.msra.mxu1 %vm16971_vm1, %v14656_v48  ;;  %14493 = vmatprep.mubr.msk.f32.mxu1 %vm1173_vm0, %v1258_v47  ;;  %v1131_v48 = vld [vmem:[%s19205_s13 + $0x20] sm:$0xff] }
 0x2a1   : > { %14664 = vmatprep.subr.msk.bf16.mxu1 %vm16971_vm1, %v14662_v53 }
 0x2a2   : > { %v15015_v59 = vpop.permute.xlu0 %15014  ;;  %v1440_v60 = vpop.permute.xlu1 %1439 }
 0x2a3   : > { %v15017_v61 = vunpack.i.h.bf16 %v15015_v59  ;;  %v15016_v62 = vunpack.i.l.bf16 %v15015_v59  ;;  %v1134_v59 = vld [vmem:[%s19205_s13 + $0x38] sm:$0xff] }
 0x2a5   : > { %v14674_v63 = vpack.c.bf16 %v15017_v61, %v15016_v62 }
 0x2a6   : > { %v15020_v0 = vpop.permute.xlu1 %15019  ;;  %v1442_v1 = vpop.permute.xlu0 %1441 }
 0x2a7   : > { %14494 = vmatmul.mubr.msk.f32.vlgmr.msra.gmra.mrb[2].mxu1 %vm1173_vm0, %v1260_v51  ;;  %v15022_v2 = vunpack.i.h.bf16 %v15020_v0  ;;  %v15021_v3 = vunpack.i.l.bf16 %v15020_v0  ;;  %v13071_v51 = vld [vmem:[%s19205_s13 + $0x88] sm:$0xff] }
 0x2a8   : > { %14667 = vmatpush3.bf16.xpose.msk.msra.mxu1 %vm16971_vm1, %v14662_v53  ;;  %14500 = vmatprep.mubr.msk.f32.mxu1 %vm1173_vm0, %v1349_v54  ;;  %v13070_v53 = vld [vmem:[%s19205_s13 + $0x80] sm:$0xff] }
 0x2a9   : > { %14670 = vmatprep.subr.msk.bf16.mxu1 %vm16971_vm1, %v14668_v58  ;;  %v14680_v4 = vpack.c.bf16 %v15022_v2, %v15021_v3  ;;  %v13073_v2 = vld [vmem:[%s19205_s13 + $0x98] sm:$0xff] }
 0x2aa   : > { %v1531_v5 = vpop.permute.xlu0 %1530  ;;  %v1533_v6 = vpop.permute.xlu1 %1532 }
 0x2ae   : > { %v1622_v7 = vpop.permute.xlu0 %1621  ;;  %v1624_v8 = vpop.permute.xlu1 %1623 }
 0x2af   : > { %14501 = vmatmul.mubr.msk.f32.vlgmr.msra.gmra.mrb[4].mxu1 %vm1173_vm0, %v1351_v57 }
 0x2b0   : > { %14673 = vmatpush3.bf16.xpose.msk.msra.mxu1 %vm16971_vm1, %v14668_v58  ;;  %14507 = vmatprep.mubr.msk.f32.mxu1 %vm1173_vm0, %v1440_v60 }
 0x2b1   : > { %14676 = vmatprep.subr.msk.bf16.mxu1 %vm16971_vm1, %v14674_v63 }
 0x2b7   : > { %14508 = vmatmul.mubr.msk.f32.vlgmr.msra.gmra.mrb[6].mxu1 %vm1173_vm0, %v1442_v1 }
 0x2b8   : > { %14679 = vmatpush3.bf16.xpose.msk.msra.mxu1 %vm16971_vm1, %v14674_v63  ;;  %14514 = vmatprep.mubr.msk.f32.mxu1 %vm1173_vm0, %v1531_v5  ;;  %v1133_v63 = vld [vmem:[%s19205_s13 + $0x30] sm:$0xff] }
 0x2b9   : > { %14682 = vmatprep.subr.msk.bf16.mxu1 %vm16971_vm1, %v14680_v4 }
 0x2bf   : > { %14515 = vmatmul.mubr.msk.f32.vlgmr.msra.gmra.mrb[8].mxu1 %vm1173_vm0, %v1533_v6 }
 0x2c0   : > { %14685 = vmatpush3.bf16.xpose.msk.msra.mxu1 %vm16971_vm1, %v14680_v4  ;;  %14521 = vmatprep.mubr.msk.f32.mxu1 %vm1173_vm0, %v1622_v7  ;;  %v13072_v4 = vld [vmem:[%s19205_s13 + $0x90] sm:$0xff] }
 0x2c7   : > { %14522 = vmatmul.mubr.msk.f32.vlgmr.msra.gmra.mrb[10].mxu1 %vm1173_vm0, %v1624_v8 }
 0x372   : > { %v14488_v10 = vpop.f32.mrb[0].mxu1 }
 0x373   : > { %v1713_v11 = vmul.f32 0.35355338, %v14488_v10  ;;  %v1248_v13 = vpop.f32.mrb[1].mxu1 }
 0x374   : > { %v1712_v14 = vmul.f32 0.35355338, %v1248_v13  ;;  %v1135_v13 = vld [vmem:[%s19205_s13 + $0x40] sm:$0xff] }
 0x375   : > { %v1725_v16 = vmul.f32 %v1713_v11, %v1128_v9  ;;  %v1136_v9 = vld [vmem:[%s19205_s13 + $0x48] sm:$0xff] }
 0x376   : > { %v1724_v18 = vmul.f32 %v1712_v14, %v1127_v12 }
 0x377   : > { %v17022_v19 = vadd.f32 %v13067_v15, %v1725_v16  ;;  %v13075_v16 = vld [vmem:[%s19205_s13 + $0xa8] sm:$0xff] }
 0x378   : > { %v17024_v20 = vadd.f32 %v13066_v17, %v1724_v18  ;;  %v13074_v18 = vld [vmem:[%s19205_s13 + $0xa0] sm:$0xff] }
 0x379   : > { %v1752_v23 = vsel %vm1748_vm2, %v17022_v19, -inf }
 0x37a   : > { %1753 = vmax.xlane.f32.xlu1 %v1752_v23  ;;  %v14495_v25 = vpop.f32.mrb[2].mxu1  ;;  %v1749_v26 = vsel %vm1748_vm2, %v17024_v20, -inf }
 0x37b   : > { %v1715_v28 = vmul.f32 0.35355338, %v14495_v25  ;;  %1750 = vmax.xlane.f32.xlu0 %v1749_v26  ;;  %v1339_v30 = vpop.f32.mrb[3].mxu1 }
 0x37c   : > { %v1714_v31 = vmul.f32 0.35355338, %v1339_v30 }
 0x37d   : > { %v1727_v38 = vmul.f32 %v1715_v28, %v1130_v27  ;;  %v1138_v28 = vld [vmem:[%s19205_s13 + $0x58] sm:$0xff] }
 0x37e   : > { %v1726_v39 = vmul.f32 %v1714_v31, %v1129_v29 }
 0x37f   : > { %v17049_v46 = vadd.f32 %v13069_v40, %v1727_v38  ;;  %v13077_v38 = vld [vmem:[%s19205_s13 + $0xb8] sm:$0xff] }
 0x380   : > { %v17042_v41 = vadd.f32 %v13068_v32, %v1726_v39 }
 0x381   : > { %v1758_v55 = vsel %vm1748_vm2, %v17049_v46, -inf }
 0x382   : > { %v14502_v44 = vpop.f32.mrb[4].mxu1  ;;  %v1755_v45 = vsel %vm1748_vm2, %v17042_v41, -inf }
 0x383   : > { %v1717_v47 = vmul.f32 0.35355338, %v14502_v44  ;;  %1756 = vmax.xlane.f32.xlu0 %v1755_v45  ;;  %v1430_v49 = vpop.f32.mrb[5].mxu1  ;;  %v1137_v45 = vld [vmem:[%s19205_s13 + $0x50] sm:$0xff] }
 0x384   : > { %v1716_v50 = vmul.f32 0.35355338, %v1430_v49 }
 0x385   : > { %v1729_v52 = vmul.f32 %v1717_v47, %v1132_v43 }
 0x386   : > { %v1728_v54 = vmul.f32 %v1716_v50, %v1131_v48  ;;  %v13076_v48 = vld [vmem:[%s19205_s13 + $0xb0] sm:$0xff] }
 0x387   : > { %1759 = vmax.xlane.f32.xlu0 %v1758_v55  ;;  %v17062_v56 = vadd.f32 %v13071_v51, %v1729_v52 }
 0x388   : > { %v17064_v57 = vadd.f32 %v13070_v53, %v1728_v54 }
 0x389   : > { %v1764_v58 = vsel %vm1748_vm2, %v17062_v56, -inf }
 0x38a   : > { %v14509_v60 = vpop.f32.mrb[6].mxu1  ;;  %v1761_v61 = vsel %vm1748_vm2, %v17064_v57, -inf }
 0x38b   : > { %v1719_v62 = vmul.f32 0.35355338, %v14509_v60  ;;  %1765 = vmax.xlane.f32.xlu0 %v1764_v58  ;;  %1762 = vmax.xlane.f32.xlu1 %v1761_v61  ;;  %v1521_v0 = vpop.f32.mrb[7].mxu1 }
 0x38c   : > { %v1718_v1 = vmul.f32 0.35355338, %v1521_v0 }
 0x38d   : > { %v1731_v3 = vmul.f32 %v1719_v62, %v1134_v59 }
 0x38e   : > { %v1730_v5 = vmul.f32 %v1718_v1, %v1133_v63 }
 0x38f   : > { %v17082_v6 = vadd.f32 %v13073_v2, %v1731_v3 }
 0x390   : > { %v17084_v7 = vadd.f32 %v13072_v4, %v1730_v5 }
 0x391   : > { %v1770_v8 = vsel %vm1748_vm2, %v17082_v6, -inf }
 0x392   : > { %1771 = vmax.xlane.f32.xlu0 %v1770_v8  ;;  %v14516_v10 = vpop.f32.mrb[8].mxu1  ;;  %v1767_v11 = vsel %vm1748_vm2, %v17084_v7, -inf }
 0x393   : > { %v1721_v12 = vmul.f32 0.35355338, %v14516_v10  ;;  %1768 = vmax.xlane.f32.xlu1 %v1767_v11  ;;  %v1612_v14 = vpop.f32.mrb[9].mxu1 }
 0x394   : > { %v1720_v15 = vmul.f32 0.35355338, %v1612_v14 }
 0x395   : > { %v1733_v17 = vmul.f32 %v1721_v12, %v1136_v9 }
 0x396   : > { %v1732_v23 = vmul.f32 %v1720_v15, %v1135_v13 }
 0x397   : > { %v17102_v25 = vadd.f32 %v13075_v16, %v1733_v17 }
 0x398   : > { %v17104_v26 = vadd.f32 %v13074_v18, %v1732_v23 }
 0x399   : > { %v1776_v27 = vsel %vm1748_vm2, %v17102_v25, -inf }
 0x39a   : > { %1777 = vmax.xlane.f32.xlu0 %v1776_v27  ;;  %v14523_v29 = vpop.f32.mrb[10].mxu1  ;;  %v1773_v30 = vsel %vm1748_vm2, %v17104_v26, -inf }
 0x39b   : > { %v1723_v31 = vmul.f32 0.35355338, %v14523_v29  ;;  %1774 = vmax.xlane.f32.xlu1 %v1773_v30  ;;  %v1703_v32 = vpop.f32.mrb[11].mxu1 }
 0x39c   : > { %v1722_v44 = vmul.f32 0.35355338, %v1703_v32 }
 0x39d   : > { %v1735_v39 = vmul.f32 %v1723_v31, %v1138_v28 }
 0x39e   : > { %v1734_v47 = vmul.f32 %v1722_v44, %v1137_v45 }
 0x39f   : > { %v17116_v40 = vadd.f32 %v13077_v38, %v1735_v39 }
 0x3a0   : > { %v17130_v49 = vadd.f32 %v13076_v48, %v1734_v47 }
 0x3a1   : > { %v1782_v43 = vsel %vm1748_vm2, %v17116_v40, -inf }
 0x3a2   : > { %1783 = vmax.xlane.f32.xlu0 %v1782_v43  ;;  %v1779_v50 = vsel %vm1748_vm2, %v17130_v49, -inf }
 0x3ac   : > { %15024 = vrot.lane.b32.xlu1 %v16939_v35, %s19170_s27 }
 0x3b8   : > { %15029 = vrot.lane.b32.xlu0 %v16939_v35, %s19171_s26 }
 0x3d0   : > { %1780 = vmax.xlane.f32.xlu1 %v1779_v50 }
 0x3e1   : > { %15034 = vrot.lane.b32.xlu1 %v16939_v35, %s19172_s15 }
 0x407   : > { %v1754_v51 = vpop.xlane.xlu1 %1753 }
 0x408   : > { %v1786_v52 = vsub.f32 %v17022_v19, %v1754_v51  ;;  %v1751_v53 = vpop.xlane.xlu0 %1750 }
 0x409   : > { %v1785_v54 = vsub.f32 %v17024_v20, %v1751_v53 }
 0x40a   : > { %v1799_v55 = vmul.f32 1.442695, %v1786_v52 }
 0x40b   : > { %v1797_v58 = vmul.f32 1.442695, %v1785_v54 }
 0x40c   : > { %16117 = vpow2.f32 %v1799_v55 }
 0x40d   : > { %16119 = vpow2.f32 %v1797_v58 }
 0x410   : > { %v1757_v59 = vpop.xlane.xlu0 %1756 }
 0x411   : > { %v1787_v60 = vsub.f32 %v17042_v41, %v1757_v59 }
 0x413   : > { %v1801_v61 = vmul.f32 1.442695, %v1787_v60 }
 0x414   : > { %v1760_v62 = vpop.xlane.xlu0 %1759 }
 0x415   : > { %16121 = vpow2.f32 %v1801_v61  ;;  %v1788_v63 = vsub.f32 %v17049_v46, %v1760_v62 }
 0x416   : > { %v17140_v0 = vpop.eup %16117 }
 0x417   : > { %v17142_v1 = vpop.eup %16119  ;;  %v1803_v19 = vmul.f32 1.442695, %v1788_v63  ;;  %v1824_v20 = vsel %vm1748_vm2, %v17140_v0, 0.0 }
 0x418   : > { %v1766_v2 = vpop.xlane.xlu0 %1765  ;;  %v1763_v3 = vpop.xlane.xlu1 %1762  ;;  %1825 = vadd.xlane.f32.xlu0 %v1824_v20  ;;  %v1821_v4 = vsel %vm1748_vm2, %v17142_v1, 0.0 }
 0x419   : > { %16123 = vpow2.f32 %v1803_v19  ;;  %v1790_v41 = vsub.f32 %v17062_v56, %v1766_v2  ;;  %v1789_v5 = vsub.f32 %v17064_v57, %v1763_v3  ;;  %1822 = vadd.xlane.f32.xlu1 %v1821_v4 }
 0x41b   : > { %v1807_v46 = vmul.f32 1.442695, %v1790_v41  ;;  %v1805_v8 = vmul.f32 1.442695, %v1789_v5 }
 0x41d   : > { %16125 = vpow2.f32 %v1807_v46 }
 0x41e   : > { %16127 = vpow2.f32 %v1805_v8 }
 0x41f   : > { %v17150_v9 = vpop.eup %16121  ;;  %v1772_v10 = vpop.xlane.xlu0 %1771 }
 0x420   : > { %v1792_v11 = vsub.f32 %v17082_v6, %v1772_v10  ;;  %v1769_v12 = vpop.xlane.xlu1 %1768  ;;  %v1827_v13 = vsel %vm1748_vm2, %v17150_v9, 0.0 }
 0x421   : > { %v1791_v14 = vsub.f32 %v17084_v7, %v1769_v12  ;;  %1828 = vadd.xlane.f32.xlu1 %v1827_v13 }
 0x422   : > { %v1811_v56 = vmul.f32 1.442695, %v1792_v11 }
 0x423   : > { %v17156_v15 = vpop.eup %16123  ;;  %v1809_v57 = vmul.f32 1.442695, %v1791_v14 }
 0x424   : > { %16129 = vpow2.f32 %v1811_v56  ;;  %v1830_v16 = vsel %vm1748_vm2, %v17156_v15, 0.0 }
 0x425   : > { %16131 = vpow2.f32 %v1809_v57  ;;  %1831 = vadd.xlane.f32.xlu0 %v1830_v16 }
 0x427   : > { %v17160_v17 = vpop.eup %16125  ;;  %v1778_v6 = vpop.xlane.xlu0 %1777 }
 0x428   : > { %v17162_v18 = vpop.eup %16127  ;;  %v1794_v23 = vsub.f32 %v17102_v25, %v1778_v6  ;;  %v1775_v27 = vpop.xlane.xlu1 %1774  ;;  %v1836_v7 = vsel %vm1748_vm2, %v17160_v17, 0.0 }
 0x429   : > { %v1793_v28 = vsub.f32 %v17104_v26, %v1775_v27  ;;  %1837 = vadd.xlane.f32.xlu0 %v1836_v7  ;;  %v1833_v29 = vsel %vm1748_vm2, %v17162_v18, 0.0 }
 0x42a   : > { %v1815_v30 = vmul.f32 1.442695, %v1794_v23  ;;  %1834 = vadd.xlane.f32.xlu1 %v1833_v29 }
 0x42b   : > { %v1813_v31 = vmul.f32 1.442695, %v1793_v28 }
 0x42c   : > { %16133 = vpow2.f32 %v1815_v30  ;;  %v15025_v32 = vpop.permute.xlu1 %15024 }
 0x42d   : > { %16135 = vpow2.f32 %v1813_v31  ;;  %v15027_v38 = vunpack.i.h.bf16 %v15025_v32  ;;  %v15026_v39 = vunpack.i.l.bf16 %v15025_v32 }
 0x42e   : > { %v17170_v43 = vpop.eup %16129 }
 0x42f   : > { %v17172_v25 = vpop.eup %16131  ;;  %v14686_v44 = vpack.c.bf16 %v15027_v38, %v15026_v39  ;;  %v1784_v45 = vpop.xlane.xlu0 %1783  ;;  %v1842_v26 = vsel %vm1748_vm2, %v17170_v43, 0.0 }
 0x430   : > { %v1796_v47 = vsub.f32 %v17116_v40, %v1784_v45  ;;  %1843 = vadd.xlane.f32.xlu0 %v1842_v26  ;;  %v1839_v48 = vsel %vm1748_vm2, %v17172_v25, 0.0 }
 0x431   : > { %14687 = vmatprep.subr.bf16.mxu1 %v14686_v44  ;;  %1840 = vadd.xlane.f32.xlu1 %v1839_v48 }
 0x432   : > { %v1819_v50 = vmul.f32 1.442695, %v1796_v47  ;;  %14689 = vmatpush3.bf16.msra.mxu1 %v14686_v44 }
 0x433   : > { %v15030_v51 = vpop.permute.xlu0 %15029 }
 0x434   : > { %16137 = vpow2.f32 %v1819_v50  ;;  %v15032_v52 = vunpack.i.h.bf16 %v15030_v51  ;;  %v15031_v53 = vunpack.i.l.bf16 %v15030_v51 }
 0x436   : > { %v17179_v54 = vpop.eup %16133  ;;  %v14690_v55 = vpack.c.bf16 %v15032_v52, %v15031_v53 }
 0x437   : > { %v17181_v58 = vpop.eup %16135  ;;  %v1848_v40 = vsel %vm1748_vm2, %v17179_v54, 0.0 }
 0x438   : > { %1849 = vadd.xlane.f32.xlu0 %v1848_v40  ;;  %14691 = vmatprep.subr.bf16.mxu1 %v14690_v55  ;;  %v1845_v59 = vsel %vm1748_vm2, %v17181_v58, 0.0 }
 0x439   : > { %1846 = vadd.xlane.f32.xlu1 %v1845_v59 }
 0x43e   : > { %v17187_v60 = vpop.eup %16137 }
 0x43f   : > { %v1854_v61 = vsel %vm1748_vm2, %v17187_v60, 0.0 }
 0x440   : > { %1855 = vadd.xlane.f32.xlu0 %v1854_v61 }
 0x456   : > { %15044 = vrot.lane.b32.xlu0 %v15043_v36, %s16438_s2 }
 0x45d   : > { %v1781_v62 = vpop.xlane.xlu1 %1780 }
 0x45e   : > { %v1795_v63 = vsub.f32 %v17130_v49, %v1781_v62 }
 0x460   : > { %v1817_v19 = vmul.f32 1.442695, %v1795_v63 }
 0x461   : > { %v15035_v3 = vpop.permute.xlu1 %15034 }
 0x462   : > { %16139 = vpow2.f32 %v1817_v19  ;;  %v15037_v41 = vunpack.i.h.bf16 %v15035_v3  ;;  %v15036_v5 = vunpack.i.l.bf16 %v15035_v3  ;;  %v15249_v19 = vld [vmem:[%s16746_s11] ss:$16 sps:$4 sm:$0xff]  }
 0x46c   : > { %v17196_v20 = vpop.eup %16139 }
 0x46d   : > { %v1851_v2 = vsel %vm1748_vm2, %v17196_v20, 0.0 }
 0x46e   : > { %1852 = vadd.xlane.f32.xlu1 %v1851_v2  ;;  %v15252_v2 = vld [vmem:[%s16746_s11 + $0x20] ss:$16 sps:$4 sm:$0xff]  }
 0x47f   : > { %15039 = vrot.lane.b32.xlu1 %v16939_v35, %s16450_s16  ;;  %v14694_v35 = vpack.c.bf16 %v15037_v41, %v15036_v5  ;;  %v16451_v41 = vmov 0  }
 0x4a5   : > { %v1826_v4 = vpop.xlane.xlu0 %1825 }
 0x4a6   : > { %16141 = vrcp.f32 %v1826_v4  ;;  %v1823_v33 = vpop.xlane.xlu1 %1822  ;;  %v15257_v4 = vld [vmem:[%s16746_s11 + $0x44] ss:$16 sps:$4 sm:$0xff]  }
 0x4a7   : > { %16143 = vrcp.f32 %v1823_v33 }
 0x4ae   : > { %v1829_v34 = vpop.xlane.xlu1 %1828 }
 0x4af   : > { %16145 = vrcp.f32 %v1829_v34  ;;  %v15255_v34 = vld [vmem:[%s16746_s11 + $0x40] ss:$16 sps:$4 sm:$0xff]  }
 0x4b0   : > { %v16142_v36 = vpop.eup %16141 }
 0x4b1   : > { %v16144_v49 = vpop.eup %16143  ;;  %v1860_v10 = vmul.f32 %v16142_v36, %v17140_v0 }
 0x4b2   : > { %v1832_v46 = vpop.xlane.xlu0 %1831  ;;  %v1858_v8 = vmul.f32 %v16144_v49, %v17142_v1  ;;  %v15260_v49 = vld [vmem:[%s16746_s11 + $0xc] ss:$16 sps:$4 sm:$0xff]  }
 0x4b3   : > { %16147 = vrcp.f32 %v1832_v46 }
 0x4b4   : > { %14528 = vmatprep.mubr.msk.f32.mxu1 %vm1748_vm2, %v1858_v8 }
 0x4b5   : > { %14529 = vmatmul.mubr.msk.f32.vlgmr.msra.gmra.mrb[12].mxu1 %vm1748_vm2, %v1860_v10 }
 0x4b6   : > { %14693 = vmatpush3.bf16.msra.mxu1 %v14690_v55  ;;  %v1838_v11 = vpop.xlane.xlu0 %1837 }
 0x4b7   : > { %16149 = vrcp.f32 %v1838_v11  ;;  %v1835_v12 = vpop.xlane.xlu1 %1834  ;;  %14695 = vmatprep.subr.bf16.mxu1 %v14694_v35 }
 0x4b8   : > { %16151 = vrcp.f32 %v1835_v12 }
 0x4b9   : > { %v16146_v13 = vpop.eup %16145 }
 0x4ba   : > { %v1862_v14 = vmul.f32 %v16146_v13, %v17150_v9 }
 0x4bc   : > { %14535 = vmatprep.mubr.msk.f32.mxu1 %vm1748_vm2, %v1862_v14 }
 0x4bd   : > { %v16148_v1 = vpop.eup %16147 }
 0x4be   : > { %v1864_v0 = vmul.f32 %v16148_v1, %v17156_v15  ;;  %v1841_v56 = vpop.xlane.xlu1 %1840  ;;  %v1844_v15 = vpop.xlane.xlu0 %1843 }
 0x4bf   : > { %16153 = vrcp.f32 %v1841_v56 }
 0x4c0   : > { %14536 = vmatmul.mubr.msk.f32.vlgmr.msra.gmra.mrb[14].mxu1 %vm1748_vm2, %v1864_v0  ;;  %16155 = vrcp.f32 %v1844_v15 }
 0x4c1   : > { %v16150_v57 = vpop.eup %16149  ;;  %14697 = vmatpush3.bf16.msra.mxu1 %v14694_v35 }
 0x4c2   : > { %v16152_v16 = vpop.eup %16151  ;;  %v1868_v6 = vmul.f32 %v16150_v57, %v17160_v17 }
 0x4c3   : > { %v1866_v23 = vmul.f32 %v16152_v16, %v17162_v18 }
 0x4c5   : > { %14542 = vmatprep.mubr.msk.f32.mxu1 %vm1748_vm2, %v1866_v23  ;;  %v1850_v7 = vpop.xlane.xlu0 %1849 }
 0x4c6   : > { %14543 = vmatmul.mubr.msk.f32.vlgmr.msra.gmra.mrb[16].mxu1 %vm1748_vm2, %v1868_v6  ;;  %v1847_v28 = vpop.xlane.xlu1 %1846 }
 0x4c7   : > { %16157 = vrcp.f32 %v1847_v28 }
 0x4c8   : > { %16159 = vrcp.f32 %v1850_v7 }
 0x4c9   : > { %v16154_v9 = vpop.eup %16153 }
 0x4ca   : > { %v1870_v27 = vmul.f32 %v16154_v9, %v17172_v25  ;;  %v16156_v39 = vpop.eup %16155 }
 0x4cb   : > { %v1872_v26 = vmul.f32 %v16156_v39, %v17170_v43 }
 0x4cc   : > { %14549 = vmatprep.mubr.msk.f32.mxu1 %vm1748_vm2, %v1870_v27 }
 0x4cd   : > { %v1856_v29 = vpop.xlane.xlu0 %1855 }
 0x4d1   : > { %v15045_v32 = vpop.permute.xlu0 %15044  ;;  %v16158_v44 = vpop.eup %16157 }
 0x4d2   : > { %v15047_v25 = vunpack.i.h.bf16 %v15045_v32  ;;  %v15046_v45 = vunpack.i.l.bf16 %v15045_v32  ;;  %v16160_v47 = vpop.eup %16159  ;;  %v1874_v48 = vmul.f32 %v16158_v44, %v17181_v58 }
 0x4d3   : > { %v1876_v52 = vmul.f32 %v16160_v47, %v17179_v54  ;;  %v15263_v47 = vld [vmem:[%s16746_s11 + $0x2c] ss:$16 sps:$4 sm:$0xff]  }
 0x4d4   : > { %v14706_v51 = vpack.c.bf16 %v15047_v25, %v15046_v45  ;;  %v15258_v45 = vld [vmem:[%s16746_s11 + $0x8] ss:$16 sps:$4 sm:$0xff]  }
 0x4fb   : > { %v1853_v30 = vpop.xlane.xlu1 %1852 }
 0x4fc   : > { %16161 = vrcp.f32 %v1853_v30 }
 0x4fd   : > { %16163 = vrcp.f32 %v1856_v29 }
 0x4ff   : > { %v15040_v17 = vpop.permute.xlu1 %15039 }
 0x500   : > { %v15042_v18 = vunpack.i.h.bf16 %v15040_v17  ;;  %v15041_v31 = vunpack.i.l.bf16 %v15040_v17 }
 0x502   : > { %v14698_v38 = vpack.c.bf16 %v15042_v18, %v15041_v31 }
 0x504   : > { %14699 = vmatprep.subr.bf16.mxu1 %v14698_v38 }
 0x505   : > { %14701 = vmatpush3.bf16.msra.mxu1 %v14698_v38 }
 0x506   : > { %14703 = vmatprep.subr.bf16.mxu1 %v16945_v37  ;;  %v16162_v50 = vpop.eup %16161 }
 0x507   : > { %v16164_v53 = vpop.eup %16163  ;;  %v1878_v55 = vmul.f32 %v16162_v50, %v17196_v20  ;;  %v15254_v20 = vld [vmem:[%s16746_s11 + $0x24] ss:$16 sps:$4 sm:$0xff]   ;;  %v15266_v50 = vld [vmem:[%s16746_s11 + $0x4c] ss:$16 sps:$4 sm:$0xff]  }
 0x508   : > { %14550 = vmatmul.mubr.msk.f32.vlgmr.msra.gmra.mrb[18].mxu1 %vm1748_vm2, %v1872_v26  ;;  %v1880_v43 = vmul.f32 %v16164_v53, %v17187_v60  ;;  %v15251_v60 = vld [vmem:[%s16746_s11 + $0x4] ss:$16 sps:$4 sm:$0xff]  }
 0x509   : > { %14705 = vmatpush3.bf16.msra.mxu1 %v16945_v37  ;;  %14556 = vmatprep.mubr.msk.f32.mxu1 %vm1748_vm2, %v1874_v48  ;;  %v15261_v48 = vld [vmem:[%s16746_s11 + $0x28] ss:$16 sps:$4 sm:$0xff]  }
 0x50a   : > { %14707 = vmatprep.subr.bf16.mxu1 %v14706_v51 }
 0x50c   : > { %14557 = vmatmul.mubr.msk.f32.vlgmr.msra.gmra.mrb[20].mxu1 %vm1748_vm2, %v1876_v52  ;;  %v1164_v52 = vld [vmem:[%s16784_s4 + $0x10] sm:$0xf] }
 0x50d   : > { %14709 = vmatpush3.bf16.msra.mxu1 %v14706_v51  ;;  %14563 = vmatprep.mubr.msk.f32.mxu1 %vm1748_vm2, %v1878_v55  ;;  %v15264_v51 = vld [vmem:[%s16746_s11 + $0x48] ss:$16 sps:$4 sm:$0xff]  }
 0x50e   : > { %2538 = vmatprep.subr.bf16.mxu1 %v15251_v60 }
 0x510   : > { %14564 = vmatmul.mubr.msk.f32.vlgmr.msra.gmra.mrb[22].mxu1 %vm1748_vm2, %v1880_v43 }
 0x511   : > { %2539 = vmatpush1.bf16.msra.mxu1 %v15249_v19  ;;  %2570 = vmatprep.mubr.bf16.mxu1 %v16451_v41 }
 0x512   : > { %2540 = vmatprep.subr.bf16.mxu1 %v15254_v20 }
 0x515   : > { %2541 = vmatpush1.bf16.msra.mxu1 %v15252_v2  ;;  %v16225_v2 = vld [vmem:[%s19202_s12] sm:$0xff] }
 0x516   : > { %2542 = vmatprep.subr.bf16.mxu1 %v15257_v4  ;;  %v16226_v4 = vld [vmem:[%s19202_s12 + $0x8] sm:$0xff] }
 0x519   : > { %2543 = vmatpush1.bf16.msra.mxu1 %v15255_v34 }
 0x51a   : > { %2581 = vmatprep.subr.bf16.mxu1 %v15260_v49 }
 0x588   : > { %v14530_v37 = vpop.f32.mrb[12].mxu1 }
 0x589   : > { %v1959_v58 = vpop.f32.mrb[13].mxu1 }
 0x593   : > { %v14537_v54 = vpop.f32.mrb[14].mxu1 }
 0x594   : > { %v2046_v40 = vpop.f32.mrb[15].mxu1 }
 0x595   : > { %v15048_v59 = vpack.i.bf16 %v14537_v54, %v2046_v40  ;;  %v17263_v40 = vsub.s32 2, %v16923_v21 }
 0x597   : > { %15049 = vrot.lane.b32.xlu1 %v15048_v59, %s16450_s16  ;;  %v17266_v59 = vsub.s32 3, %v16923_v21  ;;  %v2465_v19 = vrot.slane %v1164_v52, %v17263_v40 }
 0x599   : > { %v14544_v61 = vpop.f32.mrb[16].mxu1  ;;  %v2469_v20 = vrot.slane %v1164_v52, %v17266_v59 }
 0x59a   : > { %v2133_v62 = vpop.f32.mrb[17].mxu1 }
 0x59b   : > { %v15053_v63 = vpack.i.bf16 %v14544_v61, %v2133_v62 }
 0x59d   : > { %15054 = vrot.lane.b32.xlu0 %v15053_v63, %s19172_s15 }
 0x5db   : > { %v14551_v3 = vpop.f32.mrb[18].mxu1 }
 0x5dc   : > { %v2220_v33 = vpop.f32.mrb[19].mxu1 }
 0x5dd   : > { %v15058_v36 = vpack.i.bf16 %v14551_v3, %v2220_v33 }
 0x5df   : > { %15059 = vrot.lane.b32.xlu1 %v15058_v36, %s19171_s26  ;;  %v14558_v5 = vpop.f32.mrb[20].mxu1  ;;  %v16227_v36 = vld [vmem:[%s19202_s12 + $0x20] sm:$0xff]  ;;  %s19213_s26 = smov 32  }
 0x5e0   : > { %v2301_v46 = vpop.f32.mrb[21].mxu1 }
 0x5e1   : > { %v15063_v8 = vpack.i.bf16 %v14558_v5, %v2301_v46  ;;  %v16228_v5 = vld [vmem:[%s19202_s12 + $0x28] sm:$0xff] }
 0x5e3   : > { %15064 = vrot.lane.b32.xlu0 %v15063_v8, %s19170_s27  ;;  %v14565_v10 = vpop.f32.mrb[22].mxu1  ;;  %s19209_s27 = smov 56  }
 0x5e4   : > { %v2390_v35 = vpop.f32.mrb[23].mxu1 }
 0x5e5   : > { %v15068_v11 = vpack.i.bf16 %v14565_v10, %v2390_v35 }
 0x5e7   : > { %15069 = vrot.lane.b32.xlu1 %v15068_v11, %s16444_s21 }
 0x609   : > { %v15050_v12 = vpop.permute.xlu1 %15049 }
 0x60a   : > { %v15052_v1 = vunpack.i.h.bf16 %v15050_v12  ;;  %v15051_v0 = vunpack.i.l.bf16 %v15050_v12 }
 0x60c   : > { %v2440_v15 = vsel %vm1173_vm0, %v14530_v37, %v15052_v1  ;;  %v2439_v7 = vsel %vm1173_vm0, %v1959_v58, %v15051_v0  ;;  %v2457_v37 = vrot.slane %v1164_v52, %v16926_v22  ;;  %v2461_v58 = vrot.slane %v1164_v52, %v16930_v24 }
 0x60f   : > { %v15055_v13 = vpop.permute.xlu0 %15054 }
 0x610   : > { %v15057_v56 = vunpack.i.h.bf16 %v15055_v13  ;;  %v15056_v57 = vunpack.i.l.bf16 %v15055_v13  ;;  %v16229_v13 = vld [vmem:[%s19202_s12 + $0x10] sm:$0xff] }
 0x612   : > { %v2442_v28 = vsel %vm1748_vm2, %v2440_v15, %v15057_v56  ;;  %v2441_v29 = vsel %vm1748_vm2, %v2439_v7, %v15056_v57  ;;  %v16230_v56 = vld [vmem:[%s19202_s12 + $0x18] sm:$0xff] }
 0x613   : > { %v16232_v15 = vld [vmem:[%s19202_s12 + $0x38] sm:$0xff] }
 0x651   : > { %v15060_v14 = vpop.permute.xlu1 %15059 }
 0x652   : > { %v15062_v6 = vunpack.i.h.bf16 %v15060_v14  ;;  %v15061_v23 = vunpack.i.l.bf16 %v15060_v14 }
 0x654   : > { %v2445_v17 = vsel %vm2443_vm3, %v2442_v28, %v15062_v6  ;;  %v2444_v18 = vsel %vm2443_vm3, %v2441_v29, %v15061_v23  ;;  %v16231_v23 = vld [vmem:[%s19202_s12 + $0x30] sm:$0xff] }
 0x655   : > { %v15065_v16 = vpop.permute.xlu0 %15064 }
 0x656   : > { %v15067_v9 = vunpack.i.h.bf16 %v15065_v16  ;;  %v15066_v27 = vunpack.i.l.bf16 %v15065_v16 }
 0x658   : > { %v2448_v38 = vsel %vm2446_vm4, %v2445_v17, %v15067_v9  ;;  %v2447_v39 = vsel %vm2446_vm4, %v2444_v18, %v15066_v27  ;;  %v15267_v17 = vld [vmem:[%s16777_s22 + $0x40] sm:$0xff]  }
 0x659   : > { %v15070_v30 = vpop.permute.xlu1 %15069  ;;  %v15268_v18 = vld [vmem:[%s16777_s22 + $0xc0] sm:$0xff]  }
 0x65a   : > { %v15072_v31 = vunpack.i.h.bf16 %v15070_v30  ;;  %v15071_v32 = vunpack.i.l.bf16 %v15070_v30  ;;  %14368 = vmatprep.subr.bf16.mxu0 %v15268_v18  ;;  %v15299_v18 = vld [vmem:[%s16782_s23 + $0x40] sm:$0xff]  }
 0x65c   : > { %v2451_v44 = vsel %vm2449_vm5, %v2448_v38, %v15072_v31  ;;  %v2450_v25 = vsel %vm2449_vm5, %v2447_v39, %v15071_v32  ;;  %v15269_v31 = vld [vmem:[%s16777_s22] sm:$0xff]   ;;  %v15271_v38 = vld [vmem:[%s16777_s22 + $0x48] sm:$0xff]  }
 0x65d   : > { %v2452_v26 = vpack.c.bf16 %v2451_v44, %v2450_v25  ;;  %v15270_v32 = vld [vmem:[%s16777_s22 + $0x80] sm:$0xff]   ;;  %v15272_v39 = vld [vmem:[%s16777_s22 + $0xc8] sm:$0xff]  }
 0x65e   : > { %14369 = vmatpush3.bf16.msra.mxu0 %v15270_v32  ;;  %v3162_v32 = vld [vmem:[%s16784_s4 + $0x2d] sm:$0x3] }
 0x65f   : > { %13126 = vmatmul.mubr.msk.bf16.vlgmr.msra.gmra.mrb[24].mxu1 %vm2534_vm6, %v2452_v26  ;;  %14370 = vmatprep.subr.bf16.mxu0 %v15272_v39  ;;  %v3171_v39 = vrot.slane %v3162_v32, %v16930_v24 }
 0x660   : > { %2582 = vmatpush1.bf16.msra.mxu1 %v15258_v45  ;;  %2613 = vmatprep.mubr.bf16.mxu1 %v16451_v41 }
 0x661   : > { %2583 = vmatprep.subr.bf16.mxu1 %v15263_v47 }
 0x664   : > { %2584 = vmatpush1.bf16.msra.mxu1 %v15261_v48 }
 0x665   : > { %2585 = vmatprep.subr.bf16.mxu1 %v15266_v50 }
 0x668   : > { %2586 = vmatpush1.bf16.msra.mxu1 %v15264_v51 }
 0x669   : > { %14346 = vmatprep.subr.bf16.mxu1 %v15267_v17  ;;  %v15298_v17 = vld [vmem:[%s16777_s22 + $0xb8] sm:$0xff]  }
 0x66b   : > { %13127 = vmatmul.mubr.msk.bf16.vlgmr.msra.gmra.mrb[28].mxu1 %vm2534_vm6, %v2452_v26 }
 0x66c   : > { %14347 = vmatpush3.bf16.msra.mxu1 %v15269_v31  ;;  %v15300_v31 = vld [vmem:[%s16782_s23 + $0xc0] sm:$0xff]  }
 0x66d   : > { %14348 = vmatprep.subr.bf16.mxu1 %v15271_v38  ;;  %v3167_v38 = vrot.slane %v3162_v32, %v16926_v22  ;;  %v15304_v32 = vld [vmem:[%s16782_s23 + $0xc8] sm:$0xff]  }
 0x732   : > { %v2572_v53 = vpop.f32.mrb[24].mxu1 }
 0x733   : > { %v2574_v55 = vpop.f32.mrb[25].mxu1  ;;  %v2573_v61 = vadd.f32 %v2572_v53, %v2457_v37 }
 0x734   : > { %v2576_v43 = vpop.f32.mrb[26].mxu1  ;;  %v2575_v62 = vadd.f32 %v2574_v55, %v2461_v58 }
 0x735   : > { %v2578_v54 = vpop.f32.mrb[27].mxu1  ;;  %v2577_v63 = vadd.f32 %v2576_v43, %v2457_v37  ;;  %v2624_v3 = vadd.f32 %v16225_v2, %v2573_v61 }
 0x736   : > { %v2579_v60 = vadd.f32 %v2578_v54, %v2461_v58  ;;  %v2625_v33 = vadd.f32 %v16226_v4, %v2575_v62 }
 0x737   : > { %v2628_v49 = vadd.f32 %v16227_v36, %v2577_v63  ;;  %v15273_v36 = vld [vmem:[%s16777_s22 + $0x8] sm:$0xff]  }
 0x738   : > { %v2629_v46 = vadd.f32 %v16228_v5, %v2579_v60  ;;  %v2632_v12 = vadd.f32 %v2625_v33, %v2624_v3  ;;  %14349 = vmatpush3.bf16.msra.mxu1 %v15273_v36  ;;  %v15275_v5 = vld [vmem:[%s16777_s22 + $0x50] sm:$0xff]  }
 0x739   : > { %14350 = vmatprep.subr.bf16.mxu1 %v15275_v5 }
 0x73a   : > { %v2637_v6 = vadd.f32 %v2629_v46, %v2628_v49 }
 0x73e   : > { %v2615_v34 = vpop.f32.mrb[28].mxu1 }
 0x73f   : > { %v2616_v8 = vadd.f32 %v2615_v34, %v2465_v19  ;;  %v2617_v10 = vpop.f32.mrb[29].mxu1 }
 0x740   : > { %v2618_v35 = vadd.f32 %v2617_v10, %v2469_v20  ;;  %v2619_v11 = vpop.f32.mrb[30].mxu1  ;;  %v15278_v10 = vld [vmem:[%s16777_s22 + $0x90] sm:$0xff]  }
 0x741   : > { %v2626_v14 = vadd.f32 %v16229_v13, %v2616_v8  ;;  %v2620_v1 = vadd.f32 %v2619_v11, %v2465_v19  ;;  %v2621_v0 = vpop.f32.mrb[31].mxu1  ;;  %v15277_v8 = vld [vmem:[%s16777_s22 + $0x10] sm:$0xff]   ;;  %v15280_v11 = vld [vmem:[%s16777_s22 + $0xd8] sm:$0xff]  }
 0x742   : > { %v2627_v57 = vadd.f32 %v16230_v56, %v2618_v35  ;;  %v2622_v16 = vadd.f32 %v2621_v0, %v2469_v20  ;;  %14351 = vmatpush3.bf16.msra.mxu1 %v15277_v8  ;;  %v15279_v35 = vld [vmem:[%s16777_s22 + $0x58] sm:$0xff]   ;;  %v15285_v0 = vld [vmem:[%s16777_s22 + $0x20] sm:$0xff]  }
 0x743   : > { %v2630_v9 = vadd.f32 %v16231_v23, %v2620_v1  ;;  %v2633_v27 = vadd.f32 %v2632_v12, %v2626_v14  ;;  %v15281_v12 = vld [vmem:[%s16777_s22 + $0x18] sm:$0xff]   ;;  %14352 = vmatprep.subr.bf16.mxu1 %v15279_v35  ;;  %v15284_v1 = vld [vmem:[%s16777_s22 + $0xe0] sm:$0xff]   ;;  %v15290_v23 = vld [vmem:[%s16777_s22 + $0xa8] sm:$0xff]  }
 0x744   : > { %v2631_v7 = vadd.f32 %v16232_v15, %v2622_v16  ;;  %v15282_v13 = vld [vmem:[%s16777_s22 + $0x98] sm:$0xff]   ;;  %v15286_v56 = vld [vmem:[%s16777_s22 + $0xa0] sm:$0xff]   ;;  %v15288_v16 = vld [vmem:[%s16777_s22 + $0xe8] sm:$0xff]  }
 0x745   : > { %v2634_v28 = vadd.f32 %v2633_v27, %v2627_v57  ;;  %v2638_v29 = vadd.f32 %v2637_v6, %v2630_v9  ;;  %v15289_v6 = vld [vmem:[%s16777_s22 + $0x28] sm:$0xff]   ;;  %v15292_v27 = vld [vmem:[%s16777_s22 + $0xf0] sm:$0xff]  }
 0x746   : > { %14353 = vmatpush3.bf16.msra.mxu1 %v15281_v12  ;;  %v15293_v15 = vld [vmem:[%s16777_s22 + $0x30] sm:$0xff]  }
 0x747   : > { %2635 = vadd.xlane.f32.xlu0 %v2634_v28  ;;  %v2639_v30 = vadd.f32 %v2638_v29, %v2631_v7  ;;  %v15295_v28 = vld [vmem:[%s16777_s22 + $0x78] sm:$0xff]  }
 0x748   : > { %v15296_v29 = vld [vmem:[%s16777_s22 + $0xf8] sm:$0xff]  }
 0x749   : > { %2640 = vadd.xlane.f32.xlu1 %v2639_v30  ;;  %v15297_v30 = vld [vmem:[%s16777_s22 + $0x38] sm:$0xff]  }
 0x75a   : > { %3364 = vrot.lane.b32.xlu1 %v3167_v38, %s16436_s24 }
 0x7d4   : > { %v2636_v44 = vpop.xlane.xlu0 %2635 }
 0x7d5   : > { %v2643_v25 = vmul.f32 0.001953125, %v2636_v44  ;;  %v13128_v44 = vld [vmem:[%s16784_s4 + $0x2d] ss:$0 sm:$0xff] }
 0x7d6   : > { %v2641_v45 = vpop.xlane.xlu1 %2640  ;;  %3009 = vrot.lane.b32.xlu1 %v13128_v44, %s16441_s9  ;;  %v15305_v44 = vld [vmem:[%s16782_s23 + $0x8] sm:$0xff]  }
 0x7d7   : > { %v17300_v26 = vsub.f32 %v2624_v3, %v2643_v25  ;;  %v17302_v47 = vsub.f32 %v2625_v33, %v2643_v25  ;;  %v2644_v48 = vmul.f32 0.001953125, %v2641_v45  ;;  %v17304_v50 = vsub.f32 %v2626_v14, %v2643_v25  ;;  %v15283_v14 = vld [vmem:[%s16777_s22 + $0x60] sm:$0xff]  }
 0x7d8   : > { %v17306_v51 = vsub.f32 %v2627_v57, %v2643_v25  ;;  %14354 = vmatprep.subr.bf16.mxu1 %v15283_v14  ;;  %v15287_v57 = vld [vmem:[%s16777_s22 + $0x68] sm:$0xff]  }
 0x7d9   : > { %v17308_v52 = vsub.f32 %v2628_v49, %v2644_v48  ;;  %v17310_v53 = vsub.f32 %v2629_v46, %v2644_v48  ;;  %v2653_v55 = vmul.f32 %v17300_v26, %v17300_v26  ;;  %v2654_v43 = vmul.f32 %v17302_v47, %v17302_v47  ;;  %v15274_v49 = vld [vmem:[%s16777_s22 + $0x88] sm:$0xff]   ;;  %v15276_v46 = vld [vmem:[%s16777_s22 + $0xd0] sm:$0xff]   ;;  %14355 = vmatpush3.bf16.msra.mxu1 %v15285_v0 }
 0x7da   : > { %v17316_v37 = vsub.f32 %v2630_v9, %v2644_v48  ;;  %v2655_v58 = vmul.f32 %v17304_v50, %v17304_v50  ;;  %v2656_v63 = vmul.f32 %v17306_v51, %v17306_v51  ;;  %v17326_v19 = vsub.f32 %v2631_v7, %v2644_v48  ;;  %14371 = vmatpush3.bf16.msra.mxu0 %v15274_v49  ;;  %v15291_v9 = vld [vmem:[%s16777_s22 + $0x70] sm:$0xff]  }
 0x7db   : > { %v2661_v54 = vadd.f32 %v2654_v43, %v2653_v55  ;;  %v2657_v61 = vmul.f32 %v17308_v52, %v17308_v52  ;;  %v2658_v62 = vmul.f32 %v17310_v53, %v17310_v53  ;;  %14372 = vmatprep.subr.bf16.mxu0 %v15276_v46  ;;  %14356 = vmatprep.subr.bf16.mxu1 %v15287_v57  ;;  %v15294_v7 = vld [vmem:[%s16777_s22 + $0xb0] sm:$0xff]  }
 0x7dc   : > { %v2659_v20 = vmul.f32 %v17316_v37, %v17316_v37  ;;  %v2660_v33 = vmul.f32 %v17326_v19, %v17326_v19 }
 0x7dd   : > { %v2662_v60 = vadd.f32 %v2661_v54, %v2655_v58  ;;  %v2666_v2 = vadd.f32 %v2658_v62, %v2657_v61  ;;  %14357 = vmatpush3.bf16.msra.mxu1 %v15289_v6  ;;  %v1165_v54 = vld [vmem:[%s16784_s4 + $0x14] sm:$0xf]  ;;  %v1166_v62 = vld [vmem:[%s16784_s4 + $0x18] sm:$0xf] }
 0x7de   : > { %14373 = vmatpush3.bf16.msra.mxu0 %v15278_v10  ;;  %14358 = vmatprep.subr.bf16.mxu1 %v15291_v9  ;;  %v2722_v49 = vrot.slane %v1166_v62, %v16930_v24  ;;  %v2730_v5 = vrot.slane %v1166_v62, %v17266_v59  ;;  %v2726_v46 = vrot.slane %v1166_v62, %v17263_v40  ;;  %v638_v9 = vld [vmem:[%s19206_s1 + $0x28] sm:$0xff] }
 0x7df   : > { %v2663_v3 = vadd.f32 %v2662_v60, %v2656_v63  ;;  %v2667_v4 = vadd.f32 %v2666_v2, %v2659_v20  ;;  %14374 = vmatprep.subr.bf16.mxu0 %v15280_v11  ;;  %v2693_v60 = vrot.slane %v1165_v54, %v16930_v24  ;;  %v2701_v2 = vrot.slane %v1165_v54, %v17266_v59 }
 0x7e1   : > { %2664 = vadd.xlane.f32.xlu0 %v2663_v3  ;;  %v2668_v34 = vadd.f32 %v2667_v4, %v2660_v33  ;;  %14359 = vmatpush3.bf16.msra.mxu1 %v15293_v15  ;;  %v2689_v4 = vrot.slane %v1165_v54, %v16926_v22  ;;  %v640_v15 = vld [vmem:[%s19206_s1 + $0x38] sm:$0xff] }
 0x7e2   : > { %14375 = vmatpush3.bf16.msra.mxu0 %v15282_v13  ;;  %14360 = vmatprep.subr.bf16.mxu1 %v15295_v28 }
 0x7e3   : > { %14376 = vmatprep.subr.bf16.mxu0 %v15284_v1 }
 0x7e5   : > { %2669 = vadd.xlane.f32.xlu0 %v2668_v34  ;;  %14361 = vmatpush3.bf16.msra.mxu1 %v15297_v30  ;;  %v2697_v34 = vrot.slane %v1165_v54, %v17263_v40  ;;  %v15302_v30 = vld [vmem:[%s16782_s23 + $0x80] sm:$0xff]   ;;  %v15312_v54 = vld [vmem:[%s16782_s23 + $0xd8] sm:$0xff]  }
 0x7e6   : > { %14377 = vmatpush3.bf16.msra.mxu0 %v15286_v56  ;;  %14390 = vmatprep.subr.bf16.mxu1 %v15299_v18 }
 0x7e7   : > { %14378 = vmatprep.subr.bf16.mxu0 %v15288_v16 }
 0x7ea   : > { %14379 = vmatpush3.bf16.msra.mxu0 %v15290_v23 }
 0x7eb   : > { %14380 = vmatprep.subr.bf16.mxu0 %v15292_v27  ;;  %v636_v27 = vld [vmem:[%s19206_s1 + $0x18] sm:$0xff] }
 0x7ee   : > { %14381 = vmatpush3.bf16.msra.mxu0 %v15294_v7 }
 0x7ef   : > { %14382 = vmatprep.subr.bf16.mxu0 %v15296_v29  ;;  %v15301_v29 = vld [vmem:[%s16782_s23] sm:$0xff]  }
 0x7f2   : > { %14383 = vmatpush3.bf16.msra.mxu0 %v15298_v17 }
 0x7f3   : > { %14412 = vmatprep.subr.bf16.mxu0 %v15300_v31  ;;  %v15303_v31 = vld [vmem:[%s16782_s23 + $0x48] sm:$0xff]  }
 0x7fb   : > { %3366 = vrot.lane.b32.xlu0 %v3171_v39, %s16436_s24  ;;  %v3097_v39 = vpack.c.bf16 %v640_v15, %v636_v27 }
 0x86e   : > { %v2665_v25 = vpop.xlane.xlu0 %2664 }
 0x86f   : > { %v2671_v45 = vmul.f32 0.001953125, %v2665_v25  ;;  %v15306_v25 = vld [vmem:[%s16782_s23 + $0x88] sm:$0xff]  }
 0x871   : > { %v2673_v48 = vadd.f32 1e-05, %v2671_v45  ;;  %v15307_v45 = vld [vmem:[%s16782_s23 + $0x50] sm:$0xff]  }
 0x872   : > { %v2670_v55 = vpop.xlane.xlu0 %2669 }
 0x873   : > { %16165 = vrsqrt.f32 %v2673_v48  ;;  %v2672_v43 = vmul.f32 0.001953125, %v2670_v55  ;;  %v15308_v48 = vld [vmem:[%s16782_s23 + $0xd0] sm:$0xff]  }
 0x874   : > { %v15309_v55 = vld [vmem:[%s16782_s23 + $0x10] sm:$0xff]  }
 0x875   : > { %v2674_v58 = vadd.f32 1e-05, %v2672_v43  ;;  %v15310_v43 = vld [vmem:[%s16782_s23 + $0x90] sm:$0xff]  }
 0x877   : > { %16167 = vrsqrt.f32 %v2674_v58  ;;  %v15311_v58 = vld [vmem:[%s16782_s23 + $0x58] sm:$0xff]  }
 0x87d   : > { %v16166_v61 = vpop.eup %16165 }
 0x87e   : > { %v2678_v63 = vmul.f32 %v16166_v61, %v17302_v47  ;;  %v2680_v20 = vmul.f32 %v16166_v61, %v17306_v51  ;;  %v2677_v3 = vmul.f32 %v16166_v61, %v17300_v26  ;;  %v2679_v33 = vmul.f32 %v16166_v61, %v17304_v50  ;;  %v15313_v61 = vld [vmem:[%s16782_s23 + $0x18] sm:$0xff]  }
 0x87f   : > { %v2718_v47 = vrot.slane %v1166_v62, %v16926_v22  ;;  %v15314_v62 = vld [vmem:[%s16782_s23 + $0x98] sm:$0xff]  }
 0x880   : > { %v2707_v8 = vmul.f32 %v2693_v60, %v2678_v63  ;;  %v2709_v10 = vmul.f32 %v2701_v2, %v2680_v20  ;;  %v2706_v50 = vmul.f32 %v2689_v4, %v2677_v3  ;;  %v2708_v12 = vmul.f32 %v2697_v34, %v2679_v33  ;;  %v15315_v63 = vld [vmem:[%s16782_s23 + $0x60] sm:$0xff]   ;;  %v15319_v3 = vld [vmem:[%s16782_s23 + $0x68] sm:$0xff]  }
 0x881   : > { %v16168_v36 = vpop.eup %16167  ;;  %v15317_v20 = vld [vmem:[%s16782_s23 + $0x20] sm:$0xff]   ;;  %v15321_v33 = vld [vmem:[%s16782_s23 + $0x28] sm:$0xff]  }
 0x882   : > { %v2682_v51 = vmul.f32 %v16168_v36, %v17310_v53  ;;  %v2684_v26 = vmul.f32 %v16168_v36, %v17326_v19  ;;  %v2681_v35 = vmul.f32 %v16168_v36, %v17308_v52  ;;  %v2683_v11 = vmul.f32 %v16168_v36, %v17316_v37  ;;  %v634_v52 = vld [vmem:[%s19206_s1 + $0x8] sm:$0xff]  ;;  %v15323_v36 = vld [vmem:[%s16782_s23 + $0x70] sm:$0xff]  }
 0x883   : > { %v17385_v56 = vadd.f32 %v2722_v49, %v2707_v8  ;;  %v17389_v53 = vadd.f32 %v2730_v5, %v2709_v10  ;;  %v17396_v37 = vadd.f32 %v2718_v47, %v2706_v50  ;;  %v17400_v6 = vadd.f32 %v2726_v46, %v2708_v12  ;;  %v15329_v8 = vld [vmem:[%s16782_s23 + $0x38] sm:$0xff]   ;;  %v633_v10 = vld [vmem:[%s19206_s1] sm:$0xff]  ;;  %v635_v50 = vld [vmem:[%s19206_s1 + $0x10] sm:$0xff] }
 0x884   : > { %v2711_v13 = vmul.f32 %v2693_v60, %v2682_v51  ;;  %v2713_v14 = vmul.f32 %v2701_v2, %v2684_v26  ;;  %v2710_v1 = vmul.f32 %v2689_v4, %v2681_v35  ;;  %v2712_v0 = vmul.f32 %v2697_v34, %v2683_v11  ;;  %v15316_v60 = vld [vmem:[%s16782_s23 + $0xe0] sm:$0xff]   ;;  %v15320_v4 = vld [vmem:[%s16782_s23 + $0xe8] sm:$0xff]   ;;  %v15328_v51 = vld [vmem:[%s16782_s23 + $0xf8] sm:$0xff]  }
 0x885   : > { %v3095_v38 = vpack.c.bf16 %v638_v9, %v634_v52  ;;  %v15318_v2 = vld [vmem:[%s16782_s23 + $0xa0] sm:$0xff]   ;;  %v15322_v34 = vld [vmem:[%s16782_s23 + $0xa8] sm:$0xff]   ;;  %v15330_v26 = vld [vmem:[%s16782_s23 + $0xb8] sm:$0xff]  }
 0x886   : > { %v17387_v57 = vadd.f32 %v2722_v49, %v2711_v13  ;;  %v17391_v19 = vadd.f32 %v2730_v5, %v2713_v14  ;;  %v17398_v16 = vadd.f32 %v2718_v47, %v2710_v1  ;;  %v17402_v23 = vadd.f32 %v2726_v46, %v2712_v0  ;;  %v15324_v49 = vld [vmem:[%s16782_s23 + $0xf0] sm:$0xff]   ;;  %v15327_v46 = vld [vmem:[%s16782_s23 + $0x78] sm:$0xff]   ;;  %v637_v35 = vld [vmem:[%s19206_s1 + $0x20] sm:$0xff]  ;;  %v3365_v14 = vpop.permute.xlu1 %3364 }
 0x887   : > { %v15325_v5 = vld [vmem:[%s16782_s23 + $0x30] sm:$0xff]   ;;  %v3094_v12 = vpack.c.bf16 %v637_v35, %v633_v10 }
 0x888   : > { %v2744_v7 = vpack.c.bf16 %v17387_v57, %v17385_v56  ;;  %v2746_v28 = vpack.c.bf16 %v17391_v19, %v17389_v53  ;;  %v2743_v17 = vpack.c.bf16 %v17398_v16, %v17396_v37  ;;  %v2745_v18 = vpack.c.bf16 %v17402_v23, %v17400_v6  ;;  %v15326_v47 = vld [vmem:[%s16782_s23 + $0xb0] sm:$0xff]  }
 0x889   : > { %v639_v11 = vld [vmem:[%s19206_s1 + $0x30] sm:$0xff] }
 0x88a   : > { %3044 = vmatprep.mubr.bf16.mxu1 %v2744_v7  ;;  %3085 = vmatprep.mubr.bf16.mxu0 %v2746_v28  ;;  %v3096_v13 = vpack.c.bf16 %v639_v11, %v635_v50  ;;  %v3010_v1 = vpop.permute.xlu1 %3009 }
 0x88b   : > { %3045 = vmatmul.mubr.bf16.vlgmr.msra.gmra.mrb[32].mxu1 %v2743_v17  ;;  %3086 = vmatmul.mubr.bf16.vlgmr.msra.gmra.mrb[4].mxu0 %v2745_v18 }
 0x88c   : > { %14391 = vmatpush3.bf16.msra.mxu1 %v15301_v29  ;;  %14413 = vmatpush3.bf16.msra.mxu0 %v15302_v30 }
 0x88d   : > { %14392 = vmatprep.subr.bf16.mxu1 %v15303_v31  ;;  %14414 = vmatprep.subr.bf16.mxu0 %v15304_v32 }
 0x88e   : > { %3403 = vmatprep.mubr.bf16.mxu1 %v3095_v38  ;;  %3444 = vmatprep.mubr.bf16.mxu0 %v3097_v39 }
 0x890   : > { %14393 = vmatpush3.bf16.msra.mxu1 %v15305_v44  ;;  %14415 = vmatpush3.bf16.msra.mxu0 %v15306_v25  ;;  %v3367_v25 = vpop.permute.xlu0 %3366 }
 0x891   : > { %14394 = vmatprep.subr.bf16.mxu1 %v15307_v45  ;;  %14416 = vmatprep.subr.bf16.mxu0 %v15308_v48 }
 0x894   : > { %14395 = vmatpush3.bf16.msra.mxu1 %v15309_v55  ;;  %14417 = vmatpush3.bf16.msra.mxu0 %v15310_v43 }
 0x895   : > { %14396 = vmatprep.subr.bf16.mxu1 %v15311_v58  ;;  %14418 = vmatprep.subr.bf16.mxu0 %v15312_v54  ;;  %v3369_v58 = vsel %vm3368_vm7, %v3365_v14, %v3367_v25 }
 0x898   : > { %14397 = vmatpush3.bf16.msra.mxu1 %v15313_v61  ;;  %14419 = vmatpush3.bf16.msra.mxu0 %v15314_v62 }
 0x899   : > { %14398 = vmatprep.subr.bf16.mxu1 %v15315_v63  ;;  %14420 = vmatprep.subr.bf16.mxu0 %v15316_v60 }
 0x89c   : > { %14399 = vmatpush3.bf16.msra.mxu1 %v15317_v20  ;;  %14421 = vmatpush3.bf16.msra.mxu0 %v15318_v2 }
 0x89d   : > { %14400 = vmatprep.subr.bf16.mxu1 %v15319_v3  ;;  %14422 = vmatprep.subr.bf16.mxu0 %v15320_v4 }
 0x8a0   : > { %14401 = vmatpush3.bf16.msra.mxu1 %v15321_v33  ;;  %14423 = vmatpush3.bf16.msra.mxu0 %v15322_v34 }
 0x8a1   : > { %14402 = vmatprep.subr.bf16.mxu1 %v15323_v36  ;;  %14424 = vmatprep.subr.bf16.mxu0 %v15324_v49 }
 0x8a4   : > { %14403 = vmatpush3.bf16.msra.mxu1 %v15325_v5  ;;  %14425 = vmatpush3.bf16.msra.mxu0 %v15326_v47 }
 0x8a5   : > { %14404 = vmatprep.subr.bf16.mxu1 %v15327_v46  ;;  %14426 = vmatprep.subr.bf16.mxu0 %v15328_v51 }
 0x8a8   : > { %14405 = vmatpush3.bf16.msra.mxu1 %v15329_v8  ;;  %14427 = vmatpush3.bf16.msra.mxu0 %v15330_v26 }
 0x8ab   : > { %3404 = vmatmul.mubr.bf16.vlgmr.msra.gmra.mrb[36].mxu1 %v3094_v12  ;;  %3445 = vmatmul.mubr.bf16.vlgmr.msra.gmra.mrb[8].mxu0 %v3096_v13 }
 0x95e   : > { %v14362_v0 = vpop.f32.mrb[32].mxu1  ;;  %v14384_v52 = vpop.f32.mrb[4].mxu0 }
 0x95f   : > { %v14363_v9 = vpop.f32.mrb[33].mxu1  ;;  %v14385_v27 = vpop.f32.mrb[5].mxu0 }
 0x960   : > { %v14364_v15 = vadd.f32 %v14363_v9, %v14362_v0  ;;  %v14386_v7 = vadd.f32 %v14385_v27, %v14384_v52  ;;  %v14365_v28 = vpop.f32.mrb[34].mxu1  ;;  %v14387_v29 = vpop.f32.mrb[6].mxu0 }
 0x961   : > { %v14366_v30 = vpop.f32.mrb[35].mxu1  ;;  %v14388_v17 = vpop.f32.mrb[7].mxu0 }
 0x962   : > { %v3047_v18 = vadd.f32 %v14364_v15, %v3010_v1  ;;  %v14367_v31 = vadd.f32 %v14366_v30, %v14365_v28  ;;  %v14389_v32 = vadd.f32 %v14388_v17, %v14387_v29 }
 0x964   : > { %v3088_v38 = vadd.f32 %v14386_v7, %v3047_v18  ;;  %v3050_v39 = vadd.f32 %v14367_v31, %v3010_v1 }
 0x966   : > { %v3091_v44 = vadd.f32 %v14389_v32, %v3050_v39  ;;  %14570 = vmatprep.mubr.msk.f32.mxu1 %vm1173_vm0, %v3088_v38 }
 0x97e   : > { %v14406_v45 = vpop.f32.mrb[36].mxu1  ;;  %v14428_v48 = vpop.f32.mrb[8].mxu0 }
 0x97f   : > { %v14407_v55 = vpop.f32.mrb[37].mxu1  ;;  %v14429_v43 = vpop.f32.mrb[9].mxu0 }
 0x980   : > { %v14408_v54 = vadd.f32 %v14407_v55, %v14406_v45  ;;  %v14430_v61 = vadd.f32 %v14429_v43, %v14428_v48  ;;  %v14409_v62 = vpop.f32.mrb[38].mxu1  ;;  %v14431_v63 = vpop.f32.mrb[10].mxu0  ;;  %v13194_v45 = vld [vmem:[%s19205_s13 + $0xc8] sm:$0xff]  ;;  %v13193_v43 = vld [vmem:[%s19205_s13 + $0xc0] sm:$0xff] }
 0x981   : > { %v14410_v60 = vpop.f32.mrb[39].mxu1  ;;  %v14432_v20 = vpop.f32.mrb[11].mxu0 }
 0x982   : > { %v3406_v2 = vadd.f32 %v14408_v54, %v3369_v58  ;;  %v14411_v3 = vadd.f32 %v14410_v60, %v14409_v62  ;;  %v14433_v4 = vadd.f32 %v14432_v20, %v14431_v63  ;;  %v13205_v62 = vld [vmem:[%s19205_s13 + $0x120] sm:$0xff] }
 0x984   : > { %v3447_v33 = vadd.f32 %v14430_v61, %v3406_v2  ;;  %v3409_v34 = vadd.f32 %v14411_v3, %v3369_v58 }
 0x986   : > { %v3450_v36 = vadd.f32 %v14433_v4, %v3409_v34  ;;  %v13196_v4 = vld [vmem:[%s19205_s13 + $0xd8] sm:$0xff] }
 0x988   : > { %v17464_v49 = vpack.i.bf16 %v3450_v36, %v3447_v33  ;;  %v14710_v5 = vpack.c.bf16 %v3450_v36, %v3447_v33 }
 0x98a   : > { %15079 = vrot.lane.b32.xlu0 %v17464_v49, %s16441_s9  ;;  %15074 = vrot.lane.b32.xlu1 %v17464_v49, %s16438_s2 }
 0x98b   : > { %14712 = vmatprep.subr.msk.bf16.mxu1 %vm16971_vm1, %v14710_v5 }
 0x98c   : > { %14715 = vmatpush3.bf16.xpose.msk.msra.mxu1 %vm16971_vm1, %v14710_v5  ;;  %v13208_v5 = vld [vmem:[%s19205_s13 + $0x138] sm:$0xff] }
 0x98e   : > { %3583 = vrot.lane.b32.xlu0 %v3091_v44, %s16438_s2  ;;  %3581 = vrot.lane.b32.xlu1 %v3088_v38, %s16438_s2 }
 0x992   : > { %3672 = vrot.lane.b32.xlu0 %v3088_v38, %s16441_s9  ;;  %15084 = vrot.lane.b32.xlu1 %v17464_v49, %s16442_s17 }
 0x993   : > { %14571 = vmatmul.mubr.msk.f32.vlgmr.msra.gmra.mrb[40].mxu1 %vm1173_vm0, %v3091_v44 }
 0x996   : > { %15089 = vrot.lane.b32.xlu0 %v17464_v49, %s16445_s7  ;;  %3674 = vrot.lane.b32.xlu1 %v3091_v44, %s16441_s9  ;;  %s19207_s9 = smov 80  }
 0x99a   : > { %3763 = vrot.lane.b32.xlu0 %v3088_v38, %s16442_s17  ;;  %15094 = vrot.lane.b32.xlu1 %v17464_v49, %s16446_s20 }
 0x99e   : > { %3854 = vrot.lane.b32.xlu0 %v3088_v38, %s16445_s7  ;;  %3765 = vrot.lane.b32.xlu1 %v3091_v44, %s16442_s17  ;;  %s19208_s17 = smov 72  }
 0x9a2   : > { %3945 = vrot.lane.b32.xlu0 %v3088_v38, %s16446_s20  ;;  %3856 = vrot.lane.b32.xlu1 %v3091_v44, %s16445_s7 }
 0x9a6   : > { %3947 = vrot.lane.b32.xlu1 %v3091_v44, %s16446_s20 }
 0x9fc   : > { %v15080_v47 = vpop.permute.xlu0 %15079  ;;  %v15075_v46 = vpop.permute.xlu1 %15074 }
 0x9fd   : > { %v15082_v51 = vunpack.i.h.bf16 %v15080_v47  ;;  %v15081_v8 = vunpack.i.l.bf16 %v15080_v47  ;;  %v15077_v26 = vunpack.i.h.bf16 %v15075_v46  ;;  %v15076_v10 = vunpack.i.l.bf16 %v15075_v46 }
 0x9ff   : > { %v14716_v35 = vpack.c.bf16 %v15077_v26, %v15076_v10  ;;  %v14722_v12 = vpack.c.bf16 %v15082_v51, %v15081_v8 }
 0xa00   : > { %v3584_v50 = vpop.permute.xlu0 %3583  ;;  %v3582_v11 = vpop.permute.xlu1 %3581 }
 0xa01   : > { %14718 = vmatprep.subr.msk.bf16.mxu1 %vm16971_vm1, %v14716_v35  ;;  %14577 = vmatprep.mubr.msk.f32.mxu1 %vm1173_vm0, %v3582_v11  ;;  %v13202_v11 = vld [vmem:[%s19205_s13 + $0x108] sm:$0xff] }
 0xa02   : > { %14721 = vmatpush3.bf16.xpose.msk.msra.mxu1 %vm16971_vm1, %v14716_v35  ;;  %v13195_v35 = vld [vmem:[%s19205_s13 + $0xd0] sm:$0xff] }
 0xa03   : > { %14724 = vmatprep.subr.msk.bf16.mxu1 %vm16971_vm1, %v14722_v12 }
 0xa04   : > { %v3673_v13 = vpop.permute.xlu0 %3672  ;;  %v15085_v14 = vpop.permute.xlu1 %15084 }
 0xa05   : > { %v15087_v1 = vunpack.i.h.bf16 %v15085_v14  ;;  %v15086_v0 = vunpack.i.l.bf16 %v15085_v14 }
 0xa07   : > { %v14728_v27 = vpack.c.bf16 %v15087_v1, %v15086_v0  ;;  %v13201_v1 = vld [vmem:[%s19205_s13 + $0x100] sm:$0xff] }
 0xa08   : > { %v15090_v52 = vpop.permute.xlu0 %15089  ;;  %v3675_v9 = vpop.permute.xlu1 %3674 }
 0xa09   : > { %v15092_v15 = vunpack.i.h.bf16 %v15090_v52  ;;  %v15091_v7 = vunpack.i.l.bf16 %v15090_v52  ;;  %14578 = vmatmul.mubr.msk.f32.vlgmr.msra.gmra.mrb[42].mxu1 %vm1173_vm0, %v3584_v50 }
 0xa0a   : > { %14727 = vmatpush3.bf16.xpose.msk.msra.mxu1 %vm16971_vm1, %v14722_v12  ;;  %14584 = vmatprep.mubr.msk.f32.mxu1 %vm1173_vm0, %v3673_v13  ;;  %v13197_v13 = vld [vmem:[%s19205_s13 + $0xe0] sm:$0xff] }
 0xa0b   : > { %v14734_v28 = vpack.c.bf16 %v15092_v15, %v15091_v7  ;;  %14730 = vmatprep.subr.msk.bf16.mxu1 %vm16971_vm1, %v14728_v27 }
 0xa0c   : > { %v3764_v29 = vpop.permute.xlu0 %3763  ;;  %v15095_v30 = vpop.permute.xlu1 %15094 }
 0xa0d   : > { %v15097_v17 = vunpack.i.h.bf16 %v15095_v30  ;;  %v15096_v18 = vunpack.i.l.bf16 %v15095_v30  ;;  %14736 = vmatprep.subr.msk.bf16.mxu0 %vm16971_vm1, %v14734_v28 }
 0xa0e   : > { %14739 = vmatpush3.bf16.xpose.msk.msra.mxu0 %vm16971_vm1, %v14734_v28  ;;  %v13213_v28 = vld [vmem:[%s19205_s13 + $0x160] sm:$0xff] }
 0xa0f   : > { %v14740_v38 = vpack.c.bf16 %v15097_v17, %v15096_v18 }
 0xa10   : > { %v3855_v31 = vpop.permute.xlu0 %3854  ;;  %v3766_v32 = vpop.permute.xlu1 %3765 }
 0xa11   : > { %14585 = vmatmul.mubr.msk.f32.vlgmr.msra.gmra.mrb[44].mxu1 %vm1173_vm0, %v3675_v9  ;;  %14598 = vmatprep.mubr.msk.f32.mxu0 %vm1173_vm0, %v3855_v31  ;;  %v13214_v9 = vld [vmem:[%s19205_s13 + $0x168] sm:$0xff]  ;;  %v13207_v31 = vld [vmem:[%s19205_s13 + $0x130] sm:$0xff] }
 0xa12   : > { %14733 = vmatpush3.bf16.xpose.msk.msra.mxu1 %vm16971_vm1, %v14728_v27  ;;  %14591 = vmatprep.mubr.msk.f32.mxu1 %vm1173_vm0, %v3764_v29  ;;  %v13198_v29 = vld [vmem:[%s19205_s13 + $0xe8] sm:$0xff] }
 0xa13   : > { %14742 = vmatprep.subr.msk.bf16.mxu1 %vm16971_vm1, %v14740_v38 }
 0xa14   : > { %v3857_v39 = vpop.permute.xlu1 %3856  ;;  %v3946_v44 = vpop.permute.xlu0 %3945 }
 0xa15   : > { %14599 = vmatmul.mubr.msk.f32.vlgmr.msra.gmra.mrb[12].mxu0 %vm1173_vm0, %v3857_v39 }
 0xa18   : > { %v3948_v25 = vpop.permute.xlu1 %3947 }
 0xa19   : > { %14592 = vmatmul.mubr.msk.f32.vlgmr.msra.gmra.mrb[46].mxu1 %vm1173_vm0, %v3766_v32  ;;  %v13199_v32 = vld [vmem:[%s19205_s13 + $0xf0] sm:$0xff] }
 0xa1a   : > { %14745 = vmatpush3.bf16.xpose.msk.msra.mxu1 %vm16971_vm1, %v14740_v38  ;;  %14605 = vmatprep.mubr.msk.f32.mxu1 %vm1173_vm0, %v3946_v44  ;;  %v13209_v44 = vld [vmem:[%s19205_s13 + $0x140] sm:$0xff] }
 0xa21   : > { %14606 = vmatmul.mubr.msk.f32.vlgmr.msra.gmra.mrb[48].mxu1 %vm1173_vm0, %v3948_v25 }
 0xa66   : > { %v14572_v48 = vpop.f32.mrb[40].mxu1 }
 0xa67   : > { %v4037_v55 = vmul.f32 0.35355338, %v14572_v48  ;;  %v3572_v58 = vpop.f32.mrb[41].mxu1 }
 0xa68   : > { %v4036_v54 = vmul.f32 0.35355338, %v3572_v58 }
 0xa69   : > { %v4049_v61 = vmul.f32 %v13194_v45, %v4037_v55 }
 0xa6a   : > { %v4048_v63 = vmul.f32 %v13193_v43, %v4036_v54  ;;  %v13200_v54 = vld [vmem:[%s19205_s13 + $0xf8] sm:$0xff] }
 0xa6b   : > { %v17533_v60 = vadd.f32 %v13206_v42, %v4049_v61 }
 0xa6c   : > { %v17535_v20 = vadd.f32 %v13205_v62, %v4048_v63  ;;  %v13210_v63 = vld [vmem:[%s19205_s13 + $0x148] sm:$0xff] }
 0xa6d   : > { %v4075_v2 = vsel %vm1748_vm2, %v17533_v60, -inf }
 0xa6e   : > { %4076 = vmax.xlane.f32.xlu1 %v4075_v2  ;;  %v4072_v3 = vsel %vm1748_vm2, %v17535_v20, -inf  ;;  %v13211_v2 = vld [vmem:[%s19205_s13 + $0x150] sm:$0xff] }
 0xa6f   : > { %4073 = vmax.xlane.f32.xlu0 %v4072_v3 }
 0xadc   : > { %v14579_v33 = vpop.f32.mrb[42].mxu1 }
 0xadd   : > { %v4039_v34 = vmul.f32 0.35355338, %v14579_v33  ;;  %v3663_v36 = vpop.f32.mrb[43].mxu1 }
 0xade   : > { %v4038_v10 = vmul.f32 0.35355338, %v3663_v36 }
 0xadf   : > { %v4051_v47 = vmul.f32 %v13196_v4, %v4039_v34  ;;  %v13204_v34 = vld [vmem:[%s19205_s13 + $0x118] sm:$0xff] }
 0xae0   : > { %v4050_v27 = vmul.f32 %v13195_v35, %v4038_v10 }
 0xae1   : > { %v17547_v46 = vadd.f32 %v13208_v5, %v4051_v47 }
 0xae2   : > { %v17587_v58 = vadd.f32 %v13207_v31, %v4050_v27  ;;  %v13203_v27 = vld [vmem:[%s19205_s13 + $0x110] sm:$0xff] }
 0xae3   : > { %v4081_v51 = vsel %vm1748_vm2, %v17547_v46, -inf }
 0xae4   : > { %4082 = vmax.xlane.f32.xlu0 %v4081_v51  ;;  %v14586_v8 = vpop.f32.mrb[44].mxu1  ;;  %v4078_v4 = vsel %vm1748_vm2, %v17587_v58, -inf  ;;  %v13212_v51 = vld [vmem:[%s19205_s13 + $0x158] sm:$0xff] }
 0xae5   : > { %v3754_v26 = vpop.f32.mrb[45].mxu1  ;;  %v4041_v15 = vmul.f32 0.35355338, %v14586_v8 }
 0xae6   : > { %v4040_v50 = vmul.f32 0.35355338, %v3754_v26 }
 0xae7   : > { %v4053_v48 = vmul.f32 %v13198_v29, %v4041_v15 }
 0xae8   : > { %v14600_v12 = vpop.f32.mrb[12].mxu0  ;;  %v4052_v30 = vmul.f32 %v13197_v13, %v4040_v50 }
 0xae9   : > { %v4045_v14 = vmul.f32 0.35355338, %v14600_v12  ;;  %v3936_v0 = vpop.f32.mrb[13].mxu0  ;;  %v17604_v33 = vadd.f32 %v13210_v63, %v4053_v48  ;;  %v13216_v12 = vld [vmem:[%s19205_s13 + $0x178] sm:$0xff] }
 0xaea   : > { %v4044_v52 = vmul.f32 0.35355338, %v3936_v0  ;;  %v17594_v62 = vadd.f32 %v13209_v44, %v4052_v30 }
 0xaeb   : > { %v4057_v7 = vmul.f32 %v13202_v11, %v4045_v14  ;;  %v4087_v35 = vsel %vm1748_vm2, %v17604_v33, -inf }
 0xaec   : > { %v4056_v17 = vmul.f32 %v13201_v1, %v4044_v52  ;;  %v14593_v18 = vpop.f32.mrb[46].mxu1  ;;  %v4084_v5 = vsel %vm1748_vm2, %v17594_v62, -inf }
 0xaed   : > { %v3845_v38 = vpop.f32.mrb[47].mxu1  ;;  %v17578_v39 = vadd.f32 %v13214_v9, %v4057_v7  ;;  %v4043_v55 = vmul.f32 0.35355338, %v14593_v18 }
 0xaee   : > { %v4042_v25 = vmul.f32 0.35355338, %v3845_v38  ;;  %v17583_v45 = vadd.f32 %v13213_v28, %v4056_v17  ;;  %v13215_v28 = vld [vmem:[%s19205_s13 + $0x170] sm:$0xff] }
 0xaef   : > { %v4099_v43 = vsel %vm1748_vm2, %v17578_v39, -inf  ;;  %v4055_v3 = vmul.f32 %v13200_v54, %v4043_v55 }
 0xaf0   : > { %v4054_v42 = vmul.f32 %v13199_v32, %v4042_v25  ;;  %4100 = vmax.xlane.f32.xlu0 %v4099_v43  ;;  %v4096_v61 = vsel %vm1748_vm2, %v17583_v45, -inf }
 0xaf1   : > { %4097 = vmax.xlane.f32.xlu1 %v4096_v61  ;;  %v17618_v50 = vadd.f32 %v13212_v51, %v4055_v3 }
 0xaf2   : > { %v17611_v47 = vadd.f32 %v13211_v2, %v4054_v42 }
 0xaf3   : > { %v4093_v13 = vsel %vm1748_vm2, %v17618_v50, -inf }
 0xaf4   : > { %4079 = vmax.xlane.f32.xlu0 %v4078_v4  ;;  %v14607_v36 = vpop.f32.mrb[48].mxu1  ;;  %v4090_v11 = vsel %vm1748_vm2, %v17611_v47, -inf }
 0xaf5   : > { %v4047_v8 = vmul.f32 0.35355338, %v14607_v36  ;;  %4085 = vmax.xlane.f32.xlu1 %v4084_v5  ;;  %v4027_v26 = vpop.f32.mrb[49].mxu1 }
 0xaf6   : > { %v4046_v9 = vmul.f32 0.35355338, %v4027_v26 }
 0xaf7   : > { %v4059_v10 = vmul.f32 %v13204_v34, %v4047_v8 }
 0xaf8   : > { %4088 = vmax.xlane.f32.xlu0 %v4087_v35  ;;  %v4058_v7 = vmul.f32 %v13203_v27, %v4046_v9 }
 0xaf9   : > { %4091 = vmax.xlane.f32.xlu1 %v4090_v11  ;;  %v17627_v14 = vadd.f32 %v13216_v12, %v4059_v10 }
 0xafa   : > { %v17642_v29 = vadd.f32 %v13215_v28, %v4058_v7 }
 0xafb   : > { %v4105_v1 = vsel %vm1748_vm2, %v17627_v14, -inf  ;;  %v4077_v0 = vpop.xlane.xlu1 %4076 }
 0xafc   : > { %4094 = vmax.xlane.f32.xlu0 %v4093_v13  ;;  %v4109_v52 = vsub.f32 %v17533_v60, %v4077_v0  ;;  %v4102_v30 = vsel %vm1748_vm2, %v17642_v29, -inf  ;;  %v4074_v18 = vpop.xlane.xlu0 %4073 }
 0xafd   : > { %v4108_v31 = vsub.f32 %v17535_v20, %v4074_v18 }
 0xafe   : > { %v4122_v15 = vmul.f32 1.442695, %v4109_v52 }
 0xaff   : > { %v4120_v32 = vmul.f32 1.442695, %v4108_v31 }
 0xb00   : > { %4106 = vmax.xlane.f32.xlu0 %v4105_v1  ;;  %16169 = vpow2.f32 %v4122_v15 }
 0xb01   : > { %16171 = vpow2.f32 %v4120_v32 }
 0xb0a   : > { %15099 = vrot.lane.b32.xlu1 %v17464_v49, %s19207_s9  ;;  %v17646_v17 = vpop.eup %16169 }
 0xb0b   : > { %v4147_v60 = vsel %vm1748_vm2, %v17646_v17, 0.0  ;;  %v17655_v38 = vpop.eup %16171 }
 0xb0c   : > { %v4144_v44 = vsel %vm1748_vm2, %v17655_v38, 0.0 }
 0xb16   : > { %15104 = vrot.lane.b32.xlu0 %v17464_v49, %s19208_s17 }
 0xb2e   : > { %4103 = vmax.xlane.f32.xlu1 %v4102_v30 }
 0xb35   : > { %4148 = vadd.xlane.f32.xlu0 %v4147_v60 }
 0xb3f   : > { %15109 = vrot.lane.b32.xlu1 %v17464_v49, %s16436_s24  ;;  %s19210_s24 = smov 48  }
 0xb43   : > { %15114 = vrot.lane.b32.xlu1 %v17464_v49, %s19209_s27 }
 0xb67   : > { %4145 = vadd.xlane.f32.xlu1 %v4144_v44 }
 0xb71   : > { %v4083_v25 = vpop.xlane.xlu0 %4082 }
 0xb72   : > { %v4111_v48 = vsub.f32 %v17547_v46, %v4083_v25 }
 0xb74   : > { %v4126_v55 = vmul.f32 1.442695, %v4111_v48 }
 0xb76   : > { %16173 = vpow2.f32 %v4126_v55 }
 0xb7d   : > { %v4101_v43 = vpop.xlane.xlu0 %4100 }
 0xb7e   : > { %v4117_v54 = vsub.f32 %v17578_v39, %v4101_v43  ;;  %v4098_v42 = vpop.xlane.xlu1 %4097 }
 0xb7f   : > { %v4116_v63 = vsub.f32 %v17583_v45, %v4098_v42 }
 0xb80   : > { %v17661_v61 = vpop.eup %16173  ;;  %v4138_v20 = vmul.f32 1.442695, %v4117_v54 }
 0xb81   : > { %v4080_v2 = vpop.xlane.xlu0 %4079  ;;  %v4153_v3 = vsel %vm1748_vm2, %v17661_v61, 0.0  ;;  %v4136_v36 = vmul.f32 1.442695, %v4116_v63 }
 0xb82   : > { %16175 = vpow2.f32 %v4138_v20  ;;  %v4110_v4 = vsub.f32 %v17587_v58, %v4080_v2  ;;  %v4086_v34 = vpop.xlane.xlu1 %4085  ;;  %4154 = vadd.xlane.f32.xlu0 %v4153_v3 }
 0xb83   : > { %v4112_v5 = vsub.f32 %v17594_v62, %v4086_v34 }
 0xb84   : > { %v4124_v46 = vmul.f32 1.442695, %v4110_v4 }
 0xb85   : > { %v4089_v39 = vpop.xlane.xlu0 %4088  ;;  %v4128_v45 = vmul.f32 1.442695, %v4112_v5 }
 0xb86   : > { %16177 = vpow2.f32 %v4124_v46  ;;  %v4113_v51 = vsub.f32 %v17604_v33, %v4089_v39  ;;  %v4092_v8 = vpop.xlane.xlu1 %4091 }
 0xb87   : > { %16179 = vpow2.f32 %v4136_v36  ;;  %v4114_v10 = vsub.f32 %v17611_v47, %v4092_v8 }
 0xb88   : > { %v4130_v26 = vmul.f32 1.442695, %v4113_v51 }
 0xb89   : > { %v4095_v35 = vpop.xlane.xlu0 %4094  ;;  %v4132_v0 = vmul.f32 1.442695, %v4114_v10 }
 0xb8a   : > { %16181 = vpow2.f32 %v4130_v26  ;;  %v4115_v58 = vsub.f32 %v17618_v50, %v4095_v35  ;;  %v15100_v11 = vpop.permute.xlu1 %15099 }
 0xb8b   : > { %v15102_v12 = vunpack.i.h.bf16 %v15100_v11  ;;  %v15101_v13 = vunpack.i.l.bf16 %v15100_v11  ;;  %16183 = vpow2.f32 %v4128_v45 }
 0xb8c   : > { %v17671_v1 = vpop.eup %16175  ;;  %v4134_v62 = vmul.f32 1.442695, %v4115_v58 }
 0xb8d   : > { %v14746_v52 = vpack.c.bf16 %v15102_v12, %v15101_v13  ;;  %v4107_v33 = vpop.xlane.xlu0 %4106  ;;  %v4171_v9 = vsel %vm1748_vm2, %v17671_v1, 0.0 }
 0xb8e   : > { %16185 = vpow2.f32 %v4134_v62  ;;  %v4119_v47 = vsub.f32 %v17627_v14, %v4107_v33  ;;  %4172 = vadd.xlane.f32.xlu0 %v4171_v9 }
 0xb8f   : > { %14747 = vmatprep.subr.bf16.mxu0 %v14746_v52  ;;  %16187 = vpow2.f32 %v4132_v0 }
 0xb90   : > { %v17676_v27 = vpop.eup %16177  ;;  %v4142_v50 = vmul.f32 1.442695, %v4119_v47  ;;  %14749 = vmatpush3.bf16.msra.mxu0 %v14746_v52 }
 0xb91   : > { %v15105_v15 = vpop.permute.xlu0 %15104  ;;  %v4150_v7 = vsel %vm1748_vm2, %v17676_v27, 0.0  ;;  %v17680_v60 = vpop.eup %16179 }
 0xb92   : > { %16189 = vpow2.f32 %v4142_v50  ;;  %v15107_v28 = vunpack.i.h.bf16 %v15105_v15  ;;  %v15106_v30 = vunpack.i.l.bf16 %v15105_v15  ;;  %4151 = vadd.xlane.f32.xlu1 %v4150_v7  ;;  %v4168_v32 = vsel %vm1748_vm2, %v17680_v60, 0.0 }
 0xb94   : > { %v17682_v18 = vpop.eup %16181  ;;  %v14750_v14 = vpack.c.bf16 %v15107_v28, %v15106_v30 }
 0xb95   : > { %v4159_v31 = vsel %vm1748_vm2, %v17682_v18, 0.0  ;;  %v17688_v44 = vpop.eup %16183 }
 0xb96   : > { %4160 = vadd.xlane.f32.xlu0 %v4159_v31  ;;  %14751 = vmatprep.subr.bf16.mxu1 %v14750_v14  ;;  %v4156_v55 = vsel %vm1748_vm2, %v17688_v44, 0.0 }
 0xb97   : > { %4169 = vadd.xlane.f32.xlu1 %v4168_v32  ;;  %14753 = vmatpush3.bf16.msra.mxu1 %v14750_v14 }
 0xb98   : > { %v17690_v25 = vpop.eup %16185 }
 0xb99   : > { %v4165_v48 = vsel %vm1748_vm2, %v17690_v25, 0.0  ;;  %v17696_v43 = vpop.eup %16187 }
 0xb9a   : > { %4166 = vadd.xlane.f32.xlu0 %v4165_v48  ;;  %v4162_v20 = vsel %vm1748_vm2, %v17696_v43, 0.0 }
 0xb9b   : > { %4157 = vadd.xlane.f32.xlu1 %v4156_v55 }
 0xb9c   : > { %v17698_v54 = vpop.eup %16189 }
 0xb9d   : > { %v4177_v42 = vsel %vm1748_vm2, %v17698_v54, 0.0 }
 0xb9e   : > { %4178 = vadd.xlane.f32.xlu0 %v4177_v42 }
 0xb9f   : > { %4163 = vadd.xlane.f32.xlu1 %v4162_v20 }
 0xbb4   : > { %15119 = vrot.lane.b32.xlu0 %v17464_v49, %s19210_s24 }
 0xbbb   : > { %v4104_v63 = vpop.xlane.xlu1 %4103 }
 0xbbc   : > { %v4118_v2 = vsub.f32 %v17642_v29, %v4104_v63 }
 0xbbe   : > { %v4140_v3 = vmul.f32 1.442695, %v4118_v2 }
 0xbbf   : > { %v15110_v4 = vpop.permute.xlu1 %15109 }
 0xbc0   : > { %16191 = vpow2.f32 %v4140_v3  ;;  %v15112_v34 = vunpack.i.h.bf16 %v15110_v4  ;;  %v15111_v46 = vunpack.i.l.bf16 %v15110_v4 }
 0xbc2   : > { %v14754_v36 = vpack.c.bf16 %v15112_v34, %v15111_v46  ;;  %v4149_v29 = vpop.xlane.xlu0 %4148 }
 0xbc3   : > { %v15115_v5 = vpop.permute.xlu1 %15114  ;;  %16193 = vrcp.f32 %v4149_v29 }
 0xbc4   : > { %v15117_v39 = vunpack.i.h.bf16 %v15115_v5  ;;  %v15116_v51 = vunpack.i.l.bf16 %v15115_v5  ;;  %14755 = vmatprep.subr.bf16.mxu0 %v14754_v36 }
 0xbc6   : > { %v14758_v8 = vpack.c.bf16 %v15117_v39, %v15116_v51 }
 0xbc8   : > { %14759 = vmatprep.subr.bf16.mxu1 %v14758_v8 }
 0xbca   : > { %v17707_v26 = vpop.eup %16191 }
 0xbcb   : > { %v4174_v45 = vsel %vm1748_vm2, %v17707_v26, 0.0 }
 0xbcc   : > { %4175 = vadd.xlane.f32.xlu1 %v4174_v45 }
 0xbcd   : > { %v16194_v35 = vpop.eup %16193 }
 0xbce   : > { %v4183_v12 = vmul.f32 %v16194_v35, %v17646_v17  ;;  %v15334_v35 = vld [vmem:[%s16753_s25 + $0x8] ss:$16 sps:$4 sm:$0xff]  }
 0xbdd   : > { %15124 = vrot.lane.b32.xlu1 %v17464_v49, %s16444_s21 }
 0xbf4   : > { %v4146_v10 = vpop.xlane.xlu1 %4145 }
 0xbf5   : > { %16195 = vrcp.f32 %v4146_v10  ;;  %v15331_v10 = vld [vmem:[%s16753_s25] ss:$16 sps:$4 sm:$0xff]  }
 0xbff   : > { %v16196_v58 = vpop.eup %16195 }
 0xc00   : > { %v4181_v11 = vmul.f32 %v16196_v58, %v17655_v38  ;;  %v15339_v58 = vld [vmem:[%s16753_s25 + $0x24] ss:$16 sps:$4 sm:$0xff]  }
 0xc02   : > { %14612 = vmatprep.mubr.msk.f32.mxu0 %vm1748_vm2, %v4181_v11 }
 0xc03   : > { %14613 = vmatmul.mubr.msk.f32.vlgmr.msra.gmra.mrb[14].mxu0 %vm1748_vm2, %v4183_v12  ;;  %v15342_v12 = vld [vmem:[%s16753_s25 + $0x2c] ss:$16 sps:$4 sm:$0xff]  }
 0xc04   : > { %14757 = vmatpush3.bf16.msra.mxu0 %v14754_v36 }
 0xc0f   : > { %v4155_v13 = vpop.xlane.xlu0 %4154 }
 0xc10   : > { %16197 = vrcp.f32 %v4155_v13 }
 0xc1a   : > { %v16198_v47 = vpop.eup %16197 }
 0xc1b   : > { %v4173_v62 = vpop.xlane.xlu0 %4172  ;;  %v4187_v15 = vmul.f32 %v16198_v47, %v17661_v61 }
 0xc1f   : > { %v4152_v0 = vpop.xlane.xlu1 %4151 }
 0xc20   : > { %16199 = vrcp.f32 %v4152_v0  ;;  %v15340_v0 = vld [vmem:[%s16753_s25 + $0x28] ss:$16 sps:$4 sm:$0xff]  }
 0xc23   : > { %v4161_v49 = vpop.xlane.xlu0 %4160 }
 0xc24   : > { %v4170_v52 = vpop.xlane.xlu1 %4169  ;;  %16201 = vrcp.f32 %v4161_v49 }
 0xc25   : > { %16203 = vrcp.f32 %v4170_v52 }
 0xc27   : > { %v4167_v33 = vpop.xlane.xlu0 %4166 }
 0xc28   : > { %v4158_v9 = vpop.xlane.xlu1 %4157 }
 0xc29   : > { %16205 = vrcp.f32 %v4158_v9 }
 0xc2a   : > { %v16200_v38 = vpop.eup %16199  ;;  %16207 = vrcp.f32 %v4173_v62 }
 0xc2b   : > { %v4179_v17 = vpop.xlane.xlu0 %4178  ;;  %v4185_v50 = vmul.f32 %v16200_v38, %v17676_v27  ;;  %16209 = vrcp.f32 %v4167_v33 }
 0xc2c   : > { %v4164_v7 = vpop.xlane.xlu1 %4163 }
 0xc2d   : > { %16211 = vrcp.f32 %v4164_v7  ;;  %14619 = vmatprep.mubr.msk.f32.mxu1 %vm1748_vm2, %v4185_v50  ;;  %v15348_v50 = vld [vmem:[%s16753_s25 + $0x4c] ss:$16 sps:$4 sm:$0xff]   ;;  %v15346_v7 = vld [vmem:[%s16753_s25 + $0x48] ss:$16 sps:$4 sm:$0xff]  }
 0xc2e   : > { %14620 = vmatmul.mubr.msk.f32.vlgmr.msra.gmra.mrb[50].mxu1 %vm1748_vm2, %v4187_v15  ;;  %v16202_v31 = vpop.eup %16201  ;;  %16213 = vrcp.f32 %v4179_v17  ;;  %v15345_v17 = vld [vmem:[%s16753_s25 + $0x44] ss:$16 sps:$4 sm:$0xff]   ;;  %v15343_v15 = vld [vmem:[%s16753_s25 + $0x40] ss:$16 sps:$4 sm:$0xff]  }
 0xc2f   : > { %14761 = vmatpush3.bf16.msra.mxu1 %v14758_v8  ;;  %v15120_v28 = vpop.permute.xlu0 %15119  ;;  %v16204_v32 = vpop.eup %16203  ;;  %v4191_v61 = vmul.f32 %v16202_v31, %v17682_v18 }
 0xc30   : > { %v15122_v30 = vunpack.i.h.bf16 %v15120_v28  ;;  %v15121_v14 = vunpack.i.l.bf16 %v15120_v28  ;;  %v4197_v63 = vmul.f32 %v16204_v32, %v17680_v60 }
 0xc32   : > { %v14762_v48 = vpack.c.bf16 %v15122_v30, %v15121_v14 }
 0xc33   : > { %v16206_v55 = vpop.eup %16205 }
 0xc34   : > { %14763 = vmatprep.subr.bf16.mxu0 %v14762_v48  ;;  %v4189_v27 = vmul.f32 %v16206_v55, %v17688_v44  ;;  %v16208_v42 = vpop.eup %16207 }
 0xc35   : > { %v16210_v20 = vpop.eup %16209  ;;  %v4199_v4 = vmul.f32 %v16208_v42, %v17671_v1 }
 0xc36   : > { %14626 = vmatprep.mubr.msk.f32.mxu0 %vm1748_vm2, %v4189_v27  ;;  %v4195_v44 = vmul.f32 %v16210_v20, %v17690_v25 }
 0xc37   : > { %v16212_v2 = vpop.eup %16211  ;;  %14627 = vmatmul.mubr.msk.f32.vlgmr.msra.gmra.mrb[16].mxu0 %vm1748_vm2, %v4191_v61 }
 0xc38   : > { %14765 = vmatpush3.bf16.msra.mxu0 %v14762_v48  ;;  %14640 = vmatprep.mubr.msk.f32.mxu0 %vm1748_vm2, %v4197_v63  ;;  %v4193_v3 = vmul.f32 %v16212_v2, %v17696_v43  ;;  %v16214_v1 = vpop.eup %16213 }
 0xc39   : > { %v4203_v5 = vmul.f32 %v16214_v1, %v17698_v54  ;;  %v15336_v54 = vld [vmem:[%s16753_s25 + $0xc] ss:$16 sps:$4 sm:$0xff]  }
 0xc3a   : > { %14633 = vmatprep.mubr.msk.f32.mxu1 %vm1748_vm2, %v4193_v3 }
 0xc3b   : > { %14634 = vmatmul.mubr.msk.f32.vlgmr.msra.gmra.mrb[52].mxu1 %vm1748_vm2, %v4195_v44  ;;  %14641 = vmatmul.mubr.msk.f32.vlgmr.msra.gmra.mrb[18].mxu0 %vm1748_vm2, %v4199_v4 }
 0xc3c   : > { %4893 = vmatprep.mubr.bf16.mxu0 %v16451_v41 }
 0xc59   : > { %v4176_v60 = vpop.xlane.xlu1 %4175 }
 0xc5a   : > { %16215 = vrcp.f32 %v4176_v60 }
 0xc5d   : > { %v15125_v18 = vpop.permute.xlu1 %15124 }
 0xc5e   : > { %v15127_v34 = vunpack.i.h.bf16 %v15125_v18  ;;  %v15126_v46 = vunpack.i.l.bf16 %v15125_v18 }
 0xc60   : > { %v14766_v36 = vpack.c.bf16 %v15127_v34, %v15126_v46 }
 0xc62   : > { %14767 = vmatprep.subr.bf16.mxu1 %v14766_v36 }
 0xc63   : > { %14769 = vmatpush3.bf16.msra.mxu1 %v14766_v36 }
 0xc64   : > { %v16216_v25 = vpop.eup %16215  ;;  %4904 = vmatprep.subr.bf16.mxu1 %v15336_v54 }
 0xc65   : > { %v4201_v43 = vmul.f32 %v16216_v25, %v17707_v26  ;;  %v15333_v26 = vld [vmem:[%s16753_s25 + $0x4] ss:$16 sps:$4 sm:$0xff]  }
 0xc66   : > { %4861 = vmatprep.subr.bf16.mxu0 %v15333_v26 }
 0xc67   : > { %14647 = vmatprep.mubr.msk.f32.mxu1 %vm1748_vm2, %v4201_v43  ;;  %4862 = vmatpush1.bf16.msra.mxu0 %v15331_v10 }
 0xc68   : > { %14648 = vmatmul.mubr.msk.f32.vlgmr.msra.gmra.mrb[54].mxu1 %vm1748_vm2, %v4203_v5  ;;  %4863 = vmatprep.subr.bf16.mxu0 %v15339_v58 }
 0xc69   : > { %4936 = vmatprep.mubr.bf16.mxu1 %v16451_v41  ;;  %v15337_v41 = vld [vmem:[%s16753_s25 + $0x20] ss:$16 sps:$4 sm:$0xff]   ;;  %4905 = vmatpush1.bf16.msra.mxu1 %v15334_v35 }
 0xc6a   : > { %4906 = vmatprep.subr.bf16.mxu1 %v15342_v12 }
 0xc6b   : > { %4864 = vmatpush1.bf16.msra.mxu0 %v15337_v41 }
 0xc6c   : > { %4865 = vmatprep.subr.bf16.mxu0 %v15345_v17 }
 0xc6d   : > { %4907 = vmatpush1.bf16.msra.mxu1 %v15340_v0 }
 0xc6e   : > { %4908 = vmatprep.subr.bf16.mxu1 %v15348_v50 }
 0xc6f   : > { %4866 = vmatpush1.bf16.msra.mxu0 %v15343_v15 }
 0xc71   : > { %4909 = vmatpush1.bf16.msra.mxu1 %v15346_v7 }
 0xcd6   : > { %v14614_v39 = vpop.f32.mrb[14].mxu0 }
 0xcd7   : > { %v4282_v51 = vpop.f32.mrb[15].mxu0 }
 0xd01   : > { %v14621_v8 = vpop.f32.mrb[50].mxu1 }
 0xd02   : > { %v4369_v45 = vpop.f32.mrb[51].mxu1 }
 0xd03   : > { %v15128_v29 = vpack.i.bf16 %v14621_v8, %v4369_v45 }
 0xd05   : > { %15129 = vrot.lane.b32.xlu0 %v15128_v29, %s16450_s16  ;;  %s19211_s16 = smov 16   ;;  %v3491_v29 = vld [vmem:[%s16784_s4 + $0x1c] sm:$0xf] }
 0xd06   : > { %v4781_v10 = vrot.slane %v3491_v29, %v16926_v22  ;;  %v4789_v26 = vrot.slane %v3491_v29, %v17263_v40  ;;  %v4785_v35 = vrot.slane %v3491_v29, %v16930_v24 }
 0xd0a   : > { %v14628_v11 = vpop.f32.mrb[16].mxu0 }
 0xd0b   : > { %v4456_v13 = vpop.f32.mrb[17].mxu0 }
 0xd0c   : > { %v15133_v62 = vpack.i.bf16 %v14628_v11, %v4456_v13  ;;  %v4793_v11 = vrot.slane %v3491_v29, %v17266_v59  ;;  %v5118_v29 = vld [vmem:[%s16759_s0 + $0x188] sm:$0xff] }
 0xd0e   : > { %v14635_v49 = vpop.f32.mrb[52].mxu1  ;;  %15134 = vrot.lane.b32.xlu1 %v15133_v62, %s19211_s16  ;;  %v14642_v52 = vpop.f32.mrb[18].mxu0 }
 0xd0f   : > { %v4543_v33 = vpop.f32.mrb[53].mxu1  ;;  %v4630_v9 = vpop.f32.mrb[19].mxu0 }
 0xd10   : > { %v15143_v47 = vpack.i.bf16 %v14635_v49, %v4543_v33  ;;  %v15138_v38 = vpack.i.bf16 %v14642_v52, %v4630_v9 }
 0xd12   : > { %15144 = vrot.lane.b32.xlu0 %v15143_v47, %s19212_s30  ;;  %15139 = vrot.lane.b32.xlu1 %v15138_v38, %s19213_s26 }
 0xd3b   : > { %v14649_v28 = vpop.f32.mrb[54].mxu1 }
 0xd3c   : > { %v4717_v30 = vpop.f32.mrb[55].mxu1 }
 0xd3d   : > { %v15148_v14 = vpack.i.bf16 %v14649_v28, %v4717_v30 }
 0xd3f   : > { %15149 = vrot.lane.b32.xlu0 %v15148_v14, %s16444_s21 }
 0xd77   : > { %v15130_v31 = vpop.permute.xlu0 %15129 }
 0xd78   : > { %v15132_v55 = vunpack.i.h.bf16 %v15130_v31  ;;  %v15131_v27 = vunpack.i.l.bf16 %v15130_v31 }
 0xd7a   : > { %v4767_v3 = vsel %vm1173_vm0, %v14614_v39, %v15132_v55  ;;  %v4766_v4 = vsel %vm1173_vm0, %v4282_v51, %v15131_v27  ;;  %v5077_v27 = vld [vmem:[%s16759_s0 + $0x40] sm:$0xff] }
 0xd80   : > { %v15135_v32 = vpop.permute.xlu1 %15134 }
 0xd81   : > { %v15137_v42 = vunpack.i.h.bf16 %v15135_v32  ;;  %v15136_v61 = vunpack.i.l.bf16 %v15135_v32 }
 0xd83   : > { %v4769_v44 = vsel %vm1748_vm2, %v4767_v3, %v15137_v42  ;;  %v4768_v60 = vsel %vm1748_vm2, %v4766_v4, %v15136_v61  ;;  %v5070_v42 = vld [vmem:[%s16759_s0 + $0x8] sm:$0xff] }
 0xd84   : > { %v15145_v48 = vpop.permute.xlu0 %15144  ;;  %v15140_v2 = vpop.permute.xlu1 %15139 }
 0xd85   : > { %v15147_v20 = vunpack.i.h.bf16 %v15145_v48  ;;  %v15146_v63 = vunpack.i.l.bf16 %v15145_v48  ;;  %v15142_v18 = vunpack.i.h.bf16 %v15140_v2  ;;  %v15141_v34 = vunpack.i.l.bf16 %v15140_v2  ;;  %v5093_v2 = vld [vmem:[%s16759_s0 + $0xc0] sm:$0xff] }
 0xd87   : > { %v4770_v46 = vsel %vm2443_vm3, %v4768_v60, %v15146_v63  ;;  %v4771_v36 = vsel %vm2443_vm3, %v4769_v44, %v15147_v20  ;;  %v5078_v20 = vld [vmem:[%s16759_s0 + $0x48] sm:$0xff]  ;;  %v5085_v63 = vld [vmem:[%s16759_s0 + $0x80] sm:$0xff] }
 0xd88   : > { %v4773_v5 = vsel %vm2446_vm4, %v4771_v36, %v15142_v18  ;;  %v4772_v39 = vsel %vm2446_vm4, %v4770_v46, %v15141_v34  ;;  %v13269_v3 = vcombine.low %v5070_v42, %v5078_v20  ;;  %v13270_v4 = vcombine.high %v5070_v42, %v5078_v20  ;;  %v5086_v60 = vld [vmem:[%s16759_s0 + $0x88] sm:$0xff]  ;;  %v5101_v34 = vld [vmem:[%s16759_s0 + $0x100] sm:$0xff] }
 0xd89   : > { %v13284_v44 = vcombine.high %v5085_v63, %v5093_v2  ;;  %v5094_v18 = vld [vmem:[%s16759_s0 + $0xc8] sm:$0xff]  ;;  %v5109_v36 = vld [vmem:[%s16759_s0 + $0x140] sm:$0xff] }
 0xd8a   : > { %v13286_v46 = vcombine.high %v5086_v60, %v5094_v18  ;;  %8311 = vmatprep.subr.bf16.mxu1 %v13270_v4  ;;  %v5182_v20 = vld [vmem:[%s16759_s0 + $0x388] sm:$0xff] }
 0xdb1   : > { %v15150_v1 = vpop.permute.xlu0 %15149 }
 0xdb2   : > { %v15152_v25 = vunpack.i.h.bf16 %v15150_v1  ;;  %v15151_v43 = vunpack.i.l.bf16 %v15150_v1  ;;  %v5102_v1 = vld [vmem:[%s16759_s0 + $0x108] sm:$0xff] }
 0xdb4   : > { %v4774_v51 = vsel %vm2449_vm5, %v4772_v39, %v15151_v43  ;;  %v4775_v8 = vsel %vm2449_vm5, %v4773_v5, %v15152_v25  ;;  %v5110_v25 = vld [vmem:[%s16759_s0 + $0x148] sm:$0xff]  ;;  %v13283_v43 = vcombine.low %v5085_v63, %v5093_v2  ;;  %v13285_v5 = vcombine.low %v5086_v60, %v5094_v18  ;;  %v5197_v60 = vld [vmem:[%s16759_s0 + $0x400] sm:$0xff] }
 0xdb5   : > { %v4776_v45 = vpack.c.bf16 %v4775_v8, %v4774_v51  ;;  %v13300_v39 = vcombine.high %v5101_v34, %v5109_v36  ;;  %v13302_v51 = vcombine.high %v5102_v1, %v5110_v25  ;;  %v5117_v8 = vld [vmem:[%s16759_s0 + $0x180] sm:$0xff]  ;;  %v5190_v63 = vld [vmem:[%s16759_s0 + $0x3c8] sm:$0xff] }
 0xdb6   : > { %v5205_v18 = vld [vmem:[%s16759_s0 + $0x440] sm:$0xff] }
 0xdb7   : > { %13265 = vmatmul.mubr.msk.bf16.vlgmr.msra.gmra.mrb[20].mxu0 %vm2534_vm6, %v4776_v45  ;;  %13266 = vmatmul.mubr.msk.bf16.vlgmr.msra.gmra.mrb[56].mxu1 %vm2534_vm6, %v4776_v45  ;;  %v5125_v45 = vld [vmem:[%s16759_s0 + $0x1c0] sm:$0xff] }
 0xdb8   : > { %8312 = vmatpush1.bf16.msra.mxu1 %v13269_v3 }
 0xdb9   : > { %8313 = vmatprep.subr.bf16.mxu1 %v13286_v46  ;;  %v5206_v46 = vld [vmem:[%s16759_s0 + $0x448] sm:$0xff] }
 0xdbc   : > { %8314 = vmatpush1.bf16.msra.mxu1 %v13285_v5  ;;  %v5213_v5 = vld [vmem:[%s16759_s0 + $0x480] sm:$0xff] }
 0xdbd   : > { %8315 = vmatprep.subr.bf16.mxu1 %v13302_v51  ;;  %v5214_v51 = vld [vmem:[%s16759_s0 + $0x488] sm:$0xff] }
 0xe8a   : > { %v4895_v54 = vpop.f32.mrb[20].mxu0  ;;  %v4938_v58 = vpop.f32.mrb[56].mxu1 }
 0xe8b   : > { %v4896_v12 = vadd.f32 %v4895_v54, %v4781_v10  ;;  %v4897_v13 = vpop.f32.mrb[21].mxu0  ;;  %v4940_v41 = vpop.f32.mrb[57].mxu1  ;;  %v4939_v62 = vadd.f32 %v4938_v58, %v4789_v26  ;;  %v13316_v54 = vcombine.high %v5117_v8, %v5125_v45 }
 0xe8c   : > { %v4898_v0 = vadd.f32 %v4897_v13, %v4785_v35  ;;  %v4899_v49 = vpop.f32.mrb[22].mxu0  ;;  %v4942_v52 = vpop.f32.mrb[58].mxu1  ;;  %v4941_v50 = vadd.f32 %v4940_v41, %v4793_v11  ;;  %v5134_v13 = vld [vmem:[%s16759_s0 + $0x208] sm:$0xff] }
 0xe8d   : > { %v17774_v33 = vadd.f32 %v4896_v12, %v17396_v37  ;;  %v4900_v9 = vadd.f32 %v4899_v49, %v4781_v10  ;;  %v4901_v47 = vpop.f32.mrb[23].mxu0  ;;  %v4944_v38 = vpop.f32.mrb[59].mxu1  ;;  %v4943_v15 = vadd.f32 %v4942_v52, %v4789_v26  ;;  %v17783_v30 = vadd.f32 %v4939_v62, %v17400_v6  ;;  %v5126_v10 = vld [vmem:[%s16759_s0 + $0x1c8] sm:$0xff]  ;;  %v5141_v12 = vld [vmem:[%s16759_s0 + $0x240] sm:$0xff] }
 0xe8e   : > { %v17777_v17 = vadd.f32 %v4898_v0, %v17385_v56  ;;  %v4902_v7 = vadd.f32 %v4901_v47, %v4785_v35  ;;  %v4945_v56 = vadd.f32 %v4944_v38, %v4793_v11  ;;  %v17791_v31 = vadd.f32 %v4941_v50, %v17389_v53  ;;  %v5133_v11 = vld [vmem:[%s16759_s0 + $0x200] sm:$0xff]  ;;  %v5142_v41 = vld [vmem:[%s16759_s0 + $0x248] sm:$0xff] }
 0xe8f   : > { %v17780_v28 = vadd.f32 %v4900_v9, %v17398_v16  ;;  %v17794_v16 = vadd.f32 %v4943_v15, %v17402_v23  ;;  %v5069_v23 = vld [vmem:[%s16759_s0] sm:$0xff]  ;;  %v13299_v26 = vcombine.low %v5101_v34, %v5109_v36  ;;  %v13301_v35 = vcombine.low %v5102_v1, %v5110_v25  ;;  %v5150_v38 = vld [vmem:[%s16759_s0 + $0x288] sm:$0xff] }
 0xe90   : > { %v4955_v37 = vadd.f32 %v17777_v17, %v17774_v33  ;;  %v17788_v14 = vadd.f32 %v4902_v7, %v17387_v57  ;;  %v17800_v48 = vadd.f32 %v4945_v56, %v17391_v19  ;;  %v13267_v61 = vcombine.low %v5069_v23, %v5077_v27  ;;  %v5149_v9 = vld [vmem:[%s16759_s0 + $0x280] sm:$0xff]  ;;  %v5158_v50 = vld [vmem:[%s16759_s0 + $0x2c8] sm:$0xff] }
 0xe91   : > { %v13268_v19 = vcombine.high %v5069_v23, %v5077_v27  ;;  %v13318_v58 = vcombine.high %v5118_v29, %v5126_v10  ;;  %v13315_v62 = vcombine.low %v5117_v8, %v5125_v45  ;;  %8316 = vmatpush1.bf16.msra.mxu1 %v13301_v35  ;;  %v13317_v0 = vcombine.low %v5118_v29, %v5126_v10  ;;  %v5157_v47 = vld [vmem:[%s16759_s0 + $0x2c0] sm:$0xff]  ;;  %v5198_v34 = vld [vmem:[%s16759_s0 + $0x408] sm:$0xff] }
 0xe92   : > { %v4960_v6 = vadd.f32 %v17788_v14, %v17780_v28  ;;  %v4956_v32 = vadd.f32 %v4955_v37, %v17783_v30  ;;  %v13332_v49 = vcombine.high %v5133_v11, %v5141_v12  ;;  %v13334_v52 = vcombine.high %v5134_v13, %v5142_v41  ;;  %v5222_v8 = vld [vmem:[%s16759_s0 + $0x4c8] sm:$0xff] }
 0xe93   : > { %8225 = vmatprep.subr.bf16.mxu0 %v13268_v19  ;;  %8317 = vmatprep.subr.bf16.mxu1 %v13318_v58  ;;  %v13331_v15 = vcombine.low %v5133_v11, %v5141_v12  ;;  %v13333_v7 = vcombine.low %v5134_v13, %v5142_v41  ;;  %v13348_v37 = vcombine.high %v5149_v9, %v5157_v47  ;;  %v5189_v19 = vld [vmem:[%s16759_s0 + $0x3c0] sm:$0xff] }
 0xe94   : > { %v4957_v57 = vadd.f32 %v4956_v32, %v17791_v31  ;;  %v4961_v55 = vadd.f32 %v4960_v6, %v17794_v16  ;;  %8226 = vmatpush1.bf16.msra.mxu0 %v13267_v61  ;;  %v13350_v56 = vcombine.high %v5150_v38, %v5158_v50  ;;  %v5165_v6 = vld [vmem:[%s16759_s0 + $0x300] sm:$0xff]  ;;  %v13349_v23 = vcombine.low %v5150_v38, %v5158_v50 }
 0xe95   : > { %8227 = vmatprep.subr.bf16.mxu0 %v13284_v44  ;;  %8318 = vmatpush1.bf16.msra.mxu1 %v13317_v0  ;;  %v5173_v32 = vld [vmem:[%s16759_s0 + $0x340] sm:$0xff]  ;;  %v13382_v44 = vcombine.high %v5182_v20, %v5190_v63  ;;  %v13381_v1 = vcombine.low %v5182_v20, %v5190_v63  ;;  %v13396_v25 = vcombine.high %v5197_v60, %v5205_v18  ;;  %v5246_v63 = vld [vmem:[%s16759_s0 + $0x588] sm:$0xff] }
 0xe96   : > { %4958 = vadd.xlane.f32.xlu1 %v4957_v57  ;;  %v4962_v53 = vadd.f32 %v4961_v55, %v17800_v48  ;;  %8319 = vmatprep.subr.bf16.mxu1 %v13334_v52  ;;  %v5166_v57 = vld [vmem:[%s16759_s0 + $0x308] sm:$0xff]  ;;  %v13364_v27 = vcombine.high %v5165_v6, %v5173_v32  ;;  %v5181_v61 = vld [vmem:[%s16759_s0 + $0x380] sm:$0xff]  ;;  %v13363_v2 = vcombine.low %v5165_v6, %v5173_v32 }
 0xe97   : > { %v5174_v55 = vld [vmem:[%s16759_s0 + $0x348] sm:$0xff]  ;;  %v13380_v4 = vcombine.high %v5181_v61, %v5189_v19  ;;  %v13379_v36 = vcombine.low %v5181_v61, %v5189_v19  ;;  %v13395_v45 = vcombine.low %v5197_v60, %v5205_v18  ;;  %v13397_v29 = vcombine.low %v5198_v34, %v5206_v46  ;;  %v5229_v32 = vld [vmem:[%s16759_s0 + $0x500] sm:$0xff] }
 0xe98   : > { %4963 = vadd.xlane.f32.xlu0 %v4962_v53  ;;  %8228 = vmatpush1.bf16.msra.mxu0 %v13283_v43  ;;  %v13347_v53 = vcombine.low %v5149_v9, %v5157_v47  ;;  %v13366_v42 = vcombine.high %v5166_v57, %v5174_v55  ;;  %v13365_v3 = vcombine.low %v5166_v57, %v5174_v55  ;;  %v5237_v57 = vld [vmem:[%s16759_s0 + $0x540] sm:$0xff]  ;;  %v5230_v55 = vld [vmem:[%s16759_s0 + $0x508] sm:$0xff] }
 0xe99   : > { %8229 = vmatprep.subr.bf16.mxu0 %v13300_v39  ;;  %8320 = vmatpush1.bf16.msra.mxu1 %v13333_v7  ;;  %v13398_v43 = vcombine.high %v5198_v34, %v5206_v46  ;;  %v5221_v39 = vld [vmem:[%s16759_s0 + $0x4c0] sm:$0xff] }
 0xe9a   : > { %8321 = vmatprep.subr.bf16.mxu1 %v13350_v56  ;;  %v13412_v10 = vcombine.high %v5213_v5, %v5221_v39  ;;  %v13411_v35 = vcombine.low %v5213_v5, %v5221_v39  ;;  %v5245_v19 = vld [vmem:[%s16759_s0 + $0x580] sm:$0xff]  ;;  %v5278_v39 = vld [vmem:[%s16759_s0 + $0x688] sm:$0xff] }
 0xe9b   : > { %v5253_v20 = vld [vmem:[%s16759_s0 + $0x5c0] sm:$0xff] }
 0xe9c   : > { %8230 = vmatpush1.bf16.msra.mxu0 %v13299_v26  ;;  %v13414_v26 = vcombine.high %v5214_v51, %v5222_v8  ;;  %v5269_v60 = vld [vmem:[%s16759_s0 + $0x640] sm:$0xff] }
 0xe9d   : > { %8231 = vmatprep.subr.bf16.mxu0 %v13316_v54  ;;  %8322 = vmatpush1.bf16.msra.mxu1 %v13349_v23  ;;  %v13413_v54 = vcombine.low %v5214_v51, %v5222_v8  ;;  %v5238_v23 = vld [vmem:[%s16759_s0 + $0x548] sm:$0xff]  ;;  %v5285_v5 = vld [vmem:[%s16759_s0 + $0x6c0] sm:$0xff] }
 0xe9e   : > { %8323 = vmatprep.subr.bf16.mxu1 %v13366_v42  ;;  %v13429_v42 = vcombine.low %v5230_v55, %v5238_v23  ;;  %v13430_v61 = vcombine.high %v5230_v55, %v5238_v23  ;;  %v5286_v51 = vld [vmem:[%s16759_s0 + $0x6c8] sm:$0xff] }
 0xe9f   : > { %v17923_v55 = vld [vmem:[%s16759_s0 + $0x848] sm:$0xff] }
 0xea0   : > { %8232 = vmatpush1.bf16.msra.mxu0 %v13315_v62 }
 0xea1   : > { %8233 = vmatprep.subr.bf16.mxu0 %v13332_v49  ;;  %8324 = vmatpush1.bf16.msra.mxu1 %v13365_v3  ;;  %v13444_v3 = vcombine.high %v5245_v19, %v5253_v20 }
 0xea2   : > { %8325 = vmatprep.subr.bf16.mxu1 %v13382_v44  ;;  %v5261_v44 = vld [vmem:[%s16759_s0 + $0x600] sm:$0xff] }
 0xea3   : > { %v13460_v46 = vcombine.high %v5261_v44, %v5269_v60  ;;  %v13459_v8 = vcombine.low %v5261_v44, %v5269_v60 }
 0xea4   : > { %8234 = vmatpush1.bf16.msra.mxu0 %v13331_v15 }
 0xea5   : > { %8235 = vmatprep.subr.bf16.mxu0 %v13348_v37  ;;  %8326 = vmatpush1.bf16.msra.mxu1 %v13381_v1  ;;  %v5270_v1 = vld [vmem:[%s16759_s0 + $0x648] sm:$0xff] }
 0xea6   : > { %8327 = vmatprep.subr.bf16.mxu1 %v13398_v43 }
 0xea8   : > { %8236 = vmatpush1.bf16.msra.mxu0 %v13347_v53  ;;  %v13428_v53 = vcombine.high %v5229_v32, %v5237_v57 }
 0xea9   : > { %8237 = vmatprep.subr.bf16.mxu0 %v13364_v27  ;;  %8328 = vmatpush1.bf16.msra.mxu1 %v13397_v29  ;;  %v13427_v27 = vcombine.low %v5229_v32, %v5237_v57 }
 0xeaa   : > { %8329 = vmatprep.subr.bf16.mxu1 %v13414_v26  ;;  %v5293_v26 = vld [vmem:[%s16759_s0 + $0x700] sm:$0xff] }
 0xeac   : > { %8238 = vmatpush1.bf16.msra.mxu0 %v13363_v2  ;;  %v13443_v2 = vcombine.low %v5245_v19, %v5253_v20 }
 0xead   : > { %8239 = vmatprep.subr.bf16.mxu0 %v13380_v4  ;;  %8330 = vmatpush1.bf16.msra.mxu1 %v13413_v54  ;;  %v5254_v4 = vld [vmem:[%s16759_s0 + $0x5c8] sm:$0xff] }
 0xeae   : > { %8331 = vmatprep.subr.bf16.mxu1 %v13430_v61  ;;  %v13445_v18 = vcombine.low %v5246_v63, %v5254_v4  ;;  %v13446_v34 = vcombine.high %v5246_v63, %v5254_v4  ;;  %v5294_v54 = vld [vmem:[%s16759_s0 + $0x708] sm:$0xff] }
 0xeb0   : > { %8240 = vmatpush1.bf16.msra.mxu0 %v13379_v36  ;;  %v5262_v36 = vld [vmem:[%s16759_s0 + $0x608] sm:$0xff] }
 0xeb1   : > { %8241 = vmatprep.subr.bf16.mxu0 %v13396_v25  ;;  %8332 = vmatpush1.bf16.msra.mxu1 %v13429_v42  ;;  %v5277_v25 = vld [vmem:[%s16759_s0 + $0x680] sm:$0xff]  ;;  %v13462_v43 = vcombine.high %v5262_v36, %v5270_v1 }
 0xeb2   : > { %8333 = vmatprep.subr.bf16.mxu1 %v13446_v34  ;;  %v13476_v29 = vcombine.high %v5277_v25, %v5285_v5 }
 0xeb4   : > { %8242 = vmatpush1.bf16.msra.mxu0 %v13395_v45  ;;  %v13461_v45 = vcombine.low %v5262_v36, %v5270_v1 }
 0xeb5   : > { %8243 = vmatprep.subr.bf16.mxu0 %v13412_v10  ;;  %8334 = vmatpush1.bf16.msra.mxu1 %v13445_v18  ;;  %v13478_v10 = vcombine.high %v5278_v39, %v5286_v51 }
 0xeb6   : > { %8335 = vmatprep.subr.bf16.mxu1 %v13462_v43 }
 0xeb8   : > { %8244 = vmatpush1.bf16.msra.mxu0 %v13411_v35  ;;  %v5301_v35 = vld [vmem:[%s16759_s0 + $0x740] sm:$0xff] }
 0xeb9   : > { %8245 = vmatprep.subr.bf16.mxu0 %v13428_v53  ;;  %8336 = vmatpush1.bf16.msra.mxu1 %v13461_v45 }
 0xeba   : > { %8337 = vmatprep.subr.bf16.mxu1 %v13478_v10 }
 0xebc   : > { %8246 = vmatpush1.bf16.msra.mxu0 %v13427_v27 }
 0xebd   : > { %8247 = vmatprep.subr.bf16.mxu0 %v13444_v3  ;;  %v3493_v3 = vld [vmem:[%s16784_s4 + $0x24] sm:$0xf] }
 0xebe   : > { %v5044_v34 = vrot.slane %v3493_v3, %v16930_v24  ;;  %v5048_v1 = vrot.slane %v3493_v3, %v17263_v40 }
 0xec0   : > { %8248 = vmatpush1.bf16.msra.mxu0 %v13443_v2  ;;  %v3492_v2 = vld [vmem:[%s16784_s4 + $0x20] sm:$0xf] }
 0xec1   : > { %8249 = vmatprep.subr.bf16.mxu0 %v13460_v46  ;;  %v5015_v4 = vrot.slane %v3492_v2, %v16930_v24  ;;  %v5011_v44 = vrot.slane %v3492_v2, %v16926_v22  ;;  %v5019_v60 = vrot.slane %v3492_v2, %v17263_v40  ;;  %v5040_v46 = vrot.slane %v3493_v3, %v16926_v22 }
 0xec2   : > { %v5023_v36 = vrot.slane %v3492_v2, %v17266_v59  ;;  %v5373_v2 = vld [vmem:[%s16759_s0 + $0x980] sm:$0xff] }
 0xec4   : > { %8250 = vmatpush1.bf16.msra.mxu0 %v13459_v8 }
 0xec5   : > { %8251 = vmatprep.subr.bf16.mxu0 %v13476_v29 }
 0xf23   : > { %v4959_v58 = vpop.xlane.xlu1 %4958 }
 0xf24   : > { %v4965_v11 = vmul.f32 0.001953125, %v4959_v58  ;;  %v5302_v58 = vld [vmem:[%s16759_s0 + $0x748] sm:$0xff] }
 0xf25   : > { %v4964_v12 = vpop.xlane.xlu0 %4963 }
 0xf26   : > { %v17846_v13 = vsub.f32 %v17774_v33, %v4965_v11  ;;  %v17849_v41 = vsub.f32 %v17777_v17, %v4965_v11  ;;  %v4966_v62 = vmul.f32 0.001953125, %v4964_v12  ;;  %v17852_v0 = vsub.f32 %v17783_v30, %v4965_v11 }
 0xf27   : > { %v17866_v47 = vsub.f32 %v17791_v31, %v4965_v11  ;;  %v13475_v11 = vcombine.low %v5277_v25, %v5285_v5  ;;  %v13477_v12 = vcombine.low %v5278_v39, %v5286_v51 }
 0xf28   : > { %v17855_v49 = vsub.f32 %v17780_v28, %v4966_v62  ;;  %v17858_v52 = vsub.f32 %v17788_v14, %v4966_v62  ;;  %v17861_v9 = vsub.f32 %v17794_v16, %v4966_v62  ;;  %v4975_v33 = vmul.f32 %v17846_v13, %v17846_v13 }
 0xf29   : > { %v4976_v17 = vmul.f32 %v17849_v41, %v17849_v41  ;;  %v17871_v30 = vsub.f32 %v17800_v48, %v4966_v62  ;;  %v4977_v16 = vmul.f32 %v17852_v0, %v17852_v0  ;;  %v4978_v48 = vmul.f32 %v17866_v47, %v17866_v47  ;;  %8252 = vmatpush1.bf16.msra.mxu0 %v13475_v11 }
 0xf2a   : > { %v4979_v28 = vmul.f32 %v17855_v49, %v17855_v49  ;;  %v4980_v14 = vmul.f32 %v17858_v52, %v17858_v52  ;;  %v4981_v38 = vmul.f32 %v17861_v9, %v17861_v9  ;;  %v13492_v62 = vcombine.high %v5293_v26, %v5301_v35  ;;  %8338 = vmatpush1.bf16.msra.mxu1 %v13477_v12 }
 0xf2b   : > { %v4983_v31 = vadd.f32 %v4976_v17, %v4975_v33  ;;  %v4982_v7 = vmul.f32 %v17871_v30, %v17871_v30  ;;  %v13494_v33 = vcombine.high %v5294_v54, %v5302_v58  ;;  %v5309_v17 = vld [vmem:[%s16759_s0 + $0x780] sm:$0xff] }
 0xf2c   : > { %v4988_v50 = vadd.f32 %v4980_v14, %v4979_v28  ;;  %v5317_v28 = vld [vmem:[%s16759_s0 + $0x7c0] sm:$0xff]  ;;  %v5310_v14 = vld [vmem:[%s16759_s0 + $0x788] sm:$0xff]  ;;  %8253 = vmatprep.subr.bf16.mxu0 %v13492_v62 }
 0xf2d   : > { %v4984_v15 = vadd.f32 %v4983_v31, %v4977_v16  ;;  %v5318_v16 = vld [vmem:[%s16759_s0 + $0x7c8] sm:$0xff]  ;;  %v13491_v31 = vcombine.low %v5293_v26, %v5301_v35  ;;  %8339 = vmatprep.subr.bf16.mxu1 %v13494_v33  ;;  %v5341_v62 = vld [vmem:[%s16759_s0 + $0x880] sm:$0xff] }
 0xf2e   : > { %v4989_v37 = vadd.f32 %v4988_v50, %v4981_v38  ;;  %v13493_v38 = vcombine.low %v5294_v54, %v5302_v58  ;;  %v13508_v50 = vcombine.high %v5309_v17, %v5317_v28 }
 0xf2f   : > { %v4985_v56 = vadd.f32 %v4984_v15, %v4978_v48  ;;  %v13510_v48 = vcombine.high %v5310_v14, %v5318_v16  ;;  %8254 = vmatpush1.bf16.msra.mxu0 %v13491_v31  ;;  %v13507_v15 = vcombine.low %v5309_v17, %v5317_v28  ;;  %v5349_v28 = vld [vmem:[%s16759_s0 + $0x8c0] sm:$0xff] }
 0xf30   : > { %v4990_v6 = vadd.f32 %v4989_v37, %v4982_v7  ;;  %8340 = vmatpush1.bf16.msra.mxu1 %v13493_v38  ;;  %8255 = vmatprep.subr.bf16.mxu0 %v13508_v50  ;;  %v13509_v7 = vcombine.low %v5310_v14, %v5318_v16  ;;  %v17910_v37 = vld [vmem:[%s16759_s0 + $0x800] sm:$0xff]  ;;  %v5342_v14 = vld [vmem:[%s16759_s0 + $0x888] sm:$0xff] }
 0xf31   : > { %4986 = vadd.xlane.f32.xlu0 %v4985_v56  ;;  %8341 = vmatprep.subr.bf16.mxu1 %v13510_v48  ;;  %v17913_v56 = vld [vmem:[%s16759_s0 + $0x840] sm:$0xff]  ;;  %v5350_v16 = vld [vmem:[%s16759_s0 + $0x8c8] sm:$0xff] }
 0xf32   : > { %4991 = vadd.xlane.f32.xlu1 %v4990_v6  ;;  %v17916_v6 = vld [vmem:[%s16759_s0 + $0x808] sm:$0xff]  ;;  %v13523_v32 = vcombine.low %v17910_v37, %v17913_v56  ;;  %v13524_v57 = vcombine.high %v17910_v37, %v17913_v56  ;;  %v5357_v48 = vld [vmem:[%s16759_s0 + $0x900] sm:$0xff] }
 0xf33   : > { %8256 = vmatpush1.bf16.msra.mxu0 %v13507_v15  ;;  %v13525_v53 = vcombine.low %v17916_v6, %v17923_v55  ;;  %v13526_v23 = vcombine.high %v17916_v6, %v17923_v55  ;;  %v13540_v15 = vcombine.high %v5341_v62, %v5349_v28  ;;  %v5381_v37 = vld [vmem:[%s16759_s0 + $0x9c0] sm:$0xff]  ;;  %v5374_v56 = vld [vmem:[%s16759_s0 + $0x988] sm:$0xff] }
 0xf34   : > { %8342 = vmatpush1.bf16.msra.mxu1 %v13509_v7  ;;  %8268 = vmatprep.subr.bf16.mxu0 %v13524_v57  ;;  %v13542_v7 = vcombine.high %v5342_v14, %v5350_v16  ;;  %v5365_v57 = vld [vmem:[%s16759_s0 + $0x940] sm:$0xff] }
 0xf35   : > { %8354 = vmatprep.subr.bf16.mxu1 %v13526_v23  ;;  %v5358_v23 = vld [vmem:[%s16759_s0 + $0x908] sm:$0xff]  ;;  %v13555_v6 = vcombine.low %v5357_v48, %v5365_v57 }
 0xfbe   : > { %v4987_v27 = vpop.xlane.xlu0 %4986 }
 0xfbf   : > { %v4993_v42 = vmul.f32 0.001953125, %v4987_v27  ;;  %v4992_v61 = vpop.xlane.xlu1 %4991  ;;  %v5366_v27 = vld [vmem:[%s16759_s0 + $0x948] sm:$0xff] }
 0xfc0   : > { %v4994_v19 = vmul.f32 0.001953125, %v4992_v61  ;;  %v13539_v61 = vcombine.low %v5341_v62, %v5349_v28  ;;  %v13557_v55 = vcombine.low %v5358_v23, %v5366_v27  ;;  %v5438_v62 = vld [vmem:[%s16759_s0 + $0xb88] sm:$0xff] }
 0xfc1   : > { %v4995_v20 = vadd.f32 1e-05, %v4993_v42  ;;  %v5446_v28 = vld [vmem:[%s16759_s0 + $0xbc8] sm:$0xff] }
 0xfc2   : > { %v4996_v63 = vadd.f32 1e-05, %v4994_v19  ;;  %v13541_v19 = vcombine.low %v5342_v14, %v5350_v16 }
 0xfc3   : > { %16217 = vrsqrt.f32 %v4995_v20  ;;  %v13556_v20 = vcombine.high %v5357_v48, %v5365_v57  ;;  %v5461_v57 = vld [vmem:[%s16759_s0 + $0xc40] sm:$0xff] }
 0xfc4   : > { %16219 = vrsqrt.f32 %v4996_v63  ;;  %v13558_v63 = vcombine.high %v5358_v23, %v5366_v27  ;;  %v5454_v23 = vld [vmem:[%s16759_s0 + $0xc08] sm:$0xff] }
 0xfc5   : > { %v5462_v27 = vld [vmem:[%s16759_s0 + $0xc48] sm:$0xff] }
 0xfcd   : > { %v16218_v18 = vpop.eup %16217 }
 0xfce   : > { %v16220_v25 = vpop.eup %16219  ;;  %v5000_v43 = vmul.f32 %v16218_v18, %v17849_v41  ;;  %v4999_v5 = vmul.f32 %v16218_v18, %v17846_v13  ;;  %v5002_v39 = vmul.f32 %v16218_v18, %v17866_v47  ;;  %v5001_v51 = vmul.f32 %v16218_v18, %v17852_v0  ;;  %v5398_v18 = vld [vmem:[%s16759_s0 + $0xa48] sm:$0xff] }
 0xfcf   : > { %v5004_v8 = vmul.f32 %v16220_v25, %v17858_v52  ;;  %v5003_v45 = vmul.f32 %v16220_v25, %v17855_v49  ;;  %v5006_v29 = vmul.f32 %v16220_v25, %v17871_v30  ;;  %v5005_v10 = vmul.f32 %v16220_v25, %v17861_v9  ;;  %v5405_v25 = vld [vmem:[%s16759_s0 + $0xa80] sm:$0xff] }
 0xfd0   : > { %v5029_v26 = vmul.f32 %v5015_v4, %v5000_v43  ;;  %v5028_v35 = vmul.f32 %v5011_v44, %v4999_v5  ;;  %v5030_v54 = vmul.f32 %v5019_v60, %v5001_v51  ;;  %v5031_v52 = vmul.f32 %v5023_v36, %v5002_v39  ;;  %v5413_v43 = vld [vmem:[%s16759_s0 + $0xac0] sm:$0xff]  ;;  %v5406_v5 = vld [vmem:[%s16759_s0 + $0xa88] sm:$0xff] }
 0xfd1   : > { %v5033_v41 = vmul.f32 %v5015_v4, %v5004_v8  ;;  %v5032_v13 = vmul.f32 %v5011_v44, %v5003_v45  ;;  %v5035_v47 = vmul.f32 %v5023_v36, %v5006_v29  ;;  %v5034_v58 = vmul.f32 %v5019_v60, %v5005_v10  ;;  %v5389_v4 = vld [vmem:[%s16759_s0 + $0xa00] sm:$0xff]  ;;  %v5390_v60 = vld [vmem:[%s16759_s0 + $0xa08] sm:$0xff] }
 0xfd2   : > { %v17946_v0 = vadd.f32 %v5044_v34, %v5029_v26  ;;  %v5052_v49 = vrot.slane %v3493_v3, %v17266_v59  ;;  %v17949_v30 = vadd.f32 %v5048_v1, %v5030_v54  ;;  %v17953_v9 = vadd.f32 %v5040_v46, %v5028_v35  ;;  %v5397_v44 = vld [vmem:[%s16759_s0 + $0xa40] sm:$0xff]  ;;  %v5414_v39 = vld [vmem:[%s16759_s0 + $0xac8] sm:$0xff] }
 0xfd3   : > { %v17951_v11 = vadd.f32 %v5044_v34, %v5033_v41  ;;  %v17955_v12 = vadd.f32 %v5040_v46, %v5032_v13  ;;  %v17958_v33 = vadd.f32 %v5048_v1, %v5034_v58  ;;  %v13571_v34 = vcombine.low %v5373_v2, %v5381_v37  ;;  %v5421_v10 = vld [vmem:[%s16759_s0 + $0xb00] sm:$0xff]  ;;  %v5422_v35 = vld [vmem:[%s16759_s0 + $0xb08] sm:$0xff] }
 0xfd4   : > { %v17960_v17 = vadd.f32 %v5052_v49, %v5035_v47  ;;  %v17973_v50 = vadd.f32 %v5052_v49, %v5031_v52  ;;  %v13588_v36 = vcombine.high %v5389_v4, %v5397_v44  ;;  %v13590_v1 = vcombine.high %v5390_v60, %v5398_v18  ;;  %v5429_v26 = vld [vmem:[%s16759_s0 + $0xb40] sm:$0xff]  ;;  %v5430_v54 = vld [vmem:[%s16759_s0 + $0xb48] sm:$0xff] }
 0xfd5   : > { %v17967_v31 = vpack.c.bf16 %v17951_v11, %v17946_v0  ;;  %v17971_v38 = vpack.c.bf16 %v17955_v12, %v17953_v9  ;;  %v13587_v51 = vcombine.low %v5389_v4, %v5397_v44  ;;  %v13589_v8 = vcombine.low %v5390_v60, %v5398_v18  ;;  %v5437_v52 = vld [vmem:[%s16759_s0 + $0xb80] sm:$0xff]  ;;  %v5486_v60 = vld [vmem:[%s16759_s0 + $0xd08] sm:$0xff] }
 0xfd6   : > { %v17985_v42 = vpack.c.bf16 %v17960_v17, %v17973_v50  ;;  %v13604_v45 = vcombine.high %v5405_v25, %v5413_v43  ;;  %v13606_v29 = vcombine.high %v5406_v5, %v5414_v39  ;;  %v13603_v41 = vcombine.low %v5405_v25, %v5413_v43  ;;  %v5445_v49 = vld [vmem:[%s16759_s0 + $0xbc0] sm:$0xff]  ;;  %v5494_v18 = vld [vmem:[%s16759_s0 + $0xd48] sm:$0xff] }
 0xfd7   : > { %8257 = vmatprep.mubr.bf16.mxu0 %v17967_v31  ;;  %8343 = vmatprep.mubr.bf16.mxu1 %v17967_v31  ;;  %v13605_v13 = vcombine.low %v5406_v5, %v5414_v39  ;;  %v13620_v47 = vcombine.high %v5421_v10, %v5429_v26  ;;  %v13622_v58 = vcombine.high %v5422_v35, %v5430_v54  ;;  %v5485_v4 = vld [vmem:[%s16759_s0 + $0xd00] sm:$0xff]  ;;  %v5502_v5 = vld [vmem:[%s16759_s0 + $0xd88] sm:$0xff] }
 0xfd8   : > { %8258 = vmatmul.mubr.bf16.vlgmr.msra.gmra.mrb[24].mxu0 %v17971_v38  ;;  %8344 = vmatmul.mubr.bf16.vlgmr.msra.gmra.mrb[60].mxu1 %v17971_v38  ;;  %v13619_v14 = vcombine.low %v5421_v10, %v5429_v26  ;;  %v13621_v16 = vcombine.low %v5422_v35, %v5430_v54  ;;  %v13636_v48 = vcombine.high %v5437_v52, %v5445_v49  ;;  %v5493_v44 = vld [vmem:[%s16759_s0 + $0xd40] sm:$0xff]  ;;  %v5510_v39 = vld [vmem:[%s16759_s0 + $0xdc8] sm:$0xff] }
 0xfd9   : > { %8269 = vmatpush1.bf16.msra.mxu0 %v13523_v32  ;;  %8355 = vmatpush1.bf16.msra.mxu1 %v13525_v53  ;;  %v5382_v32 = vld [vmem:[%s16759_s0 + $0x9c8] sm:$0xff]  ;;  %v13572_v53 = vcombine.high %v5373_v2, %v5381_v37  ;;  %v5469_v2 = vld [vmem:[%s16759_s0 + $0xc80] sm:$0xff] }
 0xfda   : > { %8300 = vmatprep.mubr.bf16.mxu0 %v17985_v42  ;;  %8386 = vmatprep.mubr.bf16.mxu1 %v17985_v42  ;;  %v13574_v3 = vcombine.high %v5374_v56, %v5382_v32  ;;  %v13573_v46 = vcombine.low %v5374_v56, %v5382_v32  ;;  %v5477_v37 = vld [vmem:[%s16759_s0 + $0xcc0] sm:$0xff]  ;;  %v5470_v56 = vld [vmem:[%s16759_s0 + $0xc88] sm:$0xff] }
 0xfdb   : > { %8270 = vmatprep.subr.bf16.mxu0 %v13540_v15  ;;  %8356 = vmatprep.subr.bf16.mxu1 %v13542_v7  ;;  %v13638_v15 = vcombine.high %v5438_v62, %v5446_v28  ;;  %v5453_v7 = vld [vmem:[%s16759_s0 + $0xc00] sm:$0xff]  ;;  %v5478_v32 = vld [vmem:[%s16759_s0 + $0xcc8] sm:$0xff] }
 0xfdc   : > { %v5501_v25 = vld [vmem:[%s16759_s0 + $0xd80] sm:$0xff]  ;;  %v5518_v35 = vld [vmem:[%s16759_s0 + $0xe08] sm:$0xff] }
 0xfdd   : > { %8271 = vmatpush1.bf16.msra.mxu0 %v13539_v61  ;;  %8357 = vmatpush1.bf16.msra.mxu1 %v13541_v19  ;;  %v13635_v61 = vcombine.low %v5437_v52, %v5445_v49  ;;  %v13637_v19 = vcombine.low %v5438_v62, %v5446_v28  ;;  %v5509_v43 = vld [vmem:[%s16759_s0 + $0xdc0] sm:$0xff]  ;;  %v5526_v54 = vld [vmem:[%s16759_s0 + $0xe48] sm:$0xff] }
 0xfde   : > { %8272 = vmatprep.subr.bf16.mxu0 %v13556_v20  ;;  %8358 = vmatprep.subr.bf16.mxu1 %v13558_v63  ;;  %v13652_v20 = vcombine.high %v5453_v7, %v5461_v57  ;;  %v13654_v63 = vcombine.high %v5454_v23, %v5462_v27  ;;  %v5517_v10 = vld [vmem:[%s16759_s0 + $0xe00] sm:$0xff]  ;;  %v5534_v62 = vld [vmem:[%s16759_s0 + $0xe88] sm:$0xff] }
 0xfdf   : > { %v5525_v26 = vld [vmem:[%s16759_s0 + $0xe40] sm:$0xff]  ;;  %v5542_v28 = vld [vmem:[%s16759_s0 + $0xec8] sm:$0xff] }
 0xfe0   : > { %v5533_v52 = vld [vmem:[%s16759_s0 + $0xe80] sm:$0xff] }
 0xfe1   : > { %8273 = vmatpush1.bf16.msra.mxu0 %v13555_v6  ;;  %8359 = vmatpush1.bf16.msra.mxu1 %v13557_v55  ;;  %v13651_v6 = vcombine.low %v5453_v7, %v5461_v57  ;;  %v13653_v55 = vcombine.low %v5454_v23, %v5462_v27  ;;  %v5541_v49 = vld [vmem:[%s16759_s0 + $0xec0] sm:$0xff]  ;;  %v5550_v23 = vld [vmem:[%s16759_s0 + $0xf08] sm:$0xff] }
 0xfe2   : > { %8274 = vmatprep.subr.bf16.mxu0 %v13572_v53  ;;  %8360 = vmatprep.subr.bf16.mxu1 %v13574_v3  ;;  %v13668_v53 = vcombine.high %v5469_v2, %v5477_v37  ;;  %v13670_v3 = vcombine.high %v5470_v56, %v5478_v32  ;;  %v5549_v7 = vld [vmem:[%s16759_s0 + $0xf00] sm:$0xff]  ;;  %v5558_v27 = vld [vmem:[%s16759_s0 + $0xf48] sm:$0xff] }
 0xfe3   : > { %v5557_v57 = vld [vmem:[%s16759_s0 + $0xf40] sm:$0xff] }
 0xfe5   : > { %8275 = vmatpush1.bf16.msra.mxu0 %v13571_v34  ;;  %8361 = vmatpush1.bf16.msra.mxu1 %v13573_v46  ;;  %v13667_v34 = vcombine.low %v5469_v2, %v5477_v37  ;;  %v13669_v46 = vcombine.low %v5470_v56, %v5478_v32  ;;  %v5565_v2 = vld [vmem:[%s16759_s0 + $0xf80] sm:$0xff]  ;;  %v5566_v56 = vld [vmem:[%s16759_s0 + $0xf88] sm:$0xff] }
 0xfe6   : > { %8276 = vmatprep.subr.bf16.mxu0 %v13588_v36  ;;  %8362 = vmatprep.subr.bf16.mxu1 %v13590_v1  ;;  %v13684_v36 = vcombine.high %v5485_v4, %v5493_v44  ;;  %v13686_v1 = vcombine.high %v5486_v60, %v5494_v18  ;;  %v5573_v37 = vld [vmem:[%s16759_s0 + $0xfc0] sm:$0xff]  ;;  %v5574_v32 = vld [vmem:[%s16759_s0 + $0xfc8] sm:$0xff] }
 0xfe9   : > { %8277 = vmatpush1.bf16.msra.mxu0 %v13587_v51  ;;  %8363 = vmatpush1.bf16.msra.mxu1 %v13589_v8  ;;  %v13683_v51 = vcombine.low %v5485_v4, %v5493_v44  ;;  %v13685_v8 = vcombine.low %v5486_v60, %v5494_v18  ;;  %v5071_v4 = vld [vmem:[%s16759_s0 + $0x10] sm:$0xff]  ;;  %v5072_v60 = vld [vmem:[%s16759_s0 + $0x18] sm:$0xff] }
 0xfea   : > { %8278 = vmatprep.subr.bf16.mxu0 %v13604_v45  ;;  %8364 = vmatprep.subr.bf16.mxu1 %v13606_v29  ;;  %v13700_v45 = vcombine.high %v5501_v25, %v5509_v43  ;;  %v13702_v29 = vcombine.high %v5502_v5, %v5510_v39  ;;  %v5079_v44 = vld [vmem:[%s16759_s0 + $0x50] sm:$0xff]  ;;  %v5080_v18 = vld [vmem:[%s16759_s0 + $0x58] sm:$0xff] }
 0xfed   : > { %8279 = vmatpush1.bf16.msra.mxu0 %v13603_v41  ;;  %8365 = vmatpush1.bf16.msra.mxu1 %v13605_v13  ;;  %v13699_v41 = vcombine.low %v5501_v25, %v5509_v43  ;;  %v13701_v13 = vcombine.low %v5502_v5, %v5510_v39  ;;  %v5087_v25 = vld [vmem:[%s16759_s0 + $0x90] sm:$0xff]  ;;  %v5088_v5 = vld [vmem:[%s16759_s0 + $0x98] sm:$0xff] }
 0xfee   : > { %8280 = vmatprep.subr.bf16.mxu0 %v13620_v47  ;;  %8366 = vmatprep.subr.bf16.mxu1 %v13622_v58  ;;  %v13716_v47 = vcombine.high %v5517_v10, %v5525_v26  ;;  %v13718_v58 = vcombine.high %v5518_v35, %v5526_v54  ;;  %v5095_v43 = vld [vmem:[%s16759_s0 + $0xd0] sm:$0xff]  ;;  %v5096_v39 = vld [vmem:[%s16759_s0 + $0xd8] sm:$0xff] }
 0xff1   : > { %8281 = vmatpush1.bf16.msra.mxu0 %v13619_v14  ;;  %8367 = vmatpush1.bf16.msra.mxu1 %v13621_v16  ;;  %v13715_v14 = vcombine.low %v5517_v10, %v5525_v26  ;;  %v13717_v16 = vcombine.low %v5518_v35, %v5526_v54  ;;  %v13290_v10 = vcombine.high %v5088_v5, %v5096_v39  ;;  %v5103_v26 = vld [vmem:[%s16759_s0 + $0x110] sm:$0xff]  ;;  %v5104_v54 = vld [vmem:[%s16759_s0 + $0x118] sm:$0xff] }
 0xff2   : > { %8282 = vmatprep.subr.bf16.mxu0 %v13636_v48  ;;  %8368 = vmatprep.subr.bf16.mxu1 %v13638_v15  ;;  %v13732_v48 = vcombine.high %v5533_v52, %v5541_v49  ;;  %v13734_v15 = vcombine.high %v5534_v62, %v5542_v28  ;;  %v5111_v35 = vld [vmem:[%s16759_s0 + $0x150] sm:$0xff] }
 0xff5   : > { %8283 = vmatpush1.bf16.msra.mxu0 %v13635_v61  ;;  %8369 = vmatpush1.bf16.msra.mxu1 %v13637_v19  ;;  %v13731_v61 = vcombine.low %v5533_v52, %v5541_v49  ;;  %v13733_v19 = vcombine.low %v5534_v62, %v5542_v28  ;;  %v5119_v49 = vld [vmem:[%s16759_s0 + $0x190] sm:$0xff]  ;;  %v5120_v28 = vld [vmem:[%s16759_s0 + $0x198] sm:$0xff] }
 0xff6   : > { %8284 = vmatprep.subr.bf16.mxu0 %v13652_v20  ;;  %8370 = vmatprep.subr.bf16.mxu1 %v13654_v63  ;;  %v13748_v20 = vcombine.high %v5549_v7, %v5557_v57  ;;  %v13750_v63 = vcombine.high %v5550_v23, %v5558_v27  ;;  %v5127_v62 = vld [vmem:[%s16759_s0 + $0x1d0] sm:$0xff] }
 0xff9   : > { %8285 = vmatpush1.bf16.msra.mxu0 %v13651_v6  ;;  %8371 = vmatpush1.bf16.msra.mxu1 %v13653_v55  ;;  %v13747_v6 = vcombine.low %v5549_v7, %v5557_v57  ;;  %v13749_v55 = vcombine.low %v5550_v23, %v5558_v27  ;;  %v5135_v57 = vld [vmem:[%s16759_s0 + $0x210] sm:$0xff]  ;;  %v5136_v27 = vld [vmem:[%s16759_s0 + $0x218] sm:$0xff] }
 0xffa   : > { %8286 = vmatprep.subr.bf16.mxu0 %v13668_v53  ;;  %8372 = vmatprep.subr.bf16.mxu1 %v13670_v3  ;;  %v13764_v53 = vcombine.high %v5565_v2, %v5573_v37  ;;  %v13766_v3 = vcombine.high %v5566_v56, %v5574_v32  ;;  %v5143_v23 = vld [vmem:[%s16759_s0 + $0x250] sm:$0xff] }
 0xffd   : > { %8287 = vmatpush1.bf16.msra.mxu0 %v13667_v34  ;;  %8373 = vmatpush1.bf16.msra.mxu1 %v13669_v46  ;;  %v13763_v34 = vcombine.low %v5565_v2, %v5573_v37  ;;  %v13765_v46 = vcombine.low %v5566_v56, %v5574_v32  ;;  %v5151_v37 = vld [vmem:[%s16759_s0 + $0x290] sm:$0xff]  ;;  %v5152_v32 = vld [vmem:[%s16759_s0 + $0x298] sm:$0xff] }
 0xffe   : > { %8288 = vmatprep.subr.bf16.mxu0 %v13684_v36  ;;  %8374 = vmatprep.subr.bf16.mxu1 %v13686_v1  ;;  %v13272_v36 = vcombine.high %v5071_v4, %v5079_v44  ;;  %v13274_v1 = vcombine.high %v5072_v60, %v5080_v18  ;;  %v5159_v56 = vld [vmem:[%s16759_s0 + $0x2d0] sm:$0xff] }
0x1001   : > { %8289 = vmatpush1.bf16.msra.mxu0 %v13683_v51  ;;  %8375 = vmatpush1.bf16.msra.mxu1 %v13685_v8  ;;  %v13271_v51 = vcombine.low %v5071_v4, %v5079_v44  ;;  %v18057_v8 = vpack.c.bf16 %v17958_v33, %v17949_v30  ;;  %v5167_v44 = vld [vmem:[%s16759_s0 + $0x310] sm:$0xff] }
0x1002   : > { %8290 = vmatprep.subr.bf16.mxu0 %v13700_v45  ;;  %8376 = vmatprep.subr.bf16.mxu1 %v13702_v29  ;;  %v13273_v45 = vcombine.low %v5072_v60, %v5080_v18  ;;  %v13288_v29 = vcombine.high %v5087_v25, %v5095_v43  ;;  %v5175_v60 = vld [vmem:[%s16759_s0 + $0x350] sm:$0xff]  ;;  %v5168_v18 = vld [vmem:[%s16759_s0 + $0x318] sm:$0xff] }
0x1005   : > { %8291 = vmatpush1.bf16.msra.mxu0 %v13699_v41  ;;  %8377 = vmatpush1.bf16.msra.mxu1 %v13701_v13  ;;  %v5112_v41 = vld [vmem:[%s16759_s0 + $0x158] sm:$0xff]  ;;  %v13287_v13 = vcombine.low %v5087_v25, %v5095_v43  ;;  %v5183_v43 = vld [vmem:[%s16759_s0 + $0x390] sm:$0xff] }
0x1006   : > { %8292 = vmatprep.subr.bf16.mxu0 %v13716_v47  ;;  %8378 = vmatprep.subr.bf16.mxu1 %v13718_v58  ;;  %v13289_v47 = vcombine.low %v5088_v5, %v5096_v39  ;;  %v13304_v58 = vcombine.high %v5103_v26, %v5111_v35  ;;  %v13306_v52 = vcombine.high %v5104_v54, %v5112_v41  ;;  %v5191_v5 = vld [vmem:[%s16759_s0 + $0x3d0] sm:$0xff]  ;;  %v5184_v39 = vld [vmem:[%s16759_s0 + $0x398] sm:$0xff] }
0x1009   : > { %8293 = vmatpush1.bf16.msra.mxu0 %v13715_v14  ;;  %8379 = vmatpush1.bf16.msra.mxu1 %v13717_v16  ;;  %v5128_v14 = vld [vmem:[%s16759_s0 + $0x1d8] sm:$0xff]  ;;  %v13303_v16 = vcombine.low %v5103_v26, %v5111_v35  ;;  %v5199_v35 = vld [vmem:[%s16759_s0 + $0x410] sm:$0xff] }
0x100a   : > { %8294 = vmatprep.subr.bf16.mxu0 %v13732_v48  ;;  %8380 = vmatprep.subr.bf16.mxu1 %v13734_v15  ;;  %v13305_v48 = vcombine.low %v5104_v54, %v5112_v41  ;;  %v13320_v15 = vcombine.high %v5119_v49, %v5127_v62  ;;  %v13322_v7 = vcombine.high %v5120_v28, %v5128_v14  ;;  %v5207_v54 = vld [vmem:[%s16759_s0 + $0x450] sm:$0xff]  ;;  %v5200_v41 = vld [vmem:[%s16759_s0 + $0x418] sm:$0xff] }
0x100d   : > { %8295 = vmatpush1.bf16.msra.mxu0 %v13731_v61  ;;  %8381 = vmatpush1.bf16.msra.mxu1 %v13733_v19  ;;  %v5144_v61 = vld [vmem:[%s16759_s0 + $0x258] sm:$0xff]  ;;  %v13319_v19 = vcombine.low %v5119_v49, %v5127_v62  ;;  %v5215_v62 = vld [vmem:[%s16759_s0 + $0x490] sm:$0xff] }
0x100e   : > { %8296 = vmatprep.subr.bf16.mxu0 %v13748_v20  ;;  %8382 = vmatprep.subr.bf16.mxu1 %v13750_v63  ;;  %v13321_v20 = vcombine.low %v5120_v28, %v5128_v14  ;;  %v13336_v63 = vcombine.high %v5135_v57, %v5143_v23  ;;  %v13338_v2 = vcombine.high %v5136_v27, %v5144_v61  ;;  %v5223_v28 = vld [vmem:[%s16759_s0 + $0x4d0] sm:$0xff]  ;;  %v5216_v14 = vld [vmem:[%s16759_s0 + $0x498] sm:$0xff] }
0x1011   : > { %8297 = vmatpush1.bf16.msra.mxu0 %v13747_v6  ;;  %8383 = vmatpush1.bf16.msra.mxu1 %v13749_v55  ;;  %v5160_v6 = vld [vmem:[%s16759_s0 + $0x2d8] sm:$0xff]  ;;  %v13335_v55 = vcombine.low %v5135_v57, %v5143_v23  ;;  %v5231_v23 = vld [vmem:[%s16759_s0 + $0x510] sm:$0xff] }
0x1012   : > { %8298 = vmatprep.subr.bf16.mxu0 %v13764_v53  ;;  %8384 = vmatprep.subr.bf16.mxu1 %v13766_v3  ;;  %v13337_v53 = vcombine.low %v5136_v27, %v5144_v61  ;;  %v13352_v3 = vcombine.high %v5151_v37, %v5159_v56  ;;  %v13354_v4 = vcombine.high %v5152_v32, %v5160_v6  ;;  %v5239_v27 = vld [vmem:[%s16759_s0 + $0x550] sm:$0xff]  ;;  %v5232_v61 = vld [vmem:[%s16759_s0 + $0x518] sm:$0xff] }
0x1015   : > { %8299 = vmatpush1.bf16.msra.mxu0 %v13763_v34  ;;  %8385 = vmatpush1.bf16.msra.mxu1 %v13765_v46  ;;  %v5176_v34 = vld [vmem:[%s16759_s0 + $0x358] sm:$0xff]  ;;  %v13351_v46 = vcombine.low %v5151_v37, %v5159_v56  ;;  %v5247_v56 = vld [vmem:[%s16759_s0 + $0x590] sm:$0xff] }
0x1016   : > { %8397 = vmatprep.subr.bf16.mxu0 %v13272_v36  ;;  %8483 = vmatprep.subr.bf16.mxu1 %v13274_v1  ;;  %v13353_v36 = vcombine.low %v5152_v32, %v5160_v6  ;;  %v13368_v1 = vcombine.high %v5167_v44, %v5175_v60  ;;  %v13370_v25 = vcombine.high %v5168_v18, %v5176_v34  ;;  %v5255_v32 = vld [vmem:[%s16759_s0 + $0x5d0] sm:$0xff]  ;;  %v5248_v6 = vld [vmem:[%s16759_s0 + $0x598] sm:$0xff] }
0x1018   : > { %8301 = vmatmul.mubr.bf16.vlgmr.msra.gmra.mrb[24].mxu0 %v18057_v8  ;;  %8387 = vmatmul.mubr.bf16.vlgmr.msra.gmra.mrb[60].mxu1 %v18057_v8 }
0x1019   : > { %8398 = vmatpush1.bf16.msra.mxu0 %v13271_v51  ;;  %8429 = vmatprep.mubr.bf16.mxu0 %v17967_v31  ;;  %v5192_v51 = vld [vmem:[%s16759_s0 + $0x3d8] sm:$0xff] }
0x101a   : > { %8484 = vmatpush1.bf16.msra.mxu1 %v13273_v45  ;;  %8515 = vmatprep.mubr.bf16.mxu1 %v17967_v31  ;;  %v13367_v45 = vcombine.low %v5167_v44, %v5175_v60  ;;  %v13386_v26 = vcombine.high %v5184_v39, %v5192_v51  ;;  %v5263_v60 = vld [vmem:[%s16759_s0 + $0x610] sm:$0xff] }
0x101b   : > { %8399 = vmatprep.subr.bf16.mxu0 %v13288_v29  ;;  %8485 = vmatprep.subr.bf16.mxu1 %v13290_v10  ;;  %v13369_v29 = vcombine.low %v5168_v18, %v5176_v34  ;;  %v13384_v10 = vcombine.high %v5183_v43, %v5191_v5  ;;  %v5271_v18 = vld [vmem:[%s16759_s0 + $0x650] sm:$0xff]  ;;  %v5264_v34 = vld [vmem:[%s16759_s0 + $0x618] sm:$0xff] }
0x101d   : > { %8400 = vmatpush1.bf16.msra.mxu0 %v13287_v13  ;;  %v5208_v13 = vld [vmem:[%s16759_s0 + $0x458] sm:$0xff] }
0x101e   : > { %8486 = vmatpush1.bf16.msra.mxu1 %v13289_v47  ;;  %8401 = vmatprep.subr.bf16.mxu0 %v13304_v58  ;;  %v13383_v47 = vcombine.low %v5183_v43, %v5191_v5  ;;  %v13385_v58 = vcombine.low %v5184_v39, %v5192_v51  ;;  %v13402_v49 = vcombine.high %v5200_v41, %v5208_v13  ;;  %v5279_v5 = vld [vmem:[%s16759_s0 + $0x690] sm:$0xff]  ;;  %v5280_v51 = vld [vmem:[%s16759_s0 + $0x698] sm:$0xff] }
0x101f   : > { %8487 = vmatprep.subr.bf16.mxu1 %v13306_v52  ;;  %v13400_v52 = vcombine.high %v5199_v35, %v5207_v54  ;;  %v5287_v39 = vld [vmem:[%s16759_s0 + $0x6d0] sm:$0xff] }
0x1021   : > { %8402 = vmatpush1.bf16.msra.mxu0 %v13303_v16  ;;  %v5224_v16 = vld [vmem:[%s16759_s0 + $0x4d8] sm:$0xff] }
0x1022   : > { %8488 = vmatpush1.bf16.msra.mxu1 %v13305_v48  ;;  %8403 = vmatprep.subr.bf16.mxu0 %v13320_v15  ;;  %v13399_v48 = vcombine.low %v5199_v35, %v5207_v54  ;;  %v13401_v15 = vcombine.low %v5200_v41, %v5208_v13  ;;  %v13418_v57 = vcombine.high %v5216_v14, %v5224_v16  ;;  %v5295_v54 = vld [vmem:[%s16759_s0 + $0x710] sm:$0xff]  ;;  %v5296_v13 = vld [vmem:[%s16759_s0 + $0x718] sm:$0xff] }
0x1023   : > { %8489 = vmatprep.subr.bf16.mxu1 %v13322_v7  ;;  %v13416_v7 = vcombine.high %v5215_v62, %v5223_v28  ;;  %v5303_v41 = vld [vmem:[%s16759_s0 + $0x750] sm:$0xff] }
0x1025   : > { %8404 = vmatpush1.bf16.msra.mxu0 %v13319_v19  ;;  %v5240_v19 = vld [vmem:[%s16759_s0 + $0x558] sm:$0xff] }
0x1026   : > { %8490 = vmatpush1.bf16.msra.mxu1 %v13321_v20  ;;  %8405 = vmatprep.subr.bf16.mxu0 %v13336_v63  ;;  %v13415_v20 = vcombine.low %v5215_v62, %v5223_v28  ;;  %v13417_v63 = vcombine.low %v5216_v14, %v5224_v16  ;;  %v13434_v37 = vcombine.high %v5232_v61, %v5240_v19  ;;  %v5311_v28 = vld [vmem:[%s16759_s0 + $0x790] sm:$0xff]  ;;  %v5312_v16 = vld [vmem:[%s16759_s0 + $0x798] sm:$0xff] }
0x1027   : > { %8491 = vmatprep.subr.bf16.mxu1 %v13338_v2  ;;  %v13432_v2 = vcombine.high %v5231_v23, %v5239_v27  ;;  %v5319_v14 = vld [vmem:[%s16759_s0 + $0x7d0] sm:$0xff] }
0x1029   : > { %8406 = vmatpush1.bf16.msra.mxu0 %v13335_v55  ;;  %v5256_v55 = vld [vmem:[%s16759_s0 + $0x5d8] sm:$0xff] }
0x102a   : > { %8492 = vmatpush1.bf16.msra.mxu1 %v13337_v53  ;;  %8407 = vmatprep.subr.bf16.mxu0 %v13352_v3  ;;  %v13431_v53 = vcombine.low %v5231_v23, %v5239_v27  ;;  %v13433_v3 = vcombine.low %v5232_v61, %v5240_v19  ;;  %v13450_v44 = vcombine.high %v5248_v6, %v5256_v55  ;;  %v5327_v27 = vld [vmem:[%s16759_s0 + $0x810] sm:$0xff]  ;;  %v5328_v19 = vld [vmem:[%s16759_s0 + $0x818] sm:$0xff] }
0x102b   : > { %8493 = vmatprep.subr.bf16.mxu1 %v13354_v4  ;;  %v13448_v4 = vcombine.high %v5247_v56, %v5255_v32  ;;  %v5335_v61 = vld [vmem:[%s16759_s0 + $0x850] sm:$0xff] }
0x102d   : > { %8408 = vmatpush1.bf16.msra.mxu0 %v13351_v46  ;;  %v5272_v46 = vld [vmem:[%s16759_s0 + $0x658] sm:$0xff] }
0x102e   : > { %8494 = vmatpush1.bf16.msra.mxu1 %v13353_v36  ;;  %8409 = vmatprep.subr.bf16.mxu0 %v13368_v1  ;;  %v13447_v36 = vcombine.low %v5247_v56, %v5255_v32  ;;  %v13449_v1 = vcombine.low %v5248_v6, %v5256_v55  ;;  %v13466_v43 = vcombine.high %v5264_v34, %v5272_v46  ;;  %v5343_v32 = vld [vmem:[%s16759_s0 + $0x890] sm:$0xff] }
0x102f   : > { %8495 = vmatprep.subr.bf16.mxu1 %v13370_v25  ;;  %v13464_v25 = vcombine.high %v5263_v60, %v5271_v18  ;;  %v5351_v6 = vld [vmem:[%s16759_s0 + $0x8d0] sm:$0xff]  ;;  %v13527_v55 = vcombine.low %v5327_v27, %v5335_v61 }
0x1031   : > { %8410 = vmatpush1.bf16.msra.mxu0 %v13367_v45  ;;  %v5288_v45 = vld [vmem:[%s16759_s0 + $0x6d8] sm:$0xff] }
0x1032   : > { %8496 = vmatpush1.bf16.msra.mxu1 %v13369_v29  ;;  %8411 = vmatprep.subr.bf16.mxu0 %v13384_v10  ;;  %v13463_v29 = vcombine.low %v5263_v60, %v5271_v18  ;;  %v13465_v10 = vcombine.low %v5264_v34, %v5272_v46  ;;  %v13482_v35 = vcombine.high %v5280_v51, %v5288_v45  ;;  %v5359_v60 = vld [vmem:[%s16759_s0 + $0x910] sm:$0xff]  ;;  %v5360_v46 = vld [vmem:[%s16759_s0 + $0x918] sm:$0xff] }
0x1033   : > { %8497 = vmatprep.subr.bf16.mxu1 %v13386_v26  ;;  %v13480_v26 = vcombine.high %v5279_v5, %v5287_v39  ;;  %v5367_v18 = vld [vmem:[%s16759_s0 + $0x950] sm:$0xff] }
0x1035   : > { %8412 = vmatpush1.bf16.msra.mxu0 %v13383_v47  ;;  %v5304_v47 = vld [vmem:[%s16759_s0 + $0x758] sm:$0xff] }
0x1036   : > { %8498 = vmatpush1.bf16.msra.mxu1 %v13385_v58  ;;  %8413 = vmatprep.subr.bf16.mxu0 %v13400_v52  ;;  %v13479_v58 = vcombine.low %v5279_v5, %v5287_v39  ;;  %v13481_v52 = vcombine.low %v5280_v51, %v5288_v45  ;;  %v13498_v62 = vcombine.high %v5296_v13, %v5304_v47  ;;  %v5375_v39 = vld [vmem:[%s16759_s0 + $0x990] sm:$0xff]  ;;  %v5376_v45 = vld [vmem:[%s16759_s0 + $0x998] sm:$0xff] }
0x1037   : > { %8499 = vmatprep.subr.bf16.mxu1 %v13402_v49  ;;  %v13496_v49 = vcombine.high %v5295_v54, %v5303_v41  ;;  %v5383_v51 = vld [vmem:[%s16759_s0 + $0x9d0] sm:$0xff] }
0x1039   : > { %8414 = vmatpush1.bf16.msra.mxu0 %v13399_v48  ;;  %v5320_v48 = vld [vmem:[%s16759_s0 + $0x7d8] sm:$0xff] }
0x103a   : > { %8500 = vmatpush1.bf16.msra.mxu1 %v13401_v15  ;;  %8415 = vmatprep.subr.bf16.mxu0 %v13416_v7  ;;  %v13495_v15 = vcombine.low %v5295_v54, %v5303_v41  ;;  %v13497_v7 = vcombine.low %v5296_v13, %v5304_v47  ;;  %v13514_v23 = vcombine.high %v5312_v16, %v5320_v48  ;;  %v5391_v41 = vld [vmem:[%s16759_s0 + $0xa10] sm:$0xff]  ;;  %v5392_v47 = vld [vmem:[%s16759_s0 + $0xa18] sm:$0xff] }
0x103b   : > { %8501 = vmatprep.subr.bf16.mxu1 %v13418_v57  ;;  %v13512_v57 = vcombine.high %v5311_v28, %v5319_v14  ;;  %v5399_v13 = vld [vmem:[%s16759_s0 + $0xa50] sm:$0xff] }
0x103d   : > { %8416 = vmatpush1.bf16.msra.mxu0 %v13415_v20  ;;  %v5336_v20 = vld [vmem:[%s16759_s0 + $0x858] sm:$0xff] }
0x103e   : > { %8502 = vmatpush1.bf16.msra.mxu1 %v13417_v63  ;;  %8417 = vmatprep.subr.bf16.mxu0 %v13432_v2  ;;  %v13511_v63 = vcombine.low %v5311_v28, %v5319_v14  ;;  %v13513_v2 = vcombine.low %v5312_v16, %v5320_v48  ;;  %v13530_v56 = vcombine.high %v5328_v19, %v5336_v20  ;;  %v5407_v14 = vld [vmem:[%s16759_s0 + $0xa90] sm:$0xff]  ;;  %v5408_v48 = vld [vmem:[%s16759_s0 + $0xa98] sm:$0xff] }
0x103f   : > { %8503 = vmatprep.subr.bf16.mxu1 %v13434_v37  ;;  %v13528_v37 = vcombine.high %v5327_v27, %v5335_v61  ;;  %v5415_v16 = vld [vmem:[%s16759_s0 + $0xad0] sm:$0xff] }
0x1040   : > { %v5423_v61 = vld [vmem:[%s16759_s0 + $0xb10] sm:$0xff] }
0x1041   : > { %8418 = vmatpush1.bf16.msra.mxu0 %v13431_v53  ;;  %v5344_v53 = vld [vmem:[%s16759_s0 + $0x898] sm:$0xff] }
0x1042   : > { %8504 = vmatpush1.bf16.msra.mxu1 %v13433_v3  ;;  %8419 = vmatprep.subr.bf16.mxu0 %v13448_v4  ;;  %v5352_v3 = vld [vmem:[%s16759_s0 + $0x8d8] sm:$0xff]  ;;  %v13529_v4 = vcombine.low %v5328_v19, %v5336_v20  ;;  %v5431_v19 = vld [vmem:[%s16759_s0 + $0xb50] sm:$0xff] }
0x1043   : > { %8505 = vmatprep.subr.bf16.mxu1 %v13450_v44  ;;  %v13544_v44 = vcombine.high %v5343_v32, %v5351_v6  ;;  %v13546_v34 = vcombine.high %v5344_v53, %v5352_v3  ;;  %v5424_v20 = vld [vmem:[%s16759_s0 + $0xb18] sm:$0xff] }
0x1045   : > { %8420 = vmatpush1.bf16.msra.mxu0 %v13447_v36  ;;  %v5368_v36 = vld [vmem:[%s16759_s0 + $0x958] sm:$0xff] }
0x1046   : > { %8506 = vmatpush1.bf16.msra.mxu1 %v13449_v1  ;;  %8421 = vmatprep.subr.bf16.mxu0 %v13464_v25  ;;  %v13543_v1 = vcombine.low %v5343_v32, %v5351_v6  ;;  %v13545_v25 = vcombine.low %v5344_v53, %v5352_v3  ;;  %v13562_v5 = vcombine.high %v5360_v46, %v5368_v36  ;;  %v5439_v6 = vld [vmem:[%s16759_s0 + $0xb90] sm:$0xff]  ;;  %v5440_v53 = vld [vmem:[%s16759_s0 + $0xb98] sm:$0xff] }
0x1047   : > { %8507 = vmatprep.subr.bf16.mxu1 %v13466_v43  ;;  %v13560_v43 = vcombine.high %v5359_v60, %v5367_v18  ;;  %v5448_v3 = vld [vmem:[%s16759_s0 + $0xbd8] sm:$0xff] }
0x1049   : > { %8422 = vmatpush1.bf16.msra.mxu0 %v13463_v29  ;;  %v5384_v29 = vld [vmem:[%s16759_s0 + $0x9d8] sm:$0xff] }
0x104a   : > { %8508 = vmatpush1.bf16.msra.mxu1 %v13465_v10  ;;  %8423 = vmatprep.subr.bf16.mxu0 %v13480_v26  ;;  %v13559_v10 = vcombine.low %v5359_v60, %v5367_v18  ;;  %v13561_v26 = vcombine.low %v5360_v46, %v5368_v36  ;;  %v13578_v54 = vcombine.high %v5376_v45, %v5384_v29  ;;  %v5463_v46 = vld [vmem:[%s16759_s0 + $0xc50] sm:$0xff]  ;;  %v5456_v36 = vld [vmem:[%s16759_s0 + $0xc18] sm:$0xff] }
0x104b   : > { %8509 = vmatprep.subr.bf16.mxu1 %v13482_v35  ;;  %v13576_v35 = vcombine.high %v5375_v39, %v5383_v51  ;;  %v13642_v18 = vcombine.high %v5440_v53, %v5448_v3 }
0x104d   : > { %8424 = vmatpush1.bf16.msra.mxu0 %v13479_v58  ;;  %v5400_v58 = vld [vmem:[%s16759_s0 + $0xa58] sm:$0xff] }
0x104e   : > { %8510 = vmatpush1.bf16.msra.mxu1 %v13481_v52  ;;  %8425 = vmatprep.subr.bf16.mxu0 %v13496_v49  ;;  %v13575_v52 = vcombine.low %v5375_v39, %v5383_v51  ;;  %v13577_v49 = vcombine.low %v5376_v45, %v5384_v29  ;;  %v13594_v28 = vcombine.high %v5392_v47, %v5400_v58  ;;  %v5471_v51 = vld [vmem:[%s16759_s0 + $0xc90] sm:$0xff]  ;;  %v5472_v29 = vld [vmem:[%s16759_s0 + $0xc98] sm:$0xff] }
0x104f   : > { %8511 = vmatprep.subr.bf16.mxu1 %v13498_v62  ;;  %v13592_v62 = vcombine.high %v5391_v41, %v5399_v13  ;;  %v5479_v45 = vld [vmem:[%s16759_s0 + $0xcd0] sm:$0xff] }
0x1051   : > { %8426 = vmatpush1.bf16.msra.mxu0 %v13495_v15  ;;  %v5416_v15 = vld [vmem:[%s16759_s0 + $0xad8] sm:$0xff] }
0x1052   : > { %8512 = vmatpush1.bf16.msra.mxu1 %v13497_v7  ;;  %8427 = vmatprep.subr.bf16.mxu0 %v13512_v57  ;;  %v13591_v7 = vcombine.low %v5391_v41, %v5399_v13  ;;  %v13593_v57 = vcombine.low %v5392_v47, %v5400_v58  ;;  %v13610_v27 = vcombine.high %v5408_v48, %v5416_v15  ;;  %v5487_v13 = vld [vmem:[%s16759_s0 + $0xd10] sm:$0xff]  ;;  %v5488_v58 = vld [vmem:[%s16759_s0 + $0xd18] sm:$0xff] }
0x1053   : > { %8513 = vmatprep.subr.bf16.mxu1 %v13514_v23  ;;  %v13608_v23 = vcombine.high %v5407_v14, %v5415_v16  ;;  %v5495_v47 = vld [vmem:[%s16759_s0 + $0xd50] sm:$0xff] }
0x1055   : > { %8428 = vmatpush1.bf16.msra.mxu0 %v13511_v63  ;;  %v5432_v63 = vld [vmem:[%s16759_s0 + $0xb58] sm:$0xff] }
0x1056   : > { %8514 = vmatpush1.bf16.msra.mxu1 %v13513_v2  ;;  %8440 = vmatprep.subr.bf16.mxu0 %v13528_v37  ;;  %v13607_v2 = vcombine.low %v5407_v14, %v5415_v16  ;;  %v13609_v37 = vcombine.low %v5408_v48, %v5416_v15  ;;  %v13626_v32 = vcombine.high %v5424_v20, %v5432_v63  ;;  %v5503_v16 = vld [vmem:[%s16759_s0 + $0xd90] sm:$0xff]  ;;  %v5504_v15 = vld [vmem:[%s16759_s0 + $0xd98] sm:$0xff] }
0x1057   : > { %8526 = vmatprep.subr.bf16.mxu1 %v13530_v56  ;;  %v13624_v56 = vcombine.high %v5423_v61, %v5431_v19  ;;  %v5511_v48 = vld [vmem:[%s16759_s0 + $0xdd0] sm:$0xff] }
0x1058   : > { %8430 = vmatmul.mubr.bf16.vlgmr.msra.gmra.mrb[28].mxu0 %v17971_v38 }
0x1059   : > { %8516 = vmatmul.mubr.bf16.vlgmr.msra.gmra.mrb[64].mxu1 %v17971_v38  ;;  %8441 = vmatpush1.bf16.msra.mxu0 %v13527_v55  ;;  %v5447_v55 = vld [vmem:[%s16759_s0 + $0xbd0] sm:$0xff] }
0x105a   : > { %8472 = vmatprep.mubr.bf16.mxu0 %v17985_v42  ;;  %8527 = vmatpush1.bf16.msra.mxu1 %v13529_v4  ;;  %v13623_v4 = vcombine.low %v5423_v61, %v5431_v19  ;;  %v13640_v60 = vcombine.high %v5439_v6, %v5447_v55  ;;  %v5519_v19 = vld [vmem:[%s16759_s0 + $0xe10] sm:$0xff] }
0x105b   : > { %8558 = vmatprep.mubr.bf16.mxu1 %v17985_v42  ;;  %8442 = vmatprep.subr.bf16.mxu0 %v13544_v44  ;;  %v13625_v44 = vcombine.low %v5424_v20, %v5432_v63  ;;  %v5527_v20 = vld [vmem:[%s16759_s0 + $0xe50] sm:$0xff]  ;;  %v5520_v63 = vld [vmem:[%s16759_s0 + $0xe18] sm:$0xff] }
0x105c   : > { %8528 = vmatprep.subr.bf16.mxu1 %v13546_v34  ;;  %v5455_v34 = vld [vmem:[%s16759_s0 + $0xc10] sm:$0xff] }
0x105d   : > { %8443 = vmatpush1.bf16.msra.mxu0 %v13543_v1  ;;  %v5464_v1 = vld [vmem:[%s16759_s0 + $0xc58] sm:$0xff] }
0x105e   : > { %8529 = vmatpush1.bf16.msra.mxu1 %v13545_v25  ;;  %8444 = vmatprep.subr.bf16.mxu0 %v13560_v43  ;;  %v13639_v25 = vcombine.low %v5439_v6, %v5447_v55  ;;  %v13641_v43 = vcombine.low %v5440_v53, %v5448_v3  ;;  %v13658_v39 = vcombine.high %v5456_v36, %v5464_v1  ;;  %v5535_v55 = vld [vmem:[%s16759_s0 + $0xe90] sm:$0xff]  ;;  %v5536_v3 = vld [vmem:[%s16759_s0 + $0xe98] sm:$0xff] }
0x105f   : > { %8530 = vmatprep.subr.bf16.mxu1 %v13562_v5  ;;  %v13656_v5 = vcombine.high %v5455_v34, %v5463_v46  ;;  %v5543_v53 = vld [vmem:[%s16759_s0 + $0xed0] sm:$0xff] }
0x1061   : > { %8445 = vmatpush1.bf16.msra.mxu0 %v13559_v10  ;;  %v5480_v10 = vld [vmem:[%s16759_s0 + $0xcd8] sm:$0xff] }
0x1062   : > { %8531 = vmatpush1.bf16.msra.mxu1 %v13561_v26  ;;  %8446 = vmatprep.subr.bf16.mxu0 %v13576_v35  ;;  %v13655_v26 = vcombine.low %v5455_v34, %v5463_v46  ;;  %v13657_v35 = vcombine.low %v5456_v36, %v5464_v1  ;;  %v13674_v41 = vcombine.high %v5472_v29, %v5480_v10  ;;  %v5551_v46 = vld [vmem:[%s16759_s0 + $0xf10] sm:$0xff]  ;;  %v5552_v1 = vld [vmem:[%s16759_s0 + $0xf18] sm:$0xff] }
0x1063   : > { %8532 = vmatprep.subr.bf16.mxu1 %v13578_v54  ;;  %v13672_v54 = vcombine.high %v5471_v51, %v5479_v45  ;;  %v5559_v36 = vld [vmem:[%s16759_s0 + $0xf50] sm:$0xff] }
0x1065   : > { %8447 = vmatpush1.bf16.msra.mxu0 %v13575_v52  ;;  %v5496_v52 = vld [vmem:[%s16759_s0 + $0xd58] sm:$0xff] }
0x1066   : > { %8533 = vmatpush1.bf16.msra.mxu1 %v13577_v49  ;;  %8448 = vmatprep.subr.bf16.mxu0 %v13592_v62  ;;  %v13671_v49 = vcombine.low %v5471_v51, %v5479_v45  ;;  %v13673_v62 = vcombine.low %v5472_v29, %v5480_v10  ;;  %v13690_v14 = vcombine.high %v5488_v58, %v5496_v52  ;;  %v5567_v45 = vld [vmem:[%s16759_s0 + $0xf90] sm:$0xff]  ;;  %v5568_v10 = vld [vmem:[%s16759_s0 + $0xf98] sm:$0xff] }
0x1067   : > { %8534 = vmatprep.subr.bf16.mxu1 %v13594_v28  ;;  %v13688_v28 = vcombine.high %v5487_v13, %v5495_v47  ;;  %v5575_v29 = vld [vmem:[%s16759_s0 + $0xfd0] sm:$0xff] }
0x1069   : > { %8449 = vmatpush1.bf16.msra.mxu0 %v13591_v7  ;;  %v5512_v7 = vld [vmem:[%s16759_s0 + $0xdd8] sm:$0xff] }
0x106a   : > { %8535 = vmatpush1.bf16.msra.mxu1 %v13593_v57  ;;  %8450 = vmatprep.subr.bf16.mxu0 %v13608_v23  ;;  %v13687_v57 = vcombine.low %v5487_v13, %v5495_v47  ;;  %v13689_v23 = vcombine.low %v5488_v58, %v5496_v52  ;;  %v13706_v61 = vcombine.high %v5504_v15, %v5512_v7  ;;  %v5073_v47 = vld [vmem:[%s16759_s0 + $0x20] sm:$0xff]  ;;  %v5074_v52 = vld [vmem:[%s16759_s0 + $0x28] sm:$0xff] }
0x106b   : > { %8536 = vmatprep.subr.bf16.mxu1 %v13610_v27  ;;  %v13704_v27 = vcombine.high %v5503_v16, %v5511_v48  ;;  %v5081_v58 = vld [vmem:[%s16759_s0 + $0x60] sm:$0xff] }
0x106d   : > { %8451 = vmatpush1.bf16.msra.mxu0 %v13607_v2  ;;  %v5528_v2 = vld [vmem:[%s16759_s0 + $0xe58] sm:$0xff] }
0x106e   : > { %8537 = vmatpush1.bf16.msra.mxu1 %v13609_v37  ;;  %8452 = vmatprep.subr.bf16.mxu0 %v13624_v56  ;;  %v13703_v37 = vcombine.low %v5503_v16, %v5511_v48  ;;  %v13705_v56 = vcombine.low %v5504_v15, %v5512_v7  ;;  %v13722_v6 = vcombine.high %v5520_v63, %v5528_v2  ;;  %v5089_v48 = vld [vmem:[%s16759_s0 + $0xa0] sm:$0xff] }
0x106f   : > { %8538 = vmatprep.subr.bf16.mxu1 %v13626_v32  ;;  %v13720_v32 = vcombine.high %v5519_v19, %v5527_v20  ;;  %v5097_v15 = vld [vmem:[%s16759_s0 + $0xe0] sm:$0xff]  ;;  %v13275_v7 = vcombine.low %v5073_v47, %v5081_v58 }
0x1071   : > { %8453 = vmatpush1.bf16.msra.mxu0 %v13623_v4  ;;  %v5544_v4 = vld [vmem:[%s16759_s0 + $0xed8] sm:$0xff] }
0x1072   : > { %8539 = vmatpush1.bf16.msra.mxu1 %v13625_v44  ;;  %8454 = vmatprep.subr.bf16.mxu0 %v13640_v60  ;;  %v13719_v44 = vcombine.low %v5519_v19, %v5527_v20  ;;  %v13721_v60 = vcombine.low %v5520_v63, %v5528_v2  ;;  %v13738_v34 = vcombine.high %v5536_v3, %v5544_v4  ;;  %v5105_v19 = vld [vmem:[%s16759_s0 + $0x120] sm:$0xff]  ;;  %v5106_v2 = vld [vmem:[%s16759_s0 + $0x128] sm:$0xff] }
0x1073   : > { %8540 = vmatprep.subr.bf16.mxu1 %v13642_v18  ;;  %v13736_v18 = vcombine.high %v5535_v55, %v5543_v53  ;;  %v5113_v20 = vld [vmem:[%s16759_s0 + $0x160] sm:$0xff] }
0x1075   : > { %8455 = vmatpush1.bf16.msra.mxu0 %v13639_v25  ;;  %v5560_v25 = vld [vmem:[%s16759_s0 + $0xf58] sm:$0xff] }
0x1076   : > { %8541 = vmatpush1.bf16.msra.mxu1 %v13641_v43  ;;  %8456 = vmatprep.subr.bf16.mxu0 %v13656_v5  ;;  %v13735_v43 = vcombine.low %v5535_v55, %v5543_v53  ;;  %v13737_v5 = vcombine.low %v5536_v3, %v5544_v4  ;;  %v13754_v51 = vcombine.high %v5552_v1, %v5560_v25  ;;  %v5121_v53 = vld [vmem:[%s16759_s0 + $0x1a0] sm:$0xff]  ;;  %v5122_v4 = vld [vmem:[%s16759_s0 + $0x1a8] sm:$0xff] }
0x1077   : > { %8542 = vmatprep.subr.bf16.mxu1 %v13658_v39  ;;  %v13752_v39 = vcombine.high %v5551_v46, %v5559_v36  ;;  %v5129_v3 = vld [vmem:[%s16759_s0 + $0x1e0] sm:$0xff] }
0x1079   : > { %8457 = vmatpush1.bf16.msra.mxu0 %v13655_v26  ;;  %v5576_v26 = vld [vmem:[%s16759_s0 + $0xfd8] sm:$0xff] }
0x107a   : > { %8543 = vmatpush1.bf16.msra.mxu1 %v13657_v35  ;;  %8458 = vmatprep.subr.bf16.mxu0 %v13672_v54  ;;  %v13751_v35 = vcombine.low %v5551_v46, %v5559_v36  ;;  %v13753_v54 = vcombine.low %v5552_v1, %v5560_v25  ;;  %v13770_v13 = vcombine.high %v5568_v10, %v5576_v26  ;;  %v5137_v36 = vld [vmem:[%s16759_s0 + $0x220] sm:$0xff]  ;;  %v5138_v25 = vld [vmem:[%s16759_s0 + $0x228] sm:$0xff] }
0x107b   : > { %8544 = vmatprep.subr.bf16.mxu1 %v13674_v41  ;;  %v13768_v41 = vcombine.high %v5567_v45, %v5575_v29  ;;  %v5145_v1 = vld [vmem:[%s16759_s0 + $0x260] sm:$0xff] }
0x107d   : > { %8459 = vmatpush1.bf16.msra.mxu0 %v13671_v49  ;;  %v5082_v49 = vld [vmem:[%s16759_s0 + $0x68] sm:$0xff] }
0x107e   : > { %8545 = vmatpush1.bf16.msra.mxu1 %v13673_v62  ;;  %8460 = vmatprep.subr.bf16.mxu0 %v13688_v28  ;;  %v13767_v62 = vcombine.low %v5567_v45, %v5575_v29  ;;  %v13769_v28 = vcombine.low %v5568_v10, %v5576_v26  ;;  %v13278_v16 = vcombine.high %v5074_v52, %v5082_v49  ;;  %v5153_v29 = vld [vmem:[%s16759_s0 + $0x2a0] sm:$0xff]  ;;  %v5154_v26 = vld [vmem:[%s16759_s0 + $0x2a8] sm:$0xff] }
0x107f   : > { %8546 = vmatprep.subr.bf16.mxu1 %v13690_v14  ;;  %v13276_v14 = vcombine.high %v5073_v47, %v5081_v58  ;;  %v5161_v10 = vld [vmem:[%s16759_s0 + $0x2e0] sm:$0xff] }
0x1080   : > { %v5169_v58 = vld [vmem:[%s16759_s0 + $0x320] sm:$0xff] }
0x1081   : > { %8461 = vmatpush1.bf16.msra.mxu0 %v13687_v57  ;;  %v5090_v57 = vld [vmem:[%s16759_s0 + $0xa8] sm:$0xff] }
0x1082   : > { %8547 = vmatpush1.bf16.msra.mxu1 %v13689_v23  ;;  %8462 = vmatprep.subr.bf16.mxu0 %v13704_v27  ;;  %v5098_v23 = vld [vmem:[%s16759_s0 + $0xe8] sm:$0xff]  ;;  %v13277_v27 = vcombine.low %v5074_v52, %v5082_v49  ;;  %v5177_v52 = vld [vmem:[%s16759_s0 + $0x360] sm:$0xff] }
0x1083   : > { %8548 = vmatprep.subr.bf16.mxu1 %v13706_v61  ;;  %v13292_v61 = vcombine.high %v5089_v48, %v5097_v15  ;;  %v13294_v63 = vcombine.high %v5090_v57, %v5098_v23  ;;  %v5170_v49 = vld [vmem:[%s16759_s0 + $0x328] sm:$0xff] }
0x1085   : > { %8463 = vmatpush1.bf16.msra.mxu0 %v13703_v37  ;;  %v5114_v37 = vld [vmem:[%s16759_s0 + $0x168] sm:$0xff] }
0x1086   : > { %8549 = vmatpush1.bf16.msra.mxu1 %v13705_v56  ;;  %8464 = vmatprep.subr.bf16.mxu0 %v13720_v32  ;;  %v13291_v56 = vcombine.low %v5089_v48, %v5097_v15  ;;  %v13293_v32 = vcombine.low %v5090_v57, %v5098_v23  ;;  %v13310_v55 = vcombine.high %v5106_v2, %v5114_v37  ;;  %v5185_v15 = vld [vmem:[%s16759_s0 + $0x3a0] sm:$0xff]  ;;  %v5186_v57 = vld [vmem:[%s16759_s0 + $0x3a8] sm:$0xff] }
0x1087   : > { %8550 = vmatprep.subr.bf16.mxu1 %v13722_v6  ;;  %v13308_v6 = vcombine.high %v5105_v19, %v5113_v20  ;;  %v5194_v23 = vld [vmem:[%s16759_s0 + $0x3e8] sm:$0xff] }
0x1089   : > { %8465 = vmatpush1.bf16.msra.mxu0 %v13719_v44  ;;  %v5130_v44 = vld [vmem:[%s16759_s0 + $0x1e8] sm:$0xff] }
0x108a   : > { %8551 = vmatpush1.bf16.msra.mxu1 %v13721_v60  ;;  %8466 = vmatprep.subr.bf16.mxu0 %v13736_v18  ;;  %v13307_v60 = vcombine.low %v5105_v19, %v5113_v20  ;;  %v13309_v18 = vcombine.low %v5106_v2, %v5114_v37  ;;  %v13326_v46 = vcombine.high %v5122_v4, %v5130_v44  ;;  %v5209_v2 = vld [vmem:[%s16759_s0 + $0x460] sm:$0xff]  ;;  %v5202_v37 = vld [vmem:[%s16759_s0 + $0x428] sm:$0xff] }
0x108b   : > { %8552 = vmatprep.subr.bf16.mxu1 %v13738_v34  ;;  %v13324_v34 = vcombine.high %v5121_v53, %v5129_v3  ;;  %v13390_v20 = vcombine.high %v5186_v57, %v5194_v23 }
0x108d   : > { %8467 = vmatpush1.bf16.msra.mxu0 %v13735_v43  ;;  %v5146_v43 = vld [vmem:[%s16759_s0 + $0x268] sm:$0xff] }
0x108e   : > { %8553 = vmatpush1.bf16.msra.mxu1 %v13737_v5  ;;  %8468 = vmatprep.subr.bf16.mxu0 %v13752_v39  ;;  %v13323_v5 = vcombine.low %v5121_v53, %v5129_v3  ;;  %v13325_v39 = vcombine.low %v5122_v4, %v5130_v44  ;;  %v13342_v45 = vcombine.high %v5138_v25, %v5146_v43  ;;  %v5217_v3 = vld [vmem:[%s16759_s0 + $0x4a0] sm:$0xff]  ;;  %v5218_v44 = vld [vmem:[%s16759_s0 + $0x4a8] sm:$0xff] }
0x108f   : > { %8554 = vmatprep.subr.bf16.mxu1 %v13754_v51  ;;  %v13340_v51 = vcombine.high %v5137_v36, %v5145_v1  ;;  %v5225_v4 = vld [vmem:[%s16759_s0 + $0x4e0] sm:$0xff] }
0x1091   : > { %8469 = vmatpush1.bf16.msra.mxu0 %v13751_v35  ;;  %v5162_v35 = vld [vmem:[%s16759_s0 + $0x2e8] sm:$0xff] }
0x1092   : > { %8555 = vmatpush1.bf16.msra.mxu1 %v13753_v54  ;;  %8470 = vmatprep.subr.bf16.mxu0 %v13768_v41  ;;  %v13339_v54 = vcombine.low %v5137_v36, %v5145_v1  ;;  %v13341_v41 = vcombine.low %v5138_v25, %v5146_v43  ;;  %v13358_v47 = vcombine.high %v5154_v26, %v5162_v35  ;;  %v5233_v1 = vld [vmem:[%s16759_s0 + $0x520] sm:$0xff]  ;;  %v5234_v43 = vld [vmem:[%s16759_s0 + $0x528] sm:$0xff] }
0x1093   : > { %8556 = vmatprep.subr.bf16.mxu1 %v13770_v13  ;;  %v13356_v13 = vcombine.high %v5153_v29, %v5161_v10  ;;  %v5241_v25 = vld [vmem:[%s16759_s0 + $0x560] sm:$0xff] }
0x1095   : > { %8471 = vmatpush1.bf16.msra.mxu0 %v13767_v62  ;;  %v5178_v62 = vld [vmem:[%s16759_s0 + $0x368] sm:$0xff] }
0x1096   : > { %8557 = vmatpush1.bf16.msra.mxu1 %v13769_v28  ;;  %8569 = vmatprep.subr.bf16.mxu0 %v13276_v14  ;;  %v13355_v28 = vcombine.low %v5153_v29, %v5161_v10  ;;  %v13357_v14 = vcombine.low %v5154_v26, %v5162_v35  ;;  %v13374_v48 = vcombine.high %v5170_v49, %v5178_v62  ;;  %v5249_v10 = vld [vmem:[%s16759_s0 + $0x5a0] sm:$0xff]  ;;  %v5250_v35 = vld [vmem:[%s16759_s0 + $0x5a8] sm:$0xff] }
0x1097   : > { %8655 = vmatprep.subr.bf16.mxu1 %v13278_v16  ;;  %v13372_v16 = vcombine.high %v5169_v58, %v5177_v52  ;;  %v5257_v26 = vld [vmem:[%s16759_s0 + $0x5e0] sm:$0xff] }
0x1098   : > { %8473 = vmatmul.mubr.bf16.vlgmr.msra.gmra.mrb[28].mxu0 %v18057_v8 }
0x1099   : > { %8559 = vmatmul.mubr.bf16.vlgmr.msra.gmra.mrb[64].mxu1 %v18057_v8  ;;  %8570 = vmatpush1.bf16.msra.mxu0 %v13275_v7  ;;  %v5193_v7 = vld [vmem:[%s16759_s0 + $0x3e0] sm:$0xff] }
0x109a   : > { %8601 = vmatprep.mubr.bf16.mxu0 %v17967_v31  ;;  %8656 = vmatpush1.bf16.msra.mxu1 %v13277_v27  ;;  %v13371_v27 = vcombine.low %v5169_v58, %v5177_v52  ;;  %v13388_v19 = vcombine.high %v5185_v15, %v5193_v7  ;;  %v5265_v52 = vld [vmem:[%s16759_s0 + $0x620] sm:$0xff] }
0x109b   : > { %8687 = vmatprep.mubr.bf16.mxu1 %v17967_v31  ;;  %8571 = vmatprep.subr.bf16.mxu0 %v13292_v61  ;;  %v13373_v61 = vcombine.low %v5170_v49, %v5178_v62  ;;  %v5273_v49 = vld [vmem:[%s16759_s0 + $0x660] sm:$0xff]  ;;  %v5266_v62 = vld [vmem:[%s16759_s0 + $0x628] sm:$0xff] }
0x109c   : > { %8657 = vmatprep.subr.bf16.mxu1 %v13294_v63  ;;  %v5201_v63 = vld [vmem:[%s16759_s0 + $0x420] sm:$0xff] }
0x109d   : > { %8572 = vmatpush1.bf16.msra.mxu0 %v13291_v56  ;;  %v5210_v56 = vld [vmem:[%s16759_s0 + $0x468] sm:$0xff] }
0x109e   : > { %8658 = vmatpush1.bf16.msra.mxu1 %v13293_v32  ;;  %8573 = vmatprep.subr.bf16.mxu0 %v13308_v6  ;;  %v13387_v32 = vcombine.low %v5185_v15, %v5193_v7  ;;  %v13389_v6 = vcombine.low %v5186_v57, %v5194_v23  ;;  %v13406_v53 = vcombine.high %v5202_v37, %v5210_v56  ;;  %v5281_v7 = vld [vmem:[%s16759_s0 + $0x6a0] sm:$0xff]  ;;  %v5282_v23 = vld [vmem:[%s16759_s0 + $0x6a8] sm:$0xff] }
0x109f   : > { %8659 = vmatprep.subr.bf16.mxu1 %v13310_v55  ;;  %v13404_v55 = vcombine.high %v5201_v63, %v5209_v2  ;;  %v5289_v57 = vld [vmem:[%s16759_s0 + $0x6e0] sm:$0xff] }
0x10a1   : > { %8574 = vmatpush1.bf16.msra.mxu0 %v13307_v60  ;;  %v5226_v60 = vld [vmem:[%s16759_s0 + $0x4e8] sm:$0xff] }
0x10a2   : > { %8660 = vmatpush1.bf16.msra.mxu1 %v13309_v18  ;;  %8575 = vmatprep.subr.bf16.mxu0 %v13324_v34  ;;  %v13403_v18 = vcombine.low %v5201_v63, %v5209_v2  ;;  %v13405_v34 = vcombine.low %v5202_v37, %v5210_v56  ;;  %v13422_v36 = vcombine.high %v5218_v44, %v5226_v60  ;;  %v5297_v2 = vld [vmem:[%s16759_s0 + $0x720] sm:$0xff]  ;;  %v5298_v56 = vld [vmem:[%s16759_s0 + $0x728] sm:$0xff] }
0x10a3   : > { %8661 = vmatprep.subr.bf16.mxu1 %v13326_v46  ;;  %v13420_v46 = vcombine.high %v5217_v3, %v5225_v4  ;;  %v5305_v37 = vld [vmem:[%s16759_s0 + $0x760] sm:$0xff] }
0x10a5   : > { %8576 = vmatpush1.bf16.msra.mxu0 %v13323_v5  ;;  %v5242_v5 = vld [vmem:[%s16759_s0 + $0x568] sm:$0xff] }
0x10a6   : > { %8662 = vmatpush1.bf16.msra.mxu1 %v13325_v39  ;;  %8577 = vmatprep.subr.bf16.mxu0 %v13340_v51  ;;  %v13419_v39 = vcombine.low %v5217_v3, %v5225_v4  ;;  %v13421_v51 = vcombine.low %v5218_v44, %v5226_v60  ;;  %v13438_v29 = vcombine.high %v5234_v43, %v5242_v5  ;;  %v5313_v4 = vld [vmem:[%s16759_s0 + $0x7a0] sm:$0xff]  ;;  %v5314_v60 = vld [vmem:[%s16759_s0 + $0x7a8] sm:$0xff] }
0x10a7   : > { %8663 = vmatprep.subr.bf16.mxu1 %v13342_v45  ;;  %v13436_v45 = vcombine.high %v5233_v1, %v5241_v25  ;;  %v5321_v44 = vld [vmem:[%s16759_s0 + $0x7e0] sm:$0xff] }
0x10a9   : > { %8578 = vmatpush1.bf16.msra.mxu0 %v13339_v54  ;;  %v5258_v54 = vld [vmem:[%s16759_s0 + $0x5e8] sm:$0xff] }
0x10aa   : > { %8664 = vmatpush1.bf16.msra.mxu1 %v13341_v41  ;;  %8579 = vmatprep.subr.bf16.mxu0 %v13356_v13  ;;  %v13435_v41 = vcombine.low %v5233_v1, %v5241_v25  ;;  %v13437_v13 = vcombine.low %v5234_v43, %v5242_v5  ;;  %v13454_v58 = vcombine.high %v5250_v35, %v5258_v54  ;;  %v5329_v25 = vld [vmem:[%s16759_s0 + $0x820] sm:$0xff]  ;;  %v5330_v5 = vld [vmem:[%s16759_s0 + $0x828] sm:$0xff] }
0x10ab   : > { %8665 = vmatprep.subr.bf16.mxu1 %v13358_v47  ;;  %v13452_v47 = vcombine.high %v5249_v10, %v5257_v26  ;;  %v5337_v43 = vld [vmem:[%s16759_s0 + $0x860] sm:$0xff] }
0x10ad   : > { %8580 = vmatpush1.bf16.msra.mxu0 %v13355_v28  ;;  %v5274_v28 = vld [vmem:[%s16759_s0 + $0x668] sm:$0xff] }
0x10ae   : > { %8666 = vmatpush1.bf16.msra.mxu1 %v13357_v14  ;;  %8581 = vmatprep.subr.bf16.mxu0 %v13372_v16  ;;  %v13451_v14 = vcombine.low %v5249_v10, %v5257_v26  ;;  %v13453_v16 = vcombine.low %v5250_v35, %v5258_v54  ;;  %v13470_v15 = vcombine.high %v5266_v62, %v5274_v28  ;;  %v5345_v26 = vld [vmem:[%s16759_s0 + $0x8a0] sm:$0xff] }
0x10af   : > { %8667 = vmatprep.subr.bf16.mxu1 %v13374_v48  ;;  %v13468_v48 = vcombine.high %v5265_v52, %v5273_v49  ;;  %v5353_v35 = vld [vmem:[%s16759_s0 + $0x8e0] sm:$0xff]  ;;  %v13531_v54 = vcombine.low %v5329_v25, %v5337_v43 }
0x10b1   : > { %8582 = vmatpush1.bf16.msra.mxu0 %v13371_v27  ;;  %v5290_v27 = vld [vmem:[%s16759_s0 + $0x6e8] sm:$0xff] }
0x10b2   : > { %8668 = vmatpush1.bf16.msra.mxu1 %v13373_v61  ;;  %8583 = vmatprep.subr.bf16.mxu0 %v13388_v19  ;;  %v13467_v61 = vcombine.low %v5265_v52, %v5273_v49  ;;  %v13469_v19 = vcombine.low %v5266_v62, %v5274_v28  ;;  %v13486_v63 = vcombine.high %v5282_v23, %v5290_v27  ;;  %v5361_v52 = vld [vmem:[%s16759_s0 + $0x920] sm:$0xff]  ;;  %v5362_v28 = vld [vmem:[%s16759_s0 + $0x928] sm:$0xff] }
0x10b3   : > { %8669 = vmatprep.subr.bf16.mxu1 %v13390_v20  ;;  %v13484_v20 = vcombine.high %v5281_v7, %v5289_v57  ;;  %v5369_v49 = vld [vmem:[%s16759_s0 + $0x960] sm:$0xff] }
0x10b5   : > { %8584 = vmatpush1.bf16.msra.mxu0 %v13387_v32  ;;  %v5306_v32 = vld [vmem:[%s16759_s0 + $0x768] sm:$0xff] }
0x10b6   : > { %8670 = vmatpush1.bf16.msra.mxu1 %v13389_v6  ;;  %8585 = vmatprep.subr.bf16.mxu0 %v13404_v55  ;;  %v13483_v6 = vcombine.low %v5281_v7, %v5289_v57  ;;  %v13485_v55 = vcombine.low %v5282_v23, %v5290_v27  ;;  %v13502_v3 = vcombine.high %v5298_v56, %v5306_v32  ;;  %v5377_v57 = vld [vmem:[%s16759_s0 + $0x9a0] sm:$0xff]  ;;  %v5378_v27 = vld [vmem:[%s16759_s0 + $0x9a8] sm:$0xff] }
0x10b7   : > { %8671 = vmatprep.subr.bf16.mxu1 %v13406_v53  ;;  %v13500_v53 = vcombine.high %v5297_v2, %v5305_v37  ;;  %v5385_v23 = vld [vmem:[%s16759_s0 + $0x9e0] sm:$0xff] }
0x10b9   : > { %8586 = vmatpush1.bf16.msra.mxu0 %v13403_v18  ;;  %v5322_v18 = vld [vmem:[%s16759_s0 + $0x7e8] sm:$0xff] }
0x10ba   : > { %8672 = vmatpush1.bf16.msra.mxu1 %v13405_v34  ;;  %8587 = vmatprep.subr.bf16.mxu0 %v13420_v46  ;;  %v13499_v34 = vcombine.low %v5297_v2, %v5305_v37  ;;  %v13501_v46 = vcombine.low %v5298_v56, %v5306_v32  ;;  %v13518_v1 = vcombine.high %v5314_v60, %v5322_v18  ;;  %v5393_v37 = vld [vmem:[%s16759_s0 + $0xa20] sm:$0xff]  ;;  %v5394_v32 = vld [vmem:[%s16759_s0 + $0xa28] sm:$0xff] }
0x10bb   : > { %8673 = vmatprep.subr.bf16.mxu1 %v13422_v36  ;;  %v13516_v36 = vcombine.high %v5313_v4, %v5321_v44  ;;  %v5401_v56 = vld [vmem:[%s16759_s0 + $0xa60] sm:$0xff] }
0x10bd   : > { %8588 = vmatpush1.bf16.msra.mxu0 %v13419_v39  ;;  %v5338_v39 = vld [vmem:[%s16759_s0 + $0x868] sm:$0xff] }
0x10be   : > { %8674 = vmatpush1.bf16.msra.mxu1 %v13421_v51  ;;  %8589 = vmatprep.subr.bf16.mxu0 %v13436_v45  ;;  %v13515_v51 = vcombine.low %v5313_v4, %v5321_v44  ;;  %v13517_v45 = vcombine.low %v5314_v60, %v5322_v18  ;;  %v13534_v10 = vcombine.high %v5330_v5, %v5338_v39  ;;  %v5409_v44 = vld [vmem:[%s16759_s0 + $0xaa0] sm:$0xff]  ;;  %v5410_v18 = vld [vmem:[%s16759_s0 + $0xaa8] sm:$0xff] }
0x10bf   : > { %8675 = vmatprep.subr.bf16.mxu1 %v13438_v29  ;;  %v13532_v29 = vcombine.high %v5329_v25, %v5337_v43  ;;  %v5417_v60 = vld [vmem:[%s16759_s0 + $0xae0] sm:$0xff] }
0x10c0   : > { %v13612_v25 = vcombine.high %v5409_v44, %v5417_v60 }
0x10c1   : > { %8590 = vmatpush1.bf16.msra.mxu0 %v13435_v41  ;;  %v5346_v41 = vld [vmem:[%s16759_s0 + $0x8a8] sm:$0xff] }
0x10c2   : > { %8676 = vmatpush1.bf16.msra.mxu1 %v13437_v13  ;;  %8591 = vmatprep.subr.bf16.mxu0 %v13452_v47  ;;  %v5354_v13 = vld [vmem:[%s16759_s0 + $0x8e8] sm:$0xff]  ;;  %v13533_v47 = vcombine.low %v5330_v5, %v5338_v39  ;;  %v5425_v5 = vld [vmem:[%s16759_s0 + $0xb20] sm:$0xff] }
0x10c3   : > { %8677 = vmatprep.subr.bf16.mxu1 %v13454_v58  ;;  %v13548_v58 = vcombine.high %v5345_v26, %v5353_v35  ;;  %v13550_v62 = vcombine.high %v5346_v41, %v5354_v13  ;;  %v5433_v39 = vld [vmem:[%s16759_s0 + $0xb60] sm:$0xff] }
0x10c5   : > { %8592 = vmatpush1.bf16.msra.mxu0 %v13451_v14  ;;  %v5370_v14 = vld [vmem:[%s16759_s0 + $0x968] sm:$0xff] }
0x10c6   : > { %8678 = vmatpush1.bf16.msra.mxu1 %v13453_v16  ;;  %8593 = vmatprep.subr.bf16.mxu0 %v13468_v48  ;;  %v13547_v16 = vcombine.low %v5345_v26, %v5353_v35  ;;  %v13549_v48 = vcombine.low %v5346_v41, %v5354_v13  ;;  %v13566_v7 = vcombine.high %v5362_v28, %v5370_v14 }
0x10c7   : > { %8679 = vmatprep.subr.bf16.mxu1 %v13470_v15  ;;  %v13564_v15 = vcombine.high %v5361_v52, %v5369_v49  ;;  %v13628_v13 = vcombine.high %v5425_v5, %v5433_v39 }
0x10c9   : > { %8594 = vmatpush1.bf16.msra.mxu0 %v13467_v61  ;;  %v5386_v61 = vld [vmem:[%s16759_s0 + $0x9e8] sm:$0xff] }
0x10ca   : > { %8680 = vmatpush1.bf16.msra.mxu1 %v13469_v19  ;;  %8595 = vmatprep.subr.bf16.mxu0 %v13484_v20  ;;  %v13563_v19 = vcombine.low %v5361_v52, %v5369_v49  ;;  %v13565_v20 = vcombine.low %v5362_v28, %v5370_v14  ;;  %v13582_v2 = vcombine.high %v5378_v27, %v5386_v61 }
0x10cb   : > { %8681 = vmatprep.subr.bf16.mxu1 %v13486_v63  ;;  %v13580_v63 = vcombine.high %v5377_v57, %v5385_v23 }
0x10cd   : > { %8596 = vmatpush1.bf16.msra.mxu0 %v13483_v6  ;;  %v5402_v6 = vld [vmem:[%s16759_s0 + $0xa68] sm:$0xff] }
0x10ce   : > { %8682 = vmatpush1.bf16.msra.mxu1 %v13485_v55  ;;  %8597 = vmatprep.subr.bf16.mxu0 %v13500_v53  ;;  %v13579_v55 = vcombine.low %v5377_v57, %v5385_v23  ;;  %v13581_v53 = vcombine.low %v5378_v27, %v5386_v61  ;;  %v13598_v4 = vcombine.high %v5394_v32, %v5402_v6  ;;  %v5450_v57 = vld [vmem:[%s16759_s0 + $0xbe8] sm:$0xff] }
0x10cf   : > { %8683 = vmatprep.subr.bf16.mxu1 %v13502_v3  ;;  %v13596_v3 = vcombine.high %v5393_v37, %v5401_v56 }
0x10d1   : > { %8598 = vmatpush1.bf16.msra.mxu0 %v13499_v34  ;;  %v5418_v34 = vld [vmem:[%s16759_s0 + $0xae8] sm:$0xff] }
0x10d2   : > { %8684 = vmatpush1.bf16.msra.mxu1 %v13501_v46  ;;  %8599 = vmatprep.subr.bf16.mxu0 %v13516_v36  ;;  %v13595_v46 = vcombine.low %v5393_v37, %v5401_v56  ;;  %v18284_v36 = vld [vmem:[%s16784_s4] sm:$0xff]  ;;  %v13614_v43 = vcombine.high %v5410_v18, %v5418_v34  ;;  %v13613_v41 = vcombine.low %v5410_v18, %v5418_v34 }
0x10d3   : > { %8685 = vmatprep.subr.bf16.mxu1 %v13518_v1  ;;  %v13597_v1 = vcombine.low %v5394_v32, %v5402_v6  ;;  %v5592_v26 = vrot.slane %v18284_v36, %v16930_v24  ;;  %v5600_v35 = vrot.slane %v18284_v36, %v17266_v59 }
0x10d5   : > { %8600 = vmatpush1.bf16.msra.mxu0 %v13515_v51  ;;  %v5588_v51 = vrot.slane %v18284_v36, %v16926_v22 }
0x10d6   : > { %8686 = vmatpush1.bf16.msra.mxu1 %v13517_v45  ;;  %8612 = vmatprep.subr.bf16.mxu0 %v13532_v29  ;;  %v5596_v45 = vrot.slane %v18284_v36, %v17263_v40  ;;  %v5426_v29 = vld [vmem:[%s16759_s0 + $0xb28] sm:$0xff] }
0x10d7   : > { %8698 = vmatprep.subr.bf16.mxu1 %v13534_v10  ;;  %v5434_v10 = vld [vmem:[%s16759_s0 + $0xb68] sm:$0xff] }
0x10d8   : > { %8602 = vmatmul.mubr.bf16.vlgmr.msra.gmra.mrb[32].mxu0 %v17971_v38 }
0x10d9   : > { %8688 = vmatmul.mubr.bf16.vlgmr.msra.gmra.mrb[68].mxu1 %v17971_v38  ;;  %8613 = vmatpush1.bf16.msra.mxu0 %v13531_v54  ;;  %v13611_v54 = vcombine.low %v5409_v44, %v5417_v60  ;;  %v5457_v44 = vld [vmem:[%s16759_s0 + $0xc20] sm:$0xff] }
0x10da   : > { %8644 = vmatprep.mubr.bf16.mxu0 %v17985_v42  ;;  %8699 = vmatpush1.bf16.msra.mxu1 %v13533_v47  ;;  %v5441_v47 = vld [vmem:[%s16759_s0 + $0xba0] sm:$0xff] }
0x10db   : > { %8730 = vmatprep.mubr.bf16.mxu1 %v17985_v42  ;;  %8614 = vmatprep.subr.bf16.mxu0 %v13548_v58  ;;  %v5449_v58 = vld [vmem:[%s16759_s0 + $0xbe0] sm:$0xff] }
0x10dc   : > { %8700 = vmatprep.subr.bf16.mxu1 %v13550_v62  ;;  %v13630_v62 = vcombine.high %v5426_v29, %v5434_v10  ;;  %v13644_v6 = vcombine.high %v5441_v47, %v5449_v58  ;;  %v5465_v60 = vld [vmem:[%s16759_s0 + $0xc60] sm:$0xff] }
0x10dd   : > { %8615 = vmatpush1.bf16.msra.mxu0 %v13547_v16 }
0x10de   : > { %8701 = vmatpush1.bf16.msra.mxu1 %v13549_v48  ;;  %8616 = vmatprep.subr.bf16.mxu0 %v13564_v15  ;;  %v13627_v15 = vcombine.low %v5425_v5, %v5433_v39 }
0x10df   : > { %8702 = vmatprep.subr.bf16.mxu1 %v13566_v7  ;;  %v5442_v7 = vld [vmem:[%s16759_s0 + $0xba8] sm:$0xff] }
0x10e1   : > { %8617 = vmatpush1.bf16.msra.mxu0 %v13563_v19 }
0x10e2   : > { %8703 = vmatpush1.bf16.msra.mxu1 %v13565_v20  ;;  %8618 = vmatprep.subr.bf16.mxu0 %v13580_v63  ;;  %v13629_v20 = vcombine.low %v5426_v29, %v5434_v10  ;;  %v13643_v63 = vcombine.low %v5441_v47, %v5449_v58  ;;  %v5481_v47 = vld [vmem:[%s16759_s0 + $0xce0] sm:$0xff]  ;;  %v5474_v58 = vld [vmem:[%s16759_s0 + $0xca8] sm:$0xff] }
0x10e3   : > { %8704 = vmatprep.subr.bf16.mxu1 %v13582_v2 }
0x10e5   : > { %8619 = vmatpush1.bf16.msra.mxu0 %v13579_v55 }
0x10e6   : > { %8705 = vmatpush1.bf16.msra.mxu1 %v13581_v53  ;;  %8620 = vmatprep.subr.bf16.mxu0 %v13596_v3  ;;  %v13645_v3 = vcombine.low %v5442_v7, %v5450_v57 }
0x10e7   : > { %8706 = vmatprep.subr.bf16.mxu1 %v13598_v4  ;;  %v13646_v4 = vcombine.high %v5442_v7, %v5450_v57  ;;  %v5498_v7 = vld [vmem:[%s16759_s0 + $0xd68] sm:$0xff] }
0x10e9   : > { %8621 = vmatpush1.bf16.msra.mxu0 %v13595_v46 }
0x10ea   : > { %8707 = vmatpush1.bf16.msra.mxu1 %v13597_v1  ;;  %8622 = vmatprep.subr.bf16.mxu0 %v13612_v25  ;;  %v5458_v25 = vld [vmem:[%s16759_s0 + $0xc28] sm:$0xff] }
0x10eb   : > { %v8302_v52 = vpop.f32.mrb[24].mxu0  ;;  %v8388_v49 = vpop.f32.mrb[60].mxu1  ;;  %8708 = vmatprep.subr.bf16.mxu1 %v13614_v43  ;;  %v5466_v43 = vld [vmem:[%s16759_s0 + $0xc68] sm:$0xff] }
0x10ec   : > { %v14774_v28 = vadd.f32 %v8302_v52, %v5588_v51  ;;  %v14778_v14 = vadd.f32 %v8388_v49, %v5596_v45  ;;  %v8304_v16 = vpop.f32.mrb[25].mxu0  ;;  %v8390_v48 = vpop.f32.mrb[61].mxu1  ;;  %v5482_v52 = vld [vmem:[%s16759_s0 + $0xce8] sm:$0xff]  ;;  %v13659_v49 = vcombine.low %v5457_v44, %v5465_v60 }
0x10ed   : > { %v14775_v23 = vadd.f32 %v8304_v16, %v5592_v26  ;;  %v14779_v27 = vadd.f32 %v8390_v48, %v5600_v35  ;;  %v8306_v61 = vpop.f32.mrb[26].mxu0  ;;  %v8392_v19 = vpop.f32.mrb[62].mxu1  ;;  %8623 = vmatpush1.bf16.msra.mxu0 %v13611_v54  ;;  %v5489_v16 = vld [vmem:[%s16759_s0 + $0xd20] sm:$0xff] }
0x10ee   : > { %v14776_v2 = vadd.f32 %v8306_v61, %v5588_v51  ;;  %v14780_v37 = vadd.f32 %v8392_v19, %v5596_v45  ;;  %8709 = vmatpush1.bf16.msra.mxu1 %v13613_v41  ;;  %v8308_v56 = vpop.f32.mrb[27].mxu0  ;;  %v8394_v32 = vpop.f32.mrb[63].mxu1  ;;  %8624 = vmatprep.subr.bf16.mxu0 %v13628_v13  ;;  %v8913_v18 = vmax.f32 %v14774_v28, 0.0  ;;  %v8915_v34 = vmax.f32 %v14778_v14, 0.0  ;;  %v5473_v13 = vld [vmem:[%s16759_s0 + $0xca0] sm:$0xff] }
0x10ef   : > { %v14777_v55 = vadd.f32 %v8308_v56, %v5592_v26  ;;  %v14781_v53 = vadd.f32 %v8394_v32, %v5600_v35  ;;  %8710 = vmatprep.subr.bf16.mxu1 %v13630_v62  ;;  %v8914_v5 = vmax.f32 %v14775_v23, 0.0  ;;  %v8916_v39 = vmax.f32 %v14779_v27, 0.0  ;;  %v5497_v48 = vld [vmem:[%s16759_s0 + $0xd60] sm:$0xff] }
0x10f0   : > { %v8929_v46 = vmax.f32 %v14776_v2, 0.0  ;;  %v8931_v1 = vmax.f32 %v14780_v37, 0.0  ;;  %v13660_v26 = vcombine.high %v5457_v44, %v5465_v60  ;;  %v13662_v41 = vcombine.high %v5458_v25, %v5466_v43  ;;  %v5505_v19 = vld [vmem:[%s16759_s0 + $0xda0] sm:$0xff]  ;;  %v5514_v2 = vld [vmem:[%s16759_s0 + $0xde8] sm:$0xff] }
0x10f1   : > { %v8930_v51 = vmax.f32 %v14777_v55, 0.0  ;;  %v8932_v45 = vmax.f32 %v14781_v53, 0.0  ;;  %8625 = vmatpush1.bf16.msra.mxu0 %v13627_v15  ;;  %v13661_v62 = vcombine.low %v5458_v25, %v5466_v43  ;;  %v13676_v28 = vcombine.high %v5473_v13, %v5481_v47  ;;  %v5490_v15 = vld [vmem:[%s16759_s0 + $0xd28] sm:$0xff]  ;;  %v5521_v55 = vld [vmem:[%s16759_s0 + $0xe20] sm:$0xff] }
0x10f2   : > { %v18306_v29 = vpack.c.bf16 %v8929_v46, %v8913_v18  ;;  %v18308_v10 = vpack.c.bf16 %v8931_v1, %v8915_v34  ;;  %8711 = vmatpush1.bf16.msra.mxu1 %v13629_v20  ;;  %8626 = vmatprep.subr.bf16.mxu0 %v13644_v6  ;;  %v13678_v14 = vcombine.high %v5474_v58, %v5482_v52  ;;  %v5513_v20 = vld [vmem:[%s16759_s0 + $0xde0] sm:$0xff]  ;;  %v5538_v25 = vld [vmem:[%s16759_s0 + $0xea8] sm:$0xff] }
0x10f3   : > { %v18310_v35 = vpack.c.bf16 %v8930_v51, %v8914_v5  ;;  %v18312_v54 = vpack.c.bf16 %v8932_v45, %v8916_v39  ;;  %8712 = vmatprep.subr.bf16.mxu1 %v13646_v4  ;;  %v13675_v57 = vcombine.low %v5473_v13, %v5481_v47  ;;  %v13677_v23 = vcombine.low %v5474_v58, %v5482_v52  ;;  %v5529_v53 = vld [vmem:[%s16759_s0 + $0xe60] sm:$0xff]  ;;  %v5530_v4 = vld [vmem:[%s16759_s0 + $0xe68] sm:$0xff] }
0x10f4   : > { %v13692_v27 = vcombine.high %v5489_v16, %v5497_v48  ;;  %v13694_v61 = vcombine.high %v5490_v15, %v5498_v7  ;;  %v13691_v37 = vcombine.low %v5489_v16, %v5497_v48  ;;  %v13693_v56 = vcombine.low %v5490_v15, %v5498_v7  ;;  %v5537_v46 = vld [vmem:[%s16759_s0 + $0xea0] sm:$0xff]  ;;  %v5546_v43 = vld [vmem:[%s16759_s0 + $0xee8] sm:$0xff] }
0x10f5   : > { %8627 = vmatpush1.bf16.msra.mxu0 %v13643_v63  ;;  %v5506_v63 = vld [vmem:[%s16759_s0 + $0xda8] sm:$0xff]  ;;  %v13708_v32 = vcombine.high %v5505_v19, %v5513_v20  ;;  %v13707_v44 = vcombine.low %v5505_v19, %v5513_v20  ;;  %v13724_v18 = vcombine.high %v5521_v55, %v5529_v53  ;;  %v5545_v1 = vld [vmem:[%s16759_s0 + $0xee0] sm:$0xff]  ;;  %v13723_v5 = vcombine.low %v5521_v55, %v5529_v53  ;;  %v5076_v19 = vld [vmem:[%s16759_s0 + $0x38] sm:$0xff] }
0x10f6   : > { %8713 = vmatpush1.bf16.msra.mxu1 %v13645_v3  ;;  %8628 = vmatprep.subr.bf16.mxu0 %v13660_v26  ;;  %v13710_v6 = vcombine.high %v5506_v63, %v5514_v2  ;;  %v5522_v3 = vld [vmem:[%s16759_s0 + $0xe28] sm:$0xff]  ;;  %v13709_v60 = vcombine.low %v5506_v63, %v5514_v2  ;;  %v13740_v51 = vcombine.high %v5537_v46, %v5545_v1  ;;  %v5553_v26 = vld [vmem:[%s16759_s0 + $0xf20] sm:$0xff]  ;;  %v5084_v20 = vld [vmem:[%s16759_s0 + $0x78] sm:$0xff] }
0x10f7   : > { %8714 = vmatprep.subr.bf16.mxu1 %v13662_v41  ;;  %v13726_v34 = vcombine.high %v5522_v3, %v5530_v4  ;;  %v13725_v39 = vcombine.low %v5522_v3, %v5530_v4  ;;  %v13742_v45 = vcombine.high %v5538_v25, %v5546_v43  ;;  %v5561_v41 = vld [vmem:[%s16759_s0 + $0xf60] sm:$0xff]  ;;  %v5554_v13 = vld [vmem:[%s16759_s0 + $0xf28] sm:$0xff]  ;;  %v13739_v58 = vcombine.low %v5537_v46, %v5545_v1  ;;  %v5092_v53 = vld [vmem:[%s16759_s0 + $0xb8] sm:$0xff] }
0x10f8   : > { %v5562_v47 = vld [vmem:[%s16759_s0 + $0xf68] sm:$0xff]  ;;  %v13741_v52 = vcombine.low %v5538_v25, %v5546_v43  ;;  %v13755_v15 = vcombine.low %v5553_v26, %v5561_v41  ;;  %v5100_v3 = vld [vmem:[%s16759_s0 + $0xf8] sm:$0xff]  ;;  %v13281_v4 = vcombine.low %v5076_v19, %v5084_v20 }
0x10f9   : > { %8629 = vmatpush1.bf16.msra.mxu0 %v13659_v49  ;;  %v13756_v49 = vcombine.high %v5553_v26, %v5561_v41  ;;  %v5570_v16 = vld [vmem:[%s16759_s0 + $0xfa8] sm:$0xff]  ;;  %v13757_v7 = vcombine.low %v5554_v13, %v5562_v47  ;;  %v5108_v46 = vld [vmem:[%s16759_s0 + $0x138] sm:$0xff]  ;;  %v13297_v43 = vcombine.low %v5092_v53, %v5100_v3 }
0x10fa   : > { %8715 = vmatpush1.bf16.msra.mxu1 %v13661_v62  ;;  %8630 = vmatprep.subr.bf16.mxu0 %v13676_v28  ;;  %v13758_v62 = vcombine.high %v5554_v13, %v5562_v47  ;;  %v5569_v28 = vld [vmem:[%s16759_s0 + $0xfa0] sm:$0xff]  ;;  %v5578_v48 = vld [vmem:[%s16759_s0 + $0xfe8] sm:$0xff]  ;;  %v5116_v1 = vld [vmem:[%s16759_s0 + $0x178] sm:$0xff] }
0x10fb   : > { %8716 = vmatprep.subr.bf16.mxu1 %v13678_v14  ;;  %v5577_v14 = vld [vmem:[%s16759_s0 + $0xfe0] sm:$0xff]  ;;  %v13773_v2 = vcombine.low %v5570_v16, %v5578_v48  ;;  %v5124_v26 = vld [vmem:[%s16759_s0 + $0x1b8] sm:$0xff]  ;;  %v13313_v47 = vcombine.low %v5108_v46, %v5116_v1 }
0x10fc   : > { %v13771_v63 = vcombine.low %v5569_v28, %v5577_v14  ;;  %v5132_v41 = vld [vmem:[%s16759_s0 + $0x1f8] sm:$0xff] }
0x10fd   : > { %8631 = vmatpush1.bf16.msra.mxu0 %v13675_v57  ;;  %v13772_v57 = vcombine.high %v5569_v28, %v5577_v14  ;;  %v5148_v28 = vld [vmem:[%s16759_s0 + $0x278] sm:$0xff] }
0x10fe   : > { %8717 = vmatpush1.bf16.msra.mxu1 %v13677_v23  ;;  %8632 = vmatprep.subr.bf16.mxu0 %v13692_v27  ;;  %v13774_v23 = vcombine.high %v5570_v16, %v5578_v48  ;;  %v5075_v27 = vld [vmem:[%s16759_s0 + $0x30] sm:$0xff]  ;;  %v13329_v16 = vcombine.low %v5124_v26, %v5132_v41 }
0x10ff   : > { %8718 = vmatprep.subr.bf16.mxu1 %v13694_v61  ;;  %v5083_v61 = vld [vmem:[%s16759_s0 + $0x70] sm:$0xff] }
0x1100   : > { %v13279_v55 = vcombine.low %v5075_v27, %v5083_v61 }
0x1101   : > { %8633 = vmatpush1.bf16.msra.mxu0 %v13691_v37  ;;  %v13280_v37 = vcombine.high %v5075_v27, %v5083_v61  ;;  %v5164_v27 = vld [vmem:[%s16759_s0 + $0x2f8] sm:$0xff] }
0x1102   : > { %8719 = vmatpush1.bf16.msra.mxu1 %v13693_v56  ;;  %8634 = vmatprep.subr.bf16.mxu0 %v13708_v32  ;;  %v13282_v56 = vcombine.high %v5076_v19, %v5084_v20  ;;  %v5091_v32 = vld [vmem:[%s16759_s0 + $0xb0] sm:$0xff] }
0x1103   : > { %8720 = vmatprep.subr.bf16.mxu1 %v13710_v6  ;;  %v5099_v6 = vld [vmem:[%s16759_s0 + $0xf0] sm:$0xff] }
0x1104   : > { %v13295_v25 = vcombine.low %v5091_v32, %v5099_v6 }
0x1105   : > { %8635 = vmatpush1.bf16.msra.mxu0 %v13707_v44  ;;  %v13296_v44 = vcombine.high %v5091_v32, %v5099_v6  ;;  %v5180_v32 = vld [vmem:[%s16759_s0 + $0x378] sm:$0xff] }
0x1106   : > { %8721 = vmatpush1.bf16.msra.mxu1 %v13709_v60  ;;  %8636 = vmatprep.subr.bf16.mxu0 %v13724_v18  ;;  %v5107_v60 = vld [vmem:[%s16759_s0 + $0x130] sm:$0xff] }
0x1107   : > { %8722 = vmatprep.subr.bf16.mxu1 %v13726_v34  ;;  %v5115_v18 = vld [vmem:[%s16759_s0 + $0x170] sm:$0xff]  ;;  %v13298_v34 = vcombine.high %v5092_v53, %v5100_v3 }
0x1108   : > { %v13311_v13 = vcombine.low %v5107_v60, %v5115_v18 }
0x1109   : > { %8637 = vmatpush1.bf16.msra.mxu0 %v13723_v5  ;;  %v13312_v5 = vcombine.high %v5107_v60, %v5115_v18  ;;  %v5188_v60 = vld [vmem:[%s16759_s0 + $0x3b8] sm:$0xff] }
0x110a   : > { %8723 = vmatpush1.bf16.msra.mxu1 %v13725_v39  ;;  %8638 = vmatprep.subr.bf16.mxu0 %v13740_v51  ;;  %v13314_v39 = vcombine.high %v5108_v46, %v5116_v1  ;;  %v5123_v51 = vld [vmem:[%s16759_s0 + $0x1b0] sm:$0xff]  ;;  %v5196_v18 = vld [vmem:[%s16759_s0 + $0x3f8] sm:$0xff] }
0x110b   : > { %8724 = vmatprep.subr.bf16.mxu1 %v13742_v45  ;;  %v5131_v45 = vld [vmem:[%s16759_s0 + $0x1f0] sm:$0xff] }
0x110c   : > { %v13327_v14 = vcombine.low %v5123_v51, %v5131_v45 }
0x110d   : > { %8639 = vmatpush1.bf16.msra.mxu0 %v13739_v58  ;;  %v13328_v58 = vcombine.high %v5123_v51, %v5131_v45  ;;  %v5212_v51 = vld [vmem:[%s16759_s0 + $0x478] sm:$0xff] }
0x110e   : > { %8725 = vmatpush1.bf16.msra.mxu1 %v13741_v52  ;;  %8640 = vmatprep.subr.bf16.mxu0 %v13756_v49  ;;  %v5139_v52 = vld [vmem:[%s16759_s0 + $0x230] sm:$0xff] }
0x110f   : > { %8726 = vmatprep.subr.bf16.mxu1 %v13758_v62  ;;  %v5147_v49 = vld [vmem:[%s16759_s0 + $0x270] sm:$0xff]  ;;  %v5140_v62 = vld [vmem:[%s16759_s0 + $0x238] sm:$0xff] }
0x1110   : > { %v13344_v48 = vcombine.high %v5139_v52, %v5147_v49  ;;  %v13343_v61 = vcombine.low %v5139_v52, %v5147_v49  ;;  %v13345_v19 = vcombine.low %v5140_v62, %v5148_v28  ;;  %v5228_v52 = vld [vmem:[%s16759_s0 + $0x4f8] sm:$0xff] }
0x1111   : > { %8641 = vmatpush1.bf16.msra.mxu0 %v13755_v15  ;;  %v13346_v15 = vcombine.high %v5140_v62, %v5148_v28 }
0x1112   : > { %8727 = vmatpush1.bf16.msra.mxu1 %v13757_v7  ;;  %8642 = vmatprep.subr.bf16.mxu0 %v13772_v57  ;;  %v5155_v7 = vld [vmem:[%s16759_s0 + $0x2b0] sm:$0xff] }
0x1113   : > { %8728 = vmatprep.subr.bf16.mxu1 %v13774_v23  ;;  %v5163_v57 = vld [vmem:[%s16759_s0 + $0x2f0] sm:$0xff]  ;;  %v5156_v23 = vld [vmem:[%s16759_s0 + $0x2b8] sm:$0xff] }
0x1114   : > { %v13360_v20 = vcombine.high %v5155_v7, %v5163_v57  ;;  %v13359_v6 = vcombine.low %v5155_v7, %v5163_v57  ;;  %v5244_v7 = vld [vmem:[%s16759_s0 + $0x578] sm:$0xff] }
0x1115   : > { %8643 = vmatpush1.bf16.msra.mxu0 %v13771_v63  ;;  %v13362_v63 = vcombine.high %v5156_v23, %v5164_v27 }
0x1116   : > { %8729 = vmatpush1.bf16.msra.mxu1 %v13773_v2  ;;  %8741 = vmatprep.subr.bf16.mxu0 %v13280_v37  ;;  %v5171_v2 = vld [vmem:[%s16759_s0 + $0x330] sm:$0xff] }
0x1117   : > { %8827 = vmatprep.subr.bf16.mxu1 %v13282_v56  ;;  %v5179_v37 = vld [vmem:[%s16759_s0 + $0x370] sm:$0xff]  ;;  %v5172_v56 = vld [vmem:[%s16759_s0 + $0x338] sm:$0xff] }
0x1118   : > { %8645 = vmatmul.mubr.bf16.vlgmr.msra.gmra.mrb[32].mxu0 %v18057_v8  ;;  %v13376_v53 = vcombine.high %v5171_v2, %v5179_v37  ;;  %v13378_v3 = vcombine.high %v5172_v56, %v5180_v32  ;;  %v13377_v46 = vcombine.low %v5172_v56, %v5180_v32 }
0x1119   : > { %8731 = vmatmul.mubr.bf16.vlgmr.msra.gmra.mrb[68].mxu1 %v18057_v8  ;;  %8742 = vmatpush1.bf16.msra.mxu0 %v13279_v55  ;;  %v13361_v55 = vcombine.low %v5156_v23, %v5164_v27 }
0x111a   : > { %8773 = vmatprep.mubr.bf16.mxu0 %v17967_v31  ;;  %8828 = vmatpush1.bf16.msra.mxu1 %v13281_v4  ;;  %v5187_v4 = vld [vmem:[%s16759_s0 + $0x3b0] sm:$0xff] }
0x111b   : > { %8859 = vmatprep.mubr.bf16.mxu1 %v17967_v31  ;;  %8743 = vmatprep.subr.bf16.mxu0 %v13296_v44  ;;  %v13330_v31 = vcombine.high %v5124_v26, %v5132_v41  ;;  %v5195_v44 = vld [vmem:[%s16759_s0 + $0x3f0] sm:$0xff]  ;;  %v13393_v26 = vcombine.low %v5188_v60, %v5196_v18 }
0x111c   : > { %8829 = vmatprep.subr.bf16.mxu1 %v13298_v34  ;;  %v13375_v34 = vcombine.low %v5171_v2, %v5179_v37  ;;  %v13392_v1 = vcombine.high %v5187_v4, %v5195_v44  ;;  %v13391_v45 = vcombine.low %v5187_v4, %v5195_v44  ;;  %v5260_v2 = vld [vmem:[%s16759_s0 + $0x5f8] sm:$0xff] }
0x111d   : > { %8744 = vmatpush1.bf16.msra.mxu0 %v13295_v25  ;;  %v13394_v25 = vcombine.high %v5188_v60, %v5196_v18  ;;  %v5276_v4 = vld [vmem:[%s16759_s0 + $0x678] sm:$0xff] }
0x111e   : > { %8830 = vmatpush1.bf16.msra.mxu1 %v13297_v43  ;;  %8745 = vmatprep.subr.bf16.mxu0 %v13312_v5  ;;  %v5203_v43 = vld [vmem:[%s16759_s0 + $0x430] sm:$0xff] }
0x111f   : > { %8831 = vmatprep.subr.bf16.mxu1 %v13314_v39  ;;  %v5211_v5 = vld [vmem:[%s16759_s0 + $0x470] sm:$0xff]  ;;  %v5204_v39 = vld [vmem:[%s16759_s0 + $0x438] sm:$0xff] }
0x1120   : > { %v13408_v41 = vcombine.high %v5203_v43, %v5211_v5  ;;  %v13407_v49 = vcombine.low %v5203_v43, %v5211_v5  ;;  %v13409_v62 = vcombine.low %v5204_v39, %v5212_v51  ;;  %v5292_v43 = vld [vmem:[%s16759_s0 + $0x6f8] sm:$0xff] }
0x1121   : > { %8746 = vmatpush1.bf16.msra.mxu0 %v13311_v13  ;;  %v13410_v13 = vcombine.high %v5204_v39, %v5212_v51 }
0x1122   : > { %8832 = vmatpush1.bf16.msra.mxu1 %v13313_v47  ;;  %8747 = vmatprep.subr.bf16.mxu0 %v13328_v58  ;;  %v5219_v47 = vld [vmem:[%s16759_s0 + $0x4b0] sm:$0xff] }
0x1123   : > { %8833 = vmatprep.subr.bf16.mxu1 %v13330_v31  ;;  %v5227_v58 = vld [vmem:[%s16759_s0 + $0x4f0] sm:$0xff]  ;;  %v5220_v31 = vld [vmem:[%s16759_s0 + $0x4b8] sm:$0xff] }
0x1124   : > { %v13424_v28 = vcombine.high %v5219_v47, %v5227_v58  ;;  %v13423_v57 = vcombine.low %v5219_v47, %v5227_v58  ;;  %v13425_v23 = vcombine.low %v5220_v31, %v5228_v52  ;;  %v5308_v47 = vld [vmem:[%s16759_s0 + $0x778] sm:$0xff] }
0x1125   : > { %8748 = vmatpush1.bf16.msra.mxu0 %v13327_v14  ;;  %v13426_v14 = vcombine.high %v5220_v31, %v5228_v52 }
0x1126   : > { %8834 = vmatpush1.bf16.msra.mxu1 %v13329_v16  ;;  %8749 = vmatprep.subr.bf16.mxu0 %v13344_v48  ;;  %v5235_v16 = vld [vmem:[%s16759_s0 + $0x530] sm:$0xff] }
0x1127   : > { %8835 = vmatprep.subr.bf16.mxu1 %v13346_v15  ;;  %v5243_v48 = vld [vmem:[%s16759_s0 + $0x570] sm:$0xff]  ;;  %v5236_v15 = vld [vmem:[%s16759_s0 + $0x538] sm:$0xff] }
0x1128   : > { %v13440_v27 = vcombine.high %v5235_v16, %v5243_v48  ;;  %v13439_v37 = vcombine.low %v5235_v16, %v5243_v48  ;;  %v13441_v56 = vcombine.low %v5236_v15, %v5244_v7  ;;  %v5324_v16 = vld [vmem:[%s16759_s0 + $0x7f8] sm:$0xff] }
0x1129   : > { %8750 = vmatpush1.bf16.msra.mxu0 %v13343_v61  ;;  %v13442_v61 = vcombine.high %v5236_v15, %v5244_v7 }
0x112a   : > { %8836 = vmatpush1.bf16.msra.mxu1 %v13345_v19  ;;  %8751 = vmatprep.subr.bf16.mxu0 %v13360_v20  ;;  %v5251_v19 = vld [vmem:[%s16759_s0 + $0x5b0] sm:$0xff] }
0x112b   : > { %8837 = vmatprep.subr.bf16.mxu1 %v13362_v63  ;;  %v5259_v20 = vld [vmem:[%s16759_s0 + $0x5f0] sm:$0xff]  ;;  %v5252_v63 = vld [vmem:[%s16759_s0 + $0x5b8] sm:$0xff] }
0x112c   : > { %v13456_v32 = vcombine.high %v5251_v19, %v5259_v20  ;;  %v13455_v44 = vcombine.low %v5251_v19, %v5259_v20  ;;  %v13457_v60 = vcombine.low %v5252_v63, %v5260_v2  ;;  %v5340_v19 = vld [vmem:[%s16759_s0 + $0x878] sm:$0xff] }
0x112d   : > { %8752 = vmatpush1.bf16.msra.mxu0 %v13359_v6  ;;  %v13458_v6 = vcombine.high %v5252_v63, %v5260_v2 }
0x112e   : > { %8838 = vmatpush1.bf16.msra.mxu1 %v13361_v55  ;;  %8753 = vmatprep.subr.bf16.mxu0 %v13376_v53  ;;  %v5267_v55 = vld [vmem:[%s16759_s0 + $0x630] sm:$0xff] }
0x112f   : > { %8839 = vmatprep.subr.bf16.mxu1 %v13378_v3  ;;  %v5275_v53 = vld [vmem:[%s16759_s0 + $0x670] sm:$0xff]  ;;  %v5268_v3 = vld [vmem:[%s16759_s0 + $0x638] sm:$0xff] }
0x1130   : > { %v13472_v18 = vcombine.high %v5267_v55, %v5275_v53  ;;  %v13471_v5 = vcombine.low %v5267_v55, %v5275_v53  ;;  %v13473_v39 = vcombine.low %v5268_v3, %v5276_v4  ;;  %v5348_v55 = vld [vmem:[%s16759_s0 + $0x8b8] sm:$0xff] }
0x1131   : > { %8754 = vmatpush1.bf16.msra.mxu0 %v13375_v34  ;;  %v13474_v34 = vcombine.high %v5268_v3, %v5276_v4  ;;  %v5356_v53 = vld [vmem:[%s16759_s0 + $0x8f8] sm:$0xff] }
0x1132   : > { %8840 = vmatpush1.bf16.msra.mxu1 %v13377_v46  ;;  %8755 = vmatprep.subr.bf16.mxu0 %v13392_v1  ;;  %v5283_v46 = vld [vmem:[%s16759_s0 + $0x6b0] sm:$0xff] }
0x1133   : > { %8841 = vmatprep.subr.bf16.mxu1 %v13394_v25  ;;  %v5291_v1 = vld [vmem:[%s16759_s0 + $0x6f0] sm:$0xff]  ;;  %v5284_v25 = vld [vmem:[%s16759_s0 + $0x6b8] sm:$0xff] }
0x1134   : > { %v13488_v51 = vcombine.high %v5283_v46, %v5291_v1  ;;  %v13487_v58 = vcombine.low %v5283_v46, %v5291_v1  ;;  %v13489_v31 = vcombine.low %v5284_v25, %v5292_v43  ;;  %v5372_v46 = vld [vmem:[%s16759_s0 + $0x978] sm:$0xff] }
0x1135   : > { %8756 = vmatpush1.bf16.msra.mxu0 %v13391_v45  ;;  %v13490_v45 = vcombine.high %v5284_v25, %v5292_v43  ;;  %v13553_v25 = vcombine.low %v5348_v55, %v5356_v53 }
0x1136   : > { %8842 = vmatpush1.bf16.msra.mxu1 %v13393_v26  ;;  %8757 = vmatprep.subr.bf16.mxu0 %v13408_v41  ;;  %v5299_v26 = vld [vmem:[%s16759_s0 + $0x730] sm:$0xff] }
0x1137   : > { %8843 = vmatprep.subr.bf16.mxu1 %v13410_v13  ;;  %v5307_v41 = vld [vmem:[%s16759_s0 + $0x770] sm:$0xff]  ;;  %v5300_v13 = vld [vmem:[%s16759_s0 + $0x738] sm:$0xff] }
0x1138   : > { %v13504_v52 = vcombine.high %v5299_v26, %v5307_v41  ;;  %v13503_v48 = vcombine.low %v5299_v26, %v5307_v41  ;;  %v13505_v15 = vcombine.low %v5300_v13, %v5308_v47 }
0x1139   : > { %8758 = vmatpush1.bf16.msra.mxu0 %v13407_v49  ;;  %v13506_v49 = vcombine.high %v5300_v13, %v5308_v47  ;;  %v5395_v47 = vld [vmem:[%s16759_s0 + $0xa30] sm:$0xff] }
0x113a   : > { %8844 = vmatpush1.bf16.msra.mxu1 %v13409_v62  ;;  %8759 = vmatprep.subr.bf16.mxu0 %v13424_v28  ;;  %v5315_v62 = vld [vmem:[%s16759_s0 + $0x7b0] sm:$0xff] }
0x113b   : > { %8845 = vmatprep.subr.bf16.mxu1 %v13426_v14  ;;  %v5323_v28 = vld [vmem:[%s16759_s0 + $0x7f0] sm:$0xff]  ;;  %v5316_v14 = vld [vmem:[%s16759_s0 + $0x7b8] sm:$0xff] }
0x113c   : > { %v13520_v7 = vcombine.high %v5315_v62, %v5323_v28  ;;  %v13519_v20 = vcombine.low %v5315_v62, %v5323_v28  ;;  %v13521_v63 = vcombine.low %v5316_v14, %v5324_v16 }
0x113d   : > { %8760 = vmatpush1.bf16.msra.mxu0 %v13423_v57  ;;  %v13522_v57 = vcombine.high %v5316_v14, %v5324_v16  ;;  %v5411_v16 = vld [vmem:[%s16759_s0 + $0xab0] sm:$0xff] }
0x113e   : > { %8846 = vmatpush1.bf16.msra.mxu1 %v13425_v23  ;;  %8761 = vmatprep.subr.bf16.mxu0 %v13440_v27  ;;  %v5331_v23 = vld [vmem:[%s16759_s0 + $0x830] sm:$0xff] }
0x113f   : > { %8847 = vmatprep.subr.bf16.mxu1 %v13442_v61  ;;  %v5339_v27 = vld [vmem:[%s16759_s0 + $0x870] sm:$0xff]  ;;  %v5332_v61 = vld [vmem:[%s16759_s0 + $0x838] sm:$0xff] }
0x1140   : > { %v13536_v2 = vcombine.high %v5331_v23, %v5339_v27  ;;  %v13537_v3 = vcombine.low %v5332_v61, %v5340_v19 }
0x1141   : > { %8762 = vmatpush1.bf16.msra.mxu0 %v13439_v37  ;;  %v13538_v37 = vcombine.high %v5332_v61, %v5340_v19  ;;  %v5607_v61 = vsub.s32 5, %v16923_v21 }
0x1142   : > { %8848 = vmatpush1.bf16.msra.mxu1 %v13441_v56  ;;  %8763 = vmatprep.subr.bf16.mxu0 %v13456_v32  ;;  %v5347_v56 = vld [vmem:[%s16759_s0 + $0x8b0] sm:$0xff] }
0x1143   : > { %8849 = vmatprep.subr.bf16.mxu1 %v13458_v6  ;;  %v5355_v32 = vld [vmem:[%s16759_s0 + $0x8f0] sm:$0xff]  ;;  %v13535_v6 = vcombine.low %v5331_v23, %v5339_v27  ;;  %v5611_v27 = vsub.s32 6, %v16923_v21 }
0x1144   : > { %v13552_v4 = vcombine.high %v5347_v56, %v5355_v32  ;;  %v13551_v1 = vcombine.low %v5347_v56, %v5355_v32  ;;  %v5435_v56 = vld [vmem:[%s16759_s0 + $0xb70] sm:$0xff] }
0x1145   : > { %8764 = vmatpush1.bf16.msra.mxu0 %v13455_v44  ;;  %v5363_v44 = vld [vmem:[%s16759_s0 + $0x930] sm:$0xff] }
0x1146   : > { %8850 = vmatpush1.bf16.msra.mxu1 %v13457_v60  ;;  %8765 = vmatprep.subr.bf16.mxu0 %v13472_v18  ;;  %v5371_v60 = vld [vmem:[%s16759_s0 + $0x970] sm:$0xff]  ;;  %v13554_v18 = vcombine.high %v5348_v55, %v5356_v53  ;;  %v5436_v55 = vld [vmem:[%s16759_s0 + $0xb78] sm:$0xff]  ;;  %v5612_v53 = vrot.slane %v18284_v36, %v5611_v27 }
0x1147   : > { %8851 = vmatprep.subr.bf16.mxu1 %v13474_v34  ;;  %v5364_v34 = vld [vmem:[%s16759_s0 + $0x938] sm:$0xff]  ;;  %v13568_v43 = vcombine.high %v5363_v44, %v5371_v60  ;;  %v13567_v26 = vcombine.low %v5363_v44, %v5371_v60 }
0x1148   : > { %v13569_v41 = vcombine.low %v5364_v34, %v5372_v46 }
0x1149   : > { %8766 = vmatpush1.bf16.msra.mxu0 %v13471_v5  ;;  %v13570_v5 = vcombine.high %v5364_v34, %v5372_v46 }
0x114a   : > { %8852 = vmatpush1.bf16.msra.mxu1 %v13473_v39  ;;  %8767 = vmatprep.subr.bf16.mxu0 %v13488_v51  ;;  %v5379_v39 = vld [vmem:[%s16759_s0 + $0x9b0] sm:$0xff] }
0x114b   : > { %8853 = vmatprep.subr.bf16.mxu1 %v13490_v45  ;;  %v5387_v51 = vld [vmem:[%s16759_s0 + $0x9f0] sm:$0xff]  ;;  %v5380_v45 = vld [vmem:[%s16759_s0 + $0x9b8] sm:$0xff] }
0x114c   : > { %v13584_v13 = vcombine.high %v5379_v39, %v5387_v51 }
0x114d   : > { %8768 = vmatpush1.bf16.msra.mxu0 %v13487_v58  ;;  %v5403_v58 = vld [vmem:[%s16759_s0 + $0xa70] sm:$0xff] }
0x114e   : > { %8854 = vmatpush1.bf16.msra.mxu1 %v13489_v31  ;;  %8769 = vmatprep.subr.bf16.mxu0 %v13504_v52  ;;  %v5396_v31 = vld [vmem:[%s16759_s0 + $0xa38] sm:$0xff]  ;;  %v13600_v28 = vcombine.high %v5395_v47, %v5403_v58  ;;  %v13599_v23 = vcombine.low %v5395_v47, %v5403_v58 }
0x114f   : > { %8855 = vmatprep.subr.bf16.mxu1 %v13506_v49  ;;  %v5404_v52 = vld [vmem:[%s16759_s0 + $0xa78] sm:$0xff]  ;;  %v13583_v49 = vcombine.low %v5379_v39, %v5387_v51 }
0x1150   : > { %v13602_v14 = vcombine.high %v5396_v31, %v5404_v52  ;;  %v13601_v19 = vcombine.low %v5396_v31, %v5404_v52  ;;  %v5444_v51 = vld [vmem:[%s16759_s0 + $0xbb8] sm:$0xff] }
0x1151   : > { %8770 = vmatpush1.bf16.msra.mxu0 %v13503_v48  ;;  %v5419_v48 = vld [vmem:[%s16759_s0 + $0xaf0] sm:$0xff] }
0x1152   : > { %8856 = vmatpush1.bf16.msra.mxu1 %v13505_v15  ;;  %8771 = vmatprep.subr.bf16.mxu0 %v13520_v7  ;;  %v5603_v15 = vsub.s32 4, %v16923_v21  ;;  %v5412_v7 = vld [vmem:[%s16759_s0 + $0xab8] sm:$0xff] }
0x1153   : > { %8857 = vmatprep.subr.bf16.mxu1 %v13522_v57  ;;  %v5420_v57 = vld [vmem:[%s16759_s0 + $0xaf8] sm:$0xff] }
0x1154   : > { %v5604_v32 = vrot.slane %v18284_v36, %v5603_v15  ;;  %v13617_v60 = vcombine.low %v5412_v7, %v5420_v57 }
0x1155   : > { %8772 = vmatpush1.bf16.msra.mxu0 %v13519_v20  ;;  %v5615_v20 = vsub.s32 7, %v16923_v21  ;;  %v15673_v21 = vld [vmem:[%s16761_s14 + $0x6c0] ss:$16 sps:$4 sm:$0xff]  }
0x1156   : > { %8858 = vmatpush1.bf16.msra.mxu1 %v13521_v63  ;;  %8784 = vmatprep.subr.bf16.mxu0 %v13536_v2  ;;  %v13616_v63 = vcombine.high %v5411_v16, %v5419_v48  ;;  %v13618_v2 = vcombine.high %v5412_v7, %v5420_v57  ;;  %v5459_v7 = vld [vmem:[%s16759_s0 + $0xc30] sm:$0xff] }
0x1157   : > { %8870 = vmatprep.subr.bf16.mxu1 %v13538_v37  ;;  %v5427_v37 = vld [vmem:[%s16759_s0 + $0xb30] sm:$0xff]  ;;  %v5616_v44 = vrot.slane %v18284_v36, %v5615_v20 }
0x1158   : > { %8774 = vmatmul.mubr.bf16.vlgmr.msra.gmra.mrb[36].mxu0 %v17971_v38  ;;  %v5467_v57 = vld [vmem:[%s16759_s0 + $0xc70] sm:$0xff] }
0x1159   : > { %8860 = vmatmul.mubr.bf16.vlgmr.msra.gmra.mrb[72].mxu1 %v17971_v38  ;;  %8785 = vmatpush1.bf16.msra.mxu0 %v13535_v6  ;;  %v5388_v38 = vld [vmem:[%s16759_s0 + $0x9f8] sm:$0xff] }
0x115a   : > { %8816 = vmatprep.mubr.bf16.mxu0 %v17985_v42  ;;  %8871 = vmatpush1.bf16.msra.mxu1 %v13537_v3  ;;  %v13585_v62 = vcombine.low %v5380_v45, %v5388_v38  ;;  %v5428_v6 = vld [vmem:[%s16759_s0 + $0xb38] sm:$0xff]  ;;  %v5608_v3 = vrot.slane %v18284_v36, %v5607_v61  ;;  %v13631_v36 = vcombine.low %v5427_v37, %v5435_v56 }
0x115b   : > { %8902 = vmatprep.mubr.bf16.mxu1 %v17985_v42  ;;  %8786 = vmatprep.subr.bf16.mxu0 %v13552_v4  ;;  %v13586_v42 = vcombine.high %v5380_v45, %v5388_v38  ;;  %v13615_v4 = vcombine.low %v5411_v16, %v5419_v48  ;;  %v13634_v46 = vcombine.high %v5428_v6, %v5436_v55  ;;  %v5452_v45 = vld [vmem:[%s16759_s0 + $0xbf8] sm:$0xff] }
0x115c   : > { %8872 = vmatprep.subr.bf16.mxu1 %v13554_v18  ;;  %v13632_v18 = vcombine.high %v5427_v37, %v5435_v56  ;;  %v13650_v48 = vcombine.high %v5444_v51, %v5452_v45  ;;  %v5460_v37 = vld [vmem:[%s16759_s0 + $0xc38] sm:$0xff] }
0x115d   : > { %8787 = vmatpush1.bf16.msra.mxu0 %v13551_v1  ;;  %v5443_v1 = vld [vmem:[%s16759_s0 + $0xbb0] sm:$0xff]  ;;  %v5468_v56 = vld [vmem:[%s16759_s0 + $0xc78] sm:$0xff] }
0x115e   : > { %8873 = vmatpush1.bf16.msra.mxu1 %v13553_v25  ;;  %8788 = vmatprep.subr.bf16.mxu0 %v13568_v43  ;;  %v5451_v25 = vld [vmem:[%s16759_s0 + $0xbf0] sm:$0xff] }
0x115f   : > { %8874 = vmatprep.subr.bf16.mxu1 %v13570_v5  ;;  %v13647_v16 = vcombine.low %v5443_v1, %v5451_v25 }
0x1161   : > { %8789 = vmatpush1.bf16.msra.mxu0 %v13567_v26 }
0x1162   : > { %8875 = vmatpush1.bf16.msra.mxu1 %v13569_v41  ;;  %8790 = vmatprep.subr.bf16.mxu0 %v13584_v13 }
0x1163   : > { %8876 = vmatprep.subr.bf16.mxu1 %v13586_v42  ;;  %v13633_v42 = vcombine.low %v5428_v6, %v5436_v55 }
0x1165   : > { %8791 = vmatpush1.bf16.msra.mxu0 %v13583_v49  ;;  %v13648_v49 = vcombine.high %v5443_v1, %v5451_v25  ;;  %v5475_v1 = vld [vmem:[%s16759_s0 + $0xcb0] sm:$0xff] }
0x1166   : > { %8877 = vmatpush1.bf16.msra.mxu1 %v13585_v62  ;;  %8792 = vmatprep.subr.bf16.mxu0 %v13600_v28  ;;  %v5483_v25 = vld [vmem:[%s16759_s0 + $0xcf0] sm:$0xff] }
0x1167   : > { %8878 = vmatprep.subr.bf16.mxu1 %v13602_v14 }
0x1169   : > { %8793 = vmatpush1.bf16.msra.mxu0 %v13599_v23 }
0x116a   : > { %8879 = vmatpush1.bf16.msra.mxu1 %v13601_v19  ;;  %8794 = vmatprep.subr.bf16.mxu0 %v13616_v63 }
0x116b   : > { %v8474_v34 = vpop.f32.mrb[28].mxu0  ;;  %8880 = vmatprep.subr.bf16.mxu1 %v13618_v2  ;;  %v13649_v2 = vcombine.low %v5444_v51, %v5452_v45  ;;  %v13663_v51 = vcombine.low %v5459_v7, %v5467_v57  ;;  %v13665_v45 = vcombine.low %v5460_v37, %v5468_v56 }
0x116c   : > { %v14782_v43 = vadd.f32 %v8474_v34, %v5604_v32  ;;  %v8560_v5 = vpop.f32.mrb[64].mxu1  ;;  %v8476_v39 = vpop.f32.mrb[29].mxu0 }
0x116d   : > { %v14786_v38 = vadd.f32 %v8560_v5, %v5612_v53  ;;  %v14783_v26 = vadd.f32 %v8476_v39, %v5608_v3  ;;  %v8562_v41 = vpop.f32.mrb[65].mxu1  ;;  %v8478_v13 = vpop.f32.mrb[30].mxu0  ;;  %8795 = vmatpush1.bf16.msra.mxu0 %v13615_v4  ;;  %v5476_v5 = vld [vmem:[%s16759_s0 + $0xcb8] sm:$0xff] }
0x116e   : > { %v14787_v47 = vadd.f32 %v8562_v41, %v5616_v44  ;;  %v14784_v58 = vadd.f32 %v8478_v13, %v5604_v32  ;;  %v8564_v31 = vpop.f32.mrb[66].mxu1  ;;  %8881 = vmatpush1.bf16.msra.mxu1 %v13617_v60  ;;  %v8480_v52 = vpop.f32.mrb[31].mxu0  ;;  %8796 = vmatprep.subr.bf16.mxu0 %v13632_v18  ;;  %v8917_v23 = vmax.f32 %v14782_v43, 0.0  ;;  %v13664_v18 = vcombine.high %v5459_v7, %v5467_v57  ;;  %v5484_v39 = vld [vmem:[%s16759_s0 + $0xcf8] sm:$0xff]  ;;  %v5491_v41 = vld [vmem:[%s16759_s0 + $0xd30] sm:$0xff] }
0x116f   : > { %v14788_v62 = vadd.f32 %v8564_v31, %v5612_v53  ;;  %v14785_v28 = vadd.f32 %v8480_v52, %v5608_v3  ;;  %v8566_v14 = vpop.f32.mrb[67].mxu1  ;;  %8882 = vmatprep.subr.bf16.mxu1 %v13634_v46  ;;  %v8919_v32 = vmax.f32 %v14786_v38, 0.0  ;;  %v8918_v6 = vmax.f32 %v14783_v26, 0.0  ;;  %v5499_v13 = vld [vmem:[%s16759_s0 + $0xd70] sm:$0xff] }
0x1170   : > { %v8933_v19 = vmax.f32 %v14784_v58, 0.0  ;;  %v14789_v63 = vadd.f32 %v8566_v14, %v5616_v44  ;;  %v8920_v3 = vmax.f32 %v14787_v47, 0.0  ;;  %v13666_v46 = vcombine.high %v5460_v37, %v5468_v56  ;;  %v5516_v14 = vld [vmem:[%s16759_s0 + $0xdf8] sm:$0xff] }
0x1171   : > { %v8935_v55 = vmax.f32 %v14788_v62, 0.0  ;;  %v8934_v53 = vmax.f32 %v14785_v28, 0.0  ;;  %8797 = vmatpush1.bf16.msra.mxu0 %v13631_v36  ;;  %v13680_v38 = vcombine.high %v5475_v1, %v5483_v25  ;;  %v13682_v26 = vcombine.high %v5476_v5, %v5484_v39  ;;  %v5492_v36 = vld [vmem:[%s16759_s0 + $0xd38] sm:$0xff]  ;;  %v5515_v62 = vld [vmem:[%s16759_s0 + $0xdf0] sm:$0xff] }
0x1172   : > { %v18466_v4 = vpack.c.bf16 %v8933_v19, %v8917_v23  ;;  %v8936_v60 = vmax.f32 %v14789_v63, 0.0  ;;  %8883 = vmatpush1.bf16.msra.mxu1 %v13633_v42  ;;  %8798 = vmatprep.subr.bf16.mxu0 %v13648_v49  ;;  %v5500_v42 = vld [vmem:[%s16759_s0 + $0xd78] sm:$0xff]  ;;  %v13679_v47 = vcombine.low %v5475_v1, %v5483_v25  ;;  %v13681_v58 = vcombine.low %v5476_v5, %v5484_v39  ;;  %v5507_v49 = vld [vmem:[%s16759_s0 + $0xdb0] sm:$0xff] }
0x1173   : > { %v18468_v44 = vpack.c.bf16 %v8935_v55, %v8919_v32  ;;  %v18470_v34 = vpack.c.bf16 %v8934_v53, %v8918_v6  ;;  %8884 = vmatprep.subr.bf16.mxu1 %v13650_v48  ;;  %v13696_v31 = vcombine.high %v5491_v41, %v5499_v13  ;;  %v13698_v52 = vcombine.high %v5492_v36, %v5500_v42  ;;  %v5508_v28 = vld [vmem:[%s16759_s0 + $0xdb8] sm:$0xff]  ;;  %v5523_v23 = vld [vmem:[%s16759_s0 + $0xe30] sm:$0xff] }
0x1174   : > { %v18474_v43 = vpack.c.bf16 %v8936_v60, %v8920_v3  ;;  %v13697_v48 = vcombine.low %v5492_v36, %v5500_v42  ;;  %v13712_v7 = vcombine.high %v5507_v49, %v5515_v62  ;;  %v13714_v57 = vcombine.high %v5508_v28, %v5516_v14  ;;  %v5531_v19 = vld [vmem:[%s16759_s0 + $0xe70] sm:$0xff]  ;;  %v5524_v63 = vld [vmem:[%s16759_s0 + $0xe38] sm:$0xff] }
0x1175   : > { %8799 = vmatpush1.bf16.msra.mxu0 %v13647_v16  ;;  %v13695_v16 = vcombine.low %v5491_v41, %v5499_v13  ;;  %v13711_v37 = vcombine.low %v5507_v49, %v5515_v62  ;;  %v13713_v56 = vcombine.low %v5508_v28, %v5516_v14  ;;  %v13728_v32 = vcombine.high %v5523_v23, %v5531_v19  ;;  %v5539_v55 = vld [vmem:[%s16759_s0 + $0xeb0] sm:$0xff]  ;;  %v5540_v3 = vld [vmem:[%s16759_s0 + $0xeb8] sm:$0xff] }
0x1176   : > { %8885 = vmatpush1.bf16.msra.mxu1 %v13649_v2  ;;  %8800 = vmatprep.subr.bf16.mxu0 %v13664_v18  ;;  %v5532_v2 = vld [vmem:[%s16759_s0 + $0xe78] sm:$0xff]  ;;  %v5547_v53 = vld [vmem:[%s16759_s0 + $0xef0] sm:$0xff]  ;;  %v13727_v18 = vcombine.low %v5523_v23, %v5531_v19 }
0x1177   : > { %8886 = vmatprep.subr.bf16.mxu1 %v13666_v46  ;;  %v13730_v6 = vcombine.high %v5524_v63, %v5532_v2  ;;  %v5548_v60 = vld [vmem:[%s16759_s0 + $0xef8] sm:$0xff]  ;;  %v13729_v46 = vcombine.low %v5524_v63, %v5532_v2  ;;  %v13744_v1 = vcombine.high %v5539_v55, %v5547_v53  ;;  %v5555_v5 = vld [vmem:[%s16759_s0 + $0xf30] sm:$0xff] }
0x1178   : > { %v13746_v25 = vcombine.high %v5540_v3, %v5548_v60  ;;  %v5563_v39 = vld [vmem:[%s16759_s0 + $0xf70] sm:$0xff]  ;;  %v15360_v19 = vld [vmem:[%s16761_s14 + $0x2c] ss:$16 sps:$4 sm:$0xff]   ;;  %v15358_v2 = vld [vmem:[%s16761_s14 + $0x28] ss:$16 sps:$4 sm:$0xff]  }
0x1179   : > { %8801 = vmatpush1.bf16.msra.mxu0 %v13663_v51  ;;  %v5556_v51 = vld [vmem:[%s16759_s0 + $0xf38] sm:$0xff]  ;;  %v13760_v41 = vcombine.high %v5555_v5, %v5563_v39  ;;  %v5571_v36 = vld [vmem:[%s16759_s0 + $0xfb0] sm:$0xff] }
0x117a   : > { %8887 = vmatpush1.bf16.msra.mxu1 %v13665_v45  ;;  %8802 = vmatprep.subr.bf16.mxu0 %v13680_v38  ;;  %v5564_v45 = vld [vmem:[%s16759_s0 + $0xf78] sm:$0xff]  ;;  %v13743_v38 = vcombine.low %v5539_v55, %v5547_v53  ;;  %v5579_v42 = vld [vmem:[%s16759_s0 + $0xff0] sm:$0xff] }
0x117b   : > { %8888 = vmatprep.subr.bf16.mxu1 %v13682_v26  ;;  %v13745_v26 = vcombine.low %v5540_v3, %v5548_v60  ;;  %v13762_v13 = vcombine.high %v5556_v51, %v5564_v45  ;;  %v13776_v49 = vcombine.high %v5571_v36, %v5579_v42  ;;  %v13775_v28 = vcombine.low %v5571_v36, %v5579_v42  ;;  %v15357_v23 = vld [vmem:[%s16761_s14 + $0x24] ss:$16 sps:$4 sm:$0xff]   ;;  %v15355_v63 = vld [vmem:[%s16761_s14 + $0x20] ss:$16 sps:$4 sm:$0xff]   ;;  %v15372_v55 = vld [vmem:[%s16761_s14 + $0x6c] ss:$16 sps:$4 sm:$0xff]  }
0x117c   : > { %v15370_v53 = vld [vmem:[%s16761_s14 + $0x68] ss:$16 sps:$4 sm:$0xff]   ;;  %v15375_v3 = vld [vmem:[%s16761_s14 + $0x84] ss:$16 sps:$4 sm:$0xff]   ;;  %v15378_v60 = vld [vmem:[%s16761_s14 + $0x8c] ss:$16 sps:$4 sm:$0xff]  }
0x117d   : > { %8803 = vmatpush1.bf16.msra.mxu0 %v13679_v47  ;;  %v5572_v47 = vld [vmem:[%s16759_s0 + $0xfb8] sm:$0xff]  ;;  %v15391_v36 = vld [vmem:[%s16761_s14 + $0xe0] ss:$16 sps:$4 sm:$0xff]  }
0x117e   : > { %8889 = vmatpush1.bf16.msra.mxu1 %v13681_v58  ;;  %8804 = vmatprep.subr.bf16.mxu0 %v13696_v31  ;;  %v5580_v58 = vld [vmem:[%s16759_s0 + $0xff8] sm:$0xff]  ;;  %v13759_v31 = vcombine.low %v5555_v5, %v5563_v39  ;;  %v15379_v5 = vld [vmem:[%s16761_s14 + $0xa0] ss:$16 sps:$4 sm:$0xff]  }
0x117f   : > { %8890 = vmatprep.subr.bf16.mxu1 %v13698_v52  ;;  %v13761_v52 = vcombine.low %v5556_v51, %v5564_v45  ;;  %v13778_v62 = vcombine.high %v5572_v47, %v5580_v58  ;;  %v13777_v14 = vcombine.low %v5572_v47, %v5580_v58  ;;  %v15382_v39 = vld [vmem:[%s16761_s14 + $0xa8] ss:$16 sps:$4 sm:$0xff]   ;;  %v15387_v51 = vld [vmem:[%s16761_s14 + $0xc4] ss:$16 sps:$4 sm:$0xff]   ;;  %v15390_v45 = vld [vmem:[%s16761_s14 + $0xcc] ss:$16 sps:$4 sm:$0xff]  }
0x1180   : > { %v15394_v42 = vld [vmem:[%s16761_s14 + $0xe8] ss:$16 sps:$4 sm:$0xff]   ;;  %v15399_v47 = vld [vmem:[%s16761_s14 + $0x104] ss:$16 sps:$4 sm:$0xff]   ;;  %v15402_v58 = vld [vmem:[%s16761_s14 + $0x10c] ss:$16 sps:$4 sm:$0xff]  }
0x1181   : > { %8805 = vmatpush1.bf16.msra.mxu0 %v13695_v16  ;;  %v15351_v16 = vld [vmem:[%s16761_s14 + $0x4] ss:$16 sps:$4 sm:$0xff]  }
0x1182   : > { %8891 = vmatpush1.bf16.msra.mxu1 %v13697_v48  ;;  %8806 = vmatprep.subr.bf16.mxu0 %v13712_v7  ;;  %v15354_v48 = vld [vmem:[%s16761_s14 + $0xc] ss:$16 sps:$4 sm:$0xff]   ;;  %v15349_v7 = vld [vmem:[%s16761_s14] ss:$16 sps:$4 sm:$0xff]  }
0x1183   : > { %8892 = vmatprep.subr.bf16.mxu1 %v13714_v57  ;;  %v15352_v57 = vld [vmem:[%s16761_s14 + $0x8] ss:$16 sps:$4 sm:$0xff]  }
0x1185   : > { %8807 = vmatpush1.bf16.msra.mxu0 %v13711_v37  ;;  %v15363_v37 = vld [vmem:[%s16761_s14 + $0x44] ss:$16 sps:$4 sm:$0xff]  }
0x1186   : > { %8893 = vmatpush1.bf16.msra.mxu1 %v13713_v56  ;;  %8808 = vmatprep.subr.bf16.mxu0 %v13728_v32  ;;  %v15366_v56 = vld [vmem:[%s16761_s14 + $0x4c] ss:$16 sps:$4 sm:$0xff]   ;;  %v15364_v32 = vld [vmem:[%s16761_s14 + $0x48] ss:$16 sps:$4 sm:$0xff]  }
0x1187   : > { %8894 = vmatprep.subr.bf16.mxu1 %v13730_v6  ;;  %v15369_v6 = vld [vmem:[%s16761_s14 + $0x64] ss:$16 sps:$4 sm:$0xff]  }
0x1189   : > { %8809 = vmatpush1.bf16.msra.mxu0 %v13727_v18  ;;  %v15373_v18 = vld [vmem:[%s16761_s14 + $0x80] ss:$16 sps:$4 sm:$0xff]  }
0x118a   : > { %8895 = vmatpush1.bf16.msra.mxu1 %v13729_v46  ;;  %8810 = vmatprep.subr.bf16.mxu0 %v13744_v1  ;;  %v15376_v46 = vld [vmem:[%s16761_s14 + $0x88] ss:$16 sps:$4 sm:$0xff]   ;;  %v15381_v1 = vld [vmem:[%s16761_s14 + $0xa4] ss:$16 sps:$4 sm:$0xff]  }
0x118b   : > { %8896 = vmatprep.subr.bf16.mxu1 %v13746_v25  ;;  %v15384_v25 = vld [vmem:[%s16761_s14 + $0xac] ss:$16 sps:$4 sm:$0xff]  }
0x118d   : > { %8811 = vmatpush1.bf16.msra.mxu0 %v13743_v38  ;;  %v15385_v38 = vld [vmem:[%s16761_s14 + $0xc0] ss:$16 sps:$4 sm:$0xff]  }
0x118e   : > { %8897 = vmatpush1.bf16.msra.mxu1 %v13745_v26  ;;  %8812 = vmatprep.subr.bf16.mxu0 %v13760_v41  ;;  %v15388_v26 = vld [vmem:[%s16761_s14 + $0xc8] ss:$16 sps:$4 sm:$0xff]   ;;  %v15393_v41 = vld [vmem:[%s16761_s14 + $0xe4] ss:$16 sps:$4 sm:$0xff]  }
0x118f   : > { %8898 = vmatprep.subr.bf16.mxu1 %v13762_v13  ;;  %v15396_v13 = vld [vmem:[%s16761_s14 + $0xec] ss:$16 sps:$4 sm:$0xff]  }
0x1191   : > { %8813 = vmatpush1.bf16.msra.mxu0 %v13759_v31  ;;  %v15397_v31 = vld [vmem:[%s16761_s14 + $0x100] ss:$16 sps:$4 sm:$0xff]  }
0x1192   : > { %8899 = vmatpush1.bf16.msra.mxu1 %v13761_v52  ;;  %8814 = vmatprep.subr.bf16.mxu0 %v13776_v49  ;;  %v15400_v52 = vld [vmem:[%s16761_s14 + $0x108] ss:$16 sps:$4 sm:$0xff]   ;;  %v15405_v49 = vld [vmem:[%s16761_s14 + $0x124] ss:$16 sps:$4 sm:$0xff]  }
0x1193   : > { %8900 = vmatprep.subr.bf16.mxu1 %v13778_v62  ;;  %v15408_v62 = vld [vmem:[%s16761_s14 + $0x12c] ss:$16 sps:$4 sm:$0xff]  }
0x1195   : > { %8815 = vmatpush1.bf16.msra.mxu0 %v13775_v28  ;;  %v15403_v28 = vld [vmem:[%s16761_s14 + $0x120] ss:$16 sps:$4 sm:$0xff]  }
0x1196   : > { %8901 = vmatpush1.bf16.msra.mxu1 %v13777_v14  ;;  %12055 = vmatprep.subr.bf16.mxu0 %v15351_v16  ;;  %v15406_v14 = vld [vmem:[%s16761_s14 + $0x128] ss:$16 sps:$4 sm:$0xff]   ;;  %v15411_v16 = vld [vmem:[%s16761_s14 + $0x144] ss:$16 sps:$4 sm:$0xff]  }
0x1197   : > { %12399 = vmatprep.subr.bf16.mxu1 %v15354_v48  ;;  %v15414_v48 = vld [vmem:[%s16761_s14 + $0x14c] ss:$16 sps:$4 sm:$0xff]  }
0x1198   : > { %8817 = vmatmul.mubr.bf16.vlgmr.msra.gmra.mrb[36].mxu0 %v18057_v8 }
0x1199   : > { %8903 = vmatmul.mubr.bf16.vlgmr.msra.gmra.mrb[72].mxu1 %v18057_v8  ;;  %12056 = vmatpush1.bf16.msra.mxu0 %v15349_v7  ;;  %v15361_v8 = vld [vmem:[%s16761_s14 + $0x40] ss:$16 sps:$4 sm:$0xff]  }
0x119a   : > { %12087 = vmatprep.mubr.bf16.mxu0 %v18310_v35  ;;  %12400 = vmatpush1.bf16.msra.mxu1 %v15352_v57  ;;  %v15409_v7 = vld [vmem:[%s16761_s14 + $0x140] ss:$16 sps:$4 sm:$0xff]   ;;  %v15412_v57 = vld [vmem:[%s16761_s14 + $0x148] ss:$16 sps:$4 sm:$0xff]  }
0x119b   : > { %12431 = vmatprep.mubr.bf16.mxu1 %v18310_v35  ;;  %12057 = vmatprep.subr.bf16.mxu0 %v15357_v23  ;;  %v15367_v35 = vld [vmem:[%s16761_s14 + $0x60] ss:$16 sps:$4 sm:$0xff]   ;;  %v15417_v23 = vld [vmem:[%s16761_s14 + $0x164] ss:$16 sps:$4 sm:$0xff]  }
0x119c   : > { %12401 = vmatprep.subr.bf16.mxu1 %v15360_v19  ;;  %v15420_v19 = vld [vmem:[%s16761_s14 + $0x16c] ss:$16 sps:$4 sm:$0xff]  }
0x119d   : > { %12058 = vmatpush1.bf16.msra.mxu0 %v15355_v63  ;;  %v15415_v63 = vld [vmem:[%s16761_s14 + $0x160] ss:$16 sps:$4 sm:$0xff]  }
0x119e   : > { %12402 = vmatpush1.bf16.msra.mxu1 %v15358_v2  ;;  %12059 = vmatprep.subr.bf16.mxu0 %v15363_v37  ;;  %v15418_v2 = vld [vmem:[%s16761_s14 + $0x168] ss:$16 sps:$4 sm:$0xff]   ;;  %v15423_v37 = vld [vmem:[%s16761_s14 + $0x184] ss:$16 sps:$4 sm:$0xff]  }
0x119f   : > { %12403 = vmatprep.subr.bf16.mxu1 %v15366_v56  ;;  %v15426_v56 = vld [vmem:[%s16761_s14 + $0x18c] ss:$16 sps:$4 sm:$0xff]  }
0x11a1   : > { %12060 = vmatpush1.bf16.msra.mxu0 %v15361_v8  ;;  %v15421_v8 = vld [vmem:[%s16761_s14 + $0x180] ss:$16 sps:$4 sm:$0xff]  }
0x11a2   : > { %12404 = vmatpush1.bf16.msra.mxu1 %v15364_v32  ;;  %12061 = vmatprep.subr.bf16.mxu0 %v15369_v6  ;;  %v15424_v32 = vld [vmem:[%s16761_s14 + $0x188] ss:$16 sps:$4 sm:$0xff]   ;;  %v15429_v6 = vld [vmem:[%s16761_s14 + $0x1a4] ss:$16 sps:$4 sm:$0xff]  }
0x11a3   : > { %12405 = vmatprep.subr.bf16.mxu1 %v15372_v55  ;;  %v15432_v55 = vld [vmem:[%s16761_s14 + $0x1ac] ss:$16 sps:$4 sm:$0xff]  }
0x11a5   : > { %12062 = vmatpush1.bf16.msra.mxu0 %v15367_v35  ;;  %v15427_v35 = vld [vmem:[%s16761_s14 + $0x1a0] ss:$16 sps:$4 sm:$0xff]  }
0x11a6   : > { %12406 = vmatpush1.bf16.msra.mxu1 %v15370_v53  ;;  %12063 = vmatprep.subr.bf16.mxu0 %v15375_v3  ;;  %v15430_v53 = vld [vmem:[%s16761_s14 + $0x1a8] ss:$16 sps:$4 sm:$0xff]   ;;  %v15435_v3 = vld [vmem:[%s16761_s14 + $0x1c4] ss:$16 sps:$4 sm:$0xff]  }
0x11a7   : > { %12407 = vmatprep.subr.bf16.mxu1 %v15378_v60  ;;  %v15438_v60 = vld [vmem:[%s16761_s14 + $0x1cc] ss:$16 sps:$4 sm:$0xff]  }
0x11a9   : > { %12064 = vmatpush1.bf16.msra.mxu0 %v15373_v18  ;;  %v15433_v18 = vld [vmem:[%s16761_s14 + $0x1c0] ss:$16 sps:$4 sm:$0xff]  }
0x11aa   : > { %12408 = vmatpush1.bf16.msra.mxu1 %v15376_v46  ;;  %12065 = vmatprep.subr.bf16.mxu0 %v15381_v1  ;;  %v15436_v46 = vld [vmem:[%s16761_s14 + $0x1c8] ss:$16 sps:$4 sm:$0xff]   ;;  %v15441_v1 = vld [vmem:[%s16761_s14 + $0x1e4] ss:$16 sps:$4 sm:$0xff]  }
0x11ab   : > { %12409 = vmatprep.subr.bf16.mxu1 %v15384_v25  ;;  %v15444_v25 = vld [vmem:[%s16761_s14 + $0x1ec] ss:$16 sps:$4 sm:$0xff]  }
0x11ad   : > { %12066 = vmatpush1.bf16.msra.mxu0 %v15379_v5  ;;  %v15439_v5 = vld [vmem:[%s16761_s14 + $0x1e0] ss:$16 sps:$4 sm:$0xff]  }
0x11ae   : > { %12410 = vmatpush1.bf16.msra.mxu1 %v15382_v39  ;;  %12067 = vmatprep.subr.bf16.mxu0 %v15387_v51  ;;  %v15442_v39 = vld [vmem:[%s16761_s14 + $0x1e8] ss:$16 sps:$4 sm:$0xff]   ;;  %v15447_v51 = vld [vmem:[%s16761_s14 + $0x204] ss:$16 sps:$4 sm:$0xff]  }
0x11af   : > { %12411 = vmatprep.subr.bf16.mxu1 %v15390_v45  ;;  %v15450_v45 = vld [vmem:[%s16761_s14 + $0x20c] ss:$16 sps:$4 sm:$0xff]  }
0x11b1   : > { %12068 = vmatpush1.bf16.msra.mxu0 %v15385_v38  ;;  %v15445_v38 = vld [vmem:[%s16761_s14 + $0x200] ss:$16 sps:$4 sm:$0xff]  }
0x11b2   : > { %12412 = vmatpush1.bf16.msra.mxu1 %v15388_v26  ;;  %12069 = vmatprep.subr.bf16.mxu0 %v15393_v41  ;;  %v15448_v26 = vld [vmem:[%s16761_s14 + $0x208] ss:$16 sps:$4 sm:$0xff]   ;;  %v15453_v41 = vld [vmem:[%s16761_s14 + $0x224] ss:$16 sps:$4 sm:$0xff]  }
0x11b3   : > { %12413 = vmatprep.subr.bf16.mxu1 %v15396_v13  ;;  %v15456_v13 = vld [vmem:[%s16761_s14 + $0x22c] ss:$16 sps:$4 sm:$0xff]  }
0x11b5   : > { %12070 = vmatpush1.bf16.msra.mxu0 %v15391_v36  ;;  %v15451_v36 = vld [vmem:[%s16761_s14 + $0x220] ss:$16 sps:$4 sm:$0xff]  }
0x11b6   : > { %12414 = vmatpush1.bf16.msra.mxu1 %v15394_v42  ;;  %12071 = vmatprep.subr.bf16.mxu0 %v15399_v47  ;;  %v15454_v42 = vld [vmem:[%s16761_s14 + $0x228] ss:$16 sps:$4 sm:$0xff]   ;;  %v15459_v47 = vld [vmem:[%s16761_s14 + $0x244] ss:$16 sps:$4 sm:$0xff]  }
0x11b7   : > { %12415 = vmatprep.subr.bf16.mxu1 %v15402_v58  ;;  %v15462_v58 = vld [vmem:[%s16761_s14 + $0x24c] ss:$16 sps:$4 sm:$0xff]  }
0x11b9   : > { %12072 = vmatpush1.bf16.msra.mxu0 %v15397_v31  ;;  %v15460_v31 = vld [vmem:[%s16761_s14 + $0x248] ss:$16 sps:$4 sm:$0xff]  }
0x11ba   : > { %12416 = vmatpush1.bf16.msra.mxu1 %v15400_v52  ;;  %12073 = vmatprep.subr.bf16.mxu0 %v15405_v49  ;;  %v15465_v52 = vld [vmem:[%s16761_s14 + $0x264] ss:$16 sps:$4 sm:$0xff]   ;;  %v15468_v49 = vld [vmem:[%s16761_s14 + $0x26c] ss:$16 sps:$4 sm:$0xff]  }
0x11bb   : > { %12417 = vmatprep.subr.bf16.mxu1 %v15408_v62  ;;  %v15466_v62 = vld [vmem:[%s16761_s14 + $0x268] ss:$16 sps:$4 sm:$0xff]  }
0x11bd   : > { %12074 = vmatpush1.bf16.msra.mxu0 %v15403_v28  ;;  %v15471_v28 = vld [vmem:[%s16761_s14 + $0x284] ss:$16 sps:$4 sm:$0xff]  }
0x11be   : > { %12418 = vmatpush1.bf16.msra.mxu1 %v15406_v14  ;;  %12075 = vmatprep.subr.bf16.mxu0 %v15411_v16  ;;  %v15474_v14 = vld [vmem:[%s16761_s14 + $0x28c] ss:$16 sps:$4 sm:$0xff]   ;;  %v15469_v16 = vld [vmem:[%s16761_s14 + $0x280] ss:$16 sps:$4 sm:$0xff]  }
0x11bf   : > { %12419 = vmatprep.subr.bf16.mxu1 %v15414_v48  ;;  %v18594_v48 = vld [vmem:[%s16784_s4 + $0x8] sm:$0xff] }
0x11c1   : > { %12076 = vmatpush1.bf16.msra.mxu0 %v15409_v7  ;;  %v15472_v7 = vld [vmem:[%s16761_s14 + $0x288] ss:$16 sps:$4 sm:$0xff]  }
0x11c2   : > { %12420 = vmatpush1.bf16.msra.mxu1 %v15412_v57  ;;  %12077 = vmatprep.subr.bf16.mxu0 %v15417_v23  ;;  %v15477_v57 = vld [vmem:[%s16761_s14 + $0x2a4] ss:$16 sps:$4 sm:$0xff]   ;;  %v15480_v23 = vld [vmem:[%s16761_s14 + $0x2ac] ss:$16 sps:$4 sm:$0xff]  }
0x11c3   : > { %12421 = vmatprep.subr.bf16.mxu1 %v15420_v19  ;;  %v5620_v19 = vrot.slane %v18594_v48, %v16926_v22 }
0x11c5   : > { %12078 = vmatpush1.bf16.msra.mxu0 %v15415_v63  ;;  %v5628_v63 = vrot.slane %v18594_v48, %v17263_v40 }
0x11c6   : > { %12422 = vmatpush1.bf16.msra.mxu1 %v15418_v2  ;;  %12079 = vmatprep.subr.bf16.mxu0 %v15423_v37  ;;  %v5624_v2 = vrot.slane %v18594_v48, %v16930_v24  ;;  %v15475_v37 = vld [vmem:[%s16761_s14 + $0x2a0] ss:$16 sps:$4 sm:$0xff]  }
0x11c7   : > { %12423 = vmatprep.subr.bf16.mxu1 %v15426_v56  ;;  %v5632_v56 = vrot.slane %v18594_v48, %v17266_v59 }
0x11c9   : > { %12080 = vmatpush1.bf16.msra.mxu0 %v15421_v8  ;;  %v15478_v8 = vld [vmem:[%s16761_s14 + $0x2a8] ss:$16 sps:$4 sm:$0xff]  }
0x11ca   : > { %12424 = vmatpush1.bf16.msra.mxu1 %v15424_v32  ;;  %12081 = vmatprep.subr.bf16.mxu0 %v15429_v6  ;;  %v15483_v32 = vld [vmem:[%s16761_s14 + $0x2c4] ss:$16 sps:$4 sm:$0xff]  }
0x11cb   : > { %12425 = vmatprep.subr.bf16.mxu1 %v15432_v55  ;;  %v15486_v55 = vld [vmem:[%s16761_s14 + $0x2cc] ss:$16 sps:$4 sm:$0xff]  }
0x11cd   : > { %12082 = vmatpush1.bf16.msra.mxu0 %v15427_v35 }
0x11ce   : > { %12426 = vmatpush1.bf16.msra.mxu1 %v15430_v53  ;;  %12083 = vmatprep.subr.bf16.mxu0 %v15435_v3 }
0x11cf   : > { %12427 = vmatprep.subr.bf16.mxu1 %v15438_v60 }
0x11d1   : > { %12084 = vmatpush1.bf16.msra.mxu0 %v15433_v18 }
0x11d2   : > { %12428 = vmatpush1.bf16.msra.mxu1 %v15436_v46  ;;  %12085 = vmatprep.subr.bf16.mxu0 %v15441_v1 }
0x11d3   : > { %12429 = vmatprep.subr.bf16.mxu1 %v15444_v25  ;;  %v15481_v25 = vld [vmem:[%s16761_s14 + $0x2c0] ss:$16 sps:$4 sm:$0xff]  }
0x11d5   : > { %12086 = vmatpush1.bf16.msra.mxu0 %v15439_v5 }
0x11d6   : > { %12430 = vmatpush1.bf16.msra.mxu1 %v15442_v39  ;;  %12098 = vmatprep.subr.bf16.mxu0 %v15447_v51 }
0x11d7   : > { %12442 = vmatprep.subr.bf16.mxu1 %v15450_v45 }
0x11d8   : > { %12088 = vmatmul.mubr.bf16.vlgmr.msra.gmra.mrb[40].mxu0 %v18306_v29 }
0x11d9   : > { %12432 = vmatmul.mubr.bf16.vlgmr.msra.gmra.mrb[76].mxu1 %v18306_v29  ;;  %12099 = vmatpush1.bf16.msra.mxu0 %v15445_v38  ;;  %v15457_v29 = vld [vmem:[%s16761_s14 + $0x240] ss:$16 sps:$4 sm:$0xff]   ;;  %v15484_v38 = vld [vmem:[%s16761_s14 + $0x2c8] ss:$16 sps:$4 sm:$0xff]  }
0x11da   : > { %12130 = vmatprep.mubr.bf16.mxu0 %v18312_v54  ;;  %12443 = vmatpush1.bf16.msra.mxu1 %v15448_v26  ;;  %v15489_v26 = vld [vmem:[%s16761_s14 + $0x2e4] ss:$16 sps:$4 sm:$0xff]  }
0x11db   : > { %12474 = vmatprep.mubr.bf16.mxu1 %v18312_v54  ;;  %12100 = vmatprep.subr.bf16.mxu0 %v15453_v41  ;;  %v15463_v54 = vld [vmem:[%s16761_s14 + $0x260] ss:$16 sps:$4 sm:$0xff]  }
0x11dc   : > { %12444 = vmatprep.subr.bf16.mxu1 %v15456_v13 }
0x11dd   : > { %12101 = vmatpush1.bf16.msra.mxu0 %v15451_v36 }
0x11de   : > { %12445 = vmatpush1.bf16.msra.mxu1 %v15454_v42  ;;  %12102 = vmatprep.subr.bf16.mxu0 %v15459_v47  ;;  %v15492_v42 = vld [vmem:[%s16761_s14 + $0x2ec] ss:$16 sps:$4 sm:$0xff]  }
0x11df   : > { %12446 = vmatprep.subr.bf16.mxu1 %v15462_v58 }
0x11e1   : > { %12103 = vmatpush1.bf16.msra.mxu0 %v15457_v29 }
0x11e2   : > { %12447 = vmatpush1.bf16.msra.mxu1 %v15460_v31  ;;  %12104 = vmatprep.subr.bf16.mxu0 %v15465_v52 }
0x11e3   : > { %12448 = vmatprep.subr.bf16.mxu1 %v15468_v49 }
0x11e5   : > { %12105 = vmatpush1.bf16.msra.mxu0 %v15463_v54 }
0x11e6   : > { %12449 = vmatpush1.bf16.msra.mxu1 %v15466_v62  ;;  %12106 = vmatprep.subr.bf16.mxu0 %v15471_v28  ;;  %v15487_v62 = vld [vmem:[%s16761_s14 + $0x2e0] ss:$16 sps:$4 sm:$0xff]  }
0x11e7   : > { %12450 = vmatprep.subr.bf16.mxu1 %v15474_v14 }
0x11e9   : > { %12107 = vmatpush1.bf16.msra.mxu0 %v15469_v16 }
0x11ea   : > { %12451 = vmatpush1.bf16.msra.mxu1 %v15472_v7  ;;  %12108 = vmatprep.subr.bf16.mxu0 %v15477_v57  ;;  %v15490_v7 = vld [vmem:[%s16761_s14 + $0x2e8] ss:$16 sps:$4 sm:$0xff]   ;;  %v15495_v57 = vld [vmem:[%s16761_s14 + $0x304] ss:$16 sps:$4 sm:$0xff]  }
0x11eb   : > { %v8646_v6 = vpop.f32.mrb[32].mxu0  ;;  %12452 = vmatprep.subr.bf16.mxu1 %v15480_v23 }
0x11ec   : > { %v14790_v35 = vadd.f32 %v8646_v6, %v5620_v19  ;;  %v8732_v53 = vpop.f32.mrb[68].mxu1  ;;  %v8648_v3 = vpop.f32.mrb[33].mxu0  ;;  %v15499_v6 = vld [vmem:[%s16761_s14 + $0x320] ss:$16 sps:$4 sm:$0xff]  }
0x11ed   : > { %v14794_v60 = vadd.f32 %v8732_v53, %v5628_v63  ;;  %v14791_v18 = vadd.f32 %v8648_v3, %v5624_v2  ;;  %v8734_v46 = vpop.f32.mrb[69].mxu1  ;;  %v8650_v1 = vpop.f32.mrb[34].mxu0  ;;  %12109 = vmatpush1.bf16.msra.mxu0 %v15475_v37  ;;  %v15493_v37 = vld [vmem:[%s16761_s14 + $0x300] ss:$16 sps:$4 sm:$0xff]   ;;  %v15510_v53 = vld [vmem:[%s16761_s14 + $0x34c] ss:$16 sps:$4 sm:$0xff]  }
0x11ee   : > { %v14795_v5 = vadd.f32 %v8734_v46, %v5632_v56  ;;  %v14792_v39 = vadd.f32 %v8650_v1, %v5620_v19  ;;  %v8736_v51 = vpop.f32.mrb[70].mxu1  ;;  %12453 = vmatpush1.bf16.msra.mxu1 %v15478_v8  ;;  %v8652_v45 = vpop.f32.mrb[35].mxu0  ;;  %12110 = vmatprep.subr.bf16.mxu0 %v15483_v32  ;;  %v8921_v47 = vmax.f32 %v14790_v35, 0.0  ;;  %v15501_v8 = vld [vmem:[%s16761_s14 + $0x324] ss:$16 sps:$4 sm:$0xff]  }
0x11ef   : > { %v14796_v41 = vadd.f32 %v8736_v51, %v5628_v63  ;;  %v14793_v13 = vadd.f32 %v8652_v45, %v5624_v2  ;;  %v8738_v36 = vpop.f32.mrb[71].mxu1  ;;  %12454 = vmatprep.subr.bf16.mxu1 %v15486_v55  ;;  %v8923_v31 = vmax.f32 %v14794_v60, 0.0  ;;  %v8922_v52 = vmax.f32 %v14791_v18, 0.0  ;;  %v15498_v63 = vld [vmem:[%s16761_s14 + $0x30c] ss:$16 sps:$4 sm:$0xff]  }
0x11f0   : > { %v8937_v58 = vmax.f32 %v14792_v39, 0.0  ;;  %v14797_v29 = vadd.f32 %v8738_v36, %v5632_v56  ;;  %v8924_v28 = vmax.f32 %v14795_v5, 0.0  ;;  %v15496_v56 = vld [vmem:[%s16761_s14 + $0x308] ss:$16 sps:$4 sm:$0xff]   ;;  %v15504_v32 = vld [vmem:[%s16761_s14 + $0x32c] ss:$16 sps:$4 sm:$0xff]  }
0x11f1   : > { %v8939_v49 = vmax.f32 %v14796_v41, 0.0  ;;  %v8938_v54 = vmax.f32 %v14793_v13, 0.0  ;;  %12111 = vmatpush1.bf16.msra.mxu0 %v15481_v25  ;;  %v15502_v55 = vld [vmem:[%s16761_s14 + $0x328] ss:$16 sps:$4 sm:$0xff]   ;;  %v15507_v35 = vld [vmem:[%s16761_s14 + $0x344] ss:$16 sps:$4 sm:$0xff]  }
0x11f2   : > { %v18616_v14 = vpack.c.bf16 %v8937_v58, %v8921_v47  ;;  %v8940_v16 = vmax.f32 %v14797_v29, 0.0  ;;  %12455 = vmatpush1.bf16.msra.mxu1 %v15484_v38  ;;  %12112 = vmatprep.subr.bf16.mxu0 %v15489_v26  ;;  %v15505_v3 = vld [vmem:[%s16761_s14 + $0x340] ss:$16 sps:$4 sm:$0xff]   ;;  %v15508_v60 = vld [vmem:[%s16761_s14 + $0x348] ss:$16 sps:$4 sm:$0xff]  }
0x11f3   : > { %v18620_v23 = vpack.c.bf16 %v8939_v49, %v8923_v31  ;;  %v18622_v19 = vpack.c.bf16 %v8938_v54, %v8922_v52  ;;  %12456 = vmatprep.subr.bf16.mxu1 %v15492_v42  ;;  %v15513_v18 = vld [vmem:[%s16761_s14 + $0x364] ss:$16 sps:$4 sm:$0xff]   ;;  %v15516_v46 = vld [vmem:[%s16761_s14 + $0x36c] ss:$16 sps:$4 sm:$0xff]   ;;  %v15511_v1 = vld [vmem:[%s16761_s14 + $0x360] ss:$16 sps:$4 sm:$0xff]  }
0x11f4   : > { %v18625_v2 = vpack.c.bf16 %v8940_v16, %v8924_v28  ;;  %v15514_v25 = vld [vmem:[%s16761_s14 + $0x368] ss:$16 sps:$4 sm:$0xff]   ;;  %v15519_v5 = vld [vmem:[%s16761_s14 + $0x384] ss:$16 sps:$4 sm:$0xff]   ;;  %v15522_v39 = vld [vmem:[%s16761_s14 + $0x38c] ss:$16 sps:$4 sm:$0xff]  }
0x11f5   : > { %12113 = vmatpush1.bf16.msra.mxu0 %v15487_v62  ;;  %v15517_v51 = vld [vmem:[%s16761_s14 + $0x380] ss:$16 sps:$4 sm:$0xff]   ;;  %v15520_v45 = vld [vmem:[%s16761_s14 + $0x388] ss:$16 sps:$4 sm:$0xff]   ;;  %v15525_v38 = vld [vmem:[%s16761_s14 + $0x3a4] ss:$16 sps:$4 sm:$0xff]  }
0x11f6   : > { %12457 = vmatpush1.bf16.msra.mxu1 %v15490_v7  ;;  %12114 = vmatprep.subr.bf16.mxu0 %v15495_v57  ;;  %v15528_v26 = vld [vmem:[%s16761_s14 + $0x3ac] ss:$16 sps:$4 sm:$0xff]   ;;  %v15523_v41 = vld [vmem:[%s16761_s14 + $0x3a0] ss:$16 sps:$4 sm:$0xff]   ;;  %v15526_v13 = vld [vmem:[%s16761_s14 + $0x3a8] ss:$16 sps:$4 sm:$0xff]  }
0x11f7   : > { %12458 = vmatprep.subr.bf16.mxu1 %v15498_v63  ;;  %v15531_v36 = vld [vmem:[%s16761_s14 + $0x3c4] ss:$16 sps:$4 sm:$0xff]   ;;  %v15534_v42 = vld [vmem:[%s16761_s14 + $0x3cc] ss:$16 sps:$4 sm:$0xff]   ;;  %v15529_v47 = vld [vmem:[%s16761_s14 + $0x3c0] ss:$16 sps:$4 sm:$0xff]  }
0x11f8   : > { %v15532_v58 = vld [vmem:[%s16761_s14 + $0x3c8] ss:$16 sps:$4 sm:$0xff]   ;;  %v15537_v29 = vld [vmem:[%s16761_s14 + $0x3e4] ss:$16 sps:$4 sm:$0xff]   ;;  %v15540_v31 = vld [vmem:[%s16761_s14 + $0x3ec] ss:$16 sps:$4 sm:$0xff]  }
0x11f9   : > { %12115 = vmatpush1.bf16.msra.mxu0 %v15493_v37  ;;  %v15535_v52 = vld [vmem:[%s16761_s14 + $0x3e0] ss:$16 sps:$4 sm:$0xff]   ;;  %v15538_v49 = vld [vmem:[%s16761_s14 + $0x3e8] ss:$16 sps:$4 sm:$0xff]   ;;  %v15543_v54 = vld [vmem:[%s16761_s14 + $0x404] ss:$16 sps:$4 sm:$0xff]  }
0x11fa   : > { %12459 = vmatpush1.bf16.msra.mxu1 %v15496_v56  ;;  %12116 = vmatprep.subr.bf16.mxu0 %v15501_v8  ;;  %v15546_v62 = vld [vmem:[%s16761_s14 + $0x40c] ss:$16 sps:$4 sm:$0xff]   ;;  %v15541_v28 = vld [vmem:[%s16761_s14 + $0x400] ss:$16 sps:$4 sm:$0xff]   ;;  %v15544_v16 = vld [vmem:[%s16761_s14 + $0x408] ss:$16 sps:$4 sm:$0xff]  }
0x11fb   : > { %12460 = vmatprep.subr.bf16.mxu1 %v15504_v32  ;;  %v15549_v7 = vld [vmem:[%s16761_s14 + $0x424] ss:$16 sps:$4 sm:$0xff]   ;;  %v15552_v57 = vld [vmem:[%s16761_s14 + $0x42c] ss:$16 sps:$4 sm:$0xff]   ;;  %v15547_v63 = vld [vmem:[%s16761_s14 + $0x420] ss:$16 sps:$4 sm:$0xff]  }
0x11fc   : > { %v15550_v37 = vld [vmem:[%s16761_s14 + $0x428] ss:$16 sps:$4 sm:$0xff]   ;;  %v15555_v56 = vld [vmem:[%s16761_s14 + $0x444] ss:$16 sps:$4 sm:$0xff]   ;;  %v15558_v8 = vld [vmem:[%s16761_s14 + $0x44c] ss:$16 sps:$4 sm:$0xff]  }
0x11fd   : > { %12117 = vmatpush1.bf16.msra.mxu0 %v15499_v6  ;;  %v15556_v32 = vld [vmem:[%s16761_s14 + $0x448] ss:$16 sps:$4 sm:$0xff]   ;;  %v15561_v6 = vld [vmem:[%s16761_s14 + $0x464] ss:$16 sps:$4 sm:$0xff]  }
0x11fe   : > { %12461 = vmatpush1.bf16.msra.mxu1 %v15502_v55  ;;  %12118 = vmatprep.subr.bf16.mxu0 %v15507_v35  ;;  %v15564_v55 = vld [vmem:[%s16761_s14 + $0x46c] ss:$16 sps:$4 sm:$0xff]   ;;  %v15562_v35 = vld [vmem:[%s16761_s14 + $0x468] ss:$16 sps:$4 sm:$0xff]  }
0x11ff   : > { %12462 = vmatprep.subr.bf16.mxu1 %v15510_v53  ;;  %v15567_v53 = vld [vmem:[%s16761_s14 + $0x484] ss:$16 sps:$4 sm:$0xff]  }
0x1201   : > { %12119 = vmatpush1.bf16.msra.mxu0 %v15505_v3  ;;  %v15570_v3 = vld [vmem:[%s16761_s14 + $0x48c] ss:$16 sps:$4 sm:$0xff]  }
0x1202   : > { %12463 = vmatpush1.bf16.msra.mxu1 %v15508_v60  ;;  %12120 = vmatprep.subr.bf16.mxu0 %v15513_v18  ;;  %v15565_v60 = vld [vmem:[%s16761_s14 + $0x480] ss:$16 sps:$4 sm:$0xff]   ;;  %v15568_v18 = vld [vmem:[%s16761_s14 + $0x488] ss:$16 sps:$4 sm:$0xff]  }
0x1203   : > { %12464 = vmatprep.subr.bf16.mxu1 %v15516_v46  ;;  %v15573_v46 = vld [vmem:[%s16761_s14 + $0x4a4] ss:$16 sps:$4 sm:$0xff]  }
0x1205   : > { %12121 = vmatpush1.bf16.msra.mxu0 %v15511_v1  ;;  %v15576_v1 = vld [vmem:[%s16761_s14 + $0x4ac] ss:$16 sps:$4 sm:$0xff]  }
0x1206   : > { %12465 = vmatpush1.bf16.msra.mxu1 %v15514_v25  ;;  %12122 = vmatprep.subr.bf16.mxu0 %v15519_v5  ;;  %v15571_v25 = vld [vmem:[%s16761_s14 + $0x4a0] ss:$16 sps:$4 sm:$0xff]   ;;  %v15574_v5 = vld [vmem:[%s16761_s14 + $0x4a8] ss:$16 sps:$4 sm:$0xff]  }
0x1207   : > { %12466 = vmatprep.subr.bf16.mxu1 %v15522_v39  ;;  %v15579_v39 = vld [vmem:[%s16761_s14 + $0x4c4] ss:$16 sps:$4 sm:$0xff]  }
0x1209   : > { %12123 = vmatpush1.bf16.msra.mxu0 %v15517_v51  ;;  %v15582_v51 = vld [vmem:[%s16761_s14 + $0x4cc] ss:$16 sps:$4 sm:$0xff]  }
0x120a   : > { %12467 = vmatpush1.bf16.msra.mxu1 %v15520_v45  ;;  %12124 = vmatprep.subr.bf16.mxu0 %v15525_v38  ;;  %v15577_v45 = vld [vmem:[%s16761_s14 + $0x4c0] ss:$16 sps:$4 sm:$0xff]   ;;  %v15580_v38 = vld [vmem:[%s16761_s14 + $0x4c8] ss:$16 sps:$4 sm:$0xff]  }
0x120b   : > { %12468 = vmatprep.subr.bf16.mxu1 %v15528_v26  ;;  %v15585_v26 = vld [vmem:[%s16761_s14 + $0x4e4] ss:$16 sps:$4 sm:$0xff]  }
0x120d   : > { %12125 = vmatpush1.bf16.msra.mxu0 %v15523_v41  ;;  %v15588_v41 = vld [vmem:[%s16761_s14 + $0x4ec] ss:$16 sps:$4 sm:$0xff]  }
0x120e   : > { %12469 = vmatpush1.bf16.msra.mxu1 %v15526_v13  ;;  %12126 = vmatprep.subr.bf16.mxu0 %v15531_v36  ;;  %v15583_v13 = vld [vmem:[%s16761_s14 + $0x4e0] ss:$16 sps:$4 sm:$0xff]   ;;  %v15586_v36 = vld [vmem:[%s16761_s14 + $0x4e8] ss:$16 sps:$4 sm:$0xff]  }
0x120f   : > { %12470 = vmatprep.subr.bf16.mxu1 %v15534_v42  ;;  %v15591_v42 = vld [vmem:[%s16761_s14 + $0x504] ss:$16 sps:$4 sm:$0xff]  }
0x1211   : > { %12127 = vmatpush1.bf16.msra.mxu0 %v15529_v47  ;;  %v15594_v47 = vld [vmem:[%s16761_s14 + $0x50c] ss:$16 sps:$4 sm:$0xff]  }
0x1212   : > { %12471 = vmatpush1.bf16.msra.mxu1 %v15532_v58  ;;  %12128 = vmatprep.subr.bf16.mxu0 %v15537_v29  ;;  %v15589_v58 = vld [vmem:[%s16761_s14 + $0x500] ss:$16 sps:$4 sm:$0xff]   ;;  %v15592_v29 = vld [vmem:[%s16761_s14 + $0x508] ss:$16 sps:$4 sm:$0xff]  }
0x1213   : > { %12472 = vmatprep.subr.bf16.mxu1 %v15540_v31  ;;  %v15597_v31 = vld [vmem:[%s16761_s14 + $0x524] ss:$16 sps:$4 sm:$0xff]  }
0x1215   : > { %12129 = vmatpush1.bf16.msra.mxu0 %v15535_v52  ;;  %v15600_v52 = vld [vmem:[%s16761_s14 + $0x52c] ss:$16 sps:$4 sm:$0xff]  }
0x1216   : > { %12473 = vmatpush1.bf16.msra.mxu1 %v15538_v49  ;;  %12141 = vmatprep.subr.bf16.mxu0 %v15543_v54  ;;  %v15595_v49 = vld [vmem:[%s16761_s14 + $0x520] ss:$16 sps:$4 sm:$0xff]   ;;  %v15598_v54 = vld [vmem:[%s16761_s14 + $0x528] ss:$16 sps:$4 sm:$0xff]  }
0x1217   : > { %12485 = vmatprep.subr.bf16.mxu1 %v15546_v62  ;;  %v15603_v62 = vld [vmem:[%s16761_s14 + $0x544] ss:$16 sps:$4 sm:$0xff]  }
0x1218   : > { %12131 = vmatmul.mubr.bf16.vlgmr.msra.gmra.mrb[40].mxu0 %v18308_v10 }
0x1219   : > { %12475 = vmatmul.mubr.bf16.vlgmr.msra.gmra.mrb[76].mxu1 %v18308_v10  ;;  %12142 = vmatpush1.bf16.msra.mxu0 %v15541_v28  ;;  %v15553_v10 = vld [vmem:[%s16761_s14 + $0x440] ss:$16 sps:$4 sm:$0xff]   ;;  %v15606_v28 = vld [vmem:[%s16761_s14 + $0x54c] ss:$16 sps:$4 sm:$0xff]  }
0x121a   : > { %12173 = vmatprep.mubr.bf16.mxu0 %v18470_v34  ;;  %12486 = vmatpush1.bf16.msra.mxu1 %v15544_v16  ;;  %v15601_v16 = vld [vmem:[%s16761_s14 + $0x540] ss:$16 sps:$4 sm:$0xff]  }
0x121b   : > { %12517 = vmatprep.mubr.bf16.mxu1 %v18470_v34  ;;  %12143 = vmatprep.subr.bf16.mxu0 %v15549_v7  ;;  %v15559_v34 = vld [vmem:[%s16761_s14 + $0x460] ss:$16 sps:$4 sm:$0xff]   ;;  %v15604_v7 = vld [vmem:[%s16761_s14 + $0x548] ss:$16 sps:$4 sm:$0xff]  }
0x121c   : > { %12487 = vmatprep.subr.bf16.mxu1 %v15552_v57  ;;  %v15609_v57 = vld [vmem:[%s16761_s14 + $0x564] ss:$16 sps:$4 sm:$0xff]  }
0x121d   : > { %12144 = vmatpush1.bf16.msra.mxu0 %v15547_v63  ;;  %v15612_v63 = vld [vmem:[%s16761_s14 + $0x56c] ss:$16 sps:$4 sm:$0xff]  }
0x121e   : > { %12488 = vmatpush1.bf16.msra.mxu1 %v15550_v37  ;;  %12145 = vmatprep.subr.bf16.mxu0 %v15555_v56  ;;  %v15607_v37 = vld [vmem:[%s16761_s14 + $0x560] ss:$16 sps:$4 sm:$0xff]   ;;  %v15610_v56 = vld [vmem:[%s16761_s14 + $0x568] ss:$16 sps:$4 sm:$0xff]  }
0x121f   : > { %12489 = vmatprep.subr.bf16.mxu1 %v15558_v8  ;;  %v15615_v8 = vld [vmem:[%s16761_s14 + $0x584] ss:$16 sps:$4 sm:$0xff]  }
0x1221   : > { %12146 = vmatpush1.bf16.msra.mxu0 %v15553_v10  ;;  %v15618_v10 = vld [vmem:[%s16761_s14 + $0x58c] ss:$16 sps:$4 sm:$0xff]  }
0x1222   : > { %12490 = vmatpush1.bf16.msra.mxu1 %v15556_v32  ;;  %12147 = vmatprep.subr.bf16.mxu0 %v15561_v6  ;;  %v15613_v32 = vld [vmem:[%s16761_s14 + $0x580] ss:$16 sps:$4 sm:$0xff]   ;;  %v15616_v6 = vld [vmem:[%s16761_s14 + $0x588] ss:$16 sps:$4 sm:$0xff]  }
0x1223   : > { %12491 = vmatprep.subr.bf16.mxu1 %v15564_v55  ;;  %v15621_v55 = vld [vmem:[%s16761_s14 + $0x5a4] ss:$16 sps:$4 sm:$0xff]  }
0x1225   : > { %12148 = vmatpush1.bf16.msra.mxu0 %v15559_v34  ;;  %v15624_v34 = vld [vmem:[%s16761_s14 + $0x5ac] ss:$16 sps:$4 sm:$0xff]  }
0x1226   : > { %12492 = vmatpush1.bf16.msra.mxu1 %v15562_v35  ;;  %12149 = vmatprep.subr.bf16.mxu0 %v15567_v53  ;;  %v15619_v35 = vld [vmem:[%s16761_s14 + $0x5a0] ss:$16 sps:$4 sm:$0xff]   ;;  %v15622_v53 = vld [vmem:[%s16761_s14 + $0x5a8] ss:$16 sps:$4 sm:$0xff]  }
0x1227   : > { %12493 = vmatprep.subr.bf16.mxu1 %v15570_v3  ;;  %v15627_v3 = vld [vmem:[%s16761_s14 + $0x5c4] ss:$16 sps:$4 sm:$0xff]  }
0x1229   : > { %12150 = vmatpush1.bf16.msra.mxu0 %v15565_v60  ;;  %v15630_v60 = vld [vmem:[%s16761_s14 + $0x5cc] ss:$16 sps:$4 sm:$0xff]  }
0x122a   : > { %12494 = vmatpush1.bf16.msra.mxu1 %v15568_v18  ;;  %12151 = vmatprep.subr.bf16.mxu0 %v15573_v46  ;;  %v15625_v18 = vld [vmem:[%s16761_s14 + $0x5c0] ss:$16 sps:$4 sm:$0xff]   ;;  %v15628_v46 = vld [vmem:[%s16761_s14 + $0x5c8] ss:$16 sps:$4 sm:$0xff]  }
0x122b   : > { %12495 = vmatprep.subr.bf16.mxu1 %v15576_v1  ;;  %v15633_v1 = vld [vmem:[%s16761_s14 + $0x5e4] ss:$16 sps:$4 sm:$0xff]  }
0x122d   : > { %12152 = vmatpush1.bf16.msra.mxu0 %v15571_v25  ;;  %v15636_v25 = vld [vmem:[%s16761_s14 + $0x5ec] ss:$16 sps:$4 sm:$0xff]  }
0x122e   : > { %12496 = vmatpush1.bf16.msra.mxu1 %v15574_v5  ;;  %12153 = vmatprep.subr.bf16.mxu0 %v15579_v39  ;;  %v15631_v5 = vld [vmem:[%s16761_s14 + $0x5e0] ss:$16 sps:$4 sm:$0xff]   ;;  %v15634_v39 = vld [vmem:[%s16761_s14 + $0x5e8] ss:$16 sps:$4 sm:$0xff]  }
0x122f   : > { %12497 = vmatprep.subr.bf16.mxu1 %v15582_v51  ;;  %v15639_v51 = vld [vmem:[%s16761_s14 + $0x604] ss:$16 sps:$4 sm:$0xff]  }
0x1231   : > { %12154 = vmatpush1.bf16.msra.mxu0 %v15577_v45  ;;  %v15642_v45 = vld [vmem:[%s16761_s14 + $0x60c] ss:$16 sps:$4 sm:$0xff]  }
0x1232   : > { %12498 = vmatpush1.bf16.msra.mxu1 %v15580_v38  ;;  %12155 = vmatprep.subr.bf16.mxu0 %v15585_v26  ;;  %v15637_v38 = vld [vmem:[%s16761_s14 + $0x600] ss:$16 sps:$4 sm:$0xff]   ;;  %v15640_v26 = vld [vmem:[%s16761_s14 + $0x608] ss:$16 sps:$4 sm:$0xff]  }
0x1233   : > { %12499 = vmatprep.subr.bf16.mxu1 %v15588_v41  ;;  %v15645_v41 = vld [vmem:[%s16761_s14 + $0x624] ss:$16 sps:$4 sm:$0xff]  }
0x1235   : > { %12156 = vmatpush1.bf16.msra.mxu0 %v15583_v13  ;;  %v15648_v13 = vld [vmem:[%s16761_s14 + $0x62c] ss:$16 sps:$4 sm:$0xff]  }
0x1236   : > { %12500 = vmatpush1.bf16.msra.mxu1 %v15586_v36  ;;  %12157 = vmatprep.subr.bf16.mxu0 %v15591_v42  ;;  %v15643_v36 = vld [vmem:[%s16761_s14 + $0x620] ss:$16 sps:$4 sm:$0xff]   ;;  %v15646_v42 = vld [vmem:[%s16761_s14 + $0x628] ss:$16 sps:$4 sm:$0xff]  }
0x1237   : > { %12501 = vmatprep.subr.bf16.mxu1 %v15594_v47  ;;  %v15651_v47 = vld [vmem:[%s16761_s14 + $0x644] ss:$16 sps:$4 sm:$0xff]  }
0x1239   : > { %12158 = vmatpush1.bf16.msra.mxu0 %v15589_v58  ;;  %v15654_v58 = vld [vmem:[%s16761_s14 + $0x64c] ss:$16 sps:$4 sm:$0xff]  }
0x123a   : > { %12502 = vmatpush1.bf16.msra.mxu1 %v15592_v29  ;;  %12159 = vmatprep.subr.bf16.mxu0 %v15597_v31  ;;  %v15652_v29 = vld [vmem:[%s16761_s14 + $0x648] ss:$16 sps:$4 sm:$0xff]   ;;  %v15657_v31 = vld [vmem:[%s16761_s14 + $0x664] ss:$16 sps:$4 sm:$0xff]  }
0x123b   : > { %12503 = vmatprep.subr.bf16.mxu1 %v15600_v52  ;;  %v15660_v52 = vld [vmem:[%s16761_s14 + $0x66c] ss:$16 sps:$4 sm:$0xff]  }
0x123d   : > { %12160 = vmatpush1.bf16.msra.mxu0 %v15595_v49  ;;  %v15658_v49 = vld [vmem:[%s16761_s14 + $0x668] ss:$16 sps:$4 sm:$0xff]  }
0x123e   : > { %12504 = vmatpush1.bf16.msra.mxu1 %v15598_v54  ;;  %12161 = vmatprep.subr.bf16.mxu0 %v15603_v62  ;;  %v15663_v54 = vld [vmem:[%s16761_s14 + $0x684] ss:$16 sps:$4 sm:$0xff]   ;;  %v15666_v62 = vld [vmem:[%s16761_s14 + $0x68c] ss:$16 sps:$4 sm:$0xff]  }
0x123f   : > { %12505 = vmatprep.subr.bf16.mxu1 %v15606_v28  ;;  %v15661_v28 = vld [vmem:[%s16761_s14 + $0x680] ss:$16 sps:$4 sm:$0xff]  }
0x1241   : > { %12162 = vmatpush1.bf16.msra.mxu0 %v15601_v16  ;;  %v15664_v16 = vld [vmem:[%s16761_s14 + $0x688] ss:$16 sps:$4 sm:$0xff]  }
0x1242   : > { %12506 = vmatpush1.bf16.msra.mxu1 %v15604_v7  ;;  %12163 = vmatprep.subr.bf16.mxu0 %v15609_v57  ;;  %v15669_v7 = vld [vmem:[%s16761_s14 + $0x6a4] ss:$16 sps:$4 sm:$0xff]   ;;  %v15672_v57 = vld [vmem:[%s16761_s14 + $0x6ac] ss:$16 sps:$4 sm:$0xff]  }
0x1243   : > { %12507 = vmatprep.subr.bf16.mxu1 %v15612_v63  ;;  %v5636_v63 = vrot.slane %v18594_v48, %v5603_v15 }
0x1245   : > { %12164 = vmatpush1.bf16.msra.mxu0 %v15607_v37  ;;  %v5644_v37 = vrot.slane %v18594_v48, %v5611_v27 }
0x1246   : > { %12508 = vmatpush1.bf16.msra.mxu1 %v15610_v56  ;;  %12165 = vmatprep.subr.bf16.mxu0 %v15615_v8  ;;  %v5640_v56 = vrot.slane %v18594_v48, %v5607_v61  ;;  %v15667_v8 = vld [vmem:[%s16761_s14 + $0x6a0] ss:$16 sps:$4 sm:$0xff]  }
0x1247   : > { %12509 = vmatprep.subr.bf16.mxu1 %v15618_v10  ;;  %v5648_v10 = vrot.slane %v18594_v48, %v5615_v20 }
0x1249   : > { %12166 = vmatpush1.bf16.msra.mxu0 %v15613_v32  ;;  %v15670_v32 = vld [vmem:[%s16761_s14 + $0x6a8] ss:$16 sps:$4 sm:$0xff]  }
0x124a   : > { %12510 = vmatpush1.bf16.msra.mxu1 %v15616_v6  ;;  %12167 = vmatprep.subr.bf16.mxu0 %v15621_v55  ;;  %v15675_v6 = vld [vmem:[%s16761_s14 + $0x6c4] ss:$16 sps:$4 sm:$0xff]   ;;  %v15678_v55 = vld [vmem:[%s16761_s14 + $0x6cc] ss:$16 sps:$4 sm:$0xff]  }
0x124b   : > { %12511 = vmatprep.subr.bf16.mxu1 %v15624_v34 }
0x124d   : > { %12168 = vmatpush1.bf16.msra.mxu0 %v15619_v35 }
0x124e   : > { %12512 = vmatpush1.bf16.msra.mxu1 %v15622_v53  ;;  %12169 = vmatprep.subr.bf16.mxu0 %v15627_v3 }
0x124f   : > { %12513 = vmatprep.subr.bf16.mxu1 %v15630_v60 }
0x1251   : > { %12170 = vmatpush1.bf16.msra.mxu0 %v15625_v18 }
0x1252   : > { %12514 = vmatpush1.bf16.msra.mxu1 %v15628_v46  ;;  %12171 = vmatprep.subr.bf16.mxu0 %v15633_v1  ;;  %v15676_v1 = vld [vmem:[%s16761_s14 + $0x6c8] ss:$16 sps:$4 sm:$0xff]  }
0x1253   : > { %12515 = vmatprep.subr.bf16.mxu1 %v15636_v25  ;;  %v15681_v25 = vld [vmem:[%s16761_s14 + $0x6e4] ss:$16 sps:$4 sm:$0xff]  }
0x1255   : > { %12172 = vmatpush1.bf16.msra.mxu0 %v15631_v5 }
0x1256   : > { %12516 = vmatpush1.bf16.msra.mxu1 %v15634_v39  ;;  %12184 = vmatprep.subr.bf16.mxu0 %v15639_v51 }
0x1257   : > { %12528 = vmatprep.subr.bf16.mxu1 %v15642_v45  ;;  %v15684_v45 = vld [vmem:[%s16761_s14 + $0x6ec] ss:$16 sps:$4 sm:$0xff]  }
0x1258   : > { %12174 = vmatmul.mubr.bf16.vlgmr.msra.gmra.mrb[40].mxu0 %v18466_v4 }
0x1259   : > { %12518 = vmatmul.mubr.bf16.vlgmr.msra.gmra.mrb[76].mxu1 %v18466_v4  ;;  %12185 = vmatpush1.bf16.msra.mxu0 %v15637_v38  ;;  %v15649_v4 = vld [vmem:[%s16761_s14 + $0x640] ss:$16 sps:$4 sm:$0xff]  }
0x125a   : > { %12216 = vmatprep.mubr.bf16.mxu0 %v18474_v43  ;;  %12529 = vmatpush1.bf16.msra.mxu1 %v15640_v26 }
0x125b   : > { %12560 = vmatprep.mubr.bf16.mxu1 %v18474_v43  ;;  %12186 = vmatprep.subr.bf16.mxu0 %v15645_v41  ;;  %v15655_v43 = vld [vmem:[%s16761_s14 + $0x660] ss:$16 sps:$4 sm:$0xff]  }
0x125c   : > { %12530 = vmatprep.subr.bf16.mxu1 %v15648_v13 }
0x125d   : > { %12187 = vmatpush1.bf16.msra.mxu0 %v15643_v36 }
0x125e   : > { %12531 = vmatpush1.bf16.msra.mxu1 %v15646_v42  ;;  %12188 = vmatprep.subr.bf16.mxu0 %v15651_v47 }
0x125f   : > { %12532 = vmatprep.subr.bf16.mxu1 %v15654_v58  ;;  %v15679_v58 = vld [vmem:[%s16761_s14 + $0x6e0] ss:$16 sps:$4 sm:$0xff]  }
0x1261   : > { %12189 = vmatpush1.bf16.msra.mxu0 %v15649_v4 }
0x1262   : > { %12533 = vmatpush1.bf16.msra.mxu1 %v15652_v29  ;;  %12190 = vmatprep.subr.bf16.mxu0 %v15657_v31 }
0x1263   : > { %12534 = vmatprep.subr.bf16.mxu1 %v15660_v52  ;;  %v15682_v52 = vld [vmem:[%s16761_s14 + $0x6e8] ss:$16 sps:$4 sm:$0xff]  }
0x1265   : > { %12191 = vmatpush1.bf16.msra.mxu0 %v15655_v43  ;;  %v15687_v43 = vld [vmem:[%s16761_s14 + $0x704] ss:$16 sps:$4 sm:$0xff]  }
0x1266   : > { %12535 = vmatpush1.bf16.msra.mxu1 %v15658_v49  ;;  %12192 = vmatprep.subr.bf16.mxu0 %v15663_v54 }
0x1267   : > { %12536 = vmatprep.subr.bf16.mxu1 %v15666_v62  ;;  %v15690_v62 = vld [vmem:[%s16761_s14 + $0x70c] ss:$16 sps:$4 sm:$0xff]  }
0x1269   : > { %12193 = vmatpush1.bf16.msra.mxu0 %v15661_v28 }
0x126a   : > { %12537 = vmatpush1.bf16.msra.mxu1 %v15664_v16  ;;  %12194 = vmatprep.subr.bf16.mxu0 %v15669_v7  ;;  %v15685_v16 = vld [vmem:[%s16761_s14 + $0x700] ss:$16 sps:$4 sm:$0xff]   ;;  %v15688_v7 = vld [vmem:[%s16761_s14 + $0x708] ss:$16 sps:$4 sm:$0xff]  }
0x126b   : > { %v8818_v15 = vpop.f32.mrb[36].mxu0  ;;  %12538 = vmatprep.subr.bf16.mxu1 %v15672_v57  ;;  %v15693_v57 = vld [vmem:[%s16761_s14 + $0x724] ss:$16 sps:$4 sm:$0xff]  }
0x126c   : > { %v14798_v34 = vadd.f32 %v8818_v15, %v5636_v63  ;;  %v8904_v27 = vpop.f32.mrb[72].mxu1  ;;  %v8820_v35 = vpop.f32.mrb[37].mxu0  ;;  %v15705_v15 = vld [vmem:[%s16761_s14 + $0x764] ss:$16 sps:$4 sm:$0xff]  }
0x126d   : > { %v14802_v53 = vadd.f32 %v8904_v27, %v5644_v37  ;;  %v14799_v61 = vadd.f32 %v8820_v35, %v5640_v56  ;;  %v8906_v3 = vpop.f32.mrb[73].mxu1  ;;  %v8822_v60 = vpop.f32.mrb[38].mxu0  ;;  %12195 = vmatpush1.bf16.msra.mxu0 %v15667_v8  ;;  %v15699_v8 = vld [vmem:[%s16761_s14 + $0x744] ss:$16 sps:$4 sm:$0xff]   ;;  %v15706_v27 = vld [vmem:[%s16761_s14 + $0x768] ss:$16 sps:$4 sm:$0xff]  }
0x126e   : > { %v14803_v18 = vadd.f32 %v8906_v3, %v5648_v10  ;;  %v14800_v20 = vadd.f32 %v8822_v60, %v5636_v63  ;;  %v8908_v48 = vpop.f32.mrb[74].mxu1  ;;  %12539 = vmatpush1.bf16.msra.mxu1 %v15670_v32  ;;  %v8824_v46 = vpop.f32.mrb[39].mxu0  ;;  %12196 = vmatprep.subr.bf16.mxu0 %v15675_v6  ;;  %v8925_v38 = vmax.f32 %v14798_v34, 0.0  ;;  %v15696_v63 = vld [vmem:[%s16761_s14 + $0x72c] ss:$16 sps:$4 sm:$0xff]  }
0x126f   : > { %v14804_v5 = vadd.f32 %v8908_v48, %v5644_v37  ;;  %v14801_v39 = vadd.f32 %v8824_v46, %v5640_v56  ;;  %v8910_v51 = vpop.f32.mrb[75].mxu1  ;;  %12540 = vmatprep.subr.bf16.mxu1 %v15678_v55  ;;  %v8927_v13 = vmax.f32 %v14802_v53, 0.0  ;;  %v8926_v36 = vmax.f32 %v14799_v61, 0.0  ;;  %v15691_v37 = vld [vmem:[%s16761_s14 + $0x720] ss:$16 sps:$4 sm:$0xff]  }
0x1270   : > { %v8941_v26 = vmax.f32 %v14800_v20, 0.0  ;;  %v14805_v41 = vadd.f32 %v8910_v51, %v5648_v10  ;;  %v8928_v4 = vmax.f32 %v14803_v18, 0.0  ;;  %v15694_v56 = vld [vmem:[%s16761_s14 + $0x728] ss:$16 sps:$4 sm:$0xff]   ;;  %v15702_v10 = vld [vmem:[%s16761_s14 + $0x74c] ss:$16 sps:$4 sm:$0xff]  }
0x1271   : > { %v8943_v42 = vmax.f32 %v14804_v5, 0.0  ;;  %v8942_v47 = vmax.f32 %v14801_v39, 0.0  ;;  %12197 = vmatpush1.bf16.msra.mxu0 %v15673_v21  ;;  %v15697_v32 = vld [vmem:[%s16761_s14 + $0x740] ss:$16 sps:$4 sm:$0xff]   ;;  %v15700_v6 = vld [vmem:[%s16761_s14 + $0x748] ss:$16 sps:$4 sm:$0xff]  }
0x1272   : > { %v18772_v29 = vpack.c.bf16 %v8941_v26, %v8925_v38  ;;  %v8944_v31 = vmax.f32 %v14805_v41, 0.0  ;;  %12541 = vmatpush1.bf16.msra.mxu1 %v15676_v1  ;;  %12198 = vmatprep.subr.bf16.mxu0 %v15681_v25  ;;  %v15708_v55 = vld [vmem:[%s16761_s14 + $0x76c] ss:$16 sps:$4 sm:$0xff]   ;;  %v15703_v34 = vld [vmem:[%s16761_s14 + $0x760] ss:$16 sps:$4 sm:$0xff]  }
0x1273   : > { %v18776_v49 = vpack.c.bf16 %v8943_v42, %v8927_v13  ;;  %v18778_v54 = vpack.c.bf16 %v8942_v47, %v8926_v36  ;;  %12542 = vmatprep.subr.bf16.mxu1 %v15684_v45  ;;  %v15711_v35 = vld [vmem:[%s16761_s14 + $0x784] ss:$16 sps:$4 sm:$0xff]   ;;  %v15714_v53 = vld [vmem:[%s16761_s14 + $0x78c] ss:$16 sps:$4 sm:$0xff]   ;;  %v15709_v61 = vld [vmem:[%s16761_s14 + $0x780] ss:$16 sps:$4 sm:$0xff]  }
0x1274   : > { %v18781_v28 = vpack.c.bf16 %v8944_v31, %v8928_v4  ;;  %v15712_v3 = vld [vmem:[%s16761_s14 + $0x788] ss:$16 sps:$4 sm:$0xff]   ;;  %v15717_v60 = vld [vmem:[%s16761_s14 + $0x7a4] ss:$16 sps:$4 sm:$0xff]   ;;  %v15720_v21 = vld [vmem:[%s16761_s14 + $0x7ac] ss:$16 sps:$4 sm:$0xff]  }
0x1275   : > { %12199 = vmatpush1.bf16.msra.mxu0 %v15679_v58  ;;  %v15715_v18 = vld [vmem:[%s16761_s14 + $0x7a0] ss:$16 sps:$4 sm:$0xff]   ;;  %v15718_v20 = vld [vmem:[%s16761_s14 + $0x7a8] ss:$16 sps:$4 sm:$0xff]   ;;  %v15723_v48 = vld [vmem:[%s16761_s14 + $0x7c4] ss:$16 sps:$4 sm:$0xff]  }
0x1276   : > { %12543 = vmatpush1.bf16.msra.mxu1 %v15682_v52  ;;  %12200 = vmatprep.subr.bf16.mxu0 %v15687_v43  ;;  %v15726_v46 = vld [vmem:[%s16761_s14 + $0x7cc] ss:$16 sps:$4 sm:$0xff]   ;;  %v15721_v1 = vld [vmem:[%s16761_s14 + $0x7c0] ss:$16 sps:$4 sm:$0xff]   ;;  %v15724_v25 = vld [vmem:[%s16761_s14 + $0x7c8] ss:$16 sps:$4 sm:$0xff]  }
0x1277   : > { %12544 = vmatprep.subr.bf16.mxu1 %v15690_v62  ;;  %v15729_v5 = vld [vmem:[%s16761_s14 + $0x7e4] ss:$16 sps:$4 sm:$0xff]   ;;  %v15732_v39 = vld [vmem:[%s16761_s14 + $0x7ec] ss:$16 sps:$4 sm:$0xff]   ;;  %v15727_v51 = vld [vmem:[%s16761_s14 + $0x7e0] ss:$16 sps:$4 sm:$0xff]  }
0x1278   : > { %v15730_v45 = vld [vmem:[%s16761_s14 + $0x7e8] ss:$16 sps:$4 sm:$0xff]   ;;  %v15735_v38 = vld [vmem:[%s16761_s14 + $0x804] ss:$16 sps:$4 sm:$0xff]   ;;  %v15738_v26 = vld [vmem:[%s16761_s14 + $0x80c] ss:$16 sps:$4 sm:$0xff]  }
0x1279   : > { %12201 = vmatpush1.bf16.msra.mxu0 %v15685_v16  ;;  %v15733_v41 = vld [vmem:[%s16761_s14 + $0x800] ss:$16 sps:$4 sm:$0xff]   ;;  %v15736_v13 = vld [vmem:[%s16761_s14 + $0x808] ss:$16 sps:$4 sm:$0xff]   ;;  %v15741_v36 = vld [vmem:[%s16761_s14 + $0x824] ss:$16 sps:$4 sm:$0xff]  }
0x127a   : > { %12545 = vmatpush1.bf16.msra.mxu1 %v15688_v7  ;;  %12202 = vmatprep.subr.bf16.mxu0 %v15693_v57  ;;  %v15744_v42 = vld [vmem:[%s16761_s14 + $0x82c] ss:$16 sps:$4 sm:$0xff]   ;;  %v15739_v47 = vld [vmem:[%s16761_s14 + $0x820] ss:$16 sps:$4 sm:$0xff]   ;;  %v15742_v58 = vld [vmem:[%s16761_s14 + $0x828] ss:$16 sps:$4 sm:$0xff]  }
0x127b   : > { %12546 = vmatprep.subr.bf16.mxu1 %v15696_v63  ;;  %v15747_v4 = vld [vmem:[%s16761_s14 + $0x844] ss:$16 sps:$4 sm:$0xff]   ;;  %v15750_v31 = vld [vmem:[%s16761_s14 + $0x84c] ss:$16 sps:$4 sm:$0xff]   ;;  %v15748_v52 = vld [vmem:[%s16761_s14 + $0x848] ss:$16 sps:$4 sm:$0xff]  }
0x127c   : > { %v15753_v43 = vld [vmem:[%s16761_s14 + $0x864] ss:$16 sps:$4 sm:$0xff]   ;;  %v15756_v62 = vld [vmem:[%s16761_s14 + $0x86c] ss:$16 sps:$4 sm:$0xff]   ;;  %v15754_v16 = vld [vmem:[%s16761_s14 + $0x868] ss:$16 sps:$4 sm:$0xff]  }
0x127d   : > { %12203 = vmatpush1.bf16.msra.mxu0 %v15691_v37  ;;  %v15759_v7 = vld [vmem:[%s16761_s14 + $0x884] ss:$16 sps:$4 sm:$0xff]   ;;  %v15762_v57 = vld [vmem:[%s16761_s14 + $0x88c] ss:$16 sps:$4 sm:$0xff]   ;;  %v15757_v63 = vld [vmem:[%s16761_s14 + $0x880] ss:$16 sps:$4 sm:$0xff]  }
0x127e   : > { %12547 = vmatpush1.bf16.msra.mxu1 %v15694_v56  ;;  %12204 = vmatprep.subr.bf16.mxu0 %v15699_v8  ;;  %v15760_v37 = vld [vmem:[%s16761_s14 + $0x888] ss:$16 sps:$4 sm:$0xff]   ;;  %v15765_v56 = vld [vmem:[%s16761_s14 + $0x8a4] ss:$16 sps:$4 sm:$0xff]   ;;  %v15768_v8 = vld [vmem:[%s16761_s14 + $0x8ac] ss:$16 sps:$4 sm:$0xff]  }
0x127f   : > { %12548 = vmatprep.subr.bf16.mxu1 %v15702_v10  ;;  %v15763_v10 = vld [vmem:[%s16761_s14 + $0x8a0] ss:$16 sps:$4 sm:$0xff]  }
0x1281   : > { %12205 = vmatpush1.bf16.msra.mxu0 %v15697_v32  ;;  %v15766_v32 = vld [vmem:[%s16761_s14 + $0x8a8] ss:$16 sps:$4 sm:$0xff]  }
0x1282   : > { %12549 = vmatpush1.bf16.msra.mxu1 %v15700_v6  ;;  %12206 = vmatprep.subr.bf16.mxu0 %v15705_v15  ;;  %v15771_v6 = vld [vmem:[%s16761_s14 + $0x8c4] ss:$16 sps:$4 sm:$0xff]   ;;  %v15774_v15 = vld [vmem:[%s16761_s14 + $0x8cc] ss:$16 sps:$4 sm:$0xff]  }
0x1283   : > { %12550 = vmatprep.subr.bf16.mxu1 %v15708_v55  ;;  %v15769_v55 = vld [vmem:[%s16761_s14 + $0x8c0] ss:$16 sps:$4 sm:$0xff]  }
0x1285   : > { %12207 = vmatpush1.bf16.msra.mxu0 %v15703_v34  ;;  %v15772_v34 = vld [vmem:[%s16761_s14 + $0x8c8] ss:$16 sps:$4 sm:$0xff]  }
0x1286   : > { %12551 = vmatpush1.bf16.msra.mxu1 %v15706_v27  ;;  %12208 = vmatprep.subr.bf16.mxu0 %v15711_v35  ;;  %v15777_v27 = vld [vmem:[%s16761_s14 + $0x8e4] ss:$16 sps:$4 sm:$0xff]   ;;  %v15780_v35 = vld [vmem:[%s16761_s14 + $0x8ec] ss:$16 sps:$4 sm:$0xff]  }
0x1287   : > { %12552 = vmatprep.subr.bf16.mxu1 %v15714_v53  ;;  %v15775_v53 = vld [vmem:[%s16761_s14 + $0x8e0] ss:$16 sps:$4 sm:$0xff]  }
0x1289   : > { %12209 = vmatpush1.bf16.msra.mxu0 %v15709_v61  ;;  %v15778_v61 = vld [vmem:[%s16761_s14 + $0x8e8] ss:$16 sps:$4 sm:$0xff]  }
0x128a   : > { %12553 = vmatpush1.bf16.msra.mxu1 %v15712_v3  ;;  %12210 = vmatprep.subr.bf16.mxu0 %v15717_v60  ;;  %v15783_v3 = vld [vmem:[%s16761_s14 + $0x904] ss:$16 sps:$4 sm:$0xff]   ;;  %v15786_v60 = vld [vmem:[%s16761_s14 + $0x90c] ss:$16 sps:$4 sm:$0xff]  }
0x128b   : > { %12554 = vmatprep.subr.bf16.mxu1 %v15720_v21  ;;  %v15781_v21 = vld [vmem:[%s16761_s14 + $0x900] ss:$16 sps:$4 sm:$0xff]  }
0x128d   : > { %12211 = vmatpush1.bf16.msra.mxu0 %v15715_v18  ;;  %v15784_v18 = vld [vmem:[%s16761_s14 + $0x908] ss:$16 sps:$4 sm:$0xff]  }
0x128e   : > { %12555 = vmatpush1.bf16.msra.mxu1 %v15718_v20  ;;  %12212 = vmatprep.subr.bf16.mxu0 %v15723_v48  ;;  %v15789_v20 = vld [vmem:[%s16761_s14 + $0x924] ss:$16 sps:$4 sm:$0xff]   ;;  %v15792_v48 = vld [vmem:[%s16761_s14 + $0x92c] ss:$16 sps:$4 sm:$0xff]  }
0x128f   : > { %12556 = vmatprep.subr.bf16.mxu1 %v15726_v46  ;;  %v15787_v46 = vld [vmem:[%s16761_s14 + $0x920] ss:$16 sps:$4 sm:$0xff]  }
0x1291   : > { %12213 = vmatpush1.bf16.msra.mxu0 %v15721_v1  ;;  %v15790_v1 = vld [vmem:[%s16761_s14 + $0x928] ss:$16 sps:$4 sm:$0xff]  }
0x1292   : > { %12557 = vmatpush1.bf16.msra.mxu1 %v15724_v25  ;;  %12214 = vmatprep.subr.bf16.mxu0 %v15729_v5  ;;  %v15795_v25 = vld [vmem:[%s16761_s14 + $0x944] ss:$16 sps:$4 sm:$0xff]   ;;  %v15798_v5 = vld [vmem:[%s16761_s14 + $0x94c] ss:$16 sps:$4 sm:$0xff]  }
0x1293   : > { %12558 = vmatprep.subr.bf16.mxu1 %v15732_v39  ;;  %v15793_v39 = vld [vmem:[%s16761_s14 + $0x940] ss:$16 sps:$4 sm:$0xff]  }
0x1295   : > { %12215 = vmatpush1.bf16.msra.mxu0 %v15727_v51  ;;  %v15796_v51 = vld [vmem:[%s16761_s14 + $0x948] ss:$16 sps:$4 sm:$0xff]  }
0x1296   : > { %12559 = vmatpush1.bf16.msra.mxu1 %v15730_v45  ;;  %12227 = vmatprep.subr.bf16.mxu0 %v15735_v38  ;;  %v15801_v45 = vld [vmem:[%s16761_s14 + $0x964] ss:$16 sps:$4 sm:$0xff]   ;;  %v15804_v38 = vld [vmem:[%s16761_s14 + $0x96c] ss:$16 sps:$4 sm:$0xff]  }
0x1297   : > { %12571 = vmatprep.subr.bf16.mxu1 %v15738_v26  ;;  %v15799_v26 = vld [vmem:[%s16761_s14 + $0x960] ss:$16 sps:$4 sm:$0xff]  }
0x1298   : > { %12217 = vmatmul.mubr.bf16.vlgmr.msra.gmra.mrb[40].mxu0 %v18468_v44 }
0x1299   : > { %12561 = vmatmul.mubr.bf16.vlgmr.msra.gmra.mrb[76].mxu1 %v18468_v44  ;;  %12228 = vmatpush1.bf16.msra.mxu0 %v15733_v41  ;;  %v15745_v44 = vld [vmem:[%s16761_s14 + $0x840] ss:$16 sps:$4 sm:$0xff]   ;;  %v15802_v41 = vld [vmem:[%s16761_s14 + $0x968] ss:$16 sps:$4 sm:$0xff]  }
0x129a   : > { %12259 = vmatprep.mubr.bf16.mxu0 %v18622_v19  ;;  %12572 = vmatpush1.bf16.msra.mxu1 %v15736_v13  ;;  %v15807_v13 = vld [vmem:[%s16761_s14 + $0x984] ss:$16 sps:$4 sm:$0xff]  }
0x129b   : > { %12603 = vmatprep.mubr.bf16.mxu1 %v18622_v19  ;;  %12229 = vmatprep.subr.bf16.mxu0 %v15741_v36  ;;  %v15751_v19 = vld [vmem:[%s16761_s14 + $0x860] ss:$16 sps:$4 sm:$0xff]   ;;  %v15810_v36 = vld [vmem:[%s16761_s14 + $0x98c] ss:$16 sps:$4 sm:$0xff]  }
0x129c   : > { %12573 = vmatprep.subr.bf16.mxu1 %v15744_v42  ;;  %v15805_v42 = vld [vmem:[%s16761_s14 + $0x980] ss:$16 sps:$4 sm:$0xff]  }
0x129d   : > { %12230 = vmatpush1.bf16.msra.mxu0 %v15739_v47  ;;  %v15808_v47 = vld [vmem:[%s16761_s14 + $0x988] ss:$16 sps:$4 sm:$0xff]  }
0x129e   : > { %12574 = vmatpush1.bf16.msra.mxu1 %v15742_v58  ;;  %12231 = vmatprep.subr.bf16.mxu0 %v15747_v4  ;;  %v15813_v58 = vld [vmem:[%s16761_s14 + $0x9a4] ss:$16 sps:$4 sm:$0xff]   ;;  %v15816_v4 = vld [vmem:[%s16761_s14 + $0x9ac] ss:$16 sps:$4 sm:$0xff]  }
0x129f   : > { %12575 = vmatprep.subr.bf16.mxu1 %v15750_v31  ;;  %v15811_v31 = vld [vmem:[%s16761_s14 + $0x9a0] ss:$16 sps:$4 sm:$0xff]  }
0x12a1   : > { %12232 = vmatpush1.bf16.msra.mxu0 %v15745_v44  ;;  %v15814_v44 = vld [vmem:[%s16761_s14 + $0x9a8] ss:$16 sps:$4 sm:$0xff]  }
0x12a2   : > { %12576 = vmatpush1.bf16.msra.mxu1 %v15748_v52  ;;  %12233 = vmatprep.subr.bf16.mxu0 %v15753_v43  ;;  %v15819_v52 = vld [vmem:[%s16761_s14 + $0x9c4] ss:$16 sps:$4 sm:$0xff]   ;;  %v15822_v43 = vld [vmem:[%s16761_s14 + $0x9cc] ss:$16 sps:$4 sm:$0xff]  }
0x12a3   : > { %12577 = vmatprep.subr.bf16.mxu1 %v15756_v62  ;;  %v15817_v62 = vld [vmem:[%s16761_s14 + $0x9c0] ss:$16 sps:$4 sm:$0xff]  }
0x12a5   : > { %12234 = vmatpush1.bf16.msra.mxu0 %v15751_v19  ;;  %v15820_v19 = vld [vmem:[%s16761_s14 + $0x9c8] ss:$16 sps:$4 sm:$0xff]  }
0x12a6   : > { %12578 = vmatpush1.bf16.msra.mxu1 %v15754_v16  ;;  %12235 = vmatprep.subr.bf16.mxu0 %v15759_v7  ;;  %v15825_v16 = vld [vmem:[%s16761_s14 + $0x9e4] ss:$16 sps:$4 sm:$0xff]   ;;  %v15828_v7 = vld [vmem:[%s16761_s14 + $0x9ec] ss:$16 sps:$4 sm:$0xff]  }
0x12a7   : > { %12579 = vmatprep.subr.bf16.mxu1 %v15762_v57  ;;  %v15823_v57 = vld [vmem:[%s16761_s14 + $0x9e0] ss:$16 sps:$4 sm:$0xff]  }
0x12a9   : > { %12236 = vmatpush1.bf16.msra.mxu0 %v15757_v63  ;;  %v15826_v63 = vld [vmem:[%s16761_s14 + $0x9e8] ss:$16 sps:$4 sm:$0xff]  }
0x12aa   : > { %12580 = vmatpush1.bf16.msra.mxu1 %v15760_v37  ;;  %12237 = vmatprep.subr.bf16.mxu0 %v15765_v56  ;;  %v15831_v37 = vld [vmem:[%s16761_s14 + $0xa04] ss:$16 sps:$4 sm:$0xff]   ;;  %v15834_v56 = vld [vmem:[%s16761_s14 + $0xa0c] ss:$16 sps:$4 sm:$0xff]  }
0x12ab   : > { %12581 = vmatprep.subr.bf16.mxu1 %v15768_v8  ;;  %v15829_v8 = vld [vmem:[%s16761_s14 + $0xa00] ss:$16 sps:$4 sm:$0xff]  }
0x12ad   : > { %12238 = vmatpush1.bf16.msra.mxu0 %v15763_v10  ;;  %v15832_v10 = vld [vmem:[%s16761_s14 + $0xa08] ss:$16 sps:$4 sm:$0xff]  }
0x12ae   : > { %12582 = vmatpush1.bf16.msra.mxu1 %v15766_v32  ;;  %12239 = vmatprep.subr.bf16.mxu0 %v15771_v6  ;;  %v15837_v32 = vld [vmem:[%s16761_s14 + $0xa24] ss:$16 sps:$4 sm:$0xff]   ;;  %v15840_v6 = vld [vmem:[%s16761_s14 + $0xa2c] ss:$16 sps:$4 sm:$0xff]  }
0x12af   : > { %12583 = vmatprep.subr.bf16.mxu1 %v15774_v15  ;;  %v15835_v15 = vld [vmem:[%s16761_s14 + $0xa20] ss:$16 sps:$4 sm:$0xff]  }
0x12b1   : > { %12240 = vmatpush1.bf16.msra.mxu0 %v15769_v55  ;;  %v15838_v55 = vld [vmem:[%s16761_s14 + $0xa28] ss:$16 sps:$4 sm:$0xff]  }
0x12b2   : > { %12584 = vmatpush1.bf16.msra.mxu1 %v15772_v34  ;;  %12241 = vmatprep.subr.bf16.mxu0 %v15777_v27  ;;  %v15843_v34 = vld [vmem:[%s16761_s14 + $0xa44] ss:$16 sps:$4 sm:$0xff]   ;;  %v15846_v27 = vld [vmem:[%s16761_s14 + $0xa4c] ss:$16 sps:$4 sm:$0xff]  }
0x12b3   : > { %12585 = vmatprep.subr.bf16.mxu1 %v15780_v35  ;;  %v15844_v35 = vld [vmem:[%s16761_s14 + $0xa48] ss:$16 sps:$4 sm:$0xff]  }
0x12b5   : > { %12242 = vmatpush1.bf16.msra.mxu0 %v15775_v53  ;;  %v15849_v53 = vld [vmem:[%s16761_s14 + $0xa64] ss:$16 sps:$4 sm:$0xff]  }
0x12b6   : > { %12586 = vmatpush1.bf16.msra.mxu1 %v15778_v61  ;;  %12243 = vmatprep.subr.bf16.mxu0 %v15783_v3  ;;  %v15852_v61 = vld [vmem:[%s16761_s14 + $0xa6c] ss:$16 sps:$4 sm:$0xff]   ;;  %v15850_v3 = vld [vmem:[%s16761_s14 + $0xa68] ss:$16 sps:$4 sm:$0xff]  }
0x12b7   : > { %12587 = vmatprep.subr.bf16.mxu1 %v15786_v60  ;;  %v15855_v60 = vld [vmem:[%s16761_s14 + $0xa84] ss:$16 sps:$4 sm:$0xff]  }
0x12b9   : > { %12244 = vmatpush1.bf16.msra.mxu0 %v15781_v21  ;;  %v15858_v21 = vld [vmem:[%s16761_s14 + $0xa8c] ss:$16 sps:$4 sm:$0xff]  }
0x12ba   : > { %12588 = vmatpush1.bf16.msra.mxu1 %v15784_v18  ;;  %12245 = vmatprep.subr.bf16.mxu0 %v15789_v20  ;;  %v15853_v18 = vld [vmem:[%s16761_s14 + $0xa80] ss:$16 sps:$4 sm:$0xff]   ;;  %v15856_v20 = vld [vmem:[%s16761_s14 + $0xa88] ss:$16 sps:$4 sm:$0xff]  }
0x12bb   : > { %12589 = vmatprep.subr.bf16.mxu1 %v15792_v48  ;;  %v15861_v48 = vld [vmem:[%s16761_s14 + $0xaa4] ss:$16 sps:$4 sm:$0xff]  }
0x12bd   : > { %12246 = vmatpush1.bf16.msra.mxu0 %v15787_v46  ;;  %v15864_v46 = vld [vmem:[%s16761_s14 + $0xaac] ss:$16 sps:$4 sm:$0xff]  }
0x12be   : > { %12590 = vmatpush1.bf16.msra.mxu1 %v15790_v1  ;;  %12247 = vmatprep.subr.bf16.mxu0 %v15795_v25  ;;  %v15859_v1 = vld [vmem:[%s16761_s14 + $0xaa0] ss:$16 sps:$4 sm:$0xff]   ;;  %v15862_v25 = vld [vmem:[%s16761_s14 + $0xaa8] ss:$16 sps:$4 sm:$0xff]  }
0x12bf   : > { %12591 = vmatprep.subr.bf16.mxu1 %v15798_v5  ;;  %v15867_v5 = vld [vmem:[%s16761_s14 + $0xac4] ss:$16 sps:$4 sm:$0xff]  }
0x12c1   : > { %12248 = vmatpush1.bf16.msra.mxu0 %v15793_v39  ;;  %v15870_v39 = vld [vmem:[%s16761_s14 + $0xacc] ss:$16 sps:$4 sm:$0xff]  }
0x12c2   : > { %12592 = vmatpush1.bf16.msra.mxu1 %v15796_v51  ;;  %12249 = vmatprep.subr.bf16.mxu0 %v15801_v45  ;;  %v15865_v51 = vld [vmem:[%s16761_s14 + $0xac0] ss:$16 sps:$4 sm:$0xff]   ;;  %v15868_v45 = vld [vmem:[%s16761_s14 + $0xac8] ss:$16 sps:$4 sm:$0xff]  }
0x12c3   : > { %12593 = vmatprep.subr.bf16.mxu1 %v15804_v38  ;;  %v15873_v38 = vld [vmem:[%s16761_s14 + $0xae4] ss:$16 sps:$4 sm:$0xff]  }
0x12c5   : > { %12250 = vmatpush1.bf16.msra.mxu0 %v15799_v26  ;;  %v15876_v26 = vld [vmem:[%s16761_s14 + $0xaec] ss:$16 sps:$4 sm:$0xff]  }
0x12c6   : > { %12594 = vmatpush1.bf16.msra.mxu1 %v15802_v41  ;;  %12251 = vmatprep.subr.bf16.mxu0 %v15807_v13  ;;  %v15871_v41 = vld [vmem:[%s16761_s14 + $0xae0] ss:$16 sps:$4 sm:$0xff]   ;;  %v15874_v13 = vld [vmem:[%s16761_s14 + $0xae8] ss:$16 sps:$4 sm:$0xff]  }
0x12c7   : > { %12595 = vmatprep.subr.bf16.mxu1 %v15810_v36  ;;  %v15879_v36 = vld [vmem:[%s16761_s14 + $0xb04] ss:$16 sps:$4 sm:$0xff]  }
0x12c9   : > { %12252 = vmatpush1.bf16.msra.mxu0 %v15805_v42  ;;  %v15882_v42 = vld [vmem:[%s16761_s14 + $0xb0c] ss:$16 sps:$4 sm:$0xff]  }
0x12ca   : > { %12596 = vmatpush1.bf16.msra.mxu1 %v15808_v47  ;;  %12253 = vmatprep.subr.bf16.mxu0 %v15813_v58  ;;  %v15877_v47 = vld [vmem:[%s16761_s14 + $0xb00] ss:$16 sps:$4 sm:$0xff]   ;;  %v15880_v58 = vld [vmem:[%s16761_s14 + $0xb08] ss:$16 sps:$4 sm:$0xff]  }
0x12cb   : > { %12597 = vmatprep.subr.bf16.mxu1 %v15816_v4  ;;  %v15885_v4 = vld [vmem:[%s16761_s14 + $0xb24] ss:$16 sps:$4 sm:$0xff]  }
0x12cd   : > { %12254 = vmatpush1.bf16.msra.mxu0 %v15811_v31  ;;  %v15888_v31 = vld [vmem:[%s16761_s14 + $0xb2c] ss:$16 sps:$4 sm:$0xff]  }
0x12ce   : > { %12598 = vmatpush1.bf16.msra.mxu1 %v15814_v44  ;;  %12255 = vmatprep.subr.bf16.mxu0 %v15819_v52  ;;  %v15883_v44 = vld [vmem:[%s16761_s14 + $0xb20] ss:$16 sps:$4 sm:$0xff]   ;;  %v15886_v52 = vld [vmem:[%s16761_s14 + $0xb28] ss:$16 sps:$4 sm:$0xff]  }
0x12cf   : > { %12599 = vmatprep.subr.bf16.mxu1 %v15822_v43  ;;  %v15891_v43 = vld [vmem:[%s16761_s14 + $0xb44] ss:$16 sps:$4 sm:$0xff]  }
0x12d1   : > { %12256 = vmatpush1.bf16.msra.mxu0 %v15817_v62  ;;  %v15894_v62 = vld [vmem:[%s16761_s14 + $0xb4c] ss:$16 sps:$4 sm:$0xff]  }
0x12d2   : > { %12600 = vmatpush1.bf16.msra.mxu1 %v15820_v19  ;;  %12257 = vmatprep.subr.bf16.mxu0 %v15825_v16  ;;  %v15889_v19 = vld [vmem:[%s16761_s14 + $0xb40] ss:$16 sps:$4 sm:$0xff]   ;;  %v15892_v16 = vld [vmem:[%s16761_s14 + $0xb48] ss:$16 sps:$4 sm:$0xff]  }
0x12d3   : > { %12601 = vmatprep.subr.bf16.mxu1 %v15828_v7  ;;  %v15897_v7 = vld [vmem:[%s16761_s14 + $0xb64] ss:$16 sps:$4 sm:$0xff]  }
0x12d5   : > { %12258 = vmatpush1.bf16.msra.mxu0 %v15823_v57  ;;  %v15900_v57 = vld [vmem:[%s16761_s14 + $0xb6c] ss:$16 sps:$4 sm:$0xff]  }
0x12d6   : > { %12602 = vmatpush1.bf16.msra.mxu1 %v15826_v63  ;;  %12270 = vmatprep.subr.bf16.mxu0 %v15831_v37  ;;  %v15895_v63 = vld [vmem:[%s16761_s14 + $0xb60] ss:$16 sps:$4 sm:$0xff]   ;;  %v15898_v37 = vld [vmem:[%s16761_s14 + $0xb68] ss:$16 sps:$4 sm:$0xff]  }
0x12d7   : > { %12614 = vmatprep.subr.bf16.mxu1 %v15834_v56  ;;  %v15903_v56 = vld [vmem:[%s16761_s14 + $0xb84] ss:$16 sps:$4 sm:$0xff]  }
0x12d8   : > { %12260 = vmatmul.mubr.bf16.vlgmr.msra.gmra.mrb[40].mxu0 %v18616_v14 }
0x12d9   : > { %12604 = vmatmul.mubr.bf16.vlgmr.msra.gmra.mrb[76].mxu1 %v18616_v14  ;;  %12271 = vmatpush1.bf16.msra.mxu0 %v15829_v8  ;;  %v15841_v14 = vld [vmem:[%s16761_s14 + $0xa40] ss:$16 sps:$4 sm:$0xff]   ;;  %v15906_v8 = vld [vmem:[%s16761_s14 + $0xb8c] ss:$16 sps:$4 sm:$0xff]  }
0x12da   : > { %12302 = vmatprep.mubr.bf16.mxu0 %v18625_v2  ;;  %12615 = vmatpush1.bf16.msra.mxu1 %v15832_v10  ;;  %v15901_v10 = vld [vmem:[%s16761_s14 + $0xb80] ss:$16 sps:$4 sm:$0xff]  }
0x12db   : > { %12646 = vmatprep.mubr.bf16.mxu1 %v18625_v2  ;;  %12272 = vmatprep.subr.bf16.mxu0 %v15837_v32  ;;  %v15847_v2 = vld [vmem:[%s16761_s14 + $0xa60] ss:$16 sps:$4 sm:$0xff]   ;;  %v15904_v32 = vld [vmem:[%s16761_s14 + $0xb88] ss:$16 sps:$4 sm:$0xff]  }
0x12dc   : > { %12616 = vmatprep.subr.bf16.mxu1 %v15840_v6  ;;  %v15909_v6 = vld [vmem:[%s16761_s14 + $0xba4] ss:$16 sps:$4 sm:$0xff]  }
0x12dd   : > { %12273 = vmatpush1.bf16.msra.mxu0 %v15835_v15  ;;  %v15912_v15 = vld [vmem:[%s16761_s14 + $0xbac] ss:$16 sps:$4 sm:$0xff]  }
0x12de   : > { %12617 = vmatpush1.bf16.msra.mxu1 %v15838_v55  ;;  %12274 = vmatprep.subr.bf16.mxu0 %v15843_v34  ;;  %v15907_v55 = vld [vmem:[%s16761_s14 + $0xba0] ss:$16 sps:$4 sm:$0xff]   ;;  %v15910_v34 = vld [vmem:[%s16761_s14 + $0xba8] ss:$16 sps:$4 sm:$0xff]  }
0x12df   : > { %12618 = vmatprep.subr.bf16.mxu1 %v15846_v27  ;;  %v15915_v27 = vld [vmem:[%s16761_s14 + $0xbc4] ss:$16 sps:$4 sm:$0xff]  }
0x12e1   : > { %12275 = vmatpush1.bf16.msra.mxu0 %v15841_v14  ;;  %v15918_v14 = vld [vmem:[%s16761_s14 + $0xbcc] ss:$16 sps:$4 sm:$0xff]  }
0x12e2   : > { %12619 = vmatpush1.bf16.msra.mxu1 %v15844_v35  ;;  %12276 = vmatprep.subr.bf16.mxu0 %v15849_v53  ;;  %v15913_v35 = vld [vmem:[%s16761_s14 + $0xbc0] ss:$16 sps:$4 sm:$0xff]   ;;  %v15916_v53 = vld [vmem:[%s16761_s14 + $0xbc8] ss:$16 sps:$4 sm:$0xff]  }
0x12e3   : > { %12620 = vmatprep.subr.bf16.mxu1 %v15852_v61  ;;  %v15921_v61 = vld [vmem:[%s16761_s14 + $0xbe4] ss:$16 sps:$4 sm:$0xff]  }
0x12e5   : > { %12277 = vmatpush1.bf16.msra.mxu0 %v15847_v2  ;;  %v15924_v2 = vld [vmem:[%s16761_s14 + $0xbec] ss:$16 sps:$4 sm:$0xff]  }
0x12e6   : > { %12621 = vmatpush1.bf16.msra.mxu1 %v15850_v3  ;;  %12278 = vmatprep.subr.bf16.mxu0 %v15855_v60  ;;  %v15919_v3 = vld [vmem:[%s16761_s14 + $0xbe0] ss:$16 sps:$4 sm:$0xff]   ;;  %v15922_v60 = vld [vmem:[%s16761_s14 + $0xbe8] ss:$16 sps:$4 sm:$0xff]  }
0x12e7   : > { %12622 = vmatprep.subr.bf16.mxu1 %v15858_v21  ;;  %v15927_v21 = vld [vmem:[%s16761_s14 + $0xc04] ss:$16 sps:$4 sm:$0xff]  }
0x12e9   : > { %12279 = vmatpush1.bf16.msra.mxu0 %v15853_v18  ;;  %v15930_v18 = vld [vmem:[%s16761_s14 + $0xc0c] ss:$16 sps:$4 sm:$0xff]  }
0x12ea   : > { %12623 = vmatpush1.bf16.msra.mxu1 %v15856_v20  ;;  %12280 = vmatprep.subr.bf16.mxu0 %v15861_v48  ;;  %v15925_v20 = vld [vmem:[%s16761_s14 + $0xc00] ss:$16 sps:$4 sm:$0xff]   ;;  %v15928_v48 = vld [vmem:[%s16761_s14 + $0xc08] ss:$16 sps:$4 sm:$0xff]  }
0x12eb   : > { %12624 = vmatprep.subr.bf16.mxu1 %v15864_v46  ;;  %v15933_v46 = vld [vmem:[%s16761_s14 + $0xc24] ss:$16 sps:$4 sm:$0xff]  }
0x12ed   : > { %12281 = vmatpush1.bf16.msra.mxu0 %v15859_v1  ;;  %v15936_v1 = vld [vmem:[%s16761_s14 + $0xc2c] ss:$16 sps:$4 sm:$0xff]  }
0x12ee   : > { %12625 = vmatpush1.bf16.msra.mxu1 %v15862_v25  ;;  %12282 = vmatprep.subr.bf16.mxu0 %v15867_v5  ;;  %v15931_v25 = vld [vmem:[%s16761_s14 + $0xc20] ss:$16 sps:$4 sm:$0xff]   ;;  %v15934_v5 = vld [vmem:[%s16761_s14 + $0xc28] ss:$16 sps:$4 sm:$0xff]  }
0x12ef   : > { %12626 = vmatprep.subr.bf16.mxu1 %v15870_v39  ;;  %v15939_v39 = vld [vmem:[%s16761_s14 + $0xc44] ss:$16 sps:$4 sm:$0xff]  }
0x12f1   : > { %12283 = vmatpush1.bf16.msra.mxu0 %v15865_v51  ;;  %v15942_v51 = vld [vmem:[%s16761_s14 + $0xc4c] ss:$16 sps:$4 sm:$0xff]  }
0x12f2   : > { %12627 = vmatpush1.bf16.msra.mxu1 %v15868_v45  ;;  %12284 = vmatprep.subr.bf16.mxu0 %v15873_v38  ;;  %v15940_v45 = vld [vmem:[%s16761_s14 + $0xc48] ss:$16 sps:$4 sm:$0xff]   ;;  %v15945_v38 = vld [vmem:[%s16761_s14 + $0xc64] ss:$16 sps:$4 sm:$0xff]  }
0x12f3   : > { %12628 = vmatprep.subr.bf16.mxu1 %v15876_v26  ;;  %v15948_v26 = vld [vmem:[%s16761_s14 + $0xc6c] ss:$16 sps:$4 sm:$0xff]  }
0x12f5   : > { %12285 = vmatpush1.bf16.msra.mxu0 %v15871_v41  ;;  %v15946_v41 = vld [vmem:[%s16761_s14 + $0xc68] ss:$16 sps:$4 sm:$0xff]  }
0x12f6   : > { %12629 = vmatpush1.bf16.msra.mxu1 %v15874_v13  ;;  %12286 = vmatprep.subr.bf16.mxu0 %v15879_v36  ;;  %v15951_v13 = vld [vmem:[%s16761_s14 + $0xc84] ss:$16 sps:$4 sm:$0xff]   ;;  %v15954_v36 = vld [vmem:[%s16761_s14 + $0xc8c] ss:$16 sps:$4 sm:$0xff]  }
0x12f7   : > { %12630 = vmatprep.subr.bf16.mxu1 %v15882_v42  ;;  %v15949_v42 = vld [vmem:[%s16761_s14 + $0xc80] ss:$16 sps:$4 sm:$0xff]  }
0x12f9   : > { %12287 = vmatpush1.bf16.msra.mxu0 %v15877_v47  ;;  %v15952_v47 = vld [vmem:[%s16761_s14 + $0xc88] ss:$16 sps:$4 sm:$0xff]  }
0x12fa   : > { %12631 = vmatpush1.bf16.msra.mxu1 %v15880_v58  ;;  %12288 = vmatprep.subr.bf16.mxu0 %v15885_v4  ;;  %v15957_v58 = vld [vmem:[%s16761_s14 + $0xca4] ss:$16 sps:$4 sm:$0xff]   ;;  %v15960_v4 = vld [vmem:[%s16761_s14 + $0xcac] ss:$16 sps:$4 sm:$0xff]  }
0x12fb   : > { %12632 = vmatprep.subr.bf16.mxu1 %v15888_v31  ;;  %v15955_v31 = vld [vmem:[%s16761_s14 + $0xca0] ss:$16 sps:$4 sm:$0xff]  }
0x12fd   : > { %12289 = vmatpush1.bf16.msra.mxu0 %v15883_v44  ;;  %v15958_v44 = vld [vmem:[%s16761_s14 + $0xca8] ss:$16 sps:$4 sm:$0xff]  }
0x12fe   : > { %12633 = vmatpush1.bf16.msra.mxu1 %v15886_v52  ;;  %12290 = vmatprep.subr.bf16.mxu0 %v15891_v43  ;;  %v15963_v52 = vld [vmem:[%s16761_s14 + $0xcc4] ss:$16 sps:$4 sm:$0xff]   ;;  %v15966_v43 = vld [vmem:[%s16761_s14 + $0xccc] ss:$16 sps:$4 sm:$0xff]  }
0x12ff   : > { %12634 = vmatprep.subr.bf16.mxu1 %v15894_v62  ;;  %v15961_v62 = vld [vmem:[%s16761_s14 + $0xcc0] ss:$16 sps:$4 sm:$0xff]  }
0x1301   : > { %12291 = vmatpush1.bf16.msra.mxu0 %v15889_v19  ;;  %v15964_v19 = vld [vmem:[%s16761_s14 + $0xcc8] ss:$16 sps:$4 sm:$0xff]  }
0x1302   : > { %12635 = vmatpush1.bf16.msra.mxu1 %v15892_v16  ;;  %12292 = vmatprep.subr.bf16.mxu0 %v15897_v7  ;;  %v15969_v16 = vld [vmem:[%s16761_s14 + $0xce4] ss:$16 sps:$4 sm:$0xff]   ;;  %v15972_v7 = vld [vmem:[%s16761_s14 + $0xcec] ss:$16 sps:$4 sm:$0xff]  }
0x1303   : > { %12636 = vmatprep.subr.bf16.mxu1 %v15900_v57  ;;  %v15967_v57 = vld [vmem:[%s16761_s14 + $0xce0] ss:$16 sps:$4 sm:$0xff]  }
0x1305   : > { %12293 = vmatpush1.bf16.msra.mxu0 %v15895_v63  ;;  %v15970_v63 = vld [vmem:[%s16761_s14 + $0xce8] ss:$16 sps:$4 sm:$0xff]  }
0x1306   : > { %12637 = vmatpush1.bf16.msra.mxu1 %v15898_v37  ;;  %12294 = vmatprep.subr.bf16.mxu0 %v15903_v56  ;;  %v15975_v37 = vld [vmem:[%s16761_s14 + $0xd04] ss:$16 sps:$4 sm:$0xff]   ;;  %v15978_v56 = vld [vmem:[%s16761_s14 + $0xd0c] ss:$16 sps:$4 sm:$0xff]  }
0x1307   : > { %12638 = vmatprep.subr.bf16.mxu1 %v15906_v8  ;;  %v15973_v8 = vld [vmem:[%s16761_s14 + $0xd00] ss:$16 sps:$4 sm:$0xff]  }
0x1309   : > { %12295 = vmatpush1.bf16.msra.mxu0 %v15901_v10  ;;  %v15976_v10 = vld [vmem:[%s16761_s14 + $0xd08] ss:$16 sps:$4 sm:$0xff]  }
0x130a   : > { %12639 = vmatpush1.bf16.msra.mxu1 %v15904_v32  ;;  %12296 = vmatprep.subr.bf16.mxu0 %v15909_v6  ;;  %v15981_v32 = vld [vmem:[%s16761_s14 + $0xd24] ss:$16 sps:$4 sm:$0xff]   ;;  %v15984_v6 = vld [vmem:[%s16761_s14 + $0xd2c] ss:$16 sps:$4 sm:$0xff]  }
0x130b   : > { %12640 = vmatprep.subr.bf16.mxu1 %v15912_v15  ;;  %v15979_v15 = vld [vmem:[%s16761_s14 + $0xd20] ss:$16 sps:$4 sm:$0xff]  }
0x130d   : > { %12297 = vmatpush1.bf16.msra.mxu0 %v15907_v55  ;;  %v15982_v55 = vld [vmem:[%s16761_s14 + $0xd28] ss:$16 sps:$4 sm:$0xff]  }
0x130e   : > { %12641 = vmatpush1.bf16.msra.mxu1 %v15910_v34  ;;  %12298 = vmatprep.subr.bf16.mxu0 %v15915_v27  ;;  %v15987_v34 = vld [vmem:[%s16761_s14 + $0xd44] ss:$16 sps:$4 sm:$0xff]   ;;  %v15990_v27 = vld [vmem:[%s16761_s14 + $0xd4c] ss:$16 sps:$4 sm:$0xff]  }
0x130f   : > { %12642 = vmatprep.subr.bf16.mxu1 %v15918_v14  ;;  %v15985_v14 = vld [vmem:[%s16761_s14 + $0xd40] ss:$16 sps:$4 sm:$0xff]  }
0x1311   : > { %12299 = vmatpush1.bf16.msra.mxu0 %v15913_v35  ;;  %v15988_v35 = vld [vmem:[%s16761_s14 + $0xd48] ss:$16 sps:$4 sm:$0xff]  }
0x1312   : > { %12643 = vmatpush1.bf16.msra.mxu1 %v15916_v53  ;;  %12300 = vmatprep.subr.bf16.mxu0 %v15921_v61  ;;  %v15993_v53 = vld [vmem:[%s16761_s14 + $0xd64] ss:$16 sps:$4 sm:$0xff]   ;;  %v15996_v61 = vld [vmem:[%s16761_s14 + $0xd6c] ss:$16 sps:$4 sm:$0xff]  }
0x1313   : > { %12644 = vmatprep.subr.bf16.mxu1 %v15924_v2  ;;  %v15991_v2 = vld [vmem:[%s16761_s14 + $0xd60] ss:$16 sps:$4 sm:$0xff]  }
0x1315   : > { %12301 = vmatpush1.bf16.msra.mxu0 %v15919_v3  ;;  %v15994_v3 = vld [vmem:[%s16761_s14 + $0xd68] ss:$16 sps:$4 sm:$0xff]  }
0x1316   : > { %12645 = vmatpush1.bf16.msra.mxu1 %v15922_v60  ;;  %12313 = vmatprep.subr.bf16.mxu0 %v15927_v21  ;;  %v15999_v60 = vld [vmem:[%s16761_s14 + $0xd84] ss:$16 sps:$4 sm:$0xff]   ;;  %v16002_v21 = vld [vmem:[%s16761_s14 + $0xd8c] ss:$16 sps:$4 sm:$0xff]  }
0x1317   : > { %12657 = vmatprep.subr.bf16.mxu1 %v15930_v18  ;;  %v15997_v18 = vld [vmem:[%s16761_s14 + $0xd80] ss:$16 sps:$4 sm:$0xff]  }
0x1318   : > { %12303 = vmatmul.mubr.bf16.vlgmr.msra.gmra.mrb[40].mxu0 %v18620_v23 }
0x1319   : > { %12647 = vmatmul.mubr.bf16.vlgmr.msra.gmra.mrb[76].mxu1 %v18620_v23  ;;  %12314 = vmatpush1.bf16.msra.mxu0 %v15925_v20  ;;  %v15937_v23 = vld [vmem:[%s16761_s14 + $0xc40] ss:$16 sps:$4 sm:$0xff]   ;;  %v16000_v20 = vld [vmem:[%s16761_s14 + $0xd88] ss:$16 sps:$4 sm:$0xff]  }
0x131a   : > { %12345 = vmatprep.mubr.bf16.mxu0 %v18778_v54  ;;  %12658 = vmatpush1.bf16.msra.mxu1 %v15928_v48  ;;  %v16005_v48 = vld [vmem:[%s16761_s14 + $0xda4] ss:$16 sps:$4 sm:$0xff]  }
0x131b   : > { %12689 = vmatprep.mubr.bf16.mxu1 %v18778_v54  ;;  %12315 = vmatprep.subr.bf16.mxu0 %v15933_v46  ;;  %v15943_v54 = vld [vmem:[%s16761_s14 + $0xc60] ss:$16 sps:$4 sm:$0xff]   ;;  %v16008_v46 = vld [vmem:[%s16761_s14 + $0xdac] ss:$16 sps:$4 sm:$0xff]  }
0x131c   : > { %12659 = vmatprep.subr.bf16.mxu1 %v15936_v1  ;;  %v16003_v1 = vld [vmem:[%s16761_s14 + $0xda0] ss:$16 sps:$4 sm:$0xff]  }
0x131d   : > { %12316 = vmatpush1.bf16.msra.mxu0 %v15931_v25  ;;  %v16006_v25 = vld [vmem:[%s16761_s14 + $0xda8] ss:$16 sps:$4 sm:$0xff]  }
0x131e   : > { %12660 = vmatpush1.bf16.msra.mxu1 %v15934_v5  ;;  %12317 = vmatprep.subr.bf16.mxu0 %v15939_v39  ;;  %v16011_v5 = vld [vmem:[%s16761_s14 + $0xdc4] ss:$16 sps:$4 sm:$0xff]   ;;  %v16014_v39 = vld [vmem:[%s16761_s14 + $0xdcc] ss:$16 sps:$4 sm:$0xff]  }
0x131f   : > { %12661 = vmatprep.subr.bf16.mxu1 %v15942_v51  ;;  %v16009_v51 = vld [vmem:[%s16761_s14 + $0xdc0] ss:$16 sps:$4 sm:$0xff]  }
0x1321   : > { %12318 = vmatpush1.bf16.msra.mxu0 %v15937_v23  ;;  %v16012_v23 = vld [vmem:[%s16761_s14 + $0xdc8] ss:$16 sps:$4 sm:$0xff]  }
0x1322   : > { %12662 = vmatpush1.bf16.msra.mxu1 %v15940_v45  ;;  %12319 = vmatprep.subr.bf16.mxu0 %v15945_v38  ;;  %v16017_v45 = vld [vmem:[%s16761_s14 + $0xde4] ss:$16 sps:$4 sm:$0xff]   ;;  %v16020_v38 = vld [vmem:[%s16761_s14 + $0xdec] ss:$16 sps:$4 sm:$0xff]  }
0x1323   : > { %12663 = vmatprep.subr.bf16.mxu1 %v15948_v26  ;;  %v16015_v26 = vld [vmem:[%s16761_s14 + $0xde0] ss:$16 sps:$4 sm:$0xff]  }
0x1325   : > { %12320 = vmatpush1.bf16.msra.mxu0 %v15943_v54  ;;  %v16018_v54 = vld [vmem:[%s16761_s14 + $0xde8] ss:$16 sps:$4 sm:$0xff]  }
0x1326   : > { %12664 = vmatpush1.bf16.msra.mxu1 %v15946_v41  ;;  %12321 = vmatprep.subr.bf16.mxu0 %v15951_v13  ;;  %v16023_v41 = vld [vmem:[%s16761_s14 + $0xe04] ss:$16 sps:$4 sm:$0xff]   ;;  %v16026_v13 = vld [vmem:[%s16761_s14 + $0xe0c] ss:$16 sps:$4 sm:$0xff]  }
0x1327   : > { %12665 = vmatprep.subr.bf16.mxu1 %v15954_v36  ;;  %v16021_v36 = vld [vmem:[%s16761_s14 + $0xe00] ss:$16 sps:$4 sm:$0xff]  }
0x1329   : > { %12322 = vmatpush1.bf16.msra.mxu0 %v15949_v42  ;;  %v16024_v42 = vld [vmem:[%s16761_s14 + $0xe08] ss:$16 sps:$4 sm:$0xff]  }
0x132a   : > { %12666 = vmatpush1.bf16.msra.mxu1 %v15952_v47  ;;  %12323 = vmatprep.subr.bf16.mxu0 %v15957_v58  ;;  %v16029_v47 = vld [vmem:[%s16761_s14 + $0xe24] ss:$16 sps:$4 sm:$0xff]   ;;  %v16032_v58 = vld [vmem:[%s16761_s14 + $0xe2c] ss:$16 sps:$4 sm:$0xff]  }
0x132b   : > { %12667 = vmatprep.subr.bf16.mxu1 %v15960_v4  ;;  %v16027_v4 = vld [vmem:[%s16761_s14 + $0xe20] ss:$16 sps:$4 sm:$0xff]  }
0x132d   : > { %12324 = vmatpush1.bf16.msra.mxu0 %v15955_v31  ;;  %v16030_v31 = vld [vmem:[%s16761_s14 + $0xe28] ss:$16 sps:$4 sm:$0xff]  }
0x132e   : > { %12668 = vmatpush1.bf16.msra.mxu1 %v15958_v44  ;;  %12325 = vmatprep.subr.bf16.mxu0 %v15963_v52  ;;  %v16035_v44 = vld [vmem:[%s16761_s14 + $0xe44] ss:$16 sps:$4 sm:$0xff]   ;;  %v16038_v52 = vld [vmem:[%s16761_s14 + $0xe4c] ss:$16 sps:$4 sm:$0xff]  }
0x132f   : > { %12669 = vmatprep.subr.bf16.mxu1 %v15966_v43  ;;  %v16036_v43 = vld [vmem:[%s16761_s14 + $0xe48] ss:$16 sps:$4 sm:$0xff]  }
0x1331   : > { %12326 = vmatpush1.bf16.msra.mxu0 %v15961_v62  ;;  %v16041_v62 = vld [vmem:[%s16761_s14 + $0xe64] ss:$16 sps:$4 sm:$0xff]  }
0x1332   : > { %12670 = vmatpush1.bf16.msra.mxu1 %v15964_v19  ;;  %12327 = vmatprep.subr.bf16.mxu0 %v15969_v16  ;;  %v16044_v19 = vld [vmem:[%s16761_s14 + $0xe6c] ss:$16 sps:$4 sm:$0xff]   ;;  %v16042_v16 = vld [vmem:[%s16761_s14 + $0xe68] ss:$16 sps:$4 sm:$0xff]  }
0x1333   : > { %12671 = vmatprep.subr.bf16.mxu1 %v15972_v7  ;;  %v16047_v7 = vld [vmem:[%s16761_s14 + $0xe84] ss:$16 sps:$4 sm:$0xff]  }
0x1335   : > { %12328 = vmatpush1.bf16.msra.mxu0 %v15967_v57  ;;  %v16050_v57 = vld [vmem:[%s16761_s14 + $0xe8c] ss:$16 sps:$4 sm:$0xff]  }
0x1336   : > { %12672 = vmatpush1.bf16.msra.mxu1 %v15970_v63  ;;  %12329 = vmatprep.subr.bf16.mxu0 %v15975_v37  ;;  %v16045_v63 = vld [vmem:[%s16761_s14 + $0xe80] ss:$16 sps:$4 sm:$0xff]   ;;  %v16048_v37 = vld [vmem:[%s16761_s14 + $0xe88] ss:$16 sps:$4 sm:$0xff]  }
0x1337   : > { %12673 = vmatprep.subr.bf16.mxu1 %v15978_v56  ;;  %v16053_v56 = vld [vmem:[%s16761_s14 + $0xea4] ss:$16 sps:$4 sm:$0xff]  }
0x1339   : > { %12330 = vmatpush1.bf16.msra.mxu0 %v15973_v8  ;;  %v16056_v8 = vld [vmem:[%s16761_s14 + $0xeac] ss:$16 sps:$4 sm:$0xff]  }
0x133a   : > { %12674 = vmatpush1.bf16.msra.mxu1 %v15976_v10  ;;  %12331 = vmatprep.subr.bf16.mxu0 %v15981_v32  ;;  %v16051_v10 = vld [vmem:[%s16761_s14 + $0xea0] ss:$16 sps:$4 sm:$0xff]   ;;  %v16054_v32 = vld [vmem:[%s16761_s14 + $0xea8] ss:$16 sps:$4 sm:$0xff]  }
0x133b   : > { %12675 = vmatprep.subr.bf16.mxu1 %v15984_v6  ;;  %v16059_v6 = vld [vmem:[%s16761_s14 + $0xec4] ss:$16 sps:$4 sm:$0xff]  }
0x133d   : > { %12332 = vmatpush1.bf16.msra.mxu0 %v15979_v15  ;;  %v16062_v15 = vld [vmem:[%s16761_s14 + $0xecc] ss:$16 sps:$4 sm:$0xff]  }
0x133e   : > { %12676 = vmatpush1.bf16.msra.mxu1 %v15982_v55  ;;  %12333 = vmatprep.subr.bf16.mxu0 %v15987_v34  ;;  %v16057_v55 = vld [vmem:[%s16761_s14 + $0xec0] ss:$16 sps:$4 sm:$0xff]   ;;  %v16060_v34 = vld [vmem:[%s16761_s14 + $0xec8] ss:$16 sps:$4 sm:$0xff]  }
0x133f   : > { %12677 = vmatprep.subr.bf16.mxu1 %v15990_v27  ;;  %v16065_v27 = vld [vmem:[%s16761_s14 + $0xee4] ss:$16 sps:$4 sm:$0xff]  }
0x1341   : > { %12334 = vmatpush1.bf16.msra.mxu0 %v15985_v14  ;;  %v16068_v14 = vld [vmem:[%s16761_s14 + $0xeec] ss:$16 sps:$4 sm:$0xff]  }
0x1342   : > { %12678 = vmatpush1.bf16.msra.mxu1 %v15988_v35  ;;  %12335 = vmatprep.subr.bf16.mxu0 %v15993_v53  ;;  %v16063_v35 = vld [vmem:[%s16761_s14 + $0xee0] ss:$16 sps:$4 sm:$0xff]   ;;  %v16066_v53 = vld [vmem:[%s16761_s14 + $0xee8] ss:$16 sps:$4 sm:$0xff]  }
0x1343   : > { %12679 = vmatprep.subr.bf16.mxu1 %v15996_v61  ;;  %v16071_v61 = vld [vmem:[%s16761_s14 + $0xf04] ss:$16 sps:$4 sm:$0xff]  }
0x1345   : > { %12336 = vmatpush1.bf16.msra.mxu0 %v15991_v2  ;;  %v16074_v2 = vld [vmem:[%s16761_s14 + $0xf0c] ss:$16 sps:$4 sm:$0xff]  }
0x1346   : > { %12680 = vmatpush1.bf16.msra.mxu1 %v15994_v3  ;;  %12337 = vmatprep.subr.bf16.mxu0 %v15999_v60  ;;  %v16069_v3 = vld [vmem:[%s16761_s14 + $0xf00] ss:$16 sps:$4 sm:$0xff]   ;;  %v16072_v60 = vld [vmem:[%s16761_s14 + $0xf08] ss:$16 sps:$4 sm:$0xff]  }
0x1347   : > { %12681 = vmatprep.subr.bf16.mxu1 %v16002_v21  ;;  %v16077_v21 = vld [vmem:[%s16761_s14 + $0xf24] ss:$16 sps:$4 sm:$0xff]  }
0x1349   : > { %12338 = vmatpush1.bf16.msra.mxu0 %v15997_v18  ;;  %v16080_v18 = vld [vmem:[%s16761_s14 + $0xf2c] ss:$16 sps:$4 sm:$0xff]  }
0x134a   : > { %12682 = vmatpush1.bf16.msra.mxu1 %v16000_v20  ;;  %12339 = vmatprep.subr.bf16.mxu0 %v16005_v48  ;;  %v16075_v20 = vld [vmem:[%s16761_s14 + $0xf20] ss:$16 sps:$4 sm:$0xff]   ;;  %v16078_v48 = vld [vmem:[%s16761_s14 + $0xf28] ss:$16 sps:$4 sm:$0xff]  }
0x134b   : > { %12683 = vmatprep.subr.bf16.mxu1 %v16008_v46  ;;  %v16083_v46 = vld [vmem:[%s16761_s14 + $0xf44] ss:$16 sps:$4 sm:$0xff]  }
0x134d   : > { %12340 = vmatpush1.bf16.msra.mxu0 %v16003_v1  ;;  %v16086_v1 = vld [vmem:[%s16761_s14 + $0xf4c] ss:$16 sps:$4 sm:$0xff]  }
0x134e   : > { %12684 = vmatpush1.bf16.msra.mxu1 %v16006_v25  ;;  %12341 = vmatprep.subr.bf16.mxu0 %v16011_v5  ;;  %v16081_v25 = vld [vmem:[%s16761_s14 + $0xf40] ss:$16 sps:$4 sm:$0xff]   ;;  %v16084_v5 = vld [vmem:[%s16761_s14 + $0xf48] ss:$16 sps:$4 sm:$0xff]  }
0x134f   : > { %12685 = vmatprep.subr.bf16.mxu1 %v16014_v39  ;;  %v16089_v39 = vld [vmem:[%s16761_s14 + $0xf64] ss:$16 sps:$4 sm:$0xff]  }
0x1351   : > { %12342 = vmatpush1.bf16.msra.mxu0 %v16009_v51  ;;  %v16092_v51 = vld [vmem:[%s16761_s14 + $0xf6c] ss:$16 sps:$4 sm:$0xff]  }
0x1352   : > { %12686 = vmatpush1.bf16.msra.mxu1 %v16012_v23  ;;  %12343 = vmatprep.subr.bf16.mxu0 %v16017_v45  ;;  %v16087_v23 = vld [vmem:[%s16761_s14 + $0xf60] ss:$16 sps:$4 sm:$0xff]   ;;  %v16090_v45 = vld [vmem:[%s16761_s14 + $0xf68] ss:$16 sps:$4 sm:$0xff]  }
0x1353   : > { %12687 = vmatprep.subr.bf16.mxu1 %v16020_v38  ;;  %v16095_v38 = vld [vmem:[%s16761_s14 + $0xf84] ss:$16 sps:$4 sm:$0xff]  }
0x1355   : > { %12344 = vmatpush1.bf16.msra.mxu0 %v16015_v26  ;;  %v16098_v26 = vld [vmem:[%s16761_s14 + $0xf8c] ss:$16 sps:$4 sm:$0xff]  }
0x1356   : > { %12688 = vmatpush1.bf16.msra.mxu1 %v16018_v54  ;;  %12356 = vmatprep.subr.bf16.mxu0 %v16023_v41  ;;  %v16093_v54 = vld [vmem:[%s16761_s14 + $0xf80] ss:$16 sps:$4 sm:$0xff]   ;;  %v16096_v41 = vld [vmem:[%s16761_s14 + $0xf88] ss:$16 sps:$4 sm:$0xff]  }
0x1357   : > { %12700 = vmatprep.subr.bf16.mxu1 %v16026_v13  ;;  %v16101_v13 = vld [vmem:[%s16761_s14 + $0xfa4] ss:$16 sps:$4 sm:$0xff]  }
0x1358   : > { %12346 = vmatmul.mubr.bf16.vlgmr.msra.gmra.mrb[40].mxu0 %v18772_v29 }
0x1359   : > { %12690 = vmatmul.mubr.bf16.vlgmr.msra.gmra.mrb[76].mxu1 %v18772_v29  ;;  %12357 = vmatpush1.bf16.msra.mxu0 %v16021_v36  ;;  %v16033_v29 = vld [vmem:[%s16761_s14 + $0xe40] ss:$16 sps:$4 sm:$0xff]   ;;  %v16104_v36 = vld [vmem:[%s16761_s14 + $0xfac] ss:$16 sps:$4 sm:$0xff]  }
0x135a   : > { %12388 = vmatprep.mubr.bf16.mxu0 %v18781_v28  ;;  %12701 = vmatpush1.bf16.msra.mxu1 %v16024_v42  ;;  %v16099_v42 = vld [vmem:[%s16761_s14 + $0xfa0] ss:$16 sps:$4 sm:$0xff]  }
0x135b   : > { %12732 = vmatprep.mubr.bf16.mxu1 %v18781_v28  ;;  %12358 = vmatprep.subr.bf16.mxu0 %v16029_v47  ;;  %v16039_v28 = vld [vmem:[%s16761_s14 + $0xe60] ss:$16 sps:$4 sm:$0xff]   ;;  %v16102_v47 = vld [vmem:[%s16761_s14 + $0xfa8] ss:$16 sps:$4 sm:$0xff]  }
0x135c   : > { %12702 = vmatprep.subr.bf16.mxu1 %v16032_v58  ;;  %v16107_v58 = vld [vmem:[%s16761_s14 + $0xfc4] ss:$16 sps:$4 sm:$0xff]  }
0x135d   : > { %12359 = vmatpush1.bf16.msra.mxu0 %v16027_v4  ;;  %v16110_v4 = vld [vmem:[%s16761_s14 + $0xfcc] ss:$16 sps:$4 sm:$0xff]  }
0x135e   : > { %12703 = vmatpush1.bf16.msra.mxu1 %v16030_v31  ;;  %12360 = vmatprep.subr.bf16.mxu0 %v16035_v44  ;;  %v16105_v31 = vld [vmem:[%s16761_s14 + $0xfc0] ss:$16 sps:$4 sm:$0xff]   ;;  %v16108_v44 = vld [vmem:[%s16761_s14 + $0xfc8] ss:$16 sps:$4 sm:$0xff]  }
0x135f   : > { %12704 = vmatprep.subr.bf16.mxu1 %v16038_v52  ;;  %v16113_v52 = vld [vmem:[%s16761_s14 + $0xfe4] ss:$16 sps:$4 sm:$0xff]  }
0x1361   : > { %12361 = vmatpush1.bf16.msra.mxu0 %v16033_v29  ;;  %v16116_v29 = vld [vmem:[%s16761_s14 + $0xfec] ss:$16 sps:$4 sm:$0xff]  }
0x1362   : > { %12705 = vmatpush1.bf16.msra.mxu1 %v16036_v43  ;;  %12362 = vmatprep.subr.bf16.mxu0 %v16041_v62  ;;  %v16111_v43 = vld [vmem:[%s16761_s14 + $0xfe0] ss:$16 sps:$4 sm:$0xff]   ;;  %v16114_v62 = vld [vmem:[%s16761_s14 + $0xfe8] ss:$16 sps:$4 sm:$0xff]  }
0x1363   : > { %12706 = vmatprep.subr.bf16.mxu1 %v16044_v19  ;;  %v9473_v19 = vld [vmem:[%s16784_s4 + $0x28] sm:$0xf] }
0x1365   : > { %12363 = vmatpush1.bf16.msra.mxu0 %v16039_v28  ;;  %v9478_v28 = vrot.slane %v9473_v19, %v16926_v22 }
0x1366   : > { %12707 = vmatpush1.bf16.msra.mxu1 %v16042_v16  ;;  %12364 = vmatprep.subr.bf16.mxu0 %v16047_v7  ;;  %v9486_v16 = vrot.slane %v9473_v19, %v17263_v40  ;;  %v9482_v7 = vrot.slane %v9473_v19, %v16930_v24 }
0x1367   : > { %12708 = vmatprep.subr.bf16.mxu1 %v16050_v57 }
0x1369   : > { %12365 = vmatpush1.bf16.msra.mxu0 %v16045_v63  ;;  %v9490_v63 = vrot.slane %v9473_v19, %v17266_v59 }
0x136a   : > { %12709 = vmatpush1.bf16.msra.mxu1 %v16048_v37  ;;  %12366 = vmatprep.subr.bf16.mxu0 %v16053_v56 }
0x136b   : > { %12710 = vmatprep.subr.bf16.mxu1 %v16056_v8 }
0x136d   : > { %12367 = vmatpush1.bf16.msra.mxu0 %v16051_v10 }
0x136e   : > { %12711 = vmatpush1.bf16.msra.mxu1 %v16054_v32  ;;  %12368 = vmatprep.subr.bf16.mxu0 %v16059_v6 }
0x136f   : > { %12712 = vmatprep.subr.bf16.mxu1 %v16062_v15 }
0x1371   : > { %12369 = vmatpush1.bf16.msra.mxu0 %v16057_v55 }
0x1372   : > { %12713 = vmatpush1.bf16.msra.mxu1 %v16060_v34  ;;  %12370 = vmatprep.subr.bf16.mxu0 %v16065_v27 }
0x1373   : > { %12714 = vmatprep.subr.bf16.mxu1 %v16068_v14 }
0x1375   : > { %12371 = vmatpush1.bf16.msra.mxu0 %v16063_v35 }
0x1376   : > { %12715 = vmatpush1.bf16.msra.mxu1 %v16066_v53  ;;  %12372 = vmatprep.subr.bf16.mxu0 %v16071_v61 }
0x1377   : > { %12716 = vmatprep.subr.bf16.mxu1 %v16074_v2 }
0x1379   : > { %12373 = vmatpush1.bf16.msra.mxu0 %v16069_v3 }
0x137a   : > { %12717 = vmatpush1.bf16.msra.mxu1 %v16072_v60  ;;  %12374 = vmatprep.subr.bf16.mxu0 %v16077_v21 }
0x137b   : > { %12718 = vmatprep.subr.bf16.mxu1 %v16080_v18 }
0x137d   : > { %12375 = vmatpush1.bf16.msra.mxu0 %v16075_v20 }
0x137e   : > { %12719 = vmatpush1.bf16.msra.mxu1 %v16078_v48  ;;  %12376 = vmatprep.subr.bf16.mxu0 %v16083_v46 }
0x137f   : > { %12720 = vmatprep.subr.bf16.mxu1 %v16086_v1 }
0x1381   : > { %12377 = vmatpush1.bf16.msra.mxu0 %v16081_v25 }
0x1382   : > { %12721 = vmatpush1.bf16.msra.mxu1 %v16084_v5  ;;  %12378 = vmatprep.subr.bf16.mxu0 %v16089_v39 }
0x1383   : > { %12722 = vmatprep.subr.bf16.mxu1 %v16092_v51 }
0x1385   : > { %12379 = vmatpush1.bf16.msra.mxu0 %v16087_v23 }
0x1386   : > { %12723 = vmatpush1.bf16.msra.mxu1 %v16090_v45  ;;  %12380 = vmatprep.subr.bf16.mxu0 %v16095_v38 }
0x1387   : > { %12724 = vmatprep.subr.bf16.mxu1 %v16098_v26 }
0x1389   : > { %12381 = vmatpush1.bf16.msra.mxu0 %v16093_v54 }
0x138a   : > { %12725 = vmatpush1.bf16.msra.mxu1 %v16096_v41  ;;  %12382 = vmatprep.subr.bf16.mxu0 %v16101_v13 }
0x138b   : > { %12726 = vmatprep.subr.bf16.mxu1 %v16104_v36 }
0x138d   : > { %12383 = vmatpush1.bf16.msra.mxu0 %v16099_v42 }
0x138e   : > { %12727 = vmatpush1.bf16.msra.mxu1 %v16102_v47  ;;  %12384 = vmatprep.subr.bf16.mxu0 %v16107_v58 }
0x138f   : > { %12728 = vmatprep.subr.bf16.mxu1 %v16110_v4 }
0x1391   : > { %12385 = vmatpush1.bf16.msra.mxu0 %v16105_v31 }
0x1392   : > { %12729 = vmatpush1.bf16.msra.mxu1 %v16108_v44  ;;  %12386 = vmatprep.subr.bf16.mxu0 %v16113_v52 }
0x1393   : > { %12730 = vmatprep.subr.bf16.mxu1 %v16116_v29 }
0x1395   : > { %12387 = vmatpush1.bf16.msra.mxu0 %v16111_v43 }
0x1396   : > { %12731 = vmatpush1.bf16.msra.mxu1 %v16114_v62 }
0x1398   : > { %12389 = vmatmul.mubr.bf16.vlgmr.msra.gmra.mrb[40].mxu0 %v18776_v49 }
0x1399   : > { %12733 = vmatmul.mubr.bf16.vlgmr.msra.gmra.mrb[76].mxu1 %v18776_v49 }
0x146b   : > { %v12390_v57 = vpop.f32.mrb[40].mxu0 }
0x146c   : > { %v14806_v37 = vadd.f32 %v12390_v57, %v9478_v28  ;;  %v12734_v56 = vpop.f32.mrb[76].mxu1  ;;  %v12392_v8 = vpop.f32.mrb[41].mxu0 }
0x146d   : > { %v14810_v10 = vadd.f32 %v12734_v56, %v9486_v16  ;;  %v14807_v32 = vadd.f32 %v12392_v8, %v9482_v7  ;;  %v12736_v6 = vpop.f32.mrb[77].mxu1  ;;  %v12394_v15 = vpop.f32.mrb[42].mxu0 }
0x146e   : > { %v12743_v55 = vadd.f32 %v14806_v37, %v17953_v9  ;;  %v14808_v49 = vadd.f32 %v12394_v15, %v9478_v28  ;;  %v12738_v34 = vpop.f32.mrb[78].mxu1  ;;  %v12396_v27 = vpop.f32.mrb[43].mxu0  ;;  %v14811_v40 = vadd.f32 %v12736_v6, %v9490_v63 }
0x146f   : > { %v12744_v22 = vadd.f32 %v14807_v32, %v17946_v0  ;;  %v14812_v14 = vadd.f32 %v12738_v34, %v9486_v16  ;;  %v14809_v24 = vadd.f32 %v12396_v27, %v9482_v7  ;;  %v12740_v35 = vpop.f32.mrb[79].mxu1  ;;  %v12745_v53 = vadd.f32 %v14810_v10, %v17949_v30 }
0x1470   : > { %v12747_v59 = vadd.f32 %v14808_v49, %v17955_v12  ;;  %v14813_v3 = vadd.f32 %v12740_v35, %v9490_v63  ;;  %v12746_v60 = vadd.f32 %v14811_v40, %v17973_v50 }
0x1471   : > { %v12751_v61 = vadd.f32 %v12744_v22, %v12743_v55  ;;  %v12748_v2 = vadd.f32 %v14809_v24, %v17951_v11  ;;  %v12749_v9 = vadd.f32 %v14812_v14, %v17958_v33 }
0x1472   : > { %v12750_v0 = vadd.f32 %v14813_v3, %v17960_v17 }
0x1473   : > { %v12756_v21 = vadd.f32 %v12748_v2, %v12747_v59  ;;  %v12752_v18 = vadd.f32 %v12751_v61, %v12745_v53 }
0x1475   : > { %v12753_v20 = vadd.f32 %v12752_v18, %v12746_v60  ;;  %v12757_v48 = vadd.f32 %v12756_v21, %v12749_v9 }
0x1477   : > { %12754 = vadd.xlane.f32.xlu0 %v12753_v20  ;;  %v12758_v46 = vadd.f32 %v12757_v48, %v12750_v0 }
0x1479   : > { %12759 = vadd.xlane.f32.xlu1 %v12758_v46 }
0x1504   : > { %v12755_v12 = vpop.xlane.xlu0 %12754 }
0x1505   : > { %v12761_v1 = vmul.f32 0.001953125, %v12755_v12 }
0x1506   : > { %v12760_v30 = vpop.xlane.xlu1 %12759 }
0x1507   : > { %v12763_v25 = vsub.f32 %v12743_v55, %v12761_v1  ;;  %v12764_v5 = vsub.f32 %v12744_v22, %v12761_v1  ;;  %v12762_v11 = vmul.f32 0.001953125, %v12760_v30  ;;  %v12765_v39 = vsub.f32 %v12745_v53, %v12761_v1 }
0x1508   : > { %v12766_v45 = vsub.f32 %v12746_v60, %v12761_v1 }
0x1509   : > { %v12767_v51 = vsub.f32 %v12747_v59, %v12762_v11  ;;  %v12768_v50 = vsub.f32 %v12748_v2, %v12762_v11  ;;  %v12769_v23 = vsub.f32 %v12749_v9, %v12762_v11  ;;  %v12771_v33 = vmul.f32 %v12763_v25, %v12763_v25 }
0x150a   : > { %v12772_v38 = vmul.f32 %v12764_v5, %v12764_v5  ;;  %v12770_v26 = vsub.f32 %v12750_v0, %v12762_v11  ;;  %v12773_v41 = vmul.f32 %v12765_v39, %v12765_v39  ;;  %v12774_v47 = vmul.f32 %v12766_v45, %v12766_v45 }
0x150b   : > { %v12775_v17 = vmul.f32 %v12767_v51, %v12767_v51  ;;  %v12776_v54 = vmul.f32 %v12768_v50, %v12768_v50  ;;  %v12777_v36 = vmul.f32 %v12769_v23, %v12769_v23 }
0x150c   : > { %v12779_v13 = vadd.f32 %v12772_v38, %v12771_v33  ;;  %v12778_v4 = vmul.f32 %v12770_v26, %v12770_v26 }
0x150d   : > { %v12784_v42 = vadd.f32 %v12776_v54, %v12775_v17 }
0x150e   : > { %v12780_v58 = vadd.f32 %v12779_v13, %v12773_v41 }
0x150f   : > { %v12785_v31 = vadd.f32 %v12784_v42, %v12777_v36 }
0x1510   : > { %v12781_v44 = vadd.f32 %v12780_v58, %v12774_v47 }
0x1511   : > { %v12786_v52 = vadd.f32 %v12785_v31, %v12778_v4 }
0x1512   : > { %12782 = vadd.xlane.f32.xlu0 %v12781_v44 }
0x1513   : > { %12787 = vadd.xlane.f32.xlu1 %v12786_v52 }
0x159f   : > { %v12783_v29 = vpop.xlane.xlu0 %12782 }
0x15a0   : > { %v12789_v43 = vmul.f32 0.001953125, %v12783_v29  ;;  %v12788_v62 = vpop.xlane.xlu1 %12787 }
0x15a1   : > { %v12790_v19 = vmul.f32 0.001953125, %v12788_v62 }
0x15a2   : > { %v12791_v28 = vadd.f32 1e-05, %v12789_v43 }
0x15a3   : > { %v12792_v16 = vadd.f32 1e-05, %v12790_v19 }
0x15a4   : > { %16221 = vrsqrt.f32 %v12791_v28 }
0x15a5   : > { %16223 = vrsqrt.f32 %v12792_v16 }
0x15ae   : > { %v16222_v7 = vpop.eup %16221 }
0x15af   : > { %v16224_v57 = vpop.eup %16223  ;;  %v12795_v63 = vmul.f32 %v16222_v7, %v12763_v25  ;;  %v12796_v37 = vmul.f32 %v16222_v7, %v12764_v5  ;;  %v12797_v56 = vmul.f32 %v16222_v7, %v12765_v39  ;;  %v12798_v8 = vmul.f32 %v16222_v7, %v12766_v45 }
0x15b0   : > { %v12799_v10 = vmul.f32 %v16224_v57, %v12767_v51  ;;  %v12800_v32 = vmul.f32 %v16224_v57, %v12768_v50  ;;  %v12801_v6 = vmul.f32 %v16224_v57, %v12769_v23  ;;  %v12802_v15 = vmul.f32 %v16224_v57, %v12770_v26 }
0x15b1   : > { %12811 = vst [vmem:[%s19202_s12] sm:$0xff] %v12795_v63  ;;  %12812 = vst [vmem:[%s19202_s12 + $0x8] sm:$0xff] %v12796_v37 }
0x15b2   : > { %12813 = vst [vmem:[%s19202_s12 + $0x10] sm:$0xff] %v12797_v56  ;;  %12814 = vst [vmem:[%s19202_s12 + $0x18] sm:$0xff] %v12798_v8 }
0x15b3   : > { %12815 = vst [vmem:[%s19202_s12 + $0x20] sm:$0xff] %v12799_v10  ;;  %12816 = vst [vmem:[%s19202_s12 + $0x28] sm:$0xff] %v12800_v32 }
0x15b4   : > { %12817 = vst [vmem:[%s19202_s12 + $0x30] sm:$0xff] %v12801_v6  ;;  %12818 = vst [vmem:[%s19202_s12 + $0x38] sm:$0xff] %v12802_v15 }
0x15b5 PF: > { %s19214_s20 = sld [smem:[#allocation14_spill]]  ;;  %s19215_s27 = sld [smem:[#allocation13_spill]] }
0x15b6   : > { %s19216_s19 = sld [smem:[#allocation15_spill]]  ;;  %s19217_s17 = smov %s16417_s18 }
0x15bb   : > { %p27_p13 = scmp.ge.s32.totalorder %s19214_s20, 8   ;;  %s19218_s18 = smov %s19215_s27 }
0x15bd   :  { %29 = sbr.rel (!%p27_p13) target bundleno = 15 (0xf), region = 164 }
0x15c4   :  { %12830 = vsyncpa [#allocation3], 1 }
0x15c5   :  { %12832 = vsyncpa [#allocation3 + $0x1], 1 }
0x15c6   :  { %12833 = vsyncpa [#allocation5], 1 }
0x15c7   :  { %12835 = vsyncpa [#allocation5 + $0x1], 1 }
0x15c8   :  { %12836 = vsyncpa [#allocation8], 1 }
0x15c9   :  { %12838 = vsyncpa [#allocation8 + $0x1], 1 }

</bundles_post_ra>
